<compile_context>
chip_gen: v5e
topology: v5e:2x2
jax: 0.10.0
libtpu: 0.0.40
codegen_flags: <defaults>
</compile_context>

<pallas_src>
import functools

import numpy as np
import jax
import jax.numpy as jnp
from jax import lax
from jax.experimental import pallas as pl
from jax.experimental.pallas import tpu as pltpu


# ----------------------------- Pallas kernels ------------------------------

def _conv_relu_pool_kernel(xe_ref, xo_ref, w_ref, b_ref, o_ref, *, tb,
                           out_rows):
    """Fused 3x3 conv (pad=1) + bias + ReLU + 2x2 max-pool for `tb` images.

    xe_ref/xo_ref: even/odd rows of the zero-padded input slab,
                   (tb, out_rows+1, K) with K = Cin*(W+2), cols = (cin, w).
    w_ref: (3, 2, K, N) banded weight matrices, N = Cout*(W//2),
           indexed by (kernel row di, pooled-column parity q).
    b_ref: (1, N) float32 bias (per cout, repeated over pooled w).
    o_ref: (tb, out_rows, N) pooled output, cols = (cout, pooled w).
    """
    n = o_ref.shape[-1]
    bias = b_ref[...]
    for b in range(tb):                 # small static unroll over the tile
        pooled = None
        for p in range(2):              # pooled-row parity
            for q in range(2):          # pooled-column parity
                acc = jnp.zeros((out_rows, n), jnp.float32)
                for di in range(3):     # conv kernel row
                    r = p + di
                    src = xe_ref if r % 2 == 0 else xo_ref
                    lhs = src[b, r // 2:r // 2 + out_rows, :]
                    acc = acc + jnp.dot(lhs, w_ref[di, q],
                                        preferred_element_type=jnp.float32)
                act = jnp.maximum(acc + bias, 0.0)
                pooled = act if pooled is None else jnp.maximum(pooled, act)
        o_ref[b] = pooled.astype(o_ref.dtype)


def _fc_fused_kernel(x_ref, w1_ref, b1_ref, w2_ref, b2_ref, w3_ref, b3_ref,
                     o_ref):
    """fc1(1568->128)+ReLU -> fc2(128->2)+ReLU -> fc3(2->10), one kernel."""
    # fc1: bf16 MXU matmul, f32 accumulation.
    h1 = jnp.dot(x_ref[...], w1_ref[...], preferred_element_type=jnp.float32)
    h1 = jnp.maximum(h1 + b1_ref[...], 0.0)
    # fc2: tiny (N=2), f32.
    h2 = jnp.dot(h1, w2_ref[...], preferred_element_type=jnp.float32)
    h2 = jnp.maximum(h2 + b2_ref[...], 0.0)
    # fc3: K=2 -> cheaper as two broadcast multiply-adds (VPU) than an MXU pass.
    out = (h2[:, 0:1] * w3_ref[0:1, :] + h2[:, 1:2] * w3_ref[1:2, :]
           + b3_ref[...])
    o_ref[...] = out.astype(o_ref.dtype)


# ------------------------------ Pallas wrappers -----------------------------

def conv_relu_pool(x_even, x_odd, w_mats, bias, *, out_rows, tb):
    B, rows, K = x_even.shape
    N = w_mats.shape[-1]
    assert rows == out_rows + 1 and x_odd.shape == x_even.shape
    assert w_mats.shape[:2] == (3, 2) and w_mats.shape[2] == K
    assert B % tb == 0
    grid = (B // tb,)
    flops = B * 4 * 3 * 2 * out_rows * K * N
    bytes_accessed = ((x_even.size + x_odd.size + w_mats.size) * 2
                      + bias.size * 4 + B * out_rows * N * 2)
    return pl.pallas_call(
        functools.partial(_conv_relu_pool_kernel, tb=tb, out_rows=out_rows),
        out_shape=jax.ShapeDtypeStruct((B, out_rows, N), jnp.bfloat16),
        grid=grid,
        in_specs=[
            pl.BlockSpec((tb, out_rows + 1, K), lambda i: (i, 0, 0)),
            pl.BlockSpec((tb, out_rows + 1, K), lambda i: (i, 0, 0)),
            pl.BlockSpec((3, 2, K, N), lambda i: (0, 0, 0, 0)),  # VMEM-resident
            pl.BlockSpec((1, N), lambda i: (0, 0)),              # VMEM-resident
        ],
        out_specs=pl.BlockSpec((tb, out_rows, N), lambda i: (i, 0, 0)),
        compiler_params=pltpu.CompilerParams(
            dimension_semantics=("parallel",),
            vmem_limit_bytes=32 * 1024 * 1024),
        cost_estimate=pl.CostEstimate(flops=flops, transcendentals=0,
                                      bytes_accessed=bytes_accessed),
    )(x_even, x_odd, w_mats, bias)


def fc_fused(x, w1, b1, w2, b2, w3, b3, *, tm):
    B, K = x.shape
    assert B % tm == 0
    grid = (B // tm,)
    bytes_accessed = (x.size * 2 + w1.size * 2
                      + (b1.size + w2.size + b2.size + w3.size + b3.size) * 4
                      + B * 10 * 4)
    flops = B * 2 * (K * 128 + 128 * 2 + 2 * 10)
    return pl.pallas_call(
        _fc_fused_kernel,
        out_shape=jax.ShapeDtypeStruct((B, 10), jnp.float32),
        grid=grid,
        in_specs=[
            pl.BlockSpec((tm, K), lambda i: (i, 0)),
            pl.BlockSpec(w1.shape, lambda i: (0, 0)),
            pl.BlockSpec(b1.shape, lambda i: (0, 0)),
            pl.BlockSpec(w2.shape, lambda i: (0, 0)),
            pl.BlockSpec(b2.shape, lambda i: (0, 0)),
            pl.BlockSpec(w3.shape, lambda i: (0, 0)),
            pl.BlockSpec(b3.shape, lambda i: (0, 0)),
        ],
        out_specs=pl.BlockSpec((tm, 10), lambda i: (i, 0)),
        compiler_params=pltpu.CompilerParams(
            dimension_semantics=("parallel",),
            vmem_limit_bytes=32 * 1024 * 1024),
        cost_estimate=pl.CostEstimate(flops=flops, transcendentals=0,
                                      bytes_accessed=bytes_accessed),
    )(x, w1, b1, w2, b2, w3, b3)


# ----------------------- one-time weight preparation ------------------------

def _build_conv_mats(w_oihw, bias, width):
    """Banded matrices M[di, q] so that, with input slab cols = (cin, padded w),
    acc_pq[t, cout*Wh+s] = conv_out[cout, 2t+p, 2s+q] = sum_di lhs_p_di @ M[di,q]."""
    w = np.asarray(w_oihw, np.float32)
    cout, cin, _, _ = w.shape
    wp, wh = width + 2, width // 2
    m = np.zeros((3, 2, cin, wp, cout, wh), np.float32)
    s = np.arange(wh)
    for di in range(3):
        for q in range(2):
            for dj in range(3):
                u = 2 * s + q + dj             # input col (within a cin group)
                m[di, q, :, u, :, s] = w[:, :, di, dj].T
    m = m.reshape(3, 2, cin * wp, cout * wh)
    b_cols = np.repeat(np.asarray(bias, np.float32), wh).reshape(1, cout * wh)
    return m, b_cols


def prepare_params(params):
    """One-time (outside jit) repack: banded conv matrices, NCHW-flatten
    permutation folded into fc1, pre-transposed fc weights, bf16 MXU casts."""
    m1, b1 = _build_conv_mats(params["conv1_w"], params["conv1_b"], width=28)
    m2, b2 = _build_conv_mats(params["conv2_w"], params["conv2_b"], width=14)
    # kernel flatten order is (h, c, w); torch's x.view(-1, 32*7*7) is (c, h, w)
    h_i, c_i, w_i = np.unravel_index(np.arange(32 * 7 * 7), (7, 32, 7))
    perm = c_i * 49 + h_i * 7 + w_i
    fc1_w = np.asarray(params["fc1_w"], np.float32)[:, perm].T   # (1568, 128)
    return {
        "conv1_mats": jnp.asarray(m1, jnp.bfloat16),
        "conv1_bias": jnp.asarray(b1),
        "conv2_mats": jnp.asarray(m2, jnp.bfloat16),
        "conv2_bias": jnp.asarray(b2),
        "fc1_w": jnp.asarray(fc1_w, jnp.bfloat16),
        "fc1_b": jnp.asarray(params["fc1_b"], jnp.float32).reshape(1, 128),
        "fc2_w": jnp.asarray(params["fc2_w"], jnp.float32).T,     # (128, 2)
        "fc2_b": jnp.asarray(params["fc2_b"], jnp.float32).reshape(1, 2),
        "fc3_w": jnp.asarray(params["fc3_w"], jnp.float32).T,     # (2, 10)
        "fc3_b": jnp.asarray(params["fc3_b"], jnp.float32).reshape(1, 10),
    }


# --------------------------------- Model ------------------------------------

def init_params(key):
    ks = jax.random.split(key, 10)
    s = 0.05
    return {
        "conv1_w": s * jax.random.normal(ks[0], (16, 1, 3, 3), jnp.float32),
        "conv1_b": s * jax.random.normal(ks[1], (16,), jnp.float32),
        "conv2_w": s * jax.random.normal(ks[2], (32, 16, 3, 3), jnp.float32),
        "conv2_b": s * jax.random.normal(ks[3], (32,), jnp.float32),
        "fc1_w": s * jax.random.normal(ks[4], (128, 32 * 7 * 7), jnp.float32),
        "fc1_b": s * jax.random.normal(ks[5], (128,), jnp.float32),
        "fc2_w": s * jax.random.normal(ks[6], (2, 128), jnp.float32),
        "fc2_b": s * jax.random.normal(ks[7], (2,), jnp.float32),
        "fc3_w": s * jax.random.normal(ks[8], (10, 2), jnp.float32),
        "fc3_b": s * jax.random.normal(ks[9], (10,), jnp.float32),
    }


def _pick_batch_tile(batch, candidates=(8, 4, 2, 1)):
    for c in candidates:
        if batch % c == 0:
            return c
    return 1


def cnn_forward(prepped, x_nchw):
    """Forward pass matching the PyTorch CNN.forward; x_nchw: (B, 1, 28, 28)."""
    B = x_nchw.shape[0]
    tb = _pick_batch_tile(B)

    # conv1 input slab: (B, 30, 30) zero-padded; Cin=1 so cols are just w.
    x = x_nchw.reshape(B, 28, 28)
    x = jnp.pad(x, ((0, 0), (1, 1), (1, 1))).astype(jnp.bfloat16)
    # split by row parity so the kernel only needs contiguous sublane loads
    y1 = conv_relu_pool(x[:, 0::2, :], x[:, 1::2, :],
                        prepped["conv1_mats"], prepped["conv1_bias"],
                        out_rows=14, tb=tb)                 # (B, 14, 224) bf16

    # repack pooled conv1 (cols = (c, w')) into conv2's padded slab
    # (B, 16, 256), cols = (cin, padded w).
    r = jnp.pad(y1.reshape(B, 14, 16, 14), ((0, 0), (1, 1), (0, 0), (1, 1)))
    x2 = r.reshape(B, 16, 256)
    y2 = conv_relu_pool(x2[:, 0::2, :], x2[:, 1::2, :],
                        prepped["conv2_mats"], prepped["conv2_bias"],
                        out_rows=7, tb=tb)                  # (B, 7, 224) bf16

    # flatten in (h, c, w) order; torch's (c, h, w) view permutation is already
    # folded into prepped["fc1_w"].
    xf = y2.reshape(B, 7 * 224)
    tm = B if B <= 256 else (256 if B % 256 == 0 else B)
    return fc_fused(xf, prepped["fc1_w"], prepped["fc1_b"],
                    prepped["fc2_w"], prepped["fc2_b"],
                    prepped["fc3_w"], prepped["fc3_b"], tm=tm)


# ------------------------- pure-JAX f32 reference ---------------------------

def cnn_reference(params, x_nchw):
    def conv(x, w, b):
        dn = lax.conv_dimension_numbers(x.shape, w.shape,
                                        ("NCHW", "OIHW", "NCHW"))
        y = lax.conv_general_dilated(x, w, (1, 1), ((1, 1), (1, 1)),
                                     dimension_numbers=dn)
        return jax.nn.relu(y + b.reshape(1, -1, 1, 1))

    def pool(x):
        return lax.reduce_window(x, -jnp.inf, lax.max,
                                 (1, 1, 2, 2), (1, 1, 2, 2), "VALID")

    x = pool(conv(x_nchw, params["conv1_w"], params["conv1_b"]))
    x = pool(conv(x, params["conv2_w"], params["conv2_b"]))
    x = x.reshape(x.shape[0], -1)
    x = jax.nn.relu(x @ params["fc1_w"].T + params["fc1_b"])
    x = jax.nn.relu(x @ params["fc2_w"].T + params["fc2_b"])
    return x @ params["fc3_w"].T + params["fc3_b"]


if __name__ == "__main__":
    key = jax.random.PRNGKey(0)
    k_param, k_x = jax.random.split(key)
    params = init_params(k_param)
    prepped = prepare_params(params)

    # MNIST-shaped input (batch=2, NCHW): fc1 requires 28x28 spatial.
    x = jax.random.normal(k_x, (2, 1, 28, 28), jnp.float32)

    out = jax.jit(cnn_forward)(prepped, x)
    out = jax.block_until_ready(out)
    assert out.shape == (2, 10) and out.dtype == jnp.float32

    # sanity check vs. a pure-JAX float32 reference (bf16 MXU inputs -> loose tol)
    ref = jax.jit(cnn_reference)(params, x)
    err = float(jnp.max(jnp.abs(out - ref)))
    assert err < 5e-2, f"kernel/reference mismatch: max abs err {err}"
    print("KERNEL_OK")
</pallas_src>

<mosaic_0001>
module attributes {stable_mosaic.version = 11 : i64} {
  func.func @_conv_relu_pool_kernel(%arg0: i32, %arg1: memref<2x15x30xbf16, #tpu.memory_space<vmem>>, %arg2: memref<2x15x30xbf16, #tpu.memory_space<vmem>>, %arg3: memref<3x2x30x224xbf16, #tpu.memory_space<vmem>>, %arg4: memref<1x224xf32, #tpu.memory_space<vmem>>, %arg5: memref<2x14x224xbf16, #tpu.memory_space<vmem>>) attributes {dimension_semantics = [#tpu.dimension_semantics<parallel>], iteration_bounds = array<i64: 1>, scalar_prefetch = 0 : i64, scratch_operands = 0 : i64, tpu.core_type = #tpu.core_type<tc>, window_params = [{transform_indices = @transform_0, window_bounds = array<i64: 2, 15, 30>}, {transform_indices = @transform_1, window_bounds = array<i64: 2, 15, 30>}, {pipeline_mode = #tpu.pipeline_mode<synchronous>, transform_indices = @transform_2, window_bounds = array<i64: 3, 2, 30, 224>}, {pipeline_mode = #tpu.pipeline_mode<synchronous>, transform_indices = @transform_3, window_bounds = array<i64: 1, 224>}, {transform_indices = @transform_4, window_bounds = array<i64: 2, 14, 224>}]} {
    %c0 = arith.constant 0 : index
    %c0_0 = arith.constant 0 : index
    %0 = vector.load %arg4[%c0, %c0_0] : memref<1x224xf32, #tpu.memory_space<vmem>>, vector<1x224xf32>
    %cst = arith.constant 0.000000e+00 : f32
    %1 = vector.broadcast %cst : f32 to vector<14x224xf32>
    %c0_1 = arith.constant 0 : index
    %c0_2 = arith.constant 0 : index
    %c0_3 = arith.constant 0 : index
    %2 = vector.load %arg1[%c0_1, %c0_2, %c0_3] : memref<2x15x30xbf16, #tpu.memory_space<vmem>>, vector<1x14x30xbf16>
    %3 = vector.shape_cast %2 : vector<1x14x30xbf16> to vector<14x30xbf16>
    %c0_4 = arith.constant 0 : index
    %c0_5 = arith.constant 0 : index
    %c0_6 = arith.constant 0 : index
    %c0_7 = arith.constant 0 : index
    %4 = vector.load %arg3[%c0_4, %c0_5, %c0_6, %c0_7] : memref<3x2x30x224xbf16, #tpu.memory_space<vmem>>, vector<1x1x30x224xbf16>
    %5 = vector.shape_cast %4 : vector<1x1x30x224xbf16> to vector<30x224xbf16>
    %cst_8 = arith.constant dense<0.000000e+00> : vector<14x224xf32>
    %6 = tpu.matmul %3, %5, %cst_8 {dimension_numbers = #tpu.dot_dimension_numbers<[1], [0], [0], [1], [0, 0, 1, 1], [], []>} : vector<14x30xbf16>, vector<30x224xbf16>, vector<14x224xf32> -> vector<14x224xf32>
    %7 = arith.addf %1, %6 : vector<14x224xf32>
    %c0_9 = arith.constant 0 : index
    %c0_10 = arith.constant 0 : index
    %c0_11 = arith.constant 0 : index
    %8 = vector.load %arg2[%c0_9, %c0_10, %c0_11] : memref<2x15x30xbf16, #tpu.memory_space<vmem>>, vector<1x14x30xbf16>
    %9 = vector.shape_cast %8 : vector<1x14x30xbf16> to vector<14x30xbf16>
    %c1 = arith.constant 1 : index
    %c0_12 = arith.constant 0 : index
    %c0_13 = arith.constant 0 : index
    %c0_14 = arith.constant 0 : index
    %10 = vector.load %arg3[%c1, %c0_12, %c0_13, %c0_14] : memref<3x2x30x224xbf16, #tpu.memory_space<vmem>>, vector<1x1x30x224xbf16>
    %11 = vector.shape_cast %10 : vector<1x1x30x224xbf16> to vector<30x224xbf16>
    %cst_15 = arith.constant dense<0.000000e+00> : vector<14x224xf32>
    %12 = tpu.matmul %9, %11, %cst_15 {dimension_numbers = #tpu.dot_dimension_numbers<[1], [0], [0], [1], [0, 0, 1, 1], [], []>} : vector<14x30xbf16>, vector<30x224xbf16>, vector<14x224xf32> -> vector<14x224xf32>
    %13 = arith.addf %7, %12 : vector<14x224xf32>
    %c0_16 = arith.constant 0 : index
    %c1_17 = arith.constant 1 : index
    %c0_18 = arith.constant 0 : index
    %14 = vector.load %arg1[%c0_16, %c1_17, %c0_18] : memref<2x15x30xbf16, #tpu.memory_space<vmem>>, vector<1x14x30xbf16>
    %15 = vector.shape_cast %14 : vector<1x14x30xbf16> to vector<14x30xbf16>
    %c2 = arith.constant 2 : index
    %c0_19 = arith.constant 0 : index
    %c0_20 = arith.constant 0 : index
    %c0_21 = arith.constant 0 : index
    %16 = vector.load %arg3[%c2, %c0_19, %c0_20, %c0_21] : memref<3x2x30x224xbf16, #tpu.memory_space<vmem>>, vector<1x1x30x224xbf16>
    %17 = vector.shape_cast %16 : vector<1x1x30x224xbf16> to vector<30x224xbf16>
    %cst_22 = arith.constant dense<0.000000e+00> : vector<14x224xf32>
    %18 = tpu.matmul %15, %17, %cst_22 {dimension_numbers = #tpu.dot_dimension_numbers<[1], [0], [0], [1], [0, 0, 1, 1], [], []>} : vector<14x30xbf16>, vector<30x224xbf16>, vector<14x224xf32> -> vector<14x224xf32>
    %19 = arith.addf %13, %18 : vector<14x224xf32>
    %20 = vector.broadcast %0 : vector<1x224xf32> to vector<14x224xf32>
    %21 = arith.addf %19, %20 : vector<14x224xf32>
    %cst_23 = arith.constant 0.000000e+00 : f32
    %22 = vector.broadcast %cst_23 : f32 to vector<14x224xf32>
    %23 = arith.maximumf %21, %22 : vector<14x224xf32>
    %cst_24 = arith.constant 0.000000e+00 : f32
    %24 = vector.broadcast %cst_24 : f32 to vector<14x224xf32>
    %c0_25 = arith.constant 0 : index
    %c0_26 = arith.constant 0 : index
    %c0_27 = arith.constant 0 : index
    %25 = vector.load %arg1[%c0_25, %c0_26, %c0_27] : memref<2x15x30xbf16, #tpu.memory_space<vmem>>, vector<1x14x30xbf16>
    %26 = vector.shape_cast %25 : vector<1x14x30xbf16> to vector<14x30xbf16>
    %c0_28 = arith.constant 0 : index
    %c1_29 = arith.constant 1 : index
    %c0_30 = arith.constant 0 : index
    %c0_31 = arith.constant 0 : index
    %27 = vector.load %arg3[%c0_28, %c1_29, %c0_30, %c0_31] : memref<3x2x30x224xbf16, #tpu.memory_space<vmem>>, vector<1x1x30x224xbf16>
    %28 = vector.shape_cast %27 : vector<1x1x30x224xbf16> to vector<30x224xbf16>
    %cst_32 = arith.constant dense<0.000000e+00> : vector<14x224xf32>
    %29 = tpu.matmul %26, %28, %cst_32 {dimension_numbers = #tpu.dot_dimension_numbers<[1], [0], [0], [1], [0, 0, 1, 1], [], []>} : vector<14x30xbf16>, vector<30x224xbf16>, vector<14x224xf32> -> vector<14x224xf32>
    %30 = arith.addf %24, %29 : vector<14x224xf32>
    %c0_33 = arith.constant 0 : index
    %c0_34 = arith.constant 0 : index
    %c0_35 = arith.constant 0 : index
    %31 = vector.load %arg2[%c0_33, %c0_34, %c0_35] : memref<2x15x30xbf16, #tpu.memory_space<vmem>>, vector<1x14x30xbf16>
    %32 = vector.shape_cast %31 : vector<1x14x30xbf16> to vector<14x30xbf16>
    %c1_36 = arith.constant 1 : index
    %c1_37 = arith.constant 1 : index
    %c0_38 = arith.constant 0 : index
    %c0_39 = arith.constant 0 : index
    %33 = vector.load %arg3[%c1_36, %c1_37, %c0_38, %c0_39] : memref<3x2x30x224xbf16, #tpu.memory_space<vmem>>, vector<1x1x30x224xbf16>
    %34 = vector.shape_cast %33 : vector<1x1x30x224xbf16> to vector<30x224xbf16>
    %cst_40 = arith.constant dense<0.000000e+00> : vector<14x224xf32>
    %35 = tpu.matmul %32, %34, %cst_40 {dimension_numbers = #tpu.dot_dimension_numbers<[1], [0], [0], [1], [0, 0, 1, 1], [], []>} : vector<14x30xbf16>, vector<30x224xbf16>, vector<14x224xf32> -> vector<14x224xf32>
    %36 = arith.addf %30, %35 : vector<14x224xf32>
    %c0_41 = arith.constant 0 : index
    %c1_42 = arith.constant 1 : index
    %c0_43 = arith.constant 0 : index
    %37 = vector.load %arg1[%c0_41, %c1_42, %c0_43] : memref<2x15x30xbf16, #tpu.memory_space<vmem>>, vector<1x14x30xbf16>
    %38 = vector.shape_cast %37 : vector<1x14x30xbf16> to vector<14x30xbf16>
    %c2_44 = arith.constant 2 : index
    %c1_45 = arith.constant 1 : index
    %c0_46 = arith.constant 0 : index
    %c0_47 = arith.constant 0 : index
    %39 = vector.load %arg3[%c2_44, %c1_45, %c0_46, %c0_47] : memref<3x2x30x224xbf16, #tpu.memory_space<vmem>>, vector<1x1x30x224xbf16>
    %40 = vector.shape_cast %39 : vector<1x1x30x224xbf16> to vector<30x224xbf16>
    %cst_48 = arith.constant dense<0.000000e+00> : vector<14x224xf32>
    %41 = tpu.matmul %38, %40, %cst_48 {dimension_numbers = #tpu.dot_dimension_numbers<[1], [0], [0], [1], [0, 0, 1, 1], [], []>} : vector<14x30xbf16>, vector<30x224xbf16>, vector<14x224xf32> -> vector<14x224xf32>
    %42 = arith.addf %36, %41 : vector<14x224xf32>
    %43 = vector.broadcast %0 : vector<1x224xf32> to vector<14x224xf32>
    %44 = arith.addf %42, %43 : vector<14x224xf32>
    %cst_49 = arith.constant 0.000000e+00 : f32
    %45 = vector.broadcast %cst_49 : f32 to vector<14x224xf32>
    %46 = arith.maximumf %44, %45 : vector<14x224xf32>
    %47 = arith.maximumf %23, %46 : vector<14x224xf32>
    %cst_50 = arith.constant 0.000000e+00 : f32
    %48 = vector.broadcast %cst_50 : f32 to vector<14x224xf32>
    %c0_51 = arith.constant 0 : index
    %c0_52 = arith.constant 0 : index
    %c0_53 = arith.constant 0 : index
    %49 = vector.load %arg2[%c0_51, %c0_52, %c0_53] : memref<2x15x30xbf16, #tpu.memory_space<vmem>>, vector<1x14x30xbf16>
    %50 = vector.shape_cast %49 : vector<1x14x30xbf16> to vector<14x30xbf16>
    %c0_54 = arith.constant 0 : index
    %c0_55 = arith.constant 0 : index
    %c0_56 = arith.constant 0 : index
    %c0_57 = arith.constant 0 : index
    %51 = vector.load %arg3[%c0_54, %c0_55, %c0_56, %c0_57] : memref<3x2x30x224xbf16, #tpu.memory_space<vmem>>, vector<1x1x30x224xbf16>
    %52 = vector.shape_cast %51 : vector<1x1x30x224xbf16> to vector<30x224xbf16>
    %cst_58 = arith.constant dense<0.000000e+00> : vector<14x224xf32>
    %53 = tpu.matmul %50, %52, %cst_58 {dimension_numbers = #tpu.dot_dimension_numbers<[1], [0], [0], [1], [0, 0, 1, 1], [], []>} : vector<14x30xbf16>, vector<30x224xbf16>, vector<14x224xf32> -> vector<14x224xf32>
    %54 = arith.addf %48, %53 : vector<14x224xf32>
    %c0_59 = arith.constant 0 : index
    %c1_60 = arith.constant 1 : index
    %c0_61 = arith.constant 0 : index
    %55 = vector.load %arg1[%c0_59, %c1_60, %c0_61] : memref<2x15x30xbf16, #tpu.memory_space<vmem>>, vector<1x14x30xbf16>
    %56 = vector.shape_cast %55 : vector<1x14x30xbf16> to vector<14x30xbf16>
    %c1_62 = arith.constant 1 : index
    %c0_63 = arith.constant 0 : index
    %c0_64 = arith.constant 0 : index
    %c0_65 = arith.constant 0 : index
    %57 = vector.load %arg3[%c1_62, %c0_63, %c0_64, %c0_65] : memref<3x2x30x224xbf16, #tpu.memory_space<vmem>>, vector<1x1x30x224xbf16>
    %58 = vector.shape_cast %57 : vector<1x1x30x224xbf16> to vector<30x224xbf16>
    %cst_66 = arith.constant dense<0.000000e+00> : vector<14x224xf32>
    %59 = tpu.matmul %56, %58, %cst_66 {dimension_numbers = #tpu.dot_dimension_numbers<[1], [0], [0], [1], [0, 0, 1, 1], [], []>} : vector<14x30xbf16>, vector<30x224xbf16>, vector<14x224xf32> -> vector<14x224xf32>
    %60 = arith.addf %54, %59 : vector<14x224xf32>
    %c0_67 = arith.constant 0 : index
    %c1_68 = arith.constant 1 : index
    %c0_69 = arith.constant 0 : index
    %61 = vector.load %arg2[%c0_67, %c1_68, %c0_69] : memref<2x15x30xbf16, #tpu.memory_space<vmem>>, vector<1x14x30xbf16>
    %62 = vector.shape_cast %61 : vector<1x14x30xbf16> to vector<14x30xbf16>
    %c2_70 = arith.constant 2 : index
    %c0_71 = arith.constant 0 : index
    %c0_72 = arith.constant 0 : index
    %c0_73 = arith.constant 0 : index
    %63 = vector.load %arg3[%c2_70, %c0_71, %c0_72, %c0_73] : memref<3x2x30x224xbf16, #tpu.memory_space<vmem>>, vector<1x1x30x224xbf16>
    %64 = vector.shape_cast %63 : vector<1x1x30x224xbf16> to vector<30x224xbf16>
    %cst_74 = arith.constant dense<0.000000e+00> : vector<14x224xf32>
    %65 = tpu.matmul %62, %64, %cst_74 {dimension_numbers = #tpu.dot_dimension_numbers<[1], [0], [0], [1], [0, 0, 1, 1], [], []>} : vector<14x30xbf16>, vector<30x224xbf16>, vector<14x224xf32> -> vector<14x224xf32>
    %66 = arith.addf %60, %65 : vector<14x224xf32>
    %67 = vector.broadcast %0 : vector<1x224xf32> to vector<14x224xf32>
    %68 = arith.addf %66, %67 : vector<14x224xf32>
    %cst_75 = arith.constant 0.000000e+00 : f32
    %69 = vector.broadcast %cst_75 : f32 to vector<14x224xf32>
    %70 = arith.maximumf %68, %69 : vector<14x224xf32>
    %71 = arith.maximumf %47, %70 : vector<14x224xf32>
    %cst_76 = arith.constant 0.000000e+00 : f32
    %72 = vector.broadcast %cst_76 : f32 to vector<14x224xf32>
    %c0_77 = arith.constant 0 : index
    %c0_78 = arith.constant 0 : index
    %c0_79 = arith.constant 0 : index
    %73 = vector.load %arg2[%c0_77, %c0_78, %c0_79] : memref<2x15x30xbf16, #tpu.memory_space<vmem>>, vector<1x14x30xbf16>
    %74 = vector.shape_cast %73 : vector<1x14x30xbf16> to vector<14x30xbf16>
    %c0_80 = arith.constant 0 : index
    %c1_81 = arith.constant 1 : index
    %c0_82 = arith.constant 0 : index
    %c0_83 = arith.constant 0 : index
    %75 = vector.load %arg3[%c0_80, %c1_81, %c0_82, %c0_83] : memref<3x2x30x224xbf16, #tpu.memory_space<vmem>>, vector<1x1x30x224xbf16>
    %76 = vector.shape_cast %75 : vector<1x1x30x224xbf16> to vector<30x224xbf16>
    %cst_84 = arith.constant dense<0.000000e+00> : vector<14x224xf32>
    %77 = tpu.matmul %74, %76, %cst_84 {dimension_numbers = #tpu.dot_dimension_numbers<[1], [0], [0], [1], [0, 0, 1, 1], [], []>} : vector<14x30xbf16>, vector<30x224xbf16>, vector<14x224xf32> -> vector<14x224xf32>
    %78 = arith.addf %72, %77 : vector<14x224xf32>
    %c0_85 = arith.constant 0 : index
    %c1_86 = arith.constant 1 : index
    %c0_87 = arith.constant 0 : index
    %79 = vector.load %arg1[%c0_85, %c1_86, %c0_87] : memref<2x15x30xbf16, #tpu.memory_space<vmem>>, vector<1x14x30xbf16>
    %80 = vector.shape_cast %79 : vector<1x14x30xbf16> to vector<14x30xbf16>
    %c1_88 = arith.constant 1 : index
    %c1_89 = arith.constant 1 : index
    %c0_90 = arith.constant 0 : index
    %c0_91 = arith.constant 0 : index
    %81 = vector.load %arg3[%c1_88, %c1_89, %c0_90, %c0_91] : memref<3x2x30x224xbf16, #tpu.memory_space<vmem>>, vector<1x1x30x224xbf16>
    %82 = vector.shape_cast %81 : vector<1x1x30x224xbf16> to vector<30x224xbf16>
    %cst_92 = arith.constant dense<0.000000e+00> : vector<14x224xf32>
    %83 = tpu.matmul %80, %82, %cst_92 {dimension_numbers = #tpu.dot_dimension_numbers<[1], [0], [0], [1], [0, 0, 1, 1], [], []>} : vector<14x30xbf16>, vector<30x224xbf16>, vector<14x224xf32> -> vector<14x224xf32>
    %84 = arith.addf %78, %83 : vector<14x224xf32>
    %c0_93 = arith.constant 0 : index
    %c1_94 = arith.constant 1 : index
    %c0_95 = arith.constant 0 : index
    %85 = vector.load %arg2[%c0_93, %c1_94, %c0_95] : memref<2x15x30xbf16, #tpu.memory_space<vmem>>, vector<1x14x30xbf16>
    %86 = vector.shape_cast %85 : vector<1x14x30xbf16> to vector<14x30xbf16>
    %c2_96 = arith.constant 2 : index
    %c1_97 = arith.constant 1 : index
    %c0_98 = arith.constant 0 : index
    %c0_99 = arith.constant 0 : index
    %87 = vector.load %arg3[%c2_96, %c1_97, %c0_98, %c0_99] : memref<3x2x30x224xbf16, #tpu.memory_space<vmem>>, vector<1x1x30x224xbf16>
    %88 = vector.shape_cast %87 : vector<1x1x30x224xbf16> to vector<30x224xbf16>
    %cst_100 = arith.constant dense<0.000000e+00> : vector<14x224xf32>
    %89 = tpu.matmul %86, %88, %cst_100 {dimension_numbers = #tpu.dot_dimension_numbers<[1], [0], [0], [1], [0, 0, 1, 1], [], []>} : vector<14x30xbf16>, vector<30x224xbf16>, vector<14x224xf32> -> vector<14x224xf32>
    %90 = arith.addf %84, %89 : vector<14x224xf32>
    %91 = vector.broadcast %0 : vector<1x224xf32> to vector<14x224xf32>
    %92 = arith.addf %90, %91 : vector<14x224xf32>
    %cst_101 = arith.constant 0.000000e+00 : f32
    %93 = vector.broadcast %cst_101 : f32 to vector<14x224xf32>
    %94 = arith.maximumf %92, %93 : vector<14x224xf32>
    %95 = arith.maximumf %71, %94 : vector<14x224xf32>
    %96 = arith.truncf %95 : vector<14x224xf32> to vector<14x224xbf16>
    %c0_102 = arith.constant 0 : index
    %c0_103 = arith.constant 0 : index
    %c0_104 = arith.constant 0 : index
    %97 = vector.load %arg5[%c0_102, %c0_103, %c0_104] : memref<2x14x224xbf16, #tpu.memory_space<vmem>>, vector<1x14x224xbf16>
    %98 = vector.shape_cast %97 : vector<1x14x224xbf16> to vector<14x224xbf16>
    %99 = vector.shape_cast %96 : vector<14x224xbf16> to vector<1x14x224xbf16>
    tpu.vector_store %arg5[%c0_102, %c0_103, %c0_104], %99 {strides = array<i32>} : memref<2x14x224xbf16, #tpu.memory_space<vmem>>, vector<1x14x224xbf16>,
    %cst_105 = arith.constant 0.000000e+00 : f32
    %100 = vector.broadcast %cst_105 : f32 to vector<14x224xf32>
    %c1_106 = arith.constant 1 : index
    %c0_107 = arith.constant 0 : index
    %c0_108 = arith.constant 0 : index
    %101 = vector.load %arg1[%c1_106, %c0_107, %c0_108] : memref<2x15x30xbf16, #tpu.memory_space<vmem>>, vector<1x14x30xbf16>
    %102 = vector.shape_cast %101 : vector<1x14x30xbf16> to vector<14x30xbf16>
    %c0_109 = arith.constant 0 : index
    %c0_110 = arith.constant 0 : index
    %c0_111 = arith.constant 0 : index
    %c0_112 = arith.constant 0 : index
    %103 = vector.load %arg3[%c0_109, %c0_110, %c0_111, %c0_112] : memref<3x2x30x224xbf16, #tpu.memory_space<vmem>>, vector<1x1x30x224xbf16>
    %104 = vector.shape_cast %103 : vector<1x1x30x224xbf16> to vector<30x224xbf16>
    %cst_113 = arith.constant dense<0.000000e+00> : vector<14x224xf32>
    %105 = tpu.matmul %102, %104, %cst_113 {dimension_numbers = #tpu.dot_dimension_numbers<[1], [0], [0], [1], [0, 0, 1, 1], [], []>} : vector<14x30xbf16>, vector<30x224xbf16>, vector<14x224xf32> -> vector<14x224xf32>
    %106 = arith.addf %100, %105 : vector<14x224xf32>
    %c1_114 = arith.constant 1 : index
    %c0_115 = arith.constant 0 : index
    %c0_116 = arith.constant 0 : index
    %107 = vector.load %arg2[%c1_114, %c0_115, %c0_116] : memref<2x15x30xbf16, #tpu.memory_space<vmem>>, vector<1x14x30xbf16>
    %108 = vector.shape_cast %107 : vector<1x14x30xbf16> to vector<14x30xbf16>
    %c1_117 = arith.constant 1 : index
    %c0_118 = arith.constant 0 : index
    %c0_119 = arith.constant 0 : index
    %c0_120 = arith.constant 0 : index
    %109 = vector.load %arg3[%c1_117, %c0_118, %c0_119, %c0_120] : memref<3x2x30x224xbf16, #tpu.memory_space<vmem>>, vector<1x1x30x224xbf16>
    %110 = vector.shape_cast %109 : vector<1x1x30x224xbf16> to vector<30x224xbf16>
    %cst_121 = arith.constant dense<0.000000e+00> : vector<14x224xf32>
    %111 = tpu.matmul %108, %110, %cst_121 {dimension_numbers = #tpu.dot_dimension_numbers<[1], [0], [0], [1], [0, 0, 1, 1], [], []>} : vector<14x30xbf16>, vector<30x224xbf16>, vector<14x224xf32> -> vector<14x224xf32>
    %112 = arith.addf %106, %111 : vector<14x224xf32>
    %c1_122 = arith.constant 1 : index
    %c1_123 = arith.constant 1 : index
    %c0_124 = arith.constant 0 : index
    %113 = vector.load %arg1[%c1_122, %c1_123, %c0_124] : memref<2x15x30xbf16, #tpu.memory_space<vmem>>, vector<1x14x30xbf16>
    %114 = vector.shape_cast %113 : vector<1x14x30xbf16> to vector<14x30xbf16>
    %c2_125 = arith.constant 2 : index
    %c0_126 = arith.constant 0 : index
    %c0_127 = arith.constant 0 : index
    %c0_128 = arith.constant 0 : index
    %115 = vector.load %arg3[%c2_125, %c0_126, %c0_127, %c0_128] : memref<3x2x30x224xbf16, #tpu.memory_space<vmem>>, vector<1x1x30x224xbf16>
    %116 = vector.shape_cast %115 : vector<1x1x30x224xbf16> to vector<30x224xbf16>
    %cst_129 = arith.constant dense<0.000000e+00> : vector<14x224xf32>
    %117 = tpu.matmul %114, %116, %cst_129 {dimension_numbers = #tpu.dot_dimension_numbers<[1], [0], [0], [1], [0, 0, 1, 1], [], []>} : vector<14x30xbf16>, vector<30x224xbf16>, vector<14x224xf32> -> vector<14x224xf32>
    %118 = arith.addf %112, %117 : vector<14x224xf32>
    %119 = vector.broadcast %0 : vector<1x224xf32> to vector<14x224xf32>
    %120 = arith.addf %118, %119 : vector<14x224xf32>
    %cst_130 = arith.constant 0.000000e+00 : f32
    %121 = vector.broadcast %cst_130 : f32 to vector<14x224xf32>
    %122 = arith.maximumf %120, %121 : vector<14x224xf32>
    %cst_131 = arith.constant 0.000000e+00 : f32
    %123 = vector.broadcast %cst_131 : f32 to vector<14x224xf32>
    %c1_132 = arith.constant 1 : index
    %c0_133 = arith.constant 0 : index
    %c0_134 = arith.constant 0 : index
    %124 = vector.load %arg1[%c1_132, %c0_133, %c0_134] : memref<2x15x30xbf16, #tpu.memory_space<vmem>>, vector<1x14x30xbf16>
    %125 = vector.shape_cast %124 : vector<1x14x30xbf16> to vector<14x30xbf16>
    %c0_135 = arith.constant 0 : index
    %c1_136 = arith.constant 1 : index
    %c0_137 = arith.constant 0 : index
    %c0_138 = arith.constant 0 : index
    %126 = vector.load %arg3[%c0_135, %c1_136, %c0_137, %c0_138] : memref<3x2x30x224xbf16, #tpu.memory_space<vmem>>, vector<1x1x30x224xbf16>
    %127 = vector.shape_cast %126 : vector<1x1x30x224xbf16> to vector<30x224xbf16>
    %cst_139 = arith.constant dense<0.000000e+00> : vector<14x224xf32>
    %128 = tpu.matmul %125, %127, %cst_139 {dimension_numbers = #tpu.dot_dimension_numbers<[1], [0], [0], [1], [0, 0, 1, 1], [], []>} : vector<14x30xbf16>, vector<30x224xbf16>, vector<14x224xf32> -> vector<14x224xf32>
    %129 = arith.addf %123, %128 : vector<14x224xf32>
    %c1_140 = arith.constant 1 : index
    %c0_141 = arith.constant 0 : index
    %c0_142 = arith.constant 0 : index
    %130 = vector.load %arg2[%c1_140, %c0_141, %c0_142] : memref<2x15x30xbf16, #tpu.memory_space<vmem>>, vector<1x14x30xbf16>
    %131 = vector.shape_cast %130 : vector<1x14x30xbf16> to vector<14x30xbf16>
    %c1_143 = arith.constant 1 : index
    %c1_144 = arith.constant 1 : index
    %c0_145 = arith.constant 0 : index
    %c0_146 = arith.constant 0 : index
    %132 = vector.load %arg3[%c1_143, %c1_144, %c0_145, %c0_146] : memref<3x2x30x224xbf16, #tpu.memory_space<vmem>>, vector<1x1x30x224xbf16>
    %133 = vector.shape_cast %132 : vector<1x1x30x224xbf16> to vector<30x224xbf16>
    %cst_147 = arith.constant dense<0.000000e+00> : vector<14x224xf32>
    %134 = tpu.matmul %131, %133, %cst_147 {dimension_numbers = #tpu.dot_dimension_numbers<[1], [0], [0], [1], [0, 0, 1, 1], [], []>} : vector<14x30xbf16>, vector<30x224xbf16>, vector<14x224xf32> -> vector<14x224xf32>
    %135 = arith.addf %129, %134 : vector<14x224xf32>
    %c1_148 = arith.constant 1 : index
    %c1_149 = arith.constant 1 : index
    %c0_150 = arith.constant 0 : index
    %136 = vector.load %arg1[%c1_148, %c1_149, %c0_150] : memref<2x15x30xbf16, #tpu.memory_space<vmem>>, vector<1x14x30xbf16>
    %137 = vector.shape_cast %136 : vector<1x14x30xbf16> to vector<14x30xbf16>
    %c2_151 = arith.constant 2 : index
    %c1_152 = arith.constant 1 : index
    %c0_153 = arith.constant 0 : index
    %c0_154 = arith.constant 0 : index
    %138 = vector.load %arg3[%c2_151, %c1_152, %c0_153, %c0_154] : memref<3x2x30x224xbf16, #tpu.memory_space<vmem>>, vector<1x1x30x224xbf16>
    %139 = vector.shape_cast %138 : vector<1x1x30x224xbf16> to vector<30x224xbf16>
    %cst_155 = arith.constant dense<0.000000e+00> : vector<14x224xf32>
    %140 = tpu.matmul %137, %139, %cst_155 {dimension_numbers = #tpu.dot_dimension_numbers<[1], [0], [0], [1], [0, 0, 1, 1], [], []>} : vector<14x30xbf16>, vector<30x224xbf16>, vector<14x224xf32> -> vector<14x224xf32>
    %141 = arith.addf %135, %140 : vector<14x224xf32>
    %142 = vector.broadcast %0 : vector<1x224xf32> to vector<14x224xf32>
    %143 = arith.addf %141, %142 : vector<14x224xf32>
    %cst_156 = arith.constant 0.000000e+00 : f32
    %144 = vector.broadcast %cst_156 : f32 to vector<14x224xf32>
    %145 = arith.maximumf %143, %144 : vector<14x224xf32>
    %146 = arith.maximumf %122, %145 : vector<14x224xf32>
    %cst_157 = arith.constant 0.000000e+00 : f32
    %147 = vector.broadcast %cst_157 : f32 to vector<14x224xf32>
    %c1_158 = arith.constant 1 : index
    %c0_159 = arith.constant 0 : index
    %c0_160 = arith.constant 0 : index
    %148 = vector.load %arg2[%c1_158, %c0_159, %c0_160] : memref<2x15x30xbf16, #tpu.memory_space<vmem>>, vector<1x14x30xbf16>
    %149 = vector.shape_cast %148 : vector<1x14x30xbf16> to vector<14x30xbf16>
    %c0_161 = arith.constant 0 : index
    %c0_162 = arith.constant 0 : index
    %c0_163 = arith.constant 0 : index
    %c0_164 = arith.constant 0 : index
    %150 = vector.load %arg3[%c0_161, %c0_162, %c0_163, %c0_164] : memref<3x2x30x224xbf16, #tpu.memory_space<vmem>>, vector<1x1x30x224xbf16>
    %151 = vector.shape_cast %150 : vector<1x1x30x224xbf16> to vector<30x224xbf16>
    %cst_165 = arith.constant dense<0.000000e+00> : vector<14x224xf32>
    %152 = tpu.matmul %149, %151, %cst_165 {dimension_numbers = #tpu.dot_dimension_numbers<[1], [0], [0], [1], [0, 0, 1, 1], [], []>} : vector<14x30xbf16>, vector<30x224xbf16>, vector<14x224xf32> -> vector<14x224xf32>
    %153 = arith.addf %147, %152 : vector<14x224xf32>
    %c1_166 = arith.constant 1 : index
    %c1_167 = arith.constant 1 : index
    %c0_168 = arith.constant 0 : index
    %154 = vector.load %arg1[%c1_166, %c1_167, %c0_168] : memref<2x15x30xbf16, #tpu.memory_space<vmem>>, vector<1x14x30xbf16>
    %155 = vector.shape_cast %154 : vector<1x14x30xbf16> to vector<14x30xbf16>
    %c1_169 = arith.constant 1 : index
    %c0_170 = arith.constant 0 : index
    %c0_171 = arith.constant 0 : index
    %c0_172 = arith.constant 0 : index
    %156 = vector.load %arg3[%c1_169, %c0_170, %c0_171, %c0_172] : memref<3x2x30x224xbf16, #tpu.memory_space<vmem>>, vector<1x1x30x224xbf16>
    %157 = vector.shape_cast %156 : vector<1x1x30x224xbf16> to vector<30x224xbf16>
    %cst_173 = arith.constant dense<0.000000e+00> : vector<14x224xf32>
    %158 = tpu.matmul %155, %157, %cst_173 {dimension_numbers = #tpu.dot_dimension_numbers<[1], [0], [0], [1], [0, 0, 1, 1], [], []>} : vector<14x30xbf16>, vector<30x224xbf16>, vector<14x224xf32> -> vector<14x224xf32>
    %159 = arith.addf %153, %158 : vector<14x224xf32>
    %c1_174 = arith.constant 1 : index
    %c1_175 = arith.constant 1 : index
    %c0_176 = arith.constant 0 : index
    %160 = vector.load %arg2[%c1_174, %c1_175, %c0_176] : memref<2x15x30xbf16, #tpu.memory_space<vmem>>, vector<1x14x30xbf16>
    %161 = vector.shape_cast %160 : vector<1x14x30xbf16> to vector<14x30xbf16>
    %c2_177 = arith.constant 2 : index
    %c0_178 = arith.constant 0 : index
    %c0_179 = arith.constant 0 : index
    %c0_180 = arith.constant 0 : index
    %162 = vector.load %arg3[%c2_177, %c0_178, %c0_179, %c0_180] : memref<3x2x30x224xbf16, #tpu.memory_space<vmem>>, vector<1x1x30x224xbf16>
    %163 = vector.shape_cast %162 : vector<1x1x30x224xbf16> to vector<30x224xbf16>
    %cst_181 = arith.constant dense<0.000000e+00> : vector<14x224xf32>
    %164 = tpu.matmul %161, %163, %cst_181 {dimension_numbers = #tpu.dot_dimension_numbers<[1], [0], [0], [1], [0, 0, 1, 1], [], []>} : vector<14x30xbf16>, vector<30x224xbf16>, vector<14x224xf32> -> vector<14x224xf32>
    %165 = arith.addf %159, %164 : vector<14x224xf32>
    %166 = vector.broadcast %0 : vector<1x224xf32> to vector<14x224xf32>
    %167 = arith.addf %165, %166 : vector<14x224xf32>
    %cst_182 = arith.constant 0.000000e+00 : f32
    %168 = vector.broadcast %cst_182 : f32 to vector<14x224xf32>
    %169 = arith.maximumf %167, %168 : vector<14x224xf32>
    %170 = arith.maximumf %146, %169 : vector<14x224xf32>
    %cst_183 = arith.constant 0.000000e+00 : f32
    %171 = vector.broadcast %cst_183 : f32 to vector<14x224xf32>
    %c1_184 = arith.constant 1 : index
    %c0_185 = arith.constant 0 : index
    %c0_186 = arith.constant 0 : index
    %172 = vector.load %arg2[%c1_184, %c0_185, %c0_186] : memref<2x15x30xbf16, #tpu.memory_space<vmem>>, vector<1x14x30xbf16>
    %173 = vector.shape_cast %172 : vector<1x14x30xbf16> to vector<14x30xbf16>
    %c0_187 = arith.constant 0 : index
    %c1_188 = arith.constant 1 : index
    %c0_189 = arith.constant 0 : index
    %c0_190 = arith.constant 0 : index
    %174 = vector.load %arg3[%c0_187, %c1_188, %c0_189, %c0_190] : memref<3x2x30x224xbf16, #tpu.memory_space<vmem>>, vector<1x1x30x224xbf16>
    %175 = vector.shape_cast %174 : vector<1x1x30x224xbf16> to vector<30x224xbf16>
    %cst_191 = arith.constant dense<0.000000e+00> : vector<14x224xf32>
    %176 = tpu.matmul %173, %175, %cst_191 {dimension_numbers = #tpu.dot_dimension_numbers<[1], [0], [0], [1], [0, 0, 1, 1], [], []>} : vector<14x30xbf16>, vector<30x224xbf16>, vector<14x224xf32> -> vector<14x224xf32>
    %177 = arith.addf %171, %176 : vector<14x224xf32>
    %c1_192 = arith.constant 1 : index
    %c1_193 = arith.constant 1 : index
    %c0_194 = arith.constant 0 : index
    %178 = vector.load %arg1[%c1_192, %c1_193, %c0_194] : memref<2x15x30xbf16, #tpu.memory_space<vmem>>, vector<1x14x30xbf16>
    %179 = vector.shape_cast %178 : vector<1x14x30xbf16> to vector<14x30xbf16>
    %c1_195 = arith.constant 1 : index
    %c1_196 = arith.constant 1 : index
    %c0_197 = arith.constant 0 : index
    %c0_198 = arith.constant 0 : index
    %180 = vector.load %arg3[%c1_195, %c1_196, %c0_197, %c0_198] : memref<3x2x30x224xbf16, #tpu.memory_space<vmem>>, vector<1x1x30x224xbf16>
    %181 = vector.shape_cast %180 : vector<1x1x30x224xbf16> to vector<30x224xbf16>
    %cst_199 = arith.constant dense<0.000000e+00> : vector<14x224xf32>
    %182 = tpu.matmul %179, %181, %cst_199 {dimension_numbers = #tpu.dot_dimension_numbers<[1], [0], [0], [1], [0, 0, 1, 1], [], []>} : vector<14x30xbf16>, vector<30x224xbf16>, vector<14x224xf32> -> vector<14x224xf32>
    %183 = arith.addf %177, %182 : vector<14x224xf32>
    %c1_200 = arith.constant 1 : index
    %c1_201 = arith.constant 1 : index
    %c0_202 = arith.constant 0 : index
    %184 = vector.load %arg2[%c1_200, %c1_201, %c0_202] : memref<2x15x30xbf16, #tpu.memory_space<vmem>>, vector<1x14x30xbf16>
    %185 = vector.shape_cast %184 : vector<1x14x30xbf16> to vector<14x30xbf16>
    %c2_203 = arith.constant 2 : index
    %c1_204 = arith.constant 1 : index
    %c0_205 = arith.constant 0 : index
    %c0_206 = arith.constant 0 : index
    %186 = vector.load %arg3[%c2_203, %c1_204, %c0_205, %c0_206] : memref<3x2x30x224xbf16, #tpu.memory_space<vmem>>, vector<1x1x30x224xbf16>
    %187 = vector.shape_cast %186 : vector<1x1x30x224xbf16> to vector<30x224xbf16>
    %cst_207 = arith.constant dense<0.000000e+00> : vector<14x224xf32>
    %188 = tpu.matmul %185, %187, %cst_207 {dimension_numbers = #tpu.dot_dimension_numbers<[1], [0], [0], [1], [0, 0, 1, 1], [], []>} : vector<14x30xbf16>, vector<30x224xbf16>, vector<14x224xf32> -> vector<14x224xf32>
    %189 = arith.addf %183, %188 : vector<14x224xf32>
    %190 = vector.broadcast %0 : vector<1x224xf32> to vector<14x224xf32>
    %191 = arith.addf %189, %190 : vector<14x224xf32>
    %cst_208 = arith.constant 0.000000e+00 : f32
    %192 = vector.broadcast %cst_208 : f32 to vector<14x224xf32>
    %193 = arith.maximumf %191, %192 : vector<14x224xf32>
    %194 = arith.maximumf %170, %193 : vector<14x224xf32>
    %195 = arith.truncf %194 : vector<14x224xf32> to vector<14x224xbf16>
    %c1_209 = arith.constant 1 : index
    %c0_210 = arith.constant 0 : index
    %c0_211 = arith.constant 0 : index
    %196 = vector.load %arg5[%c1_209, %c0_210, %c0_211] : memref<2x14x224xbf16, #tpu.memory_space<vmem>>, vector<1x14x224xbf16>
    %197 = vector.shape_cast %196 : vector<1x14x224xbf16> to vector<14x224xbf16>
    %198 = vector.shape_cast %195 : vector<14x224xbf16> to vector<1x14x224xbf16>
    tpu.vector_store %arg5[%c1_209, %c0_210, %c0_211], %198 {strides = array<i32>} : memref<2x14x224xbf16, #tpu.memory_space<vmem>>, vector<1x14x224xbf16>,
    return
  }
  func.func @transform_0(%arg0: i32) -> (i32, i32, i32) {
    %c0_i32 = arith.constant 0 : i32
    %c0_i32_0 = arith.constant 0 : i32
    %c0_i32_1 = arith.constant 0 : i32
    return %arg0, %c0_i32, %c0_i32_0 : i32, i32, i32
  }
  func.func @transform_1(%arg0: i32) -> (i32, i32, i32) {
    %c0_i32 = arith.constant 0 : i32
    %c0_i32_0 = arith.constant 0 : i32
    %c0_i32_1 = arith.constant 0 : i32
    return %arg0, %c0_i32, %c0_i32_0 : i32, i32, i32
  }
  func.func @transform_2(%arg0: i32) -> (i32, i32, i32, i32) {
    %c0_i32 = arith.constant 0 : i32
    %c0_i32_0 = arith.constant 0 : i32
    %c0_i32_1 = arith.constant 0 : i32
    %c0_i32_2 = arith.constant 0 : i32
    %c0_i32_3 = arith.constant 0 : i32
    return %c0_i32, %c0_i32_0, %c0_i32_1, %c0_i32_2 : i32, i32, i32, i32
  }
  func.func @transform_3(%arg0: i32) -> (i32, i32) {
    %c0_i32 = arith.constant 0 : i32
    %c0_i32_0 = arith.constant 0 : i32
    %c0_i32_1 = arith.constant 0 : i32
    return %c0_i32, %c0_i32_0 : i32, i32
  }
  func.func @transform_4(%arg0: i32) -> (i32, i32, i32) {
    %c0_i32 = arith.constant 0 : i32
    %c0_i32_0 = arith.constant 0 : i32
    %c0_i32_1 = arith.constant 0 : i32
    return %arg0, %c0_i32, %c0_i32_0 : i32, i32, i32
  }
}

module attributes {stable_mosaic.version = 11 : i64} {
  func.func @_conv_relu_pool_kernel(%arg0: i32, %arg1: memref<2x8x256xbf16, #tpu.memory_space<vmem>>, %arg2: memref<2x8x256xbf16, #tpu.memory_space<vmem>>, %arg3: memref<3x2x256x224xbf16, #tpu.memory_space<vmem>>, %arg4: memref<1x224xf32, #tpu.memory_space<vmem>>, %arg5: memref<2x7x224xbf16, #tpu.memory_space<vmem>>) attributes {dimension_semantics = [#tpu.dimension_semantics<parallel>], iteration_bounds = array<i64: 1>, scalar_prefetch = 0 : i64, scratch_operands = 0 : i64, tpu.core_type = #tpu.core_type<tc>, window_params = [{transform_indices = @transform_0, window_bounds = array<i64: 2, 8, 256>}, {transform_indices = @transform_1, window_bounds = array<i64: 2, 8, 256>}, {pipeline_mode = #tpu.pipeline_mode<synchronous>, transform_indices = @transform_2, window_bounds = array<i64: 3, 2, 256, 224>}, {pipeline_mode = #tpu.pipeline_mode<synchronous>, transform_indices = @transform_3, window_bounds = array<i64: 1, 224>}, {transform_indices = @transform_4, window_bounds = array<i64: 2, 7, 224>}]} {
    %c0 = arith.constant 0 : index
    %c0_0 = arith.constant 0 : index
    %0 = vector.load %arg4[%c0, %c0_0] : memref<1x224xf32, #tpu.memory_space<vmem>>, vector<1x224xf32>
    %cst = arith.constant 0.000000e+00 : f32
    %1 = vector.broadcast %cst : f32 to vector<7x224xf32>
    %c0_1 = arith.constant 0 : index
    %c0_2 = arith.constant 0 : index
    %c0_3 = arith.constant 0 : index
    %2 = vector.load %arg1[%c0_1, %c0_2, %c0_3] : memref<2x8x256xbf16, #tpu.memory_space<vmem>>, vector<1x7x256xbf16>
    %3 = vector.shape_cast %2 : vector<1x7x256xbf16> to vector<7x256xbf16>
    %c0_4 = arith.constant 0 : index
    %c0_5 = arith.constant 0 : index
    %c0_6 = arith.constant 0 : index
    %c0_7 = arith.constant 0 : index
    %4 = vector.load %arg3[%c0_4, %c0_5, %c0_6, %c0_7] : memref<3x2x256x224xbf16, #tpu.memory_space<vmem>>, vector<1x1x256x224xbf16>
    %5 = vector.shape_cast %4 : vector<1x1x256x224xbf16> to vector<256x224xbf16>
    %cst_8 = arith.constant dense<0.000000e+00> : vector<7x224xf32>
    %6 = tpu.matmul %3, %5, %cst_8 {dimension_numbers = #tpu.dot_dimension_numbers<[1], [0], [0], [1], [0, 0, 1, 1], [], []>} : vector<7x256xbf16>, vector<256x224xbf16>, vector<7x224xf32> -> vector<7x224xf32>
    %7 = arith.addf %1, %6 : vector<7x224xf32>
    %c0_9 = arith.constant 0 : index
    %c0_10 = arith.constant 0 : index
    %c0_11 = arith.constant 0 : index
    %8 = vector.load %arg2[%c0_9, %c0_10, %c0_11] : memref<2x8x256xbf16, #tpu.memory_space<vmem>>, vector<1x7x256xbf16>
    %9 = vector.shape_cast %8 : vector<1x7x256xbf16> to vector<7x256xbf16>
    %c1 = arith.constant 1 : index
    %c0_12 = arith.constant 0 : index
    %c0_13 = arith.constant 0 : index
    %c0_14 = arith.constant 0 : index
    %10 = vector.load %arg3[%c1, %c0_12, %c0_13, %c0_14] : memref<3x2x256x224xbf16, #tpu.memory_space<vmem>>, vector<1x1x256x224xbf16>
    %11 = vector.shape_cast %10 : vector<1x1x256x224xbf16> to vector<256x224xbf16>
    %cst_15 = arith.constant dense<0.000000e+00> : vector<7x224xf32>
    %12 = tpu.matmul %9, %11, %cst_15 {dimension_numbers = #tpu.dot_dimension_numbers<[1], [0], [0], [1], [0, 0, 1, 1], [], []>} : vector<7x256xbf16>, vector<256x224xbf16>, vector<7x224xf32> -> vector<7x224xf32>
    %13 = arith.addf %7, %12 : vector<7x224xf32>
    %c0_16 = arith.constant 0 : index
    %c1_17 = arith.constant 1 : index
    %c0_18 = arith.constant 0 : index
    %14 = vector.load %arg1[%c0_16, %c1_17, %c0_18] : memref<2x8x256xbf16, #tpu.memory_space<vmem>>, vector<1x7x256xbf16>
    %15 = vector.shape_cast %14 : vector<1x7x256xbf16> to vector<7x256xbf16>
    %c2 = arith.constant 2 : index
    %c0_19 = arith.constant 0 : index
    %c0_20 = arith.constant 0 : index
    %c0_21 = arith.constant 0 : index
    %16 = vector.load %arg3[%c2, %c0_19, %c0_20, %c0_21] : memref<3x2x256x224xbf16, #tpu.memory_space<vmem>>, vector<1x1x256x224xbf16>
    %17 = vector.shape_cast %16 : vector<1x1x256x224xbf16> to vector<256x224xbf16>
    %cst_22 = arith.constant dense<0.000000e+00> : vector<7x224xf32>
    %18 = tpu.matmul %15, %17, %cst_22 {dimension_numbers = #tpu.dot_dimension_numbers<[1], [0], [0], [1], [0, 0, 1, 1], [], []>} : vector<7x256xbf16>, vector<256x224xbf16>, vector<7x224xf32> -> vector<7x224xf32>
    %19 = arith.addf %13, %18 : vector<7x224xf32>
    %20 = vector.broadcast %0 : vector<1x224xf32> to vector<7x224xf32>
    %21 = arith.addf %19, %20 : vector<7x224xf32>
    %cst_23 = arith.constant 0.000000e+00 : f32
    %22 = vector.broadcast %cst_23 : f32 to vector<7x224xf32>
    %23 = arith.maximumf %21, %22 : vector<7x224xf32>
    %cst_24 = arith.constant 0.000000e+00 : f32
    %24 = vector.broadcast %cst_24 : f32 to vector<7x224xf32>
    %c0_25 = arith.constant 0 : index
    %c0_26 = arith.constant 0 : index
    %c0_27 = arith.constant 0 : index
    %25 = vector.load %arg1[%c0_25, %c0_26, %c0_27] : memref<2x8x256xbf16, #tpu.memory_space<vmem>>, vector<1x7x256xbf16>
    %26 = vector.shape_cast %25 : vector<1x7x256xbf16> to vector<7x256xbf16>
    %c0_28 = arith.constant 0 : index
    %c1_29 = arith.constant 1 : index
    %c0_30 = arith.constant 0 : index
    %c0_31 = arith.constant 0 : index
    %27 = vector.load %arg3[%c0_28, %c1_29, %c0_30, %c0_31] : memref<3x2x256x224xbf16, #tpu.memory_space<vmem>>, vector<1x1x256x224xbf16>
    %28 = vector.shape_cast %27 : vector<1x1x256x224xbf16> to vector<256x224xbf16>
    %cst_32 = arith.constant dense<0.000000e+00> : vector<7x224xf32>
    %29 = tpu.matmul %26, %28, %cst_32 {dimension_numbers = #tpu.dot_dimension_numbers<[1], [0], [0], [1], [0, 0, 1, 1], [], []>} : vector<7x256xbf16>, vector<256x224xbf16>, vector<7x224xf32> -> vector<7x224xf32>
    %30 = arith.addf %24, %29 : vector<7x224xf32>
    %c0_33 = arith.constant 0 : index
    %c0_34 = arith.constant 0 : index
    %c0_35 = arith.constant 0 : index
    %31 = vector.load %arg2[%c0_33, %c0_34, %c0_35] : memref<2x8x256xbf16, #tpu.memory_space<vmem>>, vector<1x7x256xbf16>
    %32 = vector.shape_cast %31 : vector<1x7x256xbf16> to vector<7x256xbf16>
    %c1_36 = arith.constant 1 : index
    %c1_37 = arith.constant 1 : index
    %c0_38 = arith.constant 0 : index
    %c0_39 = arith.constant 0 : index
    %33 = vector.load %arg3[%c1_36, %c1_37, %c0_38, %c0_39] : memref<3x2x256x224xbf16, #tpu.memory_space<vmem>>, vector<1x1x256x224xbf16>
    %34 = vector.shape_cast %33 : vector<1x1x256x224xbf16> to vector<256x224xbf16>
    %cst_40 = arith.constant dense<0.000000e+00> : vector<7x224xf32>
    %35 = tpu.matmul %32, %34, %cst_40 {dimension_numbers = #tpu.dot_dimension_numbers<[1], [0], [0], [1], [0, 0, 1, 1], [], []>} : vector<7x256xbf16>, vector<256x224xbf16>, vector<7x224xf32> -> vector<7x224xf32>
    %36 = arith.addf %30, %35 : vector<7x224xf32>
    %c0_41 = arith.constant 0 : index
    %c1_42 = arith.constant 1 : index
    %c0_43 = arith.constant 0 : index
    %37 = vector.load %arg1[%c0_41, %c1_42, %c0_43] : memref<2x8x256xbf16, #tpu.memory_space<vmem>>, vector<1x7x256xbf16>
    %38 = vector.shape_cast %37 : vector<1x7x256xbf16> to vector<7x256xbf16>
    %c2_44 = arith.constant 2 : index
    %c1_45 = arith.constant 1 : index
    %c0_46 = arith.constant 0 : index
    %c0_47 = arith.constant 0 : index
    %39 = vector.load %arg3[%c2_44, %c1_45, %c0_46, %c0_47] : memref<3x2x256x224xbf16, #tpu.memory_space<vmem>>, vector<1x1x256x224xbf16>
    %40 = vector.shape_cast %39 : vector<1x1x256x224xbf16> to vector<256x224xbf16>
    %cst_48 = arith.constant dense<0.000000e+00> : vector<7x224xf32>
    %41 = tpu.matmul %38, %40, %cst_48 {dimension_numbers = #tpu.dot_dimension_numbers<[1], [0], [0], [1], [0, 0, 1, 1], [], []>} : vector<7x256xbf16>, vector<256x224xbf16>, vector<7x224xf32> -> vector<7x224xf32>
    %42 = arith.addf %36, %41 : vector<7x224xf32>
    %43 = vector.broadcast %0 : vector<1x224xf32> to vector<7x224xf32>
    %44 = arith.addf %42, %43 : vector<7x224xf32>
    %cst_49 = arith.constant 0.000000e+00 : f32
    %45 = vector.broadcast %cst_49 : f32 to vector<7x224xf32>
    %46 = arith.maximumf %44, %45 : vector<7x224xf32>
    %47 = arith.maximumf %23, %46 : vector<7x224xf32>
    %cst_50 = arith.constant 0.000000e+00 : f32
    %48 = vector.broadcast %cst_50 : f32 to vector<7x224xf32>
    %c0_51 = arith.constant 0 : index
    %c0_52 = arith.constant 0 : index
    %c0_53 = arith.constant 0 : index
    %49 = vector.load %arg2[%c0_51, %c0_52, %c0_53] : memref<2x8x256xbf16, #tpu.memory_space<vmem>>, vector<1x7x256xbf16>
    %50 = vector.shape_cast %49 : vector<1x7x256xbf16> to vector<7x256xbf16>
    %c0_54 = arith.constant 0 : index
    %c0_55 = arith.constant 0 : index
    %c0_56 = arith.constant 0 : index
    %c0_57 = arith.constant 0 : index
    %51 = vector.load %arg3[%c0_54, %c0_55, %c0_56, %c0_57] : memref<3x2x256x224xbf16, #tpu.memory_space<vmem>>, vector<1x1x256x224xbf16>
    %52 = vector.shape_cast %51 : vector<1x1x256x224xbf16> to vector<256x224xbf16>
    %cst_58 = arith.constant dense<0.000000e+00> : vector<7x224xf32>
    %53 = tpu.matmul %50, %52, %cst_58 {dimension_numbers = #tpu.dot_dimension_numbers<[1], [0], [0], [1], [0, 0, 1, 1], [], []>} : vector<7x256xbf16>, vector<256x224xbf16>, vector<7x224xf32> -> vector<7x224xf32>
    %54 = arith.addf %48, %53 : vector<7x224xf32>
    %c0_59 = arith.constant 0 : index
    %c1_60 = arith.constant 1 : index
    %c0_61 = arith.constant 0 : index
    %55 = vector.load %arg1[%c0_59, %c1_60, %c0_61] : memref<2x8x256xbf16, #tpu.memory_space<vmem>>, vector<1x7x256xbf16>
    %56 = vector.shape_cast %55 : vector<1x7x256xbf16> to vector<7x256xbf16>
    %c1_62 = arith.constant 1 : index
    %c0_63 = arith.constant 0 : index
    %c0_64 = arith.constant 0 : index
    %c0_65 = arith.constant 0 : index
    %57 = vector.load %arg3[%c1_62, %c0_63, %c0_64, %c0_65] : memref<3x2x256x224xbf16, #tpu.memory_space<vmem>>, vector<1x1x256x224xbf16>
    %58 = vector.shape_cast %57 : vector<1x1x256x224xbf16> to vector<256x224xbf16>
    %cst_66 = arith.constant dense<0.000000e+00> : vector<7x224xf32>
    %59 = tpu.matmul %56, %58, %cst_66 {dimension_numbers = #tpu.dot_dimension_numbers<[1], [0], [0], [1], [0, 0, 1, 1], [], []>} : vector<7x256xbf16>, vector<256x224xbf16>, vector<7x224xf32> -> vector<7x224xf32>
    %60 = arith.addf %54, %59 : vector<7x224xf32>
    %c0_67 = arith.constant 0 : index
    %c1_68 = arith.constant 1 : index
    %c0_69 = arith.constant 0 : index
    %61 = vector.load %arg2[%c0_67, %c1_68, %c0_69] : memref<2x8x256xbf16, #tpu.memory_space<vmem>>, vector<1x7x256xbf16>
    %62 = vector.shape_cast %61 : vector<1x7x256xbf16> to vector<7x256xbf16>
    %c2_70 = arith.constant 2 : index
    %c0_71 = arith.constant 0 : index
    %c0_72 = arith.constant 0 : index
    %c0_73 = arith.constant 0 : index
    %63 = vector.load %arg3[%c2_70, %c0_71, %c0_72, %c0_73] : memref<3x2x256x224xbf16, #tpu.memory_space<vmem>>, vector<1x1x256x224xbf16>
    %64 = vector.shape_cast %63 : vector<1x1x256x224xbf16> to vector<256x224xbf16>
    %cst_74 = arith.constant dense<0.000000e+00> : vector<7x224xf32>
    %65 = tpu.matmul %62, %64, %cst_74 {dimension_numbers = #tpu.dot_dimension_numbers<[1], [0], [0], [1], [0, 0, 1, 1], [], []>} : vector<7x256xbf16>, vector<256x224xbf16>, vector<7x224xf32> -> vector<7x224xf32>
    %66 = arith.addf %60, %65 : vector<7x224xf32>
    %67 = vector.broadcast %0 : vector<1x224xf32> to vector<7x224xf32>
    %68 = arith.addf %66, %67 : vector<7x224xf32>
    %cst_75 = arith.constant 0.000000e+00 : f32
    %69 = vector.broadcast %cst_75 : f32 to vector<7x224xf32>
    %70 = arith.maximumf %68, %69 : vector<7x224xf32>
    %71 = arith.maximumf %47, %70 : vector<7x224xf32>
    %cst_76 = arith.constant 0.000000e+00 : f32
    %72 = vector.broadcast %cst_76 : f32 to vector<7x224xf32>
    %c0_77 = arith.constant 0 : index
    %c0_78 = arith.constant 0 : index
    %c0_79 = arith.constant 0 : index
    %73 = vector.load %arg2[%c0_77, %c0_78, %c0_79] : memref<2x8x256xbf16, #tpu.memory_space<vmem>>, vector<1x7x256xbf16>
    %74 = vector.shape_cast %73 : vector<1x7x256xbf16> to vector<7x256xbf16>
    %c0_80 = arith.constant 0 : index
    %c1_81 = arith.constant 1 : index
    %c0_82 = arith.constant 0 : index
    %c0_83 = arith.constant 0 : index
    %75 = vector.load %arg3[%c0_80, %c1_81, %c0_82, %c0_83] : memref<3x2x256x224xbf16, #tpu.memory_space<vmem>>, vector<1x1x256x224xbf16>
    %76 = vector.shape_cast %75 : vector<1x1x256x224xbf16> to vector<256x224xbf16>
    %cst_84 = arith.constant dense<0.000000e+00> : vector<7x224xf32>
    %77 = tpu.matmul %74, %76, %cst_84 {dimension_numbers = #tpu.dot_dimension_numbers<[1], [0], [0], [1], [0, 0, 1, 1], [], []>} : vector<7x256xbf16>, vector<256x224xbf16>, vector<7x224xf32> -> vector<7x224xf32>
    %78 = arith.addf %72, %77 : vector<7x224xf32>
    %c0_85 = arith.constant 0 : index
    %c1_86 = arith.constant 1 : index
    %c0_87 = arith.constant 0 : index
    %79 = vector.load %arg1[%c0_85, %c1_86, %c0_87] : memref<2x8x256xbf16, #tpu.memory_space<vmem>>, vector<1x7x256xbf16>
    %80 = vector.shape_cast %79 : vector<1x7x256xbf16> to vector<7x256xbf16>
    %c1_88 = arith.constant 1 : index
    %c1_89 = arith.constant 1 : index
    %c0_90 = arith.constant 0 : index
    %c0_91 = arith.constant 0 : index
    %81 = vector.load %arg3[%c1_88, %c1_89, %c0_90, %c0_91] : memref<3x2x256x224xbf16, #tpu.memory_space<vmem>>, vector<1x1x256x224xbf16>
    %82 = vector.shape_cast %81 : vector<1x1x256x224xbf16> to vector<256x224xbf16>
    %cst_92 = arith.constant dense<0.000000e+00> : vector<7x224xf32>
    %83 = tpu.matmul %80, %82, %cst_92 {dimension_numbers = #tpu.dot_dimension_numbers<[1], [0], [0], [1], [0, 0, 1, 1], [], []>} : vector<7x256xbf16>, vector<256x224xbf16>, vector<7x224xf32> -> vector<7x224xf32>
    %84 = arith.addf %78, %83 : vector<7x224xf32>
    %c0_93 = arith.constant 0 : index
    %c1_94 = arith.constant 1 : index
    %c0_95 = arith.constant 0 : index
    %85 = vector.load %arg2[%c0_93, %c1_94, %c0_95] : memref<2x8x256xbf16, #tpu.memory_space<vmem>>, vector<1x7x256xbf16>
    %86 = vector.shape_cast %85 : vector<1x7x256xbf16> to vector<7x256xbf16>
    %c2_96 = arith.constant 2 : index
    %c1_97 = arith.constant 1 : index
    %c0_98 = arith.constant 0 : index
    %c0_99 = arith.constant 0 : index
    %87 = vector.load %arg3[%c2_96, %c1_97, %c0_98, %c0_99] : memref<3x2x256x224xbf16, #tpu.memory_space<vmem>>, vector<1x1x256x224xbf16>
    %88 = vector.shape_cast %87 : vector<1x1x256x224xbf16> to vector<256x224xbf16>
    %cst_100 = arith.constant dense<0.000000e+00> : vector<7x224xf32>
    %89 = tpu.matmul %86, %88, %cst_100 {dimension_numbers = #tpu.dot_dimension_numbers<[1], [0], [0], [1], [0, 0, 1, 1], [], []>} : vector<7x256xbf16>, vector<256x224xbf16>, vector<7x224xf32> -> vector<7x224xf32>
    %90 = arith.addf %84, %89 : vector<7x224xf32>
    %91 = vector.broadcast %0 : vector<1x224xf32> to vector<7x224xf32>
    %92 = arith.addf %90, %91 : vector<7x224xf32>
    %cst_101 = arith.constant 0.000000e+00 : f32
    %93 = vector.broadcast %cst_101 : f32 to vector<7x224xf32>
    %94 = arith.maximumf %92, %93 : vector<7x224xf32>
    %95 = arith.maximumf %71, %94 : vector<7x224xf32>
    %96 = arith.truncf %95 : vector<7x224xf32> to vector<7x224xbf16>
    %c0_102 = arith.constant 0 : index
    %c0_103 = arith.constant 0 : index
    %c0_104 = arith.constant 0 : index
    %97 = vector.load %arg5[%c0_102, %c0_103, %c0_104] : memref<2x7x224xbf16, #tpu.memory_space<vmem>>, vector<1x7x224xbf16>
    %98 = vector.shape_cast %97 : vector<1x7x224xbf16> to vector<7x224xbf16>
    %99 = vector.shape_cast %96 : vector<7x224xbf16> to vector<1x7x224xbf16>
    tpu.vector_store %arg5[%c0_102, %c0_103, %c0_104], %99 {strides = array<i32>} : memref<2x7x224xbf16, #tpu.memory_space<vmem>>, vector<1x7x224xbf16>,
    %cst_105 = arith.constant 0.000000e+00 : f32
    %100 = vector.broadcast %cst_105 : f32 to vector<7x224xf32>
    %c1_106 = arith.constant 1 : index
    %c0_107 = arith.constant 0 : index
    %c0_108 = arith.constant 0 : index
    %101 = vector.load %arg1[%c1_106, %c0_107, %c0_108] : memref<2x8x256xbf16, #tpu.memory_space<vmem>>, vector<1x7x256xbf16>
    %102 = vector.shape_cast %101 : vector<1x7x256xbf16> to vector<7x256xbf16>
    %c0_109 = arith.constant 0 : index
    %c0_110 = arith.constant 0 : index
    %c0_111 = arith.constant 0 : index
    %c0_112 = arith.constant 0 : index
    %103 = vector.load %arg3[%c0_109, %c0_110, %c0_111, %c0_112] : memref<3x2x256x224xbf16, #tpu.memory_space<vmem>>, vector<1x1x256x224xbf16>
    %104 = vector.shape_cast %103 : vector<1x1x256x224xbf16> to vector<256x224xbf16>
    %cst_113 = arith.constant dense<0.000000e+00> : vector<7x224xf32>
    %105 = tpu.matmul %102, %104, %cst_113 {dimension_numbers = #tpu.dot_dimension_numbers<[1], [0], [0], [1], [0, 0, 1, 1], [], []>} : vector<7x256xbf16>, vector<256x224xbf16>, vector<7x224xf32> -> vector<7x224xf32>
    %106 = arith.addf %100, %105 : vector<7x224xf32>
    %c1_114 = arith.constant 1 : index
    %c0_115 = arith.constant 0 : index
    %c0_116 = arith.constant 0 : index
    %107 = vector.load %arg2[%c1_114, %c0_115, %c0_116] : memref<2x8x256xbf16, #tpu.memory_space<vmem>>, vector<1x7x256xbf16>
    %108 = vector.shape_cast %107 : vector<1x7x256xbf16> to vector<7x256xbf16>
    %c1_117 = arith.constant 1 : index
    %c0_118 = arith.constant 0 : index
    %c0_119 = arith.constant 0 : index
    %c0_120 = arith.constant 0 : index
    %109 = vector.load %arg3[%c1_117, %c0_118, %c0_119, %c0_120] : memref<3x2x256x224xbf16, #tpu.memory_space<vmem>>, vector<1x1x256x224xbf16>
    %110 = vector.shape_cast %109 : vector<1x1x256x224xbf16> to vector<256x224xbf16>
    %cst_121 = arith.constant dense<0.000000e+00> : vector<7x224xf32>
    %111 = tpu.matmul %108, %110, %cst_121 {dimension_numbers = #tpu.dot_dimension_numbers<[1], [0], [0], [1], [0, 0, 1, 1], [], []>} : vector<7x256xbf16>, vector<256x224xbf16>, vector<7x224xf32> -> vector<7x224xf32>
    %112 = arith.addf %106, %111 : vector<7x224xf32>
    %c1_122 = arith.constant 1 : index
    %c1_123 = arith.constant 1 : index
    %c0_124 = arith.constant 0 : index
    %113 = vector.load %arg1[%c1_122, %c1_123, %c0_124] : memref<2x8x256xbf16, #tpu.memory_space<vmem>>, vector<1x7x256xbf16>
    %114 = vector.shape_cast %113 : vector<1x7x256xbf16> to vector<7x256xbf16>
    %c2_125 = arith.constant 2 : index
    %c0_126 = arith.constant 0 : index
    %c0_127 = arith.constant 0 : index
    %c0_128 = arith.constant 0 : index
    %115 = vector.load %arg3[%c2_125, %c0_126, %c0_127, %c0_128] : memref<3x2x256x224xbf16, #tpu.memory_space<vmem>>, vector<1x1x256x224xbf16>
    %116 = vector.shape_cast %115 : vector<1x1x256x224xbf16> to vector<256x224xbf16>
    %cst_129 = arith.constant dense<0.000000e+00> : vector<7x224xf32>
    %117 = tpu.matmul %114, %116, %cst_129 {dimension_numbers = #tpu.dot_dimension_numbers<[1], [0], [0], [1], [0, 0, 1, 1], [], []>} : vector<7x256xbf16>, vector<256x224xbf16>, vector<7x224xf32> -> vector<7x224xf32>
    %118 = arith.addf %112, %117 : vector<7x224xf32>
    %119 = vector.broadcast %0 : vector<1x224xf32> to vector<7x224xf32>
    %120 = arith.addf %118, %119 : vector<7x224xf32>
    %cst_130 = arith.constant 0.000000e+00 : f32
    %121 = vector.broadcast %cst_130 : f32 to vector<7x224xf32>
    %122 = arith.maximumf %120, %121 : vector<7x224xf32>
    %cst_131 = arith.constant 0.000000e+00 : f32
    %123 = vector.broadcast %cst_131 : f32 to vector<7x224xf32>
    %c1_132 = arith.constant 1 : index
    %c0_133 = arith.constant 0 : index
    %c0_134 = arith.constant 0 : index
    %124 = vector.load %arg1[%c1_132, %c0_133, %c0_134] : memref<2x8x256xbf16, #tpu.memory_space<vmem>>, vector<1x7x256xbf16>
    %125 = vector.shape_cast %124 : vector<1x7x256xbf16> to vector<7x256xbf16>
    %c0_135 = arith.constant 0 : index
    %c1_136 = arith.constant 1 : index
    %c0_137 = arith.constant 0 : index
    %c0_138 = arith.constant 0 : index
    %126 = vector.load %arg3[%c0_135, %c1_136, %c0_137, %c0_138] : memref<3x2x256x224xbf16, #tpu.memory_space<vmem>>, vector<1x1x256x224xbf16>
    %127 = vector.shape_cast %126 : vector<1x1x256x224xbf16> to vector<256x224xbf16>
    %cst_139 = arith.constant dense<0.000000e+00> : vector<7x224xf32>
    %128 = tpu.matmul %125, %127, %cst_139 {dimension_numbers = #tpu.dot_dimension_numbers<[1], [0], [0], [1], [0, 0, 1, 1], [], []>} : vector<7x256xbf16>, vector<256x224xbf16>, vector<7x224xf32> -> vector<7x224xf32>
    %129 = arith.addf %123, %128 : vector<7x224xf32>
    %c1_140 = arith.constant 1 : index
    %c0_141 = arith.constant 0 : index
    %c0_142 = arith.constant 0 : index
    %130 = vector.load %arg2[%c1_140, %c0_141, %c0_142] : memref<2x8x256xbf16, #tpu.memory_space<vmem>>, vector<1x7x256xbf16>
    %131 = vector.shape_cast %130 : vector<1x7x256xbf16> to vector<7x256xbf16>
    %c1_143 = arith.constant 1 : index
    %c1_144 = arith.constant 1 : index
    %c0_145 = arith.constant 0 : index
    %c0_146 = arith.constant 0 : index
    %132 = vector.load %arg3[%c1_143, %c1_144, %c0_145, %c0_146] : memref<3x2x256x224xbf16, #tpu.memory_space<vmem>>, vector<1x1x256x224xbf16>
    %133 = vector.shape_cast %132 : vector<1x1x256x224xbf16> to vector<256x224xbf16>
    %cst_147 = arith.constant dense<0.000000e+00> : vector<7x224xf32>
    %134 = tpu.matmul %131, %133, %cst_147 {dimension_numbers = #tpu.dot_dimension_numbers<[1], [0], [0], [1], [0, 0, 1, 1], [], []>} : vector<7x256xbf16>, vector<256x224xbf16>, vector<7x224xf32> -> vector<7x224xf32>
    %135 = arith.addf %129, %134 : vector<7x224xf32>
    %c1_148 = arith.constant 1 : index
    %c1_149 = arith.constant 1 : index
    %c0_150 = arith.constant 0 : index
    %136 = vector.load %arg1[%c1_148, %c1_149, %c0_150] : memref<2x8x256xbf16, #tpu.memory_space<vmem>>, vector<1x7x256xbf16>
    %137 = vector.shape_cast %136 : vector<1x7x256xbf16> to vector<7x256xbf16>
    %c2_151 = arith.constant 2 : index
    %c1_152 = arith.constant 1 : index
    %c0_153 = arith.constant 0 : index
    %c0_154 = arith.constant 0 : index
    %138 = vector.load %arg3[%c2_151, %c1_152, %c0_153, %c0_154] : memref<3x2x256x224xbf16, #tpu.memory_space<vmem>>, vector<1x1x256x224xbf16>
    %139 = vector.shape_cast %138 : vector<1x1x256x224xbf16> to vector<256x224xbf16>
    %cst_155 = arith.constant dense<0.000000e+00> : vector<7x224xf32>
    %140 = tpu.matmul %137, %139, %cst_155 {dimension_numbers = #tpu.dot_dimension_numbers<[1], [0], [0], [1], [0, 0, 1, 1], [], []>} : vector<7x256xbf16>, vector<256x224xbf16>, vector<7x224xf32> -> vector<7x224xf32>
    %141 = arith.addf %135, %140 : vector<7x224xf32>
    %142 = vector.broadcast %0 : vector<1x224xf32> to vector<7x224xf32>
    %143 = arith.addf %141, %142 : vector<7x224xf32>
    %cst_156 = arith.constant 0.000000e+00 : f32
    %144 = vector.broadcast %cst_156 : f32 to vector<7x224xf32>
    %145 = arith.maximumf %143, %144 : vector<7x224xf32>
    %146 = arith.maximumf %122, %145 : vector<7x224xf32>
    %cst_157 = arith.constant 0.000000e+00 : f32
    %147 = vector.broadcast %cst_157 : f32 to vector<7x224xf32>
    %c1_158 = arith.constant 1 : index
    %c0_159 = arith.constant 0 : index
    %c0_160 = arith.constant 0 : index
    %148 = vector.load %arg2[%c1_158, %c0_159, %c0_160] : memref<2x8x256xbf16, #tpu.memory_space<vmem>>, vector<1x7x256xbf16>
    %149 = vector.shape_cast %148 : vector<1x7x256xbf16> to vector<7x256xbf16>
    %c0_161 = arith.constant 0 : index
    %c0_162 = arith.constant 0 : index
    %c0_163 = arith.constant 0 : index
    %c0_164 = arith.constant 0 : index
    %150 = vector.load %arg3[%c0_161, %c0_162, %c0_163, %c0_164] : memref<3x2x256x224xbf16, #tpu.memory_space<vmem>>, vector<1x1x256x224xbf16>
    %151 = vector.shape_cast %150 : vector<1x1x256x224xbf16> to vector<256x224xbf16>
    %cst_165 = arith.constant dense<0.000000e+00> : vector<7x224xf32>
    %152 = tpu.matmul %149, %151, %cst_165 {dimension_numbers = #tpu.dot_dimension_numbers<[1], [0], [0], [1], [0, 0, 1, 1], [], []>} : vector<7x256xbf16>, vector<256x224xbf16>, vector<7x224xf32> -> vector<7x224xf32>
    %153 = arith.addf %147, %152 : vector<7x224xf32>
    %c1_166 = arith.constant 1 : index
    %c1_167 = arith.constant 1 : index
    %c0_168 = arith.constant 0 : index
    %154 = vector.load %arg1[%c1_166, %c1_167, %c0_168] : memref<2x8x256xbf16, #tpu.memory_space<vmem>>, vector<1x7x256xbf16>
    %155 = vector.shape_cast %154 : vector<1x7x256xbf16> to vector<7x256xbf16>
    %c1_169 = arith.constant 1 : index
    %c0_170 = arith.constant 0 : index
    %c0_171 = arith.constant 0 : index
    %c0_172 = arith.constant 0 : index
    %156 = vector.load %arg3[%c1_169, %c0_170, %c0_171, %c0_172] : memref<3x2x256x224xbf16, #tpu.memory_space<vmem>>, vector<1x1x256x224xbf16>
    %157 = vector.shape_cast %156 : vector<1x1x256x224xbf16> to vector<256x224xbf16>
    %cst_173 = arith.constant dense<0.000000e+00> : vector<7x224xf32>
    %158 = tpu.matmul %155, %157, %cst_173 {dimension_numbers = #tpu.dot_dimension_numbers<[1], [0], [0], [1], [0, 0, 1, 1], [], []>} : vector<7x256xbf16>, vector<256x224xbf16>, vector<7x224xf32> -> vector<7x224xf32>
    %159 = arith.addf %153, %158 : vector<7x224xf32>
    %c1_174 = arith.constant 1 : index
    %c1_175 = arith.constant 1 : index
    %c0_176 = arith.constant 0 : index
    %160 = vector.load %arg2[%c1_174, %c1_175, %c0_176] : memref<2x8x256xbf16, #tpu.memory_space<vmem>>, vector<1x7x256xbf16>
    %161 = vector.shape_cast %160 : vector<1x7x256xbf16> to vector<7x256xbf16>
    %c2_177 = arith.constant 2 : index
    %c0_178 = arith.constant 0 : index
    %c0_179 = arith.constant 0 : index
    %c0_180 = arith.constant 0 : index
    %162 = vector.load %arg3[%c2_177, %c0_178, %c0_179, %c0_180] : memref<3x2x256x224xbf16, #tpu.memory_space<vmem>>, vector<1x1x256x224xbf16>
    %163 = vector.shape_cast %162 : vector<1x1x256x224xbf16> to vector<256x224xbf16>
    %cst_181 = arith.constant dense<0.000000e+00> : vector<7x224xf32>
    %164 = tpu.matmul %161, %163, %cst_181 {dimension_numbers = #tpu.dot_dimension_numbers<[1], [0], [0], [1], [0, 0, 1, 1], [], []>} : vector<7x256xbf16>, vector<256x224xbf16>, vector<7x224xf32> -> vector<7x224xf32>
    %165 = arith.addf %159, %164 : vector<7x224xf32>
    %166 = vector.broadcast %0 : vector<1x224xf32> to vector<7x224xf32>
    %167 = arith.addf %165, %166 : vector<7x224xf32>
    %cst_182 = arith.constant 0.000000e+00 : f32
    %168 = vector.broadcast %cst_182 : f32 to vector<7x224xf32>
    %169 = arith.maximumf %167, %168 : vector<7x224xf32>
    %170 = arith.maximumf %146, %169 : vector<7x224xf32>
    %cst_183 = arith.constant 0.000000e+00 : f32
    %171 = vector.broadcast %cst_183 : f32 to vector<7x224xf32>
    %c1_184 = arith.constant 1 : index
    %c0_185 = arith.constant 0 : index
    %c0_186 = arith.constant 0 : index
    %172 = vector.load %arg2[%c1_184, %c0_185, %c0_186] : memref<2x8x256xbf16, #tpu.memory_space<vmem>>, vector<1x7x256xbf16>
    %173 = vector.shape_cast %172 : vector<1x7x256xbf16> to vector<7x256xbf16>
    %c0_187 = arith.constant 0 : index
    %c1_188 = arith.constant 1 : index
    %c0_189 = arith.constant 0 : index
    %c0_190 = arith.constant 0 : index
    %174 = vector.load %arg3[%c0_187, %c1_188, %c0_189, %c0_190] : memref<3x2x256x224xbf16, #tpu.memory_space<vmem>>, vector<1x1x256x224xbf16>
    %175 = vector.shape_cast %174 : vector<1x1x256x224xbf16> to vector<256x224xbf16>
    %cst_191 = arith.constant dense<0.000000e+00> : vector<7x224xf32>
    %176 = tpu.matmul %173, %175, %cst_191 {dimension_numbers = #tpu.dot_dimension_numbers<[1], [0], [0], [1], [0, 0, 1, 1], [], []>} : vector<7x256xbf16>, vector<256x224xbf16>, vector<7x224xf32> -> vector<7x224xf32>
    %177 = arith.addf %171, %176 : vector<7x224xf32>
    %c1_192 = arith.constant 1 : index
    %c1_193 = arith.constant 1 : index
    %c0_194 = arith.constant 0 : index
    %178 = vector.load %arg1[%c1_192, %c1_193, %c0_194] : memref<2x8x256xbf16, #tpu.memory_space<vmem>>, vector<1x7x256xbf16>
    %179 = vector.shape_cast %178 : vector<1x7x256xbf16> to vector<7x256xbf16>
    %c1_195 = arith.constant 1 : index
    %c1_196 = arith.constant 1 : index
    %c0_197 = arith.constant 0 : index
    %c0_198 = arith.constant 0 : index
    %180 = vector.load %arg3[%c1_195, %c1_196, %c0_197, %c0_198] : memref<3x2x256x224xbf16, #tpu.memory_space<vmem>>, vector<1x1x256x224xbf16>
    %181 = vector.shape_cast %180 : vector<1x1x256x224xbf16> to vector<256x224xbf16>
    %cst_199 = arith.constant dense<0.000000e+00> : vector<7x224xf32>
    %182 = tpu.matmul %179, %181, %cst_199 {dimension_numbers = #tpu.dot_dimension_numbers<[1], [0], [0], [1], [0, 0, 1, 1], [], []>} : vector<7x256xbf16>, vector<256x224xbf16>, vector<7x224xf32> -> vector<7x224xf32>
    %183 = arith.addf %177, %182 : vector<7x224xf32>
    %c1_200 = arith.constant 1 : index
    %c1_201 = arith.constant 1 : index
    %c0_202 = arith.constant 0 : index
    %184 = vector.load %arg2[%c1_200, %c1_201, %c0_202] : memref<2x8x256xbf16, #tpu.memory_space<vmem>>, vector<1x7x256xbf16>
    %185 = vector.shape_cast %184 : vector<1x7x256xbf16> to vector<7x256xbf16>
    %c2_203 = arith.constant 2 : index
    %c1_204 = arith.constant 1 : index
    %c0_205 = arith.constant 0 : index
    %c0_206 = arith.constant 0 : index
    %186 = vector.load %arg3[%c2_203, %c1_204, %c0_205, %c0_206] : memref<3x2x256x224xbf16, #tpu.memory_space<vmem>>, vector<1x1x256x224xbf16>
    %187 = vector.shape_cast %186 : vector<1x1x256x224xbf16> to vector<256x224xbf16>
    %cst_207 = arith.constant dense<0.000000e+00> : vector<7x224xf32>
    %188 = tpu.matmul %185, %187, %cst_207 {dimension_numbers = #tpu.dot_dimension_numbers<[1], [0], [0], [1], [0, 0, 1, 1], [], []>} : vector<7x256xbf16>, vector<256x224xbf16>, vector<7x224xf32> -> vector<7x224xf32>
    %189 = arith.addf %183, %188 : vector<7x224xf32>
    %190 = vector.broadcast %0 : vector<1x224xf32> to vector<7x224xf32>
    %191 = arith.addf %189, %190 : vector<7x224xf32>
    %cst_208 = arith.constant 0.000000e+00 : f32
    %192 = vector.broadcast %cst_208 : f32 to vector<7x224xf32>
    %193 = arith.maximumf %191, %192 : vector<7x224xf32>
    %194 = arith.maximumf %170, %193 : vector<7x224xf32>
    %195 = arith.truncf %194 : vector<7x224xf32> to vector<7x224xbf16>
    %c1_209 = arith.constant 1 : index
    %c0_210 = arith.constant 0 : index
    %c0_211 = arith.constant 0 : index
    %196 = vector.load %arg5[%c1_209, %c0_210, %c0_211] : memref<2x7x224xbf16, #tpu.memory_space<vmem>>, vector<1x7x224xbf16>
    %197 = vector.shape_cast %196 : vector<1x7x224xbf16> to vector<7x224xbf16>
    %198 = vector.shape_cast %195 : vector<7x224xbf16> to vector<1x7x224xbf16>
    tpu.vector_store %arg5[%c1_209, %c0_210, %c0_211], %198 {strides = array<i32>} : memref<2x7x224xbf16, #tpu.memory_space<vmem>>, vector<1x7x224xbf16>,
    return
  }
  func.func @transform_0(%arg0: i32) -> (i32, i32, i32) {
    %c0_i32 = arith.constant 0 : i32
    %c0_i32_0 = arith.constant 0 : i32
    %c0_i32_1 = arith.constant 0 : i32
    return %arg0, %c0_i32, %c0_i32_0 : i32, i32, i32
  }
  func.func @transform_1(%arg0: i32) -> (i32, i32, i32) {
    %c0_i32 = arith.constant 0 : i32
    %c0_i32_0 = arith.constant 0 : i32
    %c0_i32_1 = arith.constant 0 : i32
    return %arg0, %c0_i32, %c0_i32_0 : i32, i32, i32
  }
  func.func @transform_2(%arg0: i32) -> (i32, i32, i32, i32) {
    %c0_i32 = arith.constant 0 : i32
    %c0_i32_0 = arith.constant 0 : i32
    %c0_i32_1 = arith.constant 0 : i32
    %c0_i32_2 = arith.constant 0 : i32
    %c0_i32_3 = arith.constant 0 : i32
    return %c0_i32, %c0_i32_0, %c0_i32_1, %c0_i32_2 : i32, i32, i32, i32
  }
  func.func @transform_3(%arg0: i32) -> (i32, i32) {
    %c0_i32 = arith.constant 0 : i32
    %c0_i32_0 = arith.constant 0 : i32
    %c0_i32_1 = arith.constant 0 : i32
    return %c0_i32, %c0_i32_0 : i32, i32
  }
  func.func @transform_4(%arg0: i32) -> (i32, i32, i32) {
    %c0_i32 = arith.constant 0 : i32
    %c0_i32_0 = arith.constant 0 : i32
    %c0_i32_1 = arith.constant 0 : i32
    return %arg0, %c0_i32, %c0_i32_0 : i32, i32, i32
  }
}

module attributes {stable_mosaic.version = 11 : i64} {
  func.func @_fc_fused_kernel(%arg0: i32, %arg1: memref<2x1568xbf16, #tpu.memory_space<vmem>>, %arg2: memref<1568x128xbf16, #tpu.memory_space<vmem>>, %arg3: memref<1x128xf32, #tpu.memory_space<vmem>>, %arg4: memref<128x2xf32, #tpu.memory_space<vmem>>, %arg5: memref<1x2xf32, #tpu.memory_space<vmem>>, %arg6: memref<2x10xf32, #tpu.memory_space<vmem>>, %arg7: memref<1x10xf32, #tpu.memory_space<vmem>>, %arg8: memref<2x10xf32, #tpu.memory_space<vmem>>) attributes {dimension_semantics = [#tpu.dimension_semantics<parallel>], iteration_bounds = array<i64: 1>, scalar_prefetch = 0 : i64, scratch_operands = 0 : i64, tpu.core_type = #tpu.core_type<tc>, window_params = [{transform_indices = @transform_0, window_bounds = array<i64: 2, 1568>}, {pipeline_mode = #tpu.pipeline_mode<synchronous>, transform_indices = @transform_1, window_bounds = array<i64: 1568, 128>}, {pipeline_mode = #tpu.pipeline_mode<synchronous>, transform_indices = @transform_2, window_bounds = array<i64: 1, 128>}, {pipeline_mode = #tpu.pipeline_mode<synchronous>, transform_indices = @transform_3, window_bounds = array<i64: 128, 2>}, {pipeline_mode = #tpu.pipeline_mode<synchronous>, transform_indices = @transform_4, window_bounds = array<i64: 1, 2>}, {pipeline_mode = #tpu.pipeline_mode<synchronous>, transform_indices = @transform_5, window_bounds = array<i64: 2, 10>}, {pipeline_mode = #tpu.pipeline_mode<synchronous>, transform_indices = @transform_6, window_bounds = array<i64: 1, 10>}, {transform_indices = @transform_7, window_bounds = array<i64: 2, 10>}]} {
    %c0 = arith.constant 0 : index
    %c0_0 = arith.constant 0 : index
    %0 = vector.load %arg1[%c0, %c0_0] : memref<2x1568xbf16, #tpu.memory_space<vmem>>, vector<2x1568xbf16>
    %c0_1 = arith.constant 0 : index
    %c0_2 = arith.constant 0 : index
    %1 = vector.load %arg2[%c0_1, %c0_2] : memref<1568x128xbf16, #tpu.memory_space<vmem>>, vector<1568x128xbf16>
    %cst = arith.constant dense<0.000000e+00> : vector<2x128xf32>
    %2 = tpu.matmul %0, %1, %cst {dimension_numbers = #tpu.dot_dimension_numbers<[1], [0], [0], [1], [0, 0, 1, 1], [], []>} : vector<2x1568xbf16>, vector<1568x128xbf16>, vector<2x128xf32> -> vector<2x128xf32>
    %c0_3 = arith.constant 0 : index
    %c0_4 = arith.constant 0 : index
    %3 = vector.load %arg3[%c0_3, %c0_4] : memref<1x128xf32, #tpu.memory_space<vmem>>, vector<1x128xf32>
    %4 = vector.broadcast %3 : vector<1x128xf32> to vector<2x128xf32>
    %5 = arith.addf %2, %4 : vector<2x128xf32>
    %cst_5 = arith.constant 0.000000e+00 : f32
    %6 = vector.broadcast %cst_5 : f32 to vector<2x128xf32>
    %7 = arith.maximumf %5, %6 : vector<2x128xf32>
    %c0_6 = arith.constant 0 : index
    %c0_7 = arith.constant 0 : index
    %8 = vector.load %arg4[%c0_6, %c0_7] : memref<128x2xf32, #tpu.memory_space<vmem>>, vector<128x2xf32>
    %cst_8 = arith.constant dense<0.000000e+00> : vector<2x2xf32>
    %9 = tpu.matmul %7, %8, %cst_8 {dimension_numbers = #tpu.dot_dimension_numbers<[1], [0], [0], [1], [0, 0, 1, 1], [], []>} : vector<2x128xf32>, vector<128x2xf32>, vector<2x2xf32> -> vector<2x2xf32>
    %c0_9 = arith.constant 0 : index
    %c0_10 = arith.constant 0 : index
    %10 = vector.load %arg5[%c0_9, %c0_10] : memref<1x2xf32, #tpu.memory_space<vmem>>, vector<1x2xf32>
    %11 = vector.broadcast %10 : vector<1x2xf32> to vector<2x2xf32>
    %12 = arith.addf %9, %11 : vector<2x2xf32>
    %cst_11 = arith.constant 0.000000e+00 : f32
    %13 = vector.broadcast %cst_11 : f32 to vector<2x2xf32>
    %14 = arith.maximumf %12, %13 : vector<2x2xf32>
    %15 = vector.extract_strided_slice %14 {offsets = [0, 0], sizes = [2, 1], strides = [1, 1]} : vector<2x2xf32> to vector<2x1xf32>
    %c0_12 = arith.constant 0 : index
    %c0_13 = arith.constant 0 : index
    %16 = vector.load %arg6[%c0_12, %c0_13] : memref<2x10xf32, #tpu.memory_space<vmem>>, vector<1x10xf32>
    %17 = vector.broadcast %15 : vector<2x1xf32> to vector<2x10xf32>
    %18 = vector.broadcast %16 : vector<1x10xf32> to vector<2x10xf32>
    %19 = arith.mulf %17, %18 : vector<2x10xf32>
    %20 = vector.extract_strided_slice %14 {offsets = [0, 1], sizes = [2, 1], strides = [1, 1]} : vector<2x2xf32> to vector<2x1xf32>
    %c1 = arith.constant 1 : index
    %c0_14 = arith.constant 0 : index
    %21 = vector.load %arg6[%c1, %c0_14] : memref<2x10xf32, #tpu.memory_space<vmem>>, vector<1x10xf32>
    %22 = vector.broadcast %20 : vector<2x1xf32> to vector<2x10xf32>
    %23 = vector.broadcast %21 : vector<1x10xf32> to vector<2x10xf32>
    %24 = arith.mulf %22, %23 : vector<2x10xf32>
    %25 = arith.addf %19, %24 : vector<2x10xf32>
    %c0_15 = arith.constant 0 : index
    %c0_16 = arith.constant 0 : index
    %26 = vector.load %arg7[%c0_15, %c0_16] : memref<1x10xf32, #tpu.memory_space<vmem>>, vector<1x10xf32>
    %27 = vector.broadcast %26 : vector<1x10xf32> to vector<2x10xf32>
    %28 = arith.addf %25, %27 : vector<2x10xf32>
    %c0_17 = arith.constant 0 : index
    %c0_18 = arith.constant 0 : index
    %29 = vector.load %arg8[%c0_17, %c0_18] : memref<2x10xf32, #tpu.memory_space<vmem>>, vector<2x10xf32>
    tpu.vector_store %arg8[%c0_17, %c0_18], %28 {strides = array<i32>} : memref<2x10xf32, #tpu.memory_space<vmem>>, vector<2x10xf32>,
    return
  }
  func.func @transform_0(%arg0: i32) -> (i32, i32) {
    %c0_i32 = arith.constant 0 : i32
    %c0_i32_0 = arith.constant 0 : i32
    return %arg0, %c0_i32 : i32, i32
  }
  func.func @transform_1(%arg0: i32) -> (i32, i32) {
    %c0_i32 = arith.constant 0 : i32
    %c0_i32_0 = arith.constant 0 : i32
    %c0_i32_1 = arith.constant 0 : i32
    return %c0_i32, %c0_i32_0 : i32, i32
  }
  func.func @transform_2(%arg0: i32) -> (i32, i32) {
    %c0_i32 = arith.constant 0 : i32
    %c0_i32_0 = arith.constant 0 : i32
    %c0_i32_1 = arith.constant 0 : i32
    return %c0_i32, %c0_i32_0 : i32, i32
  }
  func.func @transform_3(%arg0: i32) -> (i32, i32) {
    %c0_i32 = arith.constant 0 : i32
    %c0_i32_0 = arith.constant 0 : i32
    %c0_i32_1 = arith.constant 0 : i32
    return %c0_i32, %c0_i32_0 : i32, i32
  }
  func.func @transform_4(%arg0: i32) -> (i32, i32) {
    %c0_i32 = arith.constant 0 : i32
    %c0_i32_0 = arith.constant 0 : i32
    %c0_i32_1 = arith.constant 0 : i32
    return %c0_i32, %c0_i32_0 : i32, i32
  }
  func.func @transform_5(%arg0: i32) -> (i32, i32) {
    %c0_i32 = arith.constant 0 : i32
    %c0_i32_0 = arith.constant 0 : i32
    %c0_i32_1 = arith.constant 0 : i32
    return %c0_i32, %c0_i32_0 : i32, i32
  }
  func.func @transform_6(%arg0: i32) -> (i32, i32) {
    %c0_i32 = arith.constant 0 : i32
    %c0_i32_0 = arith.constant 0 : i32
    %c0_i32_1 = arith.constant 0 : i32
    return %c0_i32, %c0_i32_0 : i32, i32
  }
  func.func @transform_7(%arg0: i32) -> (i32, i32) {
    %c0_i32 = arith.constant 0 : i32
    %c0_i32_0 = arith.constant 0 : i32
    return %arg0, %c0_i32 : i32, i32
  }
}

</mosaic_0001>

<bundles_post_ra>
// kernel: cnn_forward.3
= control target key start
LH: loop header
LB: loop body
LE: loop exit
PB: predicated region body
PF: predicated region fallthrough
CT: control target
= control target key end

     0   :  { %9 = vsyncpa [#allocation3], 0  ;;  %s1674_s18 = smov [#allocation2]   ;;  %s2414_s0 = inlined_call_operand.vmem [shape: bf16[2,15,30], index: 0, kind: input, shape index: {}]   ;;  %s2415_s1 = inlined_call_operand.vmem [shape: bf16[2,15,30], index: 1, kind: input, shape index: {}]   ;;  %s2416_s2 = inlined_call_operand.vmem [shape: bf16[3,2,30,224], index: 2, kind: input, shape index: {}]   ;;  %s2417_s3 = inlined_call_operand.hbm [shape: f32[1,224], index: 3, kind: input, shape index: {}]   ;;  %s2418_s4 = inlined_call_operand.vmem [shape: bf16[2,14,224], index: 4, kind: output, shape index: {}]  }
   0x1   :  { %s21_s17 = sshll.u32 %s2417_s3, 4  ;;  %s23_s19 = sshll.u32 %s1674_s18, 4  ;;  %s22_s17 = int_to_ptr.hbm [resolvable:$true] %s21_s17  ;;  %s24_s19 = int_to_ptr.vmem [resolvable:$true] %s23_s19 }
   0x2   :  { %26 = dma.hbm_to_vmem [thread:$0]  %s22_s17, 32, %s24_s19, [#allocation3]  }
   0x3   :  { %1656 = dma.done.wait [#allocation3], 32  }
   0x4   :  { %1657 = vsyncadd [#allocation3], 4294967264  ;;  %vm73_vm0 = vcmask 1046528   ;;  %v1305_v0 = vld [vmem:[%s2416_s2 + $0x50] sm:$0xf]  ;;  %vm69_vm1 = vcmask 244736  }
   0x5   :  { %v1586_v1 = vld [vmem:[%s2416_s2 + $0x54] sm:$0x70]  ;;  %v1585_v2 = vld [vmem:[%s2416_s2 + $0x54] sm:$0xf]  ;;  %v1307_v4 = vld [vmem:[%s2416_s2 + $0x58] sm:$0x70] }
   0x6   :  { %v1306_v3 = vor.u32 %v1586_v1, %v1305_v0  ;;  %v1323_v5 = vld [vmem:[%s2416_s2 + $0x10] sm:$0xf]  ;;  %v1582_v6 = vld [vmem:[%s2416_s2 + $0x14] sm:$0x70]  ;;  %v1310_v7 = vor.u32 %v1585_v2, %v1307_v4  ;;  %v1581_v9 = vld [vmem:[%s2416_s2 + $0x14] sm:$0xf] }
   0x7   :  { %v1324_v8 = vor.u32 %v1582_v6, %v1323_v5  ;;  %v1325_v10 = vld [vmem:[%s2416_s2 + $0x18] sm:$0x70]  ;;  %v1297_v11 = vld [vmem:[%s2416_s2 + $0x40] sm:$0xf]  ;;  %v1584_v14 = vld [vmem:[%s2416_s2 + $0x44] sm:$0xf0] }
   0x8   :  { %v1731_v12 = vsel %vm73_vm0, %v1306_v3, 0  ;;  %v1328_v13 = vor.u32 %v1581_v9, %v1325_v10  ;;  %v1583_v15 = vld [vmem:[%s2416_s2 + $0x44] sm:$0xf]  ;;  %v1661_v17 = vld [vmem:[%s2415_s1] sm:$0xf]   ;;  %v1749_v18 = vsel %vm73_vm0, %v1310_v7, 0  ;;  %v1754_v20 = vor.u32 %v1584_v14, %v1297_v11 }
   0x9   :  { %v1742_v16 = vld [vmem:[%s2415_s1] sm:$0xff]   ;;  %86 = vmatpush.bf16.msra.mxu0 %v1731_v12  ;;  %v1752_v19 = vsel %vm73_vm0, %v1324_v8, 0  ;;  %v1299_v21 = vld [vmem:[%s2416_s2 + $0x48] sm:$0xf0]  ;;  %100 = vmatpush.bf16.msra.mxu1 %v1749_v18  ;;  %v1580_v25 = vld [vmem:[%s2416_s2 + $0x4] sm:$0xf0] }
   0xa   :  { %v1315_v22 = vld [vmem:[%s2416_s2] sm:$0xf]  ;;  %146 = vmatpush.bf16.msra.mxu2 %v1752_v19  ;;  %v1765_v23 = vsel %vm73_vm0, %v1328_v13, 0  ;;  %v1767_v24 = vor.u32 %v1583_v15, %v1299_v21  ;;  %v1579_v26 = vld [vmem:[%s2416_s2 + $0x4] sm:$0xf]  ;;  %vm659_vm2 = vcmask 1043456  }
   0xb   :  { %v1778_v27 = vld [vmem:[%s2414_s0] sm:$0xff]   ;;  %160 = vmatpush.bf16.msra.mxu3 %v1765_v23  ;;  %v1784_v29 = vor.u32 %v1580_v25, %v1315_v22  ;;  %v1317_v30 = vld [vmem:[%s2416_s2 + $0x8] sm:$0xf0]  ;;  %v1371_v34 = vld [vmem:[%s2416_s2 + $0x70] sm:$0xf]  ;;  %vm660_vm3 = vcmask 785412  }
   0xc   :  { %v1630_v28 = vld [vmem:[%s2414_s0] sm:$0xf]   ;;  %v1671_v31 = vld [vmem:[%s2415_s1] sm:$0x70]  ;;  %v1795_v33 = vor.u32 %v1579_v26, %v1317_v30  ;;  %v1598_v35 = vld [vmem:[%s2416_s2 + $0x74] sm:$0x70] }
   0xd   :  { %v1658_v32 = vld [vmem:[%s2414_s0] sm:$0x70]  ;;  %v1597_v36 = vld [vmem:[%s2416_s2 + $0x74] sm:$0xf]  ;;  %87 = vmatpush.bf16.msra.mxu0 %v1754_v20  ;;  %v1372_v37 = vor.u32 %v1598_v35, %v1371_v34  ;;  %v1373_v38 = vld [vmem:[%s2416_s2 + $0x78] sm:$0x70]  ;;  %101 = vmatpush.bf16.msra.mxu1 %v1767_v24  ;;  %v1818_v41 = vor.u32 %v1671_v31, %v1661_v17 }
   0xe   :  { %v1345_v39 = vld [vmem:[%s2416_s2 + $0x90] sm:$0xf]  ;;  %v1590_v40 = vld [vmem:[%s2416_s2 + $0x94] sm:$0x70]  ;;  %147 = vmatpush.bf16.msra.mxu2 %v1784_v29  ;;  %v1820_v42 = vor.u32 %v1658_v32, %v1630_v28  ;;  %v1376_v43 = vor.u32 %v1597_v36, %v1373_v38  ;;  %v1589_v44 = vld [vmem:[%s2416_s2 + $0x94] sm:$0xf] }
   0xf   :  { %v1347_v45 = vld [vmem:[%s2416_s2 + $0x98] sm:$0x70]  ;;  %v1363_v46 = vld [vmem:[%s2416_s2 + $0x60] sm:$0xf]  ;;  %161 = vmatpush.bf16.msra.mxu3 %v1795_v33  ;;  %v1833_v47 = vsel %vm73_vm0, %v1372_v37, 0  ;;  %v1346_v48 = vor.u32 %v1590_v40, %v1345_v39  ;;  %v180_v58 = vshll.u32 %v1778_v27, 16  ;;  %vm2359_vm4 = vmor %vm660_vm3, %vm659_vm2 }
  0x10   :  { %v1596_v49 = vld [vmem:[%s2416_s2 + $0x64] sm:$0xf0]  ;;  %1311 = vmatmul.msk.bf16.vlgmr.msra.gmra.mxu0 %vm69_vm1, %v1818_v41  ;;  %v1842_v50 = vsel %vm73_vm0, %v1376_v43, 0  ;;  %v1350_v51 = vor.u32 %v1589_v44, %v1347_v45  ;;  %v1595_v53 = vld [vmem:[%s2416_s2 + $0x64] sm:$0xf]  ;;  %1312 = vmatmul.msk.bf16.vlgmr.msra.gmra.mxu1 %vm69_vm1, %v1818_v41  ;;  %v178_v14 = vshrl.u32 %v1778_v27, 16 }
  0x11   :  { %v1844_v52 = vor.u32 %v1596_v49, %v1363_v46  ;;  %v1365_v54 = vld [vmem:[%s2416_s2 + $0x68] sm:$0xf0]  ;;  %1329 = vmatmul.msk.bf16.vlgmr.msra.gmra.mxu2 %vm69_vm1, %v1820_v42  ;;  %v1857_v55 = vsel %vm73_vm0, %v1346_v48, 0  ;;  %v1337_v56 = vld [vmem:[%s2416_s2 + $0x80] sm:$0xf]  ;;  %v182_v30 = vrot.slane %v180_v58, 1 }
  0x12   :  { %296 = vmatpush.bf16.msrb.mxu2 %v1833_v47  ;;  %v1588_v57 = vld [vmem:[%s2416_s2 + $0x84] sm:$0xf0]  ;;  %1330 = vmatmul.msk.bf16.vlgmr.msra.gmra.mxu3 %vm69_vm1, %v1820_v42  ;;  %v1870_v59 = vsel %vm73_vm0, %v1350_v51, 0  ;;  %v1587_v61 = vld [vmem:[%s2416_s2 + $0x84] sm:$0xf]  ;;  %v1882_v63 = vor.u32 %v1595_v53, %v1365_v54  ;;  %vm663_vm5 = vcmask 1042432  }
  0x13   :  { %217 = vmatpush.bf16.msrb.mxu0 %v1857_v55  ;;  %v1872_v60 = vor.u32 %v1588_v57, %v1337_v56  ;;  %v1339_v62 = vld [vmem:[%s2416_s2 + $0x88] sm:$0xf0]  ;;  %310 = vmatpush.bf16.msrb.mxu3 %v1842_v50  ;;  %v1411_v1 = vld [vmem:[%s2416_s2 + $0xb0] sm:$0xf]  ;;  %v1602_v2 = vld [vmem:[%s2416_s2 + $0xb4] sm:$0x70]  ;;  %v1943_v40 = vor.u32 %v182_v30, %v178_v14 }
  0x14   :  { %231 = vmatpush.bf16.msrb.mxu1 %v1870_v59  ;;  %v1884_v0 = vor.u32 %v1587_v61, %v1339_v62  ;;  %v1601_v3 = vld [vmem:[%s2416_s2 + $0xb4] sm:$0xf]  ;;  %v1412_v4 = vor.u32 %v1602_v2, %v1411_v1  ;;  %v1413_v5 = vld [vmem:[%s2416_s2 + $0xb8] sm:$0x70]  ;;  %v1389_v6 = vld [vmem:[%s2416_s2 + $0x30] sm:$0xf] }
  0x15   :  { %v1594_v7 = vld [vmem:[%s2416_s2 + $0x34] sm:$0x70]  ;;  %v1416_v8 = vor.u32 %v1601_v3, %v1413_v5  ;;  %v1593_v10 = vld [vmem:[%s2416_s2 + $0x34] sm:$0xf]  ;;  %v1391_v11 = vld [vmem:[%s2416_s2 + $0x38] sm:$0x70] }
  0x16   :  { %297 = vmatpush.bf16.msrb.mxu2 %v1844_v52  ;;  %v1390_v9 = vor.u32 %v1594_v7, %v1389_v6  ;;  %v1403_v13 = vld [vmem:[%s2416_s2 + $0xa0] sm:$0xf]  ;;  %v394_v15 = vsel %vm73_vm0, %v1412_v4, 0  ;;  %v1394_v17 = vor.u32 %v1593_v10, %v1391_v11  ;;  %v1600_v21 = vld [vmem:[%s2416_s2 + $0xa4] sm:$0xf0]  ;;  %vm664_vm6 = vcmask 784388  }
  0x17   :  { %218 = vmatpush.bf16.msrb.mxu0 %v1872_v60  ;;  %v1599_v22 = vld [vmem:[%s2416_s2 + $0xa4] sm:$0xf]  ;;  %311 = vmatpush.bf16.msrb.mxu3 %v1882_v63  ;;  %v397_v25 = vsel %vm73_vm0, %v1416_v8, 0  ;;  %v1405_v27 = vld [vmem:[%s2416_s2 + $0xa8] sm:$0xf0]  ;;  %v1404_v32 = vor.u32 %v1600_v21, %v1403_v13  ;;  %vm2370_vm7 = vmor %vm664_vm6, %vm663_vm5 }
  0x18   :  { %232 = vmatpush.bf16.msrb.mxu1 %v1884_v0  ;;  %v337_v26 = vsel %vm73_vm0, %v1390_v9, 0  ;;  %v1381_v28 = vld [vmem:[%s2416_s2 + $0x20] sm:$0xf]  ;;  %v340_v31 = vsel %vm73_vm0, %v1394_v17, 0  ;;  %v1408_v34 = vor.u32 %v1599_v22, %v1405_v27  ;;  %v1592_v35 = vld [vmem:[%s2416_s2 + $0x24] sm:$0xf0] }
  0x19   :  { %v1591_v36 = vld [vmem:[%s2416_s2 + $0x24] sm:$0xf]  ;;  %v1382_v37 = vor.u32 %v1592_v35, %v1381_v28  ;;  %v1383_v38 = vld [vmem:[%s2416_s2 + $0x28] sm:$0xf0]  ;;  %v1609_v43 = vld [vmem:[%s2416_s2 + $0x54] sm:$0xf] }
  0x1a   :  { %405 = vmatpush.bf16.msra.mxu2 %v394_v15  ;;  %v1386_v39 = vor.u32 %v1591_v36, %v1383_v38  ;;  %v1451_v44 = vld [vmem:[%s2416_s2 + $0x58] sm:$0x70]  ;;  %v1604_v53 = vld [vmem:[%s2416_s2 + $0x4] sm:$0xf0]  ;;  %v1603_v54 = vld [vmem:[%s2416_s2 + $0x4] sm:$0xf] }
  0x1b   :  { %419 = vmatpush.bf16.msra.mxu3 %v397_v25  ;;  %348 = vmatpush.bf16.msra.mxu0 %v337_v26  ;;  %v1454_v48 = vor.u32 %v1609_v43, %v1451_v44  ;;  %v1441_v56 = vld [vmem:[%s2416_s2 + $0x40] sm:$0xf]  ;;  %v1608_v57 = vld [vmem:[%s2416_s2 + $0x44] sm:$0xf0]  ;;  %v1516_v1 = vld [vmem:[%s2416_s2 + $0x70] sm:$0xf] }
  0x1c   :  { %362 = vmatpush.bf16.msra.mxu1 %v340_v31  ;;  %v1622_v2 = vld [vmem:[%s2416_s2 + $0x74] sm:$0x70]  ;;  %v1621_v3 = vld [vmem:[%s2416_s2 + $0x74] sm:$0xf]  ;;  %v1518_v4 = vld [vmem:[%s2416_s2 + $0x78] sm:$0x70] }
  0x1d   :  { %v2043_v58 = vsel %vm73_vm0, %v1454_v48, 0  ;;  %v1490_v5 = vld [vmem:[%s2416_s2 + $0x90] sm:$0xf]  ;;  %v1614_v6 = vld [vmem:[%s2416_s2 + $0x94] sm:$0x70]  ;;  %v1517_v7 = vor.u32 %v1622_v2, %v1516_v1  ;;  %v1521_v10 = vor.u32 %v1621_v3, %v1518_v4 }
  0x1e   :  { %406 = vmatpush.bf16.msra.mxu2 %v1404_v32  ;;  %v1613_v8 = vld [vmem:[%s2416_s2 + $0x94] sm:$0xf]  ;;  %v1492_v9 = vld [vmem:[%s2416_s2 + $0x98] sm:$0x70]  ;;  %v1491_v11 = vor.u32 %v1614_v6, %v1490_v5  ;;  %v1620_v22 = vld [vmem:[%s2416_s2 + $0x64] sm:$0xf0] }
  0x1f   :  { %420 = vmatpush.bf16.msra.mxu3 %v1408_v34  ;;  %349 = vmatpush.bf16.msra.mxu0 %v1382_v37  ;;  %v1495_v13 = vor.u32 %v1613_v8, %v1492_v9  ;;  %v2094_v14 = vsel %vm73_vm0, %v1517_v7, 0  ;;  %v2100_v17 = vsel %vm73_vm0, %v1521_v10, 0  ;;  %v1482_v27 = vld [vmem:[%s2416_s2 + $0x80] sm:$0xf]  ;;  %v1612_v28 = vld [vmem:[%s2416_s2 + $0x84] sm:$0xf0] }
  0x20   :  { %363 = vmatpush.bf16.msra.mxu1 %v1386_v39  ;;  %1351 = vmatmul.msk.bf16.vlgmr.msrb.gmra.mxu0 %vm69_vm1, %v1943_v40  ;;  %v2103_v21 = vsel %vm73_vm0, %v1491_v11, 0  ;;  %v2142_v35 = vor.u32 %v1612_v28, %v1482_v27  ;;  %v1665_v38 = vld [vmem:[%s2415_s1 + $0x8] sm:$0xf]   ;;  %v1536_v43 = vld [vmem:[%s2416_s2 + $0x38] sm:$0x70] }
  0x21   :  { %1352 = vmatmul.msk.bf16.vlgmr.msrb.gmra.mxu1 %vm69_vm1, %v1943_v40  ;;  %1377 = vmatmul.msk.bf16.vlgmr.msrb.gmra.mxu2 %vm69_vm1, %v1818_v41  ;;  %v2126_v30 = vsel %vm73_vm0, %v1495_v13, 0  ;;  %v1616_v1 = vld [vmem:[%s2416_s2 + $0x24] sm:$0xf0]  ;;  %v1615_v3 = vld [vmem:[%s2416_s2 + $0x24] sm:$0xf] }
  0x22   :  { %1378 = vmatmul.msk.bf16.vlgmr.msrb.gmra.mxu3 %vm69_vm1, %v1818_v41  ;;  %477 = vmatpush.bf16.msrb.mxu2 %v1752_v19  ;;  %v1528_v4 = vld [vmem:[%s2416_s2 + $0x28] sm:$0xf0] }
  0x23   :  { %491 = vmatpush.bf16.msrb.mxu3 %v1765_v23  ;;  %449 = vmatpush.bf16.msrb.mxu0 %v1731_v12  ;;  %v506_v12 = vshll.u32 %v1742_v16, 16  ;;  %v1606_v23 = vld [vmem:[%s2416_s2 + $0x14] sm:$0x70]  ;;  %v2249_v9 = vor.u32 %v1615_v3, %v1528_v4 }
  0x24   :  { %463 = vmatpush.bf16.msrb.mxu1 %v1749_v18  ;;  %v504_v18 = vshrl.u32 %v1742_v16, 16  ;;  %v1469_v16 = vld [vmem:[%s2416_s2 + $0x18] sm:$0x70] }
  0x25   :  { %v508_v19 = vrot.slane %v506_v12, 1  ;;  %v1669_v12 = vld [vmem:[%s2414_s0 + $0x8] sm:$0xf]  }
  0x26   :  { %478 = vmatpush.bf16.msrb.mxu2 %v1784_v29  ;;  %v1449_v29 = vld [vmem:[%s2416_s2 + $0x50] sm:$0xf] }
  0x27   :  { %492 = vmatpush.bf16.msrb.mxu3 %v1795_v33  ;;  %450 = vmatpush.bf16.msrb.mxu0 %v1754_v20  ;;  %v1467_v20 = vld [vmem:[%s2416_s2 + $0x10] sm:$0xf]  ;;  %v1610_v33 = vld [vmem:[%s2416_s2 + $0x54] sm:$0x70] }
  0x28   :  { %464 = vmatpush.bf16.msrb.mxu1 %v1767_v24  ;;  %v1605_v24 = vld [vmem:[%s2416_s2 + $0x14] sm:$0xf]  ;;  %v1450_v46 = vor.u32 %v1610_v33, %v1449_v29  ;;  %v1618_v29 = vld [vmem:[%s2416_s2 + $0x34] sm:$0x70] }
  0x29   :  { %v1472_v45 = vor.u32 %v1605_v24, %v1469_v16  ;;  %v1558_v24 = vld [vmem:[%s2416_s2 + $0xb8] sm:$0x70]  ;;  %v1534_v16 = vld [vmem:[%s2416_s2 + $0x30] sm:$0xf] }
  0x2b   :  { %v2018_v51 = vsel %vm73_vm0, %v1472_v45, 0  ;;  %v1535_v45 = vor.u32 %v1618_v29, %v1534_v16 }
  0x30   :  { %1395 = vmatmul.msk.bf16.vlgmr.msra.gmra.mxu0 %vm69_vm1, %v1820_v42 }
  0x31   :  { %1396 = vmatmul.msk.bf16.vlgmr.msra.gmra.mxu1 %vm69_vm1, %v1820_v42  ;;  %1417 = vmatmul.msk.bf16.vlgmr.msra.gmra.mxu2 %vm69_vm1, %v1943_v40  ;;  %v1468_v42 = vor.u32 %v1606_v23, %v1467_v20  ;;  %v1626_v20 = vld [vmem:[%s2416_s2 + $0xb4] sm:$0x70]  ;;  %v1625_v23 = vld [vmem:[%s2416_s2 + $0xb4] sm:$0xf] }
  0x32   :  { %1418 = vmatmul.msk.bf16.vlgmr.msra.gmra.mxu3 %vm69_vm1, %v1943_v40  ;;  %563 = vmatpush.bf16.msra.mxu2 %v1833_v47  ;;  %v509_v47 = vor.u32 %v508_v19, %v504_v18  ;;  %v1673_v18 = vld [vmem:[%s2414_s0 + $0x8] sm:$0x70]  ;;  %v1556_v19 = vld [vmem:[%s2416_s2 + $0xb0] sm:$0xf]  ;;  %v1561_v44 = vor.u32 %v1625_v23, %v1558_v24 }
  0x33   :  { %577 = vmatpush.bf16.msra.mxu3 %v1842_v50  ;;  %519 = vmatpush.bf16.msra.mxu0 %v1857_v55  ;;  %v2012_v49 = vsel %vm73_vm0, %v1468_v42, 0  ;;  %v1459_v50 = vld [vmem:[%s2416_s2] sm:$0xf]  ;;  %v1461_v55 = vld [vmem:[%s2416_s2 + $0x8] sm:$0xf0]  ;;  %v1557_v33 = vor.u32 %v1626_v20, %v1556_v19 }
  0x34   :  { %533 = vmatpush.bf16.msra.mxu1 %v1870_v59  ;;  %v1607_v59 = vld [vmem:[%s2416_s2 + $0x44] sm:$0xf]  ;;  %v2054_v61 = vor.u32 %v1604_v53, %v1459_v50  ;;  %v2058_v62 = vor.u32 %v1603_v54, %v1461_v55  ;;  %v1617_v42 = vld [vmem:[%s2416_s2 + $0x34] sm:$0xf]  ;;  %v1548_v53 = vld [vmem:[%s2416_s2 + $0xa0] sm:$0xf] }
  0x35   :  { %v1539_v48 = vor.u32 %v1617_v42, %v1536_v43  ;;  %v2198_v50 = vsel %vm73_vm0, %v1557_v33, 0  ;;  %v2204_v54 = vsel %vm73_vm0, %v1561_v44, 0  ;;  %v2207_v55 = vsel %vm73_vm0, %v1535_v45, 0 }
  0x36   :  { %564 = vmatpush.bf16.msra.mxu2 %v1844_v52  ;;  %v2021_v52 = vsel %vm73_vm0, %v1450_v46, 0 }
  0x37   :  { %578 = vmatpush.bf16.msra.mxu3 %v1882_v63  ;;  %520 = vmatpush.bf16.msra.mxu0 %v1872_v60  ;;  %v1443_v60 = vld [vmem:[%s2416_s2 + $0x48] sm:$0xf0]  ;;  %v2060_v63 = vor.u32 %v1608_v57, %v1441_v56  ;;  %v1624_v56 = vld [vmem:[%s2416_s2 + $0xa4] sm:$0xf0]  ;;  %v1623_v57 = vld [vmem:[%s2416_s2 + $0xa4] sm:$0xf] }
  0x38   :  { %534 = vmatpush.bf16.msra.mxu1 %v1884_v0  ;;  %v2063_v0 = vor.u32 %v1607_v59, %v1443_v60  ;;  %v1550_v59 = vld [vmem:[%s2416_s2 + $0xa8] sm:$0xf0]  ;;  %v1526_v60 = vld [vmem:[%s2416_s2 + $0x20] sm:$0xf]  ;;  %v2230_v2 = vsel %vm73_vm0, %v1539_v48, 0  ;;  %v2240_v5 = vor.u32 %v1624_v56, %v1548_v53 }
  0x39   :  { %v2244_v6 = vor.u32 %v1623_v57, %v1550_v59  ;;  %v2246_v7 = vor.u32 %v1616_v1, %v1526_v60 }
  0x40   :  { %1419 = vmatmul.msk.bf16.vlgmr.msrb.gmra.mxu0 %vm69_vm1, %v1943_v40 }
  0x41   :  { %1420 = vmatmul.msk.bf16.vlgmr.msrb.gmra.mxu1 %vm69_vm1, %v1943_v40  ;;  %1421 = vmatmul.msk.bf16.vlgmr.msrb.gmra.mxu2 %vm69_vm1, %v1818_v41 }
  0x42   :  { %1422 = vmatmul.msk.bf16.vlgmr.msrb.gmra.mxu3 %vm69_vm1, %v1818_v41  ;;  %619 = vmatpush.bf16.msrb.mxu2 %v394_v15  ;;  %v1508_v15 = vld [vmem:[%s2416_s2 + $0x60] sm:$0xf] }
  0x43   :  { %633 = vmatpush.bf16.msrb.mxu3 %v397_v25  ;;  %591 = vmatpush.bf16.msrb.mxu0 %v337_v26  ;;  %v1619_v25 = vld [vmem:[%s2416_s2 + $0x64] sm:$0xf]  ;;  %v1510_v26 = vld [vmem:[%s2416_s2 + $0x68] sm:$0xf0] }
  0x44   :  { %605 = vmatpush.bf16.msrb.mxu1 %v340_v31  ;;  %v1611_v31 = vld [vmem:[%s2416_s2 + $0x84] sm:$0xf] }
  0x46   :  { %620 = vmatpush.bf16.msrb.mxu2 %v1404_v32  ;;  %v1484_v32 = vld [vmem:[%s2416_s2 + $0x88] sm:$0xf0] }
  0x47   :  { %634 = vmatpush.bf16.msrb.mxu3 %v1408_v34  ;;  %592 = vmatpush.bf16.msrb.mxu0 %v1382_v37  ;;  %v2136_v34 = vor.u32 %v1620_v22, %v1508_v15  ;;  %v2145_v36 = vor.u32 %v1611_v31, %v1484_v32  ;;  %v2150_v37 = vld [vmem:[%s2415_s1 + $0x8] sm:$0xff]  }
  0x48   :  { %606 = vmatpush.bf16.msrb.mxu1 %v1386_v39  ;;  %v1672_v39 = vld [vmem:[%s2415_s1 + $0x8] sm:$0x70]  ;;  %v1130_v27 = vshll.u32 %v2150_v37, 16  ;;  %v1128_v32 = vshrl.u32 %v2150_v37, 16 }
  0x49   :  { %v2195_v46 = vor.u32 %v1672_v39, %v1665_v38 }
  0x50   :  { %1423 = vmatmul.msk.bf16.vlgmr.msra.gmra.mxu0 %vm69_vm1, %v509_v47 }
  0x51   :  { %1424 = vmatmul.msk.bf16.vlgmr.msra.gmra.mxu1 %vm69_vm1, %v509_v47  ;;  %1425 = vmatmul.msk.bf16.vlgmr.msra.gmra.mxu2 %vm69_vm1, %v1943_v40 }
  0x52   :  { %1426 = vmatmul.msk.bf16.vlgmr.msra.gmra.mxu3 %vm69_vm1, %v1943_v40  ;;  %779 = vmatpush.bf16.msra.mxu2 %v2012_v49  ;;  %v1431_v40 = vld [vmem:[%s2414_s0 + $0x8] sm:$0xff]  }
  0x53   :  { %793 = vmatpush.bf16.msra.mxu3 %v2018_v51  ;;  %719 = vmatpush.bf16.msra.mxu0 %v2021_v52  ;;  %v812_v8 = vshll.u32 %v1431_v40, 16  ;;  %v810_v10 = vshrl.u32 %v1431_v40, 16 }
  0x54   :  { %733 = vmatpush.bf16.msra.mxu1 %v2043_v58 }
  0x55   :  { %v814_v11 = vrot.slane %v812_v8, 1 }
  0x56   :  { %780 = vmatpush.bf16.msra.mxu2 %v2054_v61 }
  0x57   :  { %794 = vmatpush.bf16.msra.mxu3 %v2058_v62  ;;  %720 = vmatpush.bf16.msra.mxu0 %v2060_v63  ;;  %v2255_v13 = vor.u32 %v814_v11, %v810_v10 }
  0x58   :  { %734 = vmatpush.bf16.msra.mxu1 %v2063_v0 }
  0x60   :  { %1427 = vmatmul.msk.bf16.vlgmr.msrb.gmra.mxu0 %vm69_vm1, %v1818_v41 }
  0x61   :  { %1428 = vmatmul.msk.bf16.vlgmr.msrb.gmra.mxu1 %vm69_vm1, %v1818_v41  ;;  %1429 = vmatmul.msk.bf16.vlgmr.msrb.gmra.mxu2 %vm69_vm1, %v509_v47  ;;  %v2140_v41 = vor.u32 %v1619_v25, %v1510_v26 }
  0x62   :  { %1430 = vmatmul.msk.bf16.vlgmr.msrb.gmra.mxu3 %vm69_vm1, %v509_v47  ;;  %921 = vmatpush.bf16.msrb.mxu2 %v2094_v14  ;;  %v1670_v47 = vor.u32 %v1673_v18, %v1669_v12 }
  0x63   :  { %935 = vmatpush.bf16.msrb.mxu3 %v2100_v17  ;;  %849 = vmatpush.bf16.msrb.mxu0 %v2103_v21 }
  0x64   :  { %863 = vmatpush.bf16.msrb.mxu1 %v2126_v30 }
  0x66   :  { %922 = vmatpush.bf16.msrb.mxu2 %v2136_v34 }
  0x67   :  { %936 = vmatpush.bf16.msrb.mxu3 %v2140_v41  ;;  %850 = vmatpush.bf16.msrb.mxu0 %v2142_v35 }
  0x68   :  { %864 = vmatpush.bf16.msrb.mxu1 %v2145_v36 }
  0x70   :  { %1455 = vmatmul.msk.bf16.vlgmr.msra.gmra.mxu0 %vm69_vm1, %v2195_v46 }
  0x71   :  { %1456 = vmatmul.msk.bf16.vlgmr.msra.gmra.mxu1 %vm69_vm1, %v2195_v46  ;;  %1473 = vmatmul.msk.bf16.vlgmr.msra.gmra.mxu2 %vm69_vm1, %v1670_v47 }
  0x72   :  { %1474 = vmatmul.msk.bf16.vlgmr.msra.gmra.mxu3 %vm69_vm1, %v1670_v47  ;;  %1029 = vmatpush.bf16.msra.mxu2 %v2198_v50 }
  0x73   :  { %1043 = vmatpush.bf16.msra.mxu3 %v2204_v54  ;;  %973 = vmatpush.bf16.msra.mxu0 %v2207_v55 }
  0x74   :  { %987 = vmatpush.bf16.msra.mxu1 %v2230_v2 }
  0x76   :  { %1030 = vmatpush.bf16.msra.mxu2 %v2240_v5 }
  0x77   :  { %1044 = vmatpush.bf16.msra.mxu3 %v2244_v6  ;;  %974 = vmatpush.bf16.msra.mxu0 %v2246_v7 }
  0x78   :  { %988 = vmatpush.bf16.msra.mxu1 %v2249_v9 }
  0x80   :  { %1496 = vmatmul.msk.bf16.vlgmr.msrb.gmra.mxu0 %vm69_vm1, %v2255_v13 }
  0x81   :  { %1497 = vmatmul.msk.bf16.vlgmr.msrb.gmra.mxu1 %vm69_vm1, %v2255_v13  ;;  %1522 = vmatmul.msk.bf16.vlgmr.msrb.gmra.mxu2 %vm69_vm1, %v2195_v46 }
  0x82   :  { %1523 = vmatmul.msk.bf16.vlgmr.msrb.gmra.mxu3 %vm69_vm1, %v2195_v46  ;;  %1101 = vmatpush.bf16.msrb.mxu2 %v2012_v49 }
  0x83   :  { %1115 = vmatpush.bf16.msrb.mxu3 %v2018_v51  ;;  %1073 = vmatpush.bf16.msrb.mxu0 %v2021_v52 }
  0x84   :  { %1087 = vmatpush.bf16.msrb.mxu1 %v2043_v58 }
  0x86   :  { %1102 = vmatpush.bf16.msrb.mxu2 %v2054_v61 }
  0x87   :  { %1116 = vmatpush.bf16.msrb.mxu3 %v2058_v62  ;;  %1074 = vmatpush.bf16.msrb.mxu0 %v2060_v63 }
  0x88   :  { %1088 = vmatpush.bf16.msrb.mxu1 %v2063_v0 }
  0x8d   :  { %v89_v15 = vpop.f32.mrf.mxu0  ;;  %v103_v22 = vpop.f32.mrf.mxu1 }
  0x90   :  { %1540 = vmatmul.msk.bf16.vlgmr.msra.gmra.mxu0 %vm69_vm1, %v1670_v47 }
  0x91   :  { %1541 = vmatmul.msk.bf16.vlgmr.msra.gmra.mxu1 %vm69_vm1, %v1670_v47  ;;  %1562 = vmatmul.msk.bf16.vlgmr.msra.gmra.mxu2 %vm69_vm1, %v2255_v13 }
  0x92   :  { %1563 = vmatmul.msk.bf16.vlgmr.msra.gmra.mxu3 %vm69_vm1, %v2255_v13  ;;  %1187 = vmatpush.bf16.msra.mxu2 %v2094_v14 }
  0x93   :  { %1201 = vmatpush.bf16.msra.mxu3 %v2100_v17  ;;  %1143 = vmatpush.bf16.msra.mxu0 %v2103_v21 }
  0x94   :  { %v149_v49 = vpop.f32.mrf.mxu2  ;;  %1157 = vmatpush.bf16.msra.mxu1 %v2126_v30 }
  0x95   :  { %v2283_v51 = vadd.f32 %v149_v49, %v89_v15  ;;  %v163_v52 = vpop.f32.mrf.mxu3  ;;  %v91_v58 = vpop.f32.mrf.mxu0 }
  0x96   :  { %v2285_v61 = vadd.f32 %v163_v52, %v103_v22  ;;  %v105_v62 = vpop.f32.mrf.mxu1  ;;  %1188 = vmatpush.bf16.msra.mxu2 %v2136_v34  ;;  %v1132_v34 = vrot.slane %v1130_v27, 1 }
  0x97   :  { %1202 = vmatpush.bf16.msra.mxu3 %v2140_v41  ;;  %1144 = vmatpush.bf16.msra.mxu0 %v2142_v35 }
  0x98   :  { %1158 = vmatpush.bf16.msra.mxu1 %v2145_v36  ;;  %v1133_v35 = vor.u32 %v1132_v34, %v1128_v32 }
  0x9c   :  { %v151_v63 = vpop.f32.mrf.mxu2 }
  0x9d   :  { %v2291_v0 = vadd.f32 %v151_v63, %v91_v58  ;;  %v165_v14 = vpop.f32.mrf.mxu3  ;;  %v2293_v17 = vpop.f32.mrf.mxu0 }
  0x9e   :  { %v2295_v21 = vadd.f32 %v165_v14, %v105_v62  ;;  %v2297_v25 = vpop.f32.mrf.mxu1  ;;  %v239_v4 = vadd.f32 %v2293_v17, %v2283_v51 }
  0xa0   :  { %1564 = vmatmul.msk.bf16.vlgmr.msrb.gmra.mxu0 %vm69_vm1, %v2255_v13 }
  0xa1   :  { %1565 = vmatmul.msk.bf16.vlgmr.msrb.gmra.mxu1 %vm69_vm1, %v2255_v13  ;;  %1566 = vmatmul.msk.bf16.vlgmr.msrb.gmra.mxu2 %vm69_vm1, %v2195_v46 }
  0xa2   :  { %1567 = vmatmul.msk.bf16.vlgmr.msrb.gmra.mxu3 %vm69_vm1, %v2195_v46  ;;  %1243 = vmatpush.bf16.msrb.mxu2 %v2198_v50 }
  0xa3   :  { %1257 = vmatpush.bf16.msrb.mxu3 %v2204_v54  ;;  %1215 = vmatpush.bf16.msrb.mxu0 %v2207_v55  ;;  %v32_v55 = vld [vmem:[#allocation2] sm:$0x3] }
  0xa4   :  { %v299_v26 = vpop.f32.mrf.mxu2  ;;  %1229 = vmatpush.bf16.msrb.mxu1 %v2230_v2  ;;  %v2333_v60 = vperm.slane %v32_v55, 0 }
  0xa5   :  { %v313_v28 = vpop.f32.mrf.mxu3  ;;  %v2312_v30 = vpop.f32.mrf.mxu0 }
  0xa6   :  { %v2314_v31 = vpop.f32.mrf.mxu1  ;;  %1244 = vmatpush.bf16.msrb.mxu2 %v2240_v5  ;;  %v240_v5 = vadd.f32 %v2297_v25, %v2285_v61  ;;  %v248_v22 = vadd.f32 %v2333_v60, %v239_v4  ;;  %v241_v58 = vadd.f32 %v2312_v30, %v2291_v0 }
  0xa7   :  { %1258 = vmatpush.bf16.msrb.mxu3 %v2244_v6  ;;  %1216 = vmatpush.bf16.msrb.mxu0 %v2246_v7  ;;  %v2339_v6 = vperm.slane %v32_v55, 1  ;;  %v242_v61 = vadd.f32 %v2314_v31, %v2295_v21 }
  0xa8   :  { %1230 = vmatpush.bf16.msrb.mxu1 %v2249_v9 }
  0xa9   :  { %v249_v49 = vadd.f32 %v2339_v6, %v240_v5 }
  0xac   :  { %v301_v41 = vpop.f32.mrf.mxu2 }
  0xad   :  { %v315_v36 = vpop.f32.mrf.mxu3  ;;  %v351_v38 = vpop.f32.mrf.mxu0 }
  0xae   :  { %v365_v39 = vpop.f32.mrf.mxu1  ;;  %v352_v56 = vadd.f32 %v351_v38, %v299_v26 }
  0xaf   :  { %v366_v57 = vadd.f32 %v365_v39, %v313_v28 }
  0xb0   :  { %1569 = vmatmul.msk.bf16.vlgmr.msra.gmra.mxu0 %vm69_vm1, %v1133_v35 }
  0xb1   :  { %1570 = vmatmul.msk.bf16.vlgmr.msra.gmra.mxu1 %vm69_vm1, %v1133_v35  ;;  %1571 = vmatmul.msk.bf16.vlgmr.msra.gmra.mxu2 %vm69_vm1, %v2255_v13 }
  0xb2   :  { %1572 = vmatmul.msk.bf16.vlgmr.msra.gmra.mxu3 %vm69_vm1, %v2255_v13 }
  0xb4   :  { %v408_v40 = vpop.f32.mrf.mxu2 }
  0xb5   :  { %v422_v37 = vpop.f32.mrf.mxu3  ;;  %v353_v12 = vpop.f32.mrf.mxu0 }
  0xb6   :  { %v367_v18 = vpop.f32.mrf.mxu1  ;;  %v428_v1 = vadd.f32 %v422_v37, %v366_v57  ;;  %v354_v52 = vadd.f32 %v353_v12, %v301_v41  ;;  %v253_v37 = vmax.f32 %v249_v49, 0.0 }
  0xb7   :  { %v368_v62 = vadd.f32 %v367_v18, %v315_v36  ;;  %v250_v18 = vadd.f32 %v2333_v60, %v241_v58 }
  0xb8   :  { %v432_v15 = vadd.f32 %v428_v1, %v2339_v6 }
  0xba   :  { %v436_v27 = vmax.f32 %v432_v15, 0.0 }
  0xbc   :  { %v410_v19 = vpop.f32.mrf.mxu2 }
  0xbd   :  { %v424_v20 = vpop.f32.mrf.mxu3  ;;  %v452_v23 = vpop.f32.mrf.mxu0  ;;  %v429_v17 = vadd.f32 %v410_v19, %v354_v52 }
  0xbe   :  { %v466_v24 = vpop.f32.mrf.mxu1  ;;  %v430_v28 = vadd.f32 %v424_v20, %v368_v62 }
  0xc0   :  { %1573 = vmatmul.msk.bf16.vlgmr.msrb.gmra.mxu0 %vm69_vm1, %v2195_v46 }
  0xc1   :  { %1574 = vmatmul.msk.bf16.vlgmr.msrb.gmra.mxu1 %vm69_vm1, %v2195_v46  ;;  %1575 = vmatmul.msk.bf16.vlgmr.msrb.gmra.mxu2 %vm69_vm1, %v1133_v35  ;;  %v427_v46 = vadd.f32 %v408_v40, %v352_v56 }
  0xc2   :  { %1576 = vmatmul.msk.bf16.vlgmr.msrb.gmra.mxu3 %vm69_vm1, %v1133_v35  ;;  %v252_v35 = vmax.f32 %v248_v22, 0.0 }
  0xc3   :  { %v431_v13 = vadd.f32 %v427_v46, %v2333_v60 }
  0xc4   :  { %v480_v16 = vpop.f32.mrf.mxu2 }
  0xc5   :  { %v494_v29 = vpop.f32.mrf.mxu3  ;;  %v454_v33 = vpop.f32.mrf.mxu0  ;;  %v481_v59 = vadd.f32 %v480_v16, %v452_v23  ;;  %v435_v14 = vmax.f32 %v431_v13, 0.0  ;;  %v433_v23 = vadd.f32 %v429_v17, %v2333_v60  ;;  %v440_v16 = vmax.f32 %v253_v37, %v436_v27 }
  0xc6   :  { %v468_v42 = vpop.f32.mrf.mxu1  ;;  %v495_v2 = vadd.f32 %v494_v29, %v466_v24  ;;  %v251_v24 = vadd.f32 %v2339_v6, %v242_v61  ;;  %v434_v29 = vadd.f32 %v430_v28, %v2339_v6 }
  0xc7   :  { %v439_v19 = vmax.f32 %v252_v35, %v435_v14 }
  0xc8   :  { %v438_v55 = vmax.f32 %v434_v29, 0.0 }
  0xcc   :  { %v482_v43 = vpop.f32.mrf.mxu2 }
  0xcd   :  { %v496_v44 = vpop.f32.mrf.mxu3  ;;  %v522_v45 = vpop.f32.mrf.mxu0  ;;  %v483_v25 = vadd.f32 %v482_v43, %v454_v33 }
  0xce   :  { %v536_v47 = vpop.f32.mrf.mxu1  ;;  %v541_v7 = vadd.f32 %v522_v45, %v481_v59  ;;  %v497_v32 = vadd.f32 %v496_v44, %v468_v42  ;;  %v254_v59 = vmax.f32 %v250_v18, 0.0 }
  0xcf   :  { %v542_v10 = vadd.f32 %v536_v47, %v495_v2 }
  0xd0   :  { %v545_v51 = vadd.f32 %v541_v7, %v2333_v60 }
  0xd1   :  { %v546_v63 = vadd.f32 %v542_v10, %v2339_v6 }
  0xd2   :  { %v549_v38 = vmax.f32 %v545_v51, 0.0 }
  0xd3   :  { %v550_v21 = vmax.f32 %v546_v63, 0.0 }
  0xd4   :  { %v566_v48 = vpop.f32.mrf.mxu2  ;;  %v553_v42 = vmax.f32 %v439_v19, %v549_v38 }
  0xd5   :  { %v580_v50 = vpop.f32.mrf.mxu3  ;;  %v524_v53 = vpop.f32.mrf.mxu0  ;;  %v554_v45 = vmax.f32 %v440_v16, %v550_v21 }
  0xd6   :  { %v538_v54 = vpop.f32.mrf.mxu1  ;;  %v543_v39 = vadd.f32 %v524_v53, %v483_v25 }
  0xd7   :  { %v544_v31 = vadd.f32 %v538_v54, %v497_v32 }
  0xd8   :  { %v547_v43 = vadd.f32 %v543_v39, %v2333_v60 }
  0xd9   :  { %v548_v47 = vadd.f32 %v544_v31, %v2339_v6 }
  0xda   :  { %v551_v1 = vmax.f32 %v547_v43, 0.0 }
  0xdb   :  { %v552_v10 = vmax.f32 %v548_v47, 0.0 }
  0xdc   :  { %v568_v3 = vpop.f32.mrf.mxu2 }
  0xdd   :  { %v582_v8 = vpop.f32.mrf.mxu3  ;;  %v594_v9 = vpop.f32.mrf.mxu0 }
  0xde   :  { %v608_v11 = vpop.f32.mrf.mxu1  ;;  %v595_v26 = vadd.f32 %v594_v9, %v566_v48  ;;  %v255_v9 = vmax.f32 %v251_v24, 0.0 }
  0xdf   :  { %v609_v34 = vadd.f32 %v608_v11, %v580_v50  ;;  %v437_v50 = vmax.f32 %v433_v23, 0.0 }
  0xe0   :  { %v442_v49 = vmax.f32 %v255_v9, %v438_v55 }
  0xe1   :  { %v441_v22 = vmax.f32 %v254_v59, %v437_v50 }
  0xe2   :  { %v556_v58 = vmax.f32 %v442_v49, %v552_v10 }
  0xe3   :  { %v555_v52 = vmax.f32 %v441_v22, %v551_v1 }
  0xe4   :  { %v622_v41 = vpop.f32.mrf.mxu2 }
  0xe5   :  { %v641_v40 = vadd.f32 %v622_v41, %v595_v26  ;;  %v636_v0 = vpop.f32.mrf.mxu3  ;;  %v596_v30 = vpop.f32.mrf.mxu0 }
  0xe6   :  { %v642_v36 = vadd.f32 %v636_v0, %v609_v34  ;;  %v610_v12 = vpop.f32.mrf.mxu1  ;;  %v597_v54 = vadd.f32 %v596_v30, %v568_v3 }
  0xe7   :  { %v645_v20 = vadd.f32 %v641_v40, %v2333_v60  ;;  %v611_v57 = vadd.f32 %v610_v12, %v582_v8 }
  0xe8   :  { %v646_v33 = vadd.f32 %v642_v36, %v2339_v6 }
  0xe9   :  { %v649_v44 = vmax.f32 %v645_v20, 0.0 }
  0xea   :  { %v650_v48 = vmax.f32 %v646_v33, 0.0 }
  0xeb   :  { %v653_v53 = vmax.f32 %v553_v42, %v649_v44 }
  0xec   :  { %v654_v56 = vmax.f32 %v554_v45, %v650_v48  ;;  %v624_v46 = vpop.f32.mrf.mxu2 }
  0xed   :  { %v643_v4 = vadd.f32 %v624_v46, %v597_v54  ;;  %v638_v5 = vpop.f32.mrf.mxu3  ;;  %v722_v7 = vpop.f32.mrf.mxu0 }
  0xee   :  { %v657_v11 = vpack.c.bf16 %v654_v56, %v653_v53  ;;  %v644_v13 = vadd.f32 %v638_v5, %v611_v57  ;;  %v736_v15 = vpop.f32.mrf.mxu1 }
  0xef   :  { %v647_v3 = vadd.f32 %v643_v4, %v2333_v60 }
  0xf0   :  { %662 = vst.msk [vmem:[%s2418_s4] sm:$0xff] %vm2359_vm4, %v657_v11  ;;  %v648_v8 = vadd.f32 %v644_v13, %v2339_v6 }
  0xf1   :  { %v651_v51 = vmax.f32 %v647_v3, 0.0 }
  0xf2   :  { %v652_v61 = vmax.f32 %v648_v8, 0.0 }
  0xf3   :  { %v655_v62 = vmax.f32 %v555_v52, %v651_v51 }
  0xf4   :  { %v656_v63 = vmax.f32 %v556_v58, %v652_v61  ;;  %v782_v14 = vpop.f32.mrf.mxu2 }
  0xf5   :  { %v783_v25 = vadd.f32 %v782_v14, %v722_v7  ;;  %v796_v26 = vpop.f32.mrf.mxu3  ;;  %v724_v27 = vpop.f32.mrf.mxu0 }
  0xf6   :  { %v658_v28 = vpack.c.bf16 %v656_v63, %v655_v62  ;;  %v797_v32 = vadd.f32 %v796_v26, %v736_v15  ;;  %v738_v34 = vpop.f32.mrf.mxu1 }
  0xf8   :  { %666 = vst.msk [vmem:[%s2418_s4 + $0x8] sm:$0x77] %vm2370_vm7, %v658_v28 }
  0xfc   :  { %v784_v41 = vpop.f32.mrf.mxu2 }
  0xfd   :  { %v2379_v35 = vadd.f32 %v784_v41, %v724_v27  ;;  %v798_v38 = vpop.f32.mrf.mxu3  ;;  %v852_v39 = vpop.f32.mrf.mxu0 }
  0xfe   :  { %v2381_v40 = vadd.f32 %v798_v38, %v738_v34  ;;  %v866_v0 = vpop.f32.mrf.mxu1  ;;  %v871_v4 = vadd.f32 %v852_v39, %v783_v25 }
  0xff   :  { %v872_v5 = vadd.f32 %v866_v0, %v797_v32 }
 0x100   :  { %v875_v49 = vadd.f32 %v871_v4, %v2333_v60 }
 0x101   :  { %v876_v8 = vadd.f32 %v872_v5, %v2339_v6 }
 0x102   :  { %v879_v25 = vmax.f32 %v875_v49, 0.0 }
 0x103   :  { %v880_v26 = vmax.f32 %v876_v8, 0.0 }
 0x104   :  { %v924_v30 = vpop.f32.mrf.mxu2 }
 0x105   :  { %v938_v37 = vpop.f32.mrf.mxu3  ;;  %v854_v21 = vpop.f32.mrf.mxu0 }
 0x106   :  { %v2383_v31 = vpop.f32.mrf.mxu1 }
 0x10c   :  { %v926_v36 = vpop.f32.mrf.mxu2 }
 0x10d   :  { %v940_v12 = vpop.f32.mrf.mxu3  ;;  %v976_v18 = vpop.f32.mrf.mxu0 }
 0x10e   :  { %v990_v19 = vpop.f32.mrf.mxu1  ;;  %v977_v1 = vadd.f32 %v976_v18, %v924_v30 }
 0x10f   :  { %v991_v7 = vadd.f32 %v990_v19, %v938_v37  ;;  %v873_v19 = vadd.f32 %v854_v21, %v2379_v35 }
 0x114   :  { %v1032_v23 = vpop.f32.mrf.mxu2 }
 0x115   :  { %v1046_v20 = vpop.f32.mrf.mxu3  ;;  %v978_v24 = vpop.f32.mrf.mxu0  ;;  %v1051_v9 = vadd.f32 %v1032_v23, %v977_v1 }
 0x116   :  { %v992_v16 = vpop.f32.mrf.mxu1  ;;  %v1052_v11 = vadd.f32 %v1046_v20, %v991_v7  ;;  %v979_v63 = vadd.f32 %v978_v24, %v926_v36 }
 0x117   :  { %v1055_v58 = vadd.f32 %v1051_v9, %v2333_v60  ;;  %v993_v27 = vadd.f32 %v992_v16, %v940_v12  ;;  %v874_v12 = vadd.f32 %v2383_v31, %v2381_v40 }
 0x118   :  { %v1056_v62 = vadd.f32 %v1052_v11, %v2339_v6 }
 0x119   :  { %v1059_v32 = vmax.f32 %v1055_v58, 0.0 }
 0x11a   :  { %v1060_v39 = vmax.f32 %v1056_v62, 0.0 }
 0x11c   :  { %v1034_v29 = vpop.f32.mrf.mxu2 }
 0x11d   :  { %v1048_v33 = vpop.f32.mrf.mxu3  ;;  %v1076_v42 = vpop.f32.mrf.mxu0  ;;  %v1053_v34 = vadd.f32 %v1034_v29, %v979_v63  ;;  %v1063_v29 = vmax.f32 %v879_v25, %v1059_v32 }
 0x11e   :  { %v1090_v43 = vpop.f32.mrf.mxu1  ;;  %v1054_v0 = vadd.f32 %v1048_v33, %v993_v27 }
 0x124   :  { %v1104_v44 = vpop.f32.mrf.mxu2 }
 0x125   :  { %v1118_v45 = vpop.f32.mrf.mxu3  ;;  %v1078_v47 = vpop.f32.mrf.mxu0  ;;  %v1105_v10 = vadd.f32 %v1104_v44, %v1076_v42  ;;  %v1057_v44 = vadd.f32 %v1053_v34, %v2333_v60 }
 0x126   :  { %v1092_v48 = vpop.f32.mrf.mxu1  ;;  %v1119_v13 = vadd.f32 %v1118_v45, %v1090_v43  ;;  %v1064_v45 = vmax.f32 %v880_v26, %v1060_v39 }
 0x12c   :  { %v1106_v50 = vpop.f32.mrf.mxu2 }
 0x12d   :  { %v1120_v53 = vpop.f32.mrf.mxu3  ;;  %v1146_v54 = vpop.f32.mrf.mxu0  ;;  %v1107_v41 = vadd.f32 %v1106_v50, %v1078_v47  ;;  %v1058_v47 = vadd.f32 %v1054_v0, %v2339_v6 }
 0x12e   :  { %v1160_v55 = vpop.f32.mrf.mxu1  ;;  %v1165_v22 = vadd.f32 %v1146_v54, %v1105_v10  ;;  %v1121_v30 = vadd.f32 %v1120_v53, %v1092_v48  ;;  %v877_v48 = vadd.f32 %v873_v19, %v2333_v60  ;;  %v878_v54 = vadd.f32 %v874_v12, %v2339_v6 }
 0x12f   :  { %v1166_v52 = vadd.f32 %v1160_v55, %v1119_v13  ;;  %v1062_v4 = vmax.f32 %v1058_v47, 0.0 }
 0x130   :  { %v1169_v14 = vadd.f32 %v1165_v22, %v2333_v60  ;;  %v881_v10 = vmax.f32 %v877_v48, 0.0  ;;  %v882_v49 = vmax.f32 %v878_v54, 0.0 }
 0x131   :  { %v1170_v28 = vadd.f32 %v1166_v52, %v2339_v6 }
 0x132   :  { %v1173_v23 = vmax.f32 %v1169_v14, 0.0  ;;  %v1066_v62 = vmax.f32 %v882_v49, %v1062_v4 }
 0x133   :  { %v1174_v16 = vmax.f32 %v1170_v28, 0.0 }
 0x134   :  { %v1190_v56 = vpop.f32.mrf.mxu2  ;;  %v1177_v50 = vmax.f32 %v1063_v29, %v1173_v23 }
 0x135   :  { %v1204_v57 = vpop.f32.mrf.mxu3  ;;  %v1148_v46 = vpop.f32.mrf.mxu0  ;;  %v1178_v55 = vmax.f32 %v1064_v45, %v1174_v16 }
 0x136   :  { %v1162_v59 = vpop.f32.mrf.mxu1  ;;  %v1167_v36 = vadd.f32 %v1148_v46, %v1107_v41  ;;  %v1061_v46 = vmax.f32 %v1057_v44, 0.0 }
 0x137   :  { %v1168_v42 = vadd.f32 %v1162_v59, %v1121_v30 }
 0x138   :  { %v1171_v53 = vadd.f32 %v1167_v36, %v2333_v60  ;;  %v1065_v58 = vmax.f32 %v881_v10, %v1061_v46 }
 0x13a   :  { %v1175_v11 = vmax.f32 %v1171_v53, 0.0 }
 0x13c   :  { %v1192_v15 = vpop.f32.mrf.mxu2 }
 0x13d   :  { %v1206_v3 = vpop.f32.mrf.mxu3  ;;  %v1218_v51 = vpop.f32.mrf.mxu0 }
 0x13e   :  { %v1232_v61 = vpop.f32.mrf.mxu1  ;;  %v1219_v38 = vadd.f32 %v1218_v51, %v1190_v56  ;;  %v1172_v56 = vadd.f32 %v1168_v42, %v2339_v6 }
 0x13f   :  { %v1233_v37 = vadd.f32 %v1232_v61, %v1204_v57 }
 0x140   :  { %v1176_v8 = vmax.f32 %v1172_v56, 0.0 }
 0x142   :  { %v1180_v14 = vmax.f32 %v1066_v62, %v1176_v8 }
 0x144   :  { %v1246_v18 = vpop.f32.mrf.mxu2 }
 0x145   :  { %v1265_v20 = vadd.f32 %v1246_v18, %v1219_v38  ;;  %v1260_v24 = vpop.f32.mrf.mxu3  ;;  %v1220_v21 = vpop.f32.mrf.mxu0 }
 0x146   :  { %v1266_v43 = vadd.f32 %v1260_v24, %v1233_v37  ;;  %v1234_v31 = vpop.f32.mrf.mxu1  ;;  %v1221_v1 = vadd.f32 %v1220_v21, %v1192_v15 }
 0x147   :  { %v1269_v33 = vadd.f32 %v1265_v20, %v2333_v60  ;;  %v1235_v7 = vadd.f32 %v1234_v31, %v1206_v3  ;;  %v1179_v3 = vmax.f32 %v1065_v58, %v1175_v11 }
 0x148   :  { %v1270_v35 = vadd.f32 %v1266_v43, %v2339_v6 }
 0x149   :  { %v1273_v40 = vmax.f32 %v1269_v33, 0.0 }
 0x14a   :  { %v1274_v57 = vmax.f32 %v1270_v35, 0.0 }
 0x14b   :  { %v1277_v59 = vmax.f32 %v1177_v50, %v1273_v40 }
 0x14c   :  { %v1278_v5 = vmax.f32 %v1178_v55, %v1274_v57  ;;  %v1248_v9 = vpop.f32.mrf.mxu2 }
 0x14d   :  { %v1267_v13 = vadd.f32 %v1248_v9, %v1221_v1  ;;  %v1262_v22 = vpop.f32.mrf.mxu3 }
 0x14e   :  { %v1281_v52 = vpack.c.bf16 %v1278_v5, %v1277_v59  ;;  %v1268_v51 = vadd.f32 %v1262_v22, %v1235_v7 }
 0x14f   :  { %v1271_v61 = vadd.f32 %v1267_v13, %v2333_v60 }
 0x150   :  { %1577 = vst.msk [vmem:[%s2418_s4 + $0x10] sm:$0xff] %vm2359_vm4, %v1281_v52  ;;  %v1272_v15 = vadd.f32 %v1268_v51, %v2339_v6 }
 0x151   :  { %v1275_v63 = vmax.f32 %v1271_v61, 0.0 }
 0x152   :  { %v1276_v25 = vmax.f32 %v1272_v15, 0.0 }
 0x153   :  { %v1279_v26 = vmax.f32 %v1179_v3, %v1275_v63 }
 0x154   :  { %v1280_v27 = vmax.f32 %v1180_v14, %v1276_v25 }
 0x156   :  { %v1282_v28 = vpack.c.bf16 %v1280_v27, %v1279_v26 }
 0x158   :  { %1578 = vst.msk [vmem:[%s2418_s4 + $0x18] sm:$0x77] %vm2370_vm7, %v1282_v28 }
 0x159   :  { %1290 = vsyncpa [#allocation3], 1 }

// kernel: cnn_forward.5
= control target key start
LH: loop header
LB: loop body
LE: loop exit
PB: predicated region body
PF: predicated region fallthrough
CT: control target
= control target key end

     0   :  { %s2039_s0 = inlined_call_operand.vmem [shape: bf16[2,1568], index: 0, kind: input, shape index: {}]   ;;  %s2040_s1 = inlined_call_operand.vmem [shape: bf16[1568,128], index: 1, kind: input, shape index: {}]   ;;  %s2041_s2 = inlined_call_operand.vmem [shape: f32[1,128], index: 2, kind: input, shape index: {}]   ;;  %s2042_s3 = inlined_call_operand.vmem [shape: f32[128,2], index: 3, kind: input, shape index: {}]   ;;  %s2043_s4 = inlined_call_operand.vmem [shape: f32[1,2], index: 4, kind: input, shape index: {}]   ;;  %s2044_s5 = inlined_call_operand.vmem [shape: f32[2,10], index: 5, kind: input, shape index: {}]   ;;  %s2045_s6 = inlined_call_operand.vmem [shape: f32[1,10], index: 6, kind: input, shape index: {}]   ;;  %s2046_s7 = inlined_call_operand.hbm [shape: f32[2,10], index: 7, kind: output, shape index: {}]  }
   0x1   :  { %v1500_v0 = vld [vmem:[%s2040_s1 + $0x38] sm:$0xff]  ;;  %v1499_v4 = vld [vmem:[%s2040_s1 + $0x30] sm:$0xff]  ;;  %v1498_v8 = vld [vmem:[%s2040_s1 + $0x28] sm:$0xff] }
   0x2   :  { %v1516_v1 = vld [vmem:[%s2040_s1 + $0xb8] sm:$0xff]  ;;  %850 = vmatpush.bf16.msra.mxu0 %v1500_v0  ;;  %v1515_v5 = vld [vmem:[%s2040_s1 + $0xb0] sm:$0xff]  ;;  %v1514_v9 = vld [vmem:[%s2040_s1 + $0xa8] sm:$0xff] }
   0x3   :  { %v1524_v2 = vld [vmem:[%s2040_s1 + $0xf8] sm:$0xff]  ;;  %876 = vmatpush.bf16.msra.mxu2 %v1516_v1  ;;  %v1523_v6 = vld [vmem:[%s2040_s1 + $0xf0] sm:$0xff]  ;;  %v1522_v10 = vld [vmem:[%s2040_s1 + $0xe8] sm:$0xff] }
   0x4   :  { %v1508_v3 = vld [vmem:[%s2040_s1 + $0x78] sm:$0xff]  ;;  %889 = vmatpush.bf16.msra.mxu3 %v1524_v2  ;;  %v1507_v7 = vld [vmem:[%s2040_s1 + $0x70] sm:$0xff]  ;;  %v1506_v11 = vld [vmem:[%s2040_s1 + $0x68] sm:$0xff] }
   0x5   :  { %863 = vmatpush.bf16.msra.mxu1 %v1508_v3  ;;  %v1497_v12 = vld [vmem:[%s2040_s1 + $0x20] sm:$0xff]  ;;  %v1496_v16 = vld [vmem:[%s2040_s1 + $0x18] sm:$0xff]  ;;  %v1495_v20 = vld [vmem:[%s2040_s1 + $0x10] sm:$0xff] }
   0x6   :  { %851 = vmatpush.bf16.msra.mxu0 %v1499_v4  ;;  %v1513_v13 = vld [vmem:[%s2040_s1 + $0xa0] sm:$0xff]  ;;  %v1512_v17 = vld [vmem:[%s2040_s1 + $0x98] sm:$0xff]  ;;  %v1511_v22 = vld [vmem:[%s2040_s1 + $0x90] sm:$0xff] }
   0x7   :  { %877 = vmatpush.bf16.msra.mxu2 %v1515_v5  ;;  %v1521_v14 = vld [vmem:[%s2040_s1 + $0xe0] sm:$0xff]  ;;  %v1520_v18 = vld [vmem:[%s2040_s1 + $0xd8] sm:$0xff]  ;;  %v1519_v23 = vld [vmem:[%s2040_s1 + $0xd0] sm:$0xff] }
   0x8   :  { %890 = vmatpush.bf16.msra.mxu3 %v1523_v6  ;;  %v1505_v15 = vld [vmem:[%s2040_s1 + $0x60] sm:$0xff]  ;;  %v1504_v19 = vld [vmem:[%s2040_s1 + $0x58] sm:$0xff]  ;;  %v1503_v24 = vld [vmem:[%s2040_s1 + $0x50] sm:$0xff] }
   0x9   :  { %864 = vmatpush.bf16.msra.mxu1 %v1507_v7  ;;  %v28_v21 = vld [vmem:[%s2039_s0] sm:$0xff] }
   0xa   :  { %852 = vmatpush.bf16.msra.mxu0 %v1498_v8  ;;  %231 = vst [vmem:[#allocation1] ss:$9 sm:$0xff] %v28_v21 }
   0xb   :  { %878 = vmatpush.bf16.msra.mxu2 %v1514_v9 }
   0xc   :  { %891 = vmatpush.bf16.msra.mxu3 %v1522_v10 }
   0xd   :  { %865 = vmatpush.bf16.msra.mxu1 %v1506_v11 }
   0xe   :  { %853 = vmatpush.bf16.msra.mxu0 %v1497_v12 }
   0xf   :  { %879 = vmatpush.bf16.msra.mxu2 %v1513_v13 }
  0x10   :  { %892 = vmatpush.bf16.msra.mxu3 %v1521_v14 }
  0x11   :  { %866 = vmatpush.bf16.msra.mxu1 %v1505_v15 }
  0x12   :  { %854 = vmatpush.bf16.msra.mxu0 %v1496_v16 }
  0x13   :  { %880 = vmatpush.bf16.msra.mxu2 %v1512_v17 }
  0x14   :  { %893 = vmatpush.bf16.msra.mxu3 %v1520_v18 }
  0x15   :  { %867 = vmatpush.bf16.msra.mxu1 %v1504_v19 }
  0x16   :  { %12 = vsyncpa [#allocation3], 0  ;;  %855 = vmatpush.bf16.msra.mxu0 %v1495_v20  ;;  %v1494_v25 = vld [vmem:[%s2040_s1 + $0x8] sm:$0xff]  ;;  %v1493_v29 = vld [vmem:[%s2040_s1] sm:$0xff]  ;;  %vm847_vm0 = vcmask 261120   ;;  %s1629_s25 = smov [#allocation2]  }
  0x17   :  { %881 = vmatpush.bf16.msra.mxu2 %v1511_v22  ;;  %v1510_v26 = vld [vmem:[%s2040_s1 + $0x88] sm:$0xff]  ;;  %v1509_v30 = vld [vmem:[%s2040_s1 + $0x80] sm:$0xff]  ;;  %v1532_v32 = vld [vmem:[%s2040_s1 + $0x138] sm:$0xff]  ;;  %s1089_s26 = sshll.u32 %s1629_s25, 4  ;;  %s1091_s29 = sshll.u32 %s2046_s7, 4  ;;  %vm1082_vm1 = vcmask 74752   ;;  %s1090_s26 = int_to_ptr.vmem [resolvable:$true] %s1089_s26  ;;  %s1092_s29 = int_to_ptr.hbm [resolvable:$true] %s1091_s29 }
  0x18   :  { %894 = vmatpush.bf16.msra.mxu3 %v1519_v23  ;;  %v1518_v27 = vld [vmem:[%s2040_s1 + $0xc8] sm:$0xff]  ;;  %v1517_v31 = vld [vmem:[%s2040_s1 + $0xc0] sm:$0xff]  ;;  %v1548_v33 = vld [vmem:[%s2040_s1 + $0x1b8] sm:$0xff] }
  0x19   :  { %868 = vmatpush.bf16.msra.mxu1 %v1503_v24  ;;  %v1502_v28 = vld [vmem:[%s2040_s1 + $0x48] sm:$0xff]  ;;  %v1556_v34 = vld [vmem:[%s2040_s1 + $0x1f8] sm:$0xff]  ;;  %v1501_v35 = vld [vmem:[%s2040_s1 + $0x40] sm:$0xff] }
  0x1a   :  { %856 = vmatpush.bf16.msra.mxu0 %v1494_v25  ;;  %v1540_v36 = vld [vmem:[%s2040_s1 + $0x178] sm:$0xff]  ;;  %v1531_v38 = vld [vmem:[%s2040_s1 + $0x130] sm:$0xff]  ;;  %v232_v39 = vld [vmem:[#allocation1] sm:$0xff] }
  0x1b   :  { %882 = vmatpush.bf16.msra.mxu2 %v1510_v26  ;;  %v234_v37 = vld [vmem:[#allocation1 + $0x12] sm:$0xff]  ;;  %v235_v42 = vld [vmem:[#allocation1 + $0x1b] sm:$0xff]  ;;  %v233_v44 = vld [vmem:[#allocation1 + $0x9] sm:$0xff] }
  0x1c   :  { %895 = vmatpush.bf16.msra.mxu3 %v1518_v27  ;;  %v1547_v40 = vld [vmem:[%s2040_s1 + $0x1b0] sm:$0xff]  ;;  %v1530_v45 = vld [vmem:[%s2040_s1 + $0x128] sm:$0xff]  ;;  %v239_v51 = vld [vmem:[#allocation1 + $0x3f] sm:$0xff] }
  0x1d   :  { %869 = vmatpush.bf16.msra.mxu1 %v1502_v28  ;;  %v1555_v41 = vld [vmem:[%s2040_s1 + $0x1f0] sm:$0xff]  ;;  %v1546_v46 = vld [vmem:[%s2040_s1 + $0x1a8] sm:$0xff]  ;;  %v1529_v54 = vld [vmem:[%s2040_s1 + $0x120] sm:$0xff] }
  0x1e   :  { %857 = vmatpush.bf16.msra.mxu0 %v1493_v29  ;;  %v1539_v43 = vld [vmem:[%s2040_s1 + $0x170] sm:$0xff]  ;;  %v1554_v47 = vld [vmem:[%s2040_s1 + $0x1e8] sm:$0xff]  ;;  %v1545_v55 = vld [vmem:[%s2040_s1 + $0x1a0] sm:$0xff] }
  0x1f   :  { %883 = vmatpush.bf16.msra.mxu2 %v1509_v30  ;;  %v1538_v48 = vld [vmem:[%s2040_s1 + $0x168] sm:$0xff]  ;;  %v238_v49 = vld [vmem:[#allocation1 + $0x36] sm:$0xff]  ;;  %v1553_v56 = vld [vmem:[%s2040_s1 + $0x1e0] sm:$0xff] }
  0x20   :  { %896 = vmatpush.bf16.msra.mxu3 %v1517_v31  ;;  %v236_v50 = vld [vmem:[#allocation1 + $0x24] sm:$0xff]  ;;  %v1808_v53 = vld [vmem:[#allocation1 + $0x2d] sm:$0xff]  ;;  %v1528_v58 = vld [vmem:[%s2040_s1 + $0x118] sm:$0xff] }
  0x21   :  { %870 = vmatpush.bf16.msra.mxu1 %v1501_v35  ;;  %858 = vmatmul.bf16.vlgmr.msra.gmra.mxu0 %v232_v39  ;;  %v29_v52 = vld [vmem:[%s2039_s0 + $0x8] sm:$0x1f]  ;;  %v1537_v57 = vld [vmem:[%s2040_s1 + $0x160] sm:$0xff]  ;;  %v1544_v59 = vld [vmem:[%s2040_s1 + $0x198] sm:$0xff] }
  0x22   :  { %902 = vmatpush.bf16.msrb.mxu0 %v1532_v32  ;;  %884 = vmatmul.bf16.vlgmr.msra.gmra.mxu2 %v234_v37  ;;  %241 = vst [vmem:[#allocation1] ss:$9 sm:$0xff] %v29_v52  ;;  %v1552_v60 = vld [vmem:[%s2040_s1 + $0x1d8] sm:$0xff]  ;;  %v1527_v62 = vld [vmem:[%s2040_s1 + $0x110] sm:$0xff]  ;;  %v1526_v2 = vld [vmem:[%s2040_s1 + $0x108] sm:$0xff] }
  0x23   :  { %928 = vmatpush.bf16.msrb.mxu2 %v1548_v33  ;;  %897 = vmatmul.bf16.vlgmr.msra.gmra.mxu3 %v235_v42  ;;  %v1536_v61 = vld [vmem:[%s2040_s1 + $0x158] sm:$0xff]  ;;  %v1543_v63 = vld [vmem:[%s2040_s1 + $0x190] sm:$0xff]  ;;  %v1542_v3 = vld [vmem:[%s2040_s1 + $0x188] sm:$0xff] }
  0x24   :  { %941 = vmatpush.bf16.msrb.mxu3 %v1556_v34  ;;  %871 = vmatmul.bf16.vlgmr.msra.gmra.mxu1 %v233_v44  ;;  %v1551_v0 = vld [vmem:[%s2040_s1 + $0x1d0] sm:$0xff]  ;;  %v1550_v4 = vld [vmem:[%s2040_s1 + $0x1c8] sm:$0xff]  ;;  %v1525_v6 = vld [vmem:[%s2040_s1 + $0x100] sm:$0xff] }
  0x25   :  { %915 = vmatpush.bf16.msrb.mxu1 %v1540_v36  ;;  %v1535_v1 = vld [vmem:[%s2040_s1 + $0x150] sm:$0xff]  ;;  %v1534_v5 = vld [vmem:[%s2040_s1 + $0x148] sm:$0xff]  ;;  %v1541_v7 = vld [vmem:[%s2040_s1 + $0x180] sm:$0xff] }
  0x26   :  { %903 = vmatpush.bf16.msrb.mxu0 %v1531_v38  ;;  %v1549_v8 = vld [vmem:[%s2040_s1 + $0x1c0] sm:$0xff]  ;;  %v1564_v9 = vld [vmem:[%s2040_s1 + $0x238] sm:$0xff]  ;;  %v1563_v14 = vld [vmem:[%s2040_s1 + $0x230] sm:$0xff] }
  0x27   :  { %929 = vmatpush.bf16.msrb.mxu2 %v1547_v40  ;;  %v1580_v10 = vld [vmem:[%s2040_s1 + $0x2b8] sm:$0xff]  ;;  %v1533_v12 = vld [vmem:[%s2040_s1 + $0x140] sm:$0xff]  ;;  %v1579_v15 = vld [vmem:[%s2040_s1 + $0x2b0] sm:$0xff] }
  0x28   :  { %942 = vmatpush.bf16.msrb.mxu3 %v1555_v41  ;;  %v1588_v11 = vld [vmem:[%s2040_s1 + $0x2f8] sm:$0xff]  ;;  %v1587_v16 = vld [vmem:[%s2040_s1 + $0x2f0] sm:$0xff]  ;;  %v1562_v18 = vld [vmem:[%s2040_s1 + $0x228] sm:$0xff] }
  0x29   :  { %916 = vmatpush.bf16.msrb.mxu1 %v1539_v43  ;;  %v1572_v13 = vld [vmem:[%s2040_s1 + $0x278] sm:$0xff]  ;;  %v1571_v17 = vld [vmem:[%s2040_s1 + $0x270] sm:$0xff]  ;;  %v1578_v19 = vld [vmem:[%s2040_s1 + $0x2a8] sm:$0xff] }
  0x2a   :  { %904 = vmatpush.bf16.msrb.mxu0 %v1530_v45  ;;  %v1586_v20 = vld [vmem:[%s2040_s1 + $0x2e8] sm:$0xff]  ;;  %v1561_v22 = vld [vmem:[%s2040_s1 + $0x220] sm:$0xff]  ;;  %v1560_v26 = vld [vmem:[%s2040_s1 + $0x218] sm:$0xff] }
  0x2b   :  { %930 = vmatpush.bf16.msrb.mxu2 %v1546_v46  ;;  %v1570_v21 = vld [vmem:[%s2040_s1 + $0x268] sm:$0xff]  ;;  %v1577_v23 = vld [vmem:[%s2040_s1 + $0x2a0] sm:$0xff]  ;;  %v1576_v27 = vld [vmem:[%s2040_s1 + $0x298] sm:$0xff] }
  0x2c   :  { %943 = vmatpush.bf16.msrb.mxu3 %v1554_v47  ;;  %v1585_v24 = vld [vmem:[%s2040_s1 + $0x2e0] sm:$0xff]  ;;  %v1584_v28 = vld [vmem:[%s2040_s1 + $0x2d8] sm:$0xff]  ;;  %v1559_v30 = vld [vmem:[%s2040_s1 + $0x210] sm:$0xff] }
  0x2d   :  { %917 = vmatpush.bf16.msrb.mxu1 %v1538_v48  ;;  %v1569_v25 = vld [vmem:[%s2040_s1 + $0x260] sm:$0xff]  ;;  %v1568_v29 = vld [vmem:[%s2040_s1 + $0x258] sm:$0xff]  ;;  %v1575_v31 = vld [vmem:[%s2040_s1 + $0x290] sm:$0xff] }
  0x2e   :  { %905 = vmatpush.bf16.msrb.mxu0 %v1529_v54  ;;  %v1583_v32 = vld [vmem:[%s2040_s1 + $0x2d0] sm:$0xff]  ;;  %v1558_v34 = vld [vmem:[%s2040_s1 + $0x208] sm:$0xff]  ;;  %v1557_v38 = vld [vmem:[%s2040_s1 + $0x200] sm:$0xff] }
  0x2f   :  { %931 = vmatpush.bf16.msrb.mxu2 %v1545_v55  ;;  %v1567_v33 = vld [vmem:[%s2040_s1 + $0x250] sm:$0xff]  ;;  %v1574_v35 = vld [vmem:[%s2040_s1 + $0x288] sm:$0xff]  ;;  %v1573_v39 = vld [vmem:[%s2040_s1 + $0x280] sm:$0xff] }
  0x30   :  { %944 = vmatpush.bf16.msrb.mxu3 %v1553_v56  ;;  %v1582_v36 = vld [vmem:[%s2040_s1 + $0x2c8] sm:$0xff]  ;;  %v1581_v40 = vld [vmem:[%s2040_s1 + $0x2c0] sm:$0xff]  ;;  %v244_v44 = vld [vmem:[#allocation1 + $0x12] sm:$0xff] }
  0x31   :  { %918 = vmatpush.bf16.msrb.mxu1 %v1537_v57  ;;  %v1566_v37 = vld [vmem:[%s2040_s1 + $0x248] sm:$0xff]  ;;  %v1565_v42 = vld [vmem:[%s2040_s1 + $0x240] sm:$0xff]  ;;  %v1035_v52 = vld [vmem:[%s2042_s3 + $0x78] sm:$0xff] }
  0x32   :  { %906 = vmatpush.bf16.msrb.mxu0 %v1528_v58  ;;  %v1590_v41 = vld [vmem:[%s2040_s1 + $0x308] sm:$0xff]  ;;  %v242_v43 = vld [vmem:[#allocation1] sm:$0xff] }
  0x33   :  { %932 = vmatpush.bf16.msrb.mxu2 %v1544_v59  ;;  %v245_v45 = vld [vmem:[#allocation1 + $0x1b] sm:$0xff]  ;;  %v243_v47 = vld [vmem:[#allocation1 + $0x9] sm:$0xff] }
  0x34   :  { %945 = vmatpush.bf16.msrb.mxu3 %v1552_v60  ;;  %v1589_v46 = vld [vmem:[%s2040_s1 + $0x300] sm:$0xff]  ;;  %v1033_v56 = vld [vmem:[%s2042_s3 + $0x68] sm:$0xff]  ;;  %v1031_v59 = vld [vmem:[%s2042_s3 + $0x58] sm:$0xff] }
  0x35   :  { %919 = vmatpush.bf16.msrb.mxu1 %v1536_v61  ;;  %v246_v48 = vld [vmem:[#allocation1 + $0x24] sm:$0xff] }
  0x36   :  { %907 = vmatpush.bf16.msrb.mxu0 %v1527_v62  ;;  %v1032_v58 = vld [vmem:[%s2042_s3 + $0x60] sm:$0xff]  ;;  %v1030_v62 = vld [vmem:[%s2042_s3 + $0x50] sm:$0xff] }
  0x37   :  { %933 = vmatpush.bf16.msrb.mxu2 %v1543_v63  ;;  %v1029_v63 = vld [vmem:[%s2042_s3 + $0x48] sm:$0xff] }
  0x38   :  { %946 = vmatpush.bf16.msrb.mxu3 %v1551_v0  ;;  %v1596_v0 = vld [vmem:[%s2041_s2] ss:$0 sm:$0xff] }
  0x39   :  { %920 = vmatpush.bf16.msrb.mxu1 %v1535_v1  ;;  %v1028_v1 = vld [vmem:[%s2042_s3 + $0x40] sm:$0xff] }
  0x3a   :  { %908 = vmatpush.bf16.msrb.mxu0 %v1526_v2 }
  0x3b   :  { %934 = vmatpush.bf16.msrb.mxu2 %v1542_v3 }
  0x3c   :  { %947 = vmatpush.bf16.msrb.mxu3 %v1550_v4  ;;  %v1027_v4 = vld [vmem:[%s2042_s3 + $0x38] sm:$0xff] }
  0x3d   :  { %921 = vmatpush.bf16.msrb.mxu1 %v1534_v5 }
  0x3e   :  { %909 = vmatpush.bf16.msrb.mxu0 %v1525_v6  ;;  %v1026_v6 = vld [vmem:[%s2042_s3 + $0x30] sm:$0xff] }
  0x3f   :  { %935 = vmatpush.bf16.msrb.mxu2 %v1541_v7 }
  0x40   :  { %948 = vmatpush.bf16.msrb.mxu3 %v1549_v8 }
  0x41   :  { %922 = vmatpush.bf16.msrb.mxu1 %v1533_v12  ;;  %910 = vmatmul.bf16.vlgmr.msrb.gmra.mxu0 %v236_v50 }
  0x42   :  { %954 = vmatpush.bf16.msra.mxu0 %v1564_v9  ;;  %936 = vmatmul.bf16.vlgmr.msrb.gmra.mxu2 %v238_v49  ;;  %v1025_v9 = vld [vmem:[%s2042_s3 + $0x28] sm:$0xff] }
  0x43   :  { %980 = vmatpush.bf16.msra.mxu2 %v1580_v10  ;;  %949 = vmatmul.bf16.vlgmr.msrb.gmra.mxu3 %v239_v51  ;;  %v1024_v10 = vld [vmem:[%s2042_s3 + $0x20] sm:$0xff] }
  0x44   :  { %993 = vmatpush.bf16.msra.mxu3 %v1588_v11  ;;  %923 = vmatmul.bf16.vlgmr.msrb.gmra.mxu1 %v1808_v53  ;;  %v1034_v53 = vld [vmem:[%s2042_s3 + $0x70] sm:$0xff] }
  0x45   :  { %967 = vmatpush.bf16.msra.mxu1 %v1572_v13 }
  0x46   :  { %955 = vmatpush.bf16.msra.mxu0 %v1563_v14  ;;  %v1023_v14 = vld [vmem:[%s2042_s3 + $0x18] sm:$0xff] }
  0x47   :  { %981 = vmatpush.bf16.msra.mxu2 %v1579_v15 }
  0x48   :  { %994 = vmatpush.bf16.msra.mxu3 %v1587_v16  ;;  %v1022_v16 = vld [vmem:[%s2042_s3 + $0x10] sm:$0xff] }
  0x49   :  { %968 = vmatpush.bf16.msra.mxu1 %v1571_v17 }
  0x4a   :  { %956 = vmatpush.bf16.msra.mxu0 %v1562_v18 }
  0x4b   :  { %982 = vmatpush.bf16.msra.mxu2 %v1578_v19  ;;  %v1021_v19 = vld [vmem:[%s2042_s3 + $0x8] sm:$0xff] }
  0x4c   :  { %995 = vmatpush.bf16.msra.mxu3 %v1586_v20 }
  0x4d   :  { %969 = vmatpush.bf16.msra.mxu1 %v1570_v21  ;;  %v1020_v21 = vld [vmem:[%s2042_s3] sm:$0xff] }
  0x4e   :  { %957 = vmatpush.bf16.msra.mxu0 %v1561_v22 }
  0x4f   :  { %983 = vmatpush.bf16.msra.mxu2 %v1577_v23 }
  0x50   :  { %996 = vmatpush.bf16.msra.mxu3 %v1585_v24 }
  0x51   :  { %970 = vmatpush.bf16.msra.mxu1 %v1569_v25 }
  0x52   :  { %958 = vmatpush.bf16.msra.mxu0 %v1560_v26 }
  0x53   :  { %984 = vmatpush.bf16.msra.mxu2 %v1576_v27 }
  0x54   :  { %997 = vmatpush.bf16.msra.mxu3 %v1584_v28 }
  0x55   :  { %971 = vmatpush.bf16.msra.mxu1 %v1568_v29 }
  0x56   :  { %959 = vmatpush.bf16.msra.mxu0 %v1559_v30 }
  0x57   :  { %985 = vmatpush.bf16.msra.mxu2 %v1575_v31 }
  0x58   :  { %998 = vmatpush.bf16.msra.mxu3 %v1583_v32 }
  0x59   :  { %972 = vmatpush.bf16.msra.mxu1 %v1567_v33 }
  0x5a   :  { %960 = vmatpush.bf16.msra.mxu0 %v1558_v34 }
  0x5b   :  { %986 = vmatpush.bf16.msra.mxu2 %v1574_v35 }
  0x5c   :  { %999 = vmatpush.bf16.msra.mxu3 %v1582_v36 }
  0x5d   :  { %973 = vmatpush.bf16.msra.mxu1 %v1566_v37 }
  0x5e   :  { %961 = vmatpush.bf16.msra.mxu0 %v1557_v38 }
  0x5f   :  { %987 = vmatpush.bf16.msra.mxu2 %v1573_v39 }
  0x60   :  { %1000 = vmatpush.bf16.msra.mxu3 %v1581_v40 }
  0x61   :  { %974 = vmatpush.bf16.msra.mxu1 %v1565_v42  ;;  %962 = vmatmul.bf16.vlgmr.msra.gmra.mxu0 %v242_v43  ;;  %v1627_v42 = vmov 0   ;;  %v1597_v43 = vld [vmem:[%s2043_s4] ss:$0 sm:$0xff] }
  0x62   :  { %1012 = vmatpush.bf16.msrb.mxu0 %v1590_v41  ;;  %988 = vmatmul.bf16.vlgmr.msra.gmra.mxu2 %v244_v44 }
  0x63   :  { %1001 = vmatmul.bf16.vlgmr.msra.gmra.mxu3 %v245_v45  ;;  %1594 = vset.pattern.permute.xlu0 %v1627_v42 }
  0x64   :  { %975 = vmatmul.bf16.vlgmr.msra.gmra.mxu1 %v243_v47  ;;  %v1628_v47 = vmov 1  }
  0x65   :  { %1040 = vmatpush.msrb.mxu1 %v1035_v52 }
  0x66   :  { %1013 = vmatpush.bf16.msrb.mxu0 %v1589_v46 }
  0x67   :  { %1041 = vmatpush.msrb.mxu1 %v1034_v53  ;;  %v1600_v53 = vld [vmem:[%s2045_s6] ss:$0 sm:$0xff] }
  0x69   :  { %1042 = vmatpush.msrb.mxu1 %v1033_v56 }
  0x6b   :  { %1043 = vmatpush.msrb.mxu1 %v1032_v58 }
  0x6d   :  { %1044 = vmatpush.msrb.mxu1 %v1031_v59 }
  0x6f   :  { %1045 = vmatpush.msrb.mxu1 %v1030_v62 }
  0x71   :  { %1492 = vmatmul.msk.bf16.vlgmr.msrb.gmra.mxu0 %vm847_vm0, %v246_v48  ;;  %1046 = vmatpush.msrb.mxu1 %v1029_v63 }
  0x73   :  { %1047 = vmatpush.msrb.mxu1 %v1028_v1 }
  0x75   :  { %1048 = vmatpush.msrb.mxu1 %v1027_v4 }
  0x77   :  { %1049 = vmatpush.msrb.mxu1 %v1026_v6 }
  0x79   :  { %1050 = vmatpush.msrb.mxu1 %v1025_v9 }
  0x7b   :  { %1051 = vmatpush.msrb.mxu1 %v1024_v10 }
  0x7d   :  { %1052 = vmatpush.msrb.mxu1 %v1023_v14 }
  0x7f   :  { %1053 = vmatpush.msrb.mxu1 %v1022_v16 }
  0x81   :  { %1054 = vmatpush.msrb.mxu1 %v1021_v19 }
  0x83   :  { %1055 = vmatpush.msrb.mxu1 %v1020_v21 }
  0x9e   :  { %v859_v49 = vpop.f32.mrf.mxu0 }
  0x9f   :  { %v860_v5 = vadd.f32 %v1596_v0, %v859_v49  ;;  %v1598_v49 = vld [vmem:[%s2044_s5] ss:$0 sm:$0xff] }
  0xa1   :  { %v872_v50 = vpop.f32.mrf.mxu1 }
  0xa2   :  { %v873_v11 = vadd.f32 %v872_v50, %v860_v5  ;;  %v1599_v50 = vld [vmem:[%s2044_s5 + $0x1] ss:$0 sm:$0xff] }
  0xa5   :  { %v885_v51 = vpop.f32.mrf.mxu2 }
  0xa6   :  { %v898_v54 = vpop.f32.mrf.mxu3  ;;  %v861_v55 = vpop.f32.mrf.mxu0  ;;  %v886_v15 = vadd.f32 %v885_v51, %v873_v11 }
  0xa8   :  { %v899_v20 = vadd.f32 %v898_v54, %v886_v15 }
  0xa9   :  { %v874_v57 = vpop.f32.mrf.mxu1 }
  0xad   :  { %v887_v60 = vpop.f32.mrf.mxu2 }
  0xae   :  { %v900_v61 = vpop.f32.mrf.mxu3 }
  0xbe   :  { %v911_v2 = vpop.f32.mrf.mxu0 }
  0xbf   :  { %v912_v22 = vadd.f32 %v911_v2, %v899_v20 }
  0xc1   :  { %v924_v3 = vpop.f32.mrf.mxu1 }
  0xc2   :  { %v925_v23 = vadd.f32 %v924_v3, %v912_v22 }
  0xc5   :  { %v937_v7 = vpop.f32.mrf.mxu2 }
  0xc6   :  { %v950_v8 = vpop.f32.mrf.mxu3  ;;  %v913_v12 = vpop.f32.mrf.mxu0  ;;  %v938_v24 = vadd.f32 %v937_v7, %v925_v23 }
  0xc8   :  { %v951_v27 = vadd.f32 %v950_v8, %v938_v24 }
  0xc9   :  { %v926_v13 = vpop.f32.mrf.mxu1 }
  0xcd   :  { %v939_v17 = vpop.f32.mrf.mxu2 }
  0xce   :  { %v952_v18 = vpop.f32.mrf.mxu3 }
  0xde   :  { %v963_v25 = vpop.f32.mrf.mxu0 }
  0xdf   :  { %v964_v28 = vadd.f32 %v963_v25, %v951_v27 }
  0xe1   :  { %v976_v26 = vpop.f32.mrf.mxu1 }
  0xe2   :  { %v977_v32 = vadd.f32 %v976_v26, %v964_v28 }
  0xe5   :  { %v989_v29 = vpop.f32.mrf.mxu2 }
  0xe6   :  { %v1002_v30 = vpop.f32.mrf.mxu3  ;;  %v965_v31 = vpop.f32.mrf.mxu0  ;;  %v990_v34 = vadd.f32 %v989_v29, %v977_v32 }
  0xe8   :  { %v1003_v36 = vadd.f32 %v1002_v30, %v990_v34 }
  0xe9   :  { %v978_v33 = vpop.f32.mrf.mxu1 }
  0xed   :  { %v991_v35 = vpop.f32.mrf.mxu2 }
  0xee   :  { %v1004_v37 = vpop.f32.mrf.mxu3  ;;  %v1015_v38 = vpop.f32.mrf.mxu0 }
  0xef   :  { %v1016_v39 = vadd.f32 %v1015_v38, %v1003_v36 }
  0xf1   :  { %v1019_v40 = vmax.f32 %v1016_v39, 0.0 }
  0xf3   :  { %1056 = vmatmul.f32.vlgmr.msrb.gmra.mxu1 %v1019_v40 }
  0xf6   :  { %v1017_v41 = vpop.f32.mrf.mxu0 }
 0x170   :  { %v1057_v44 = vpop.f32.mrf.mxu1 }
 0x171   :  { %v1058_v45 = vadd.f32 %v1597_v43, %v1057_v44 }
 0x173   :  { %v1060_v46 = vmax.f32 %v1058_v45, 0.0 }
 0x175   :  { %1064 = vperm.xlu0 %1594, %v1060_v46  }
 0x17d   :  { %1595 = vset.pattern.permute.xlu0 %v1628_v47 }
 0x17e   :  { %1071 = vperm.xlu0 %1595, %v1060_v46  }
 0x1e7   :  { %v1065_v48 = vpop.permute.xlu0 %1064 }
 0x1e8   :  { %v1068_v52 = vmul.f32 %v1598_v49, %v1065_v48 }
 0x1f0   :  { %v1072_v51 = vpop.permute.xlu0 %1071 }
 0x1f1   :  { %v1075_v54 = vmul.f32 %v1599_v50, %v1072_v51 }
 0x1f3   :  { %v1076_v55 = vadd.f32 %v1075_v54, %v1068_v52 }
 0x1f5   :  { %v1081_v56 = vadd.f32 %v1600_v53, %v1076_v55 }
 0x1f7   :  { %1083 = vst.msk [vmem:[#allocation2] sm:$0x3] %vm1082_vm1, %v1081_v56 }
 0x1f8   :  { %1094 = dma.vmem_to_hbm [thread:$0]  %s1090_s26, 32, %s1092_s29, [#allocation3]  }
 0x1f9   :  { %1625 = dma.done.wait [#allocation3], 32  }
 0x1fa   :  { %1626 = vsyncadd [#allocation3], 4294967264 }
 0x1fb   :  { %1099 = vsyncpa [#allocation3], 1 }

// kernel: cnn_forward.4
= control target key start
LH: loop header
LB: loop body
LE: loop exit
PB: predicated region body
PF: predicated region fallthrough
CT: control target
= control target key end

     0   :  { %vm1883_vm0 = vcmask 1043456   ;;  %vm1884_vm1 = vsmask.f32 3328  ;;  %vm1886_vm2 = vcmask 785412   ;;  %vm1887_vm3 = vsmask.f32 7424  ;;  %s10162_s2 = inlined_call_operand.vmem [shape: bf16[3,2,256,224], index: 2, kind: input, shape index: {}]   ;;  %s10163_s1 = inlined_call_operand.vmem [shape: bf16[2,8,256], index: 1, kind: input, shape index: {}]   ;;  %s10164_s0 = inlined_call_operand.vmem [shape: bf16[2,8,256], index: 0, kind: input, shape index: {}]   ;;  %s10165_s3 = inlined_call_operand.vmem [shape: f32[1,224], index: 3, kind: input, shape index: {}]   ;;  %s10166_s4 = inlined_call_operand.vmem [shape: bf16[2,7,224], index: 4, kind: output, shape index: {}]  }
   0x1   :  { %v3848_v0 = vld [vmem:[%s10162_s2 + $0x270] sm:$0xf]  ;;  %v5665_v1 = vld [vmem:[%s10162_s2 + $0x274] sm:$0xf0]  ;;  %v5664_v5 = vld [vmem:[%s10162_s2 + $0x274] sm:$0xf] }
   0x2   :  { %v3912_v2 = vld [vmem:[%s10162_s2 + $0x2f0] sm:$0xf]  ;;  %v6036_v3 = vor.u32 %v5665_v1, %v3848_v0  ;;  %v5681_v4 = vld [vmem:[%s10162_s2 + $0x2f4] sm:$0xf0]  ;;  %v3850_v6 = vld [vmem:[%s10162_s2 + $0x278] sm:$0xf0] }
   0x3   :  { %v6047_v7 = vor.u32 %v5681_v4, %v3912_v2  ;;  %v6049_v8 = vor.u32 %v5664_v5, %v3850_v6  ;;  %v5680_v9 = vld [vmem:[%s10162_s2 + $0x2f4] sm:$0xf]  ;;  %v3914_v10 = vld [vmem:[%s10162_s2 + $0x2f8] sm:$0xf0]  ;;  %v3840_v11 = vld [vmem:[%s10162_s2 + $0x260] sm:$0xf] }
   0x4   :  { %252 = vmatpush.bf16.msra.mxu0 %v6036_v3  ;;  %v6061_v12 = vor.u32 %v5680_v9, %v3914_v10  ;;  %v5663_v13 = vld [vmem:[%s10162_s2 + $0x264] sm:$0xf0]  ;;  %v3904_v14 = vld [vmem:[%s10162_s2 + $0x2e0] sm:$0xf]  ;;  %v5662_v18 = vld [vmem:[%s10162_s2 + $0x264] sm:$0xf] }
   0x5   :  { %v5679_v15 = vld [vmem:[%s10162_s2 + $0x2e4] sm:$0xf0]  ;;  %265 = vmatpush.bf16.msra.mxu1 %v6047_v7  ;;  %278 = vmatpush.bf16.msra.mxu2 %v6049_v8  ;;  %v6074_v16 = vor.u32 %v5663_v13, %v3840_v11  ;;  %v3842_v19 = vld [vmem:[%s10162_s2 + $0x268] sm:$0xf0]  ;;  %v5678_v20 = vld [vmem:[%s10162_s2 + $0x2e4] sm:$0xf] }
   0x6   :  { %v6076_v17 = vor.u32 %v5679_v15, %v3904_v14  ;;  %291 = vmatpush.bf16.msra.mxu3 %v6061_v12  ;;  %v6088_v21 = vor.u32 %v5662_v18, %v3842_v19  ;;  %v3906_v22 = vld [vmem:[%s10162_s2 + $0x2e8] sm:$0xf0]  ;;  %v3832_v23 = vld [vmem:[%s10162_s2 + $0x250] sm:$0xf]  ;;  %v5661_v24 = vld [vmem:[%s10162_s2 + $0x254] sm:$0xf0] }
   0x7   :  { %v6099_v25 = vor.u32 %v5678_v20, %v3906_v22  ;;  %v3896_v26 = vld [vmem:[%s10162_s2 + $0x2d0] sm:$0xf]  ;;  %v5677_v27 = vld [vmem:[%s10162_s2 + $0x2d4] sm:$0xf0]  ;;  %v5660_v28 = vld [vmem:[%s10162_s2 + $0x254] sm:$0xf]  ;;  %v6111_v29 = vor.u32 %v5661_v24, %v3832_v23 }
   0x8   :  { %253 = vmatpush.bf16.msra.mxu0 %v6074_v16  ;;  %v3834_v30 = vld [vmem:[%s10162_s2 + $0x258] sm:$0xf0]  ;;  %v5676_v31 = vld [vmem:[%s10162_s2 + $0x2d4] sm:$0xf]  ;;  %v6124_v33 = vor.u32 %v5677_v27, %v3896_v26  ;;  %v3824_v35 = vld [vmem:[%s10162_s2 + $0x240] sm:$0xf] }
   0x9   :  { %v3898_v32 = vld [vmem:[%s10162_s2 + $0x2d8] sm:$0xf0]  ;;  %266 = vmatpush.bf16.msra.mxu1 %v6076_v17  ;;  %279 = vmatpush.bf16.msra.mxu2 %v6088_v21  ;;  %v6126_v34 = vor.u32 %v5660_v28, %v3834_v30  ;;  %v5659_v36 = vld [vmem:[%s10162_s2 + $0x244] sm:$0xf0]  ;;  %v3888_v37 = vld [vmem:[%s10162_s2 + $0x2c0] sm:$0xf] }
   0xa   :  { %292 = vmatpush.bf16.msra.mxu3 %v6099_v25  ;;  %v6138_v38 = vor.u32 %v5676_v31, %v3898_v32  ;;  %v5675_v39 = vld [vmem:[%s10162_s2 + $0x2c4] sm:$0xf0]  ;;  %v5658_v40 = vld [vmem:[%s10162_s2 + $0x244] sm:$0xf]  ;;  %v3826_v41 = vld [vmem:[%s10162_s2 + $0x248] sm:$0xf0]  ;;  %v6156_v44 = vor.u32 %v5659_v36, %v3824_v35 }
   0xb   :  { %v5674_v42 = vld [vmem:[%s10162_s2 + $0x2c4] sm:$0xf]  ;;  %v3890_v43 = vld [vmem:[%s10162_s2 + $0x2c8] sm:$0xf0]  ;;  %v6160_v45 = vor.u32 %v5675_v39, %v3888_v37  ;;  %v6162_v46 = vor.u32 %v5658_v40, %v3826_v41  ;;  %v3816_v47 = vld [vmem:[%s10162_s2 + $0x230] sm:$0xf] }
   0xc   :  { %254 = vmatpush.bf16.msra.mxu0 %v6111_v29  ;;  %v5657_v48 = vld [vmem:[%s10162_s2 + $0x234] sm:$0xf0]  ;;  %v3880_v49 = vld [vmem:[%s10162_s2 + $0x2b0] sm:$0xf]  ;;  %v6174_v50 = vor.u32 %v5674_v42, %v3890_v43  ;;  %v5656_v52 = vld [vmem:[%s10162_s2 + $0x234] sm:$0xf] }
   0xd   :  { %267 = vmatpush.bf16.msra.mxu1 %v6124_v33  ;;  %280 = vmatpush.bf16.msra.mxu2 %v6126_v34  ;;  %v5673_v51 = vld [vmem:[%s10162_s2 + $0x2b4] sm:$0xf0]  ;;  %v3818_v53 = vld [vmem:[%s10162_s2 + $0x238] sm:$0xf0]  ;;  %v5672_v54 = vld [vmem:[%s10162_s2 + $0x2b4] sm:$0xf]  ;;  %v6192_v56 = vor.u32 %v5657_v48, %v3816_v47 }
   0xe   :  { %293 = vmatpush.bf16.msra.mxu3 %v6138_v38  ;;  %v3882_v55 = vld [vmem:[%s10162_s2 + $0x2b8] sm:$0xf0]  ;;  %v6196_v57 = vor.u32 %v5673_v51, %v3880_v49  ;;  %v6198_v58 = vor.u32 %v5656_v52, %v3818_v53  ;;  %v3808_v59 = vld [vmem:[%s10162_s2 + $0x220] sm:$0xf]  ;;  %v5655_v60 = vld [vmem:[%s10162_s2 + $0x224] sm:$0xf0] }
   0xf   :  { %v3872_v61 = vld [vmem:[%s10162_s2 + $0x2a0] sm:$0xf]  ;;  %v6210_v62 = vor.u32 %v5672_v54, %v3882_v55  ;;  %v5671_v63 = vld [vmem:[%s10162_s2 + $0x2a4] sm:$0xf0]  ;;  %v5654_v0 = vld [vmem:[%s10162_s2 + $0x224] sm:$0xf]  ;;  %v6228_v5 = vor.u32 %v5655_v60, %v3808_v59 }
  0x10   :  { %255 = vmatpush.bf16.msra.mxu0 %v6156_v44  ;;  %v3810_v1 = vld [vmem:[%s10162_s2 + $0x228] sm:$0xf0]  ;;  %v5670_v2 = vld [vmem:[%s10162_s2 + $0x2a4] sm:$0xf]  ;;  %v6232_v6 = vor.u32 %v5671_v63, %v3872_v61  ;;  %v3800_v10 = vld [vmem:[%s10162_s2 + $0x210] sm:$0xf] }
  0x11   :  { %268 = vmatpush.bf16.msra.mxu1 %v6160_v45  ;;  %281 = vmatpush.bf16.msra.mxu2 %v6162_v46  ;;  %v3874_v4 = vld [vmem:[%s10162_s2 + $0x2a8] sm:$0xf0]  ;;  %v6234_v9 = vor.u32 %v5654_v0, %v3810_v1  ;;  %v5653_v11 = vld [vmem:[%s10162_s2 + $0x214] sm:$0xf0]  ;;  %v3864_v13 = vld [vmem:[%s10162_s2 + $0x290] sm:$0xf] }
  0x12   :  { %294 = vmatpush.bf16.msra.mxu3 %v6174_v50  ;;  %v6246_v14 = vor.u32 %v5670_v2, %v3874_v4  ;;  %v5669_v15 = vld [vmem:[%s10162_s2 + $0x294] sm:$0xf0]  ;;  %v5652_v18 = vld [vmem:[%s10162_s2 + $0x214] sm:$0xf]  ;;  %v3802_v19 = vld [vmem:[%s10162_s2 + $0x218] sm:$0xf0]  ;;  %v6264_v23 = vor.u32 %v5653_v11, %v3800_v10 }
  0x13   :  { %v5668_v20 = vld [vmem:[%s10162_s2 + $0x294] sm:$0xf]  ;;  %v3866_v22 = vld [vmem:[%s10162_s2 + $0x298] sm:$0xf0]  ;;  %v3792_v24 = vld [vmem:[%s10162_s2 + $0x200] sm:$0xf]  ;;  %v6274_v27 = vor.u32 %v5669_v15, %v3864_v13  ;;  %v6276_v28 = vor.u32 %v5652_v18, %v3802_v19 }
  0x14   :  { %256 = vmatpush.bf16.msra.mxu0 %v6192_v56  ;;  %v5651_v26 = vld [vmem:[%s10162_s2 + $0x204] sm:$0xf0]  ;;  %v3856_v30 = vld [vmem:[%s10162_s2 + $0x280] sm:$0xf]  ;;  %v5650_v32 = vld [vmem:[%s10162_s2 + $0x204] sm:$0xf]  ;;  %v6288_v35 = vor.u32 %v5668_v20, %v3866_v22 }
  0x15   :  { %269 = vmatpush.bf16.msra.mxu1 %v6196_v57  ;;  %282 = vmatpush.bf16.msra.mxu2 %v6198_v58  ;;  %v5667_v31 = vld [vmem:[%s10162_s2 + $0x284] sm:$0xf0]  ;;  %v3794_v36 = vld [vmem:[%s10162_s2 + $0x208] sm:$0xf0]  ;;  %v5666_v37 = vld [vmem:[%s10162_s2 + $0x284] sm:$0xf]  ;;  %v6309_v43 = vor.u32 %v5651_v26, %v3792_v24 }
  0x16   :  { %295 = vmatpush.bf16.msra.mxu3 %v6210_v62  ;;  %v3858_v39 = vld [vmem:[%s10162_s2 + $0x288] sm:$0xf0]  ;;  %v3976_v40 = vld [vmem:[%s10162_s2 + $0x70] sm:$0xf]  ;;  %v5633_v41 = vld [vmem:[%s10162_s2 + $0x74] sm:$0xf0]  ;;  %v6322_v51 = vor.u32 %v5667_v31, %v3856_v30  ;;  %v6324_v52 = vor.u32 %v5650_v32, %v3794_v36 }
  0x17   :  { %v4040_v42 = vld [vmem:[%s10162_s2 + $0xf0] sm:$0xf]  ;;  %v5649_v47 = vld [vmem:[%s10162_s2 + $0xf4] sm:$0xf0]  ;;  %v5632_v48 = vld [vmem:[%s10162_s2 + $0x74] sm:$0xf]  ;;  %v6333_v55 = vor.u32 %v5666_v37, %v3858_v39  ;;  %v6335_v59 = vor.u32 %v5633_v41, %v3976_v40 }
  0x18   :  { %257 = vmatpush.bf16.msra.mxu0 %v6228_v5  ;;  %v3978_v49 = vld [vmem:[%s10162_s2 + $0x78] sm:$0xf0]  ;;  %v5648_v53 = vld [vmem:[%s10162_s2 + $0xf4] sm:$0xf]  ;;  %v6337_v60 = vor.u32 %v5649_v47, %v4040_v42  ;;  %v3968_v63 = vld [vmem:[%s10162_s2 + $0x60] sm:$0xf] }
  0x19   :  { %270 = vmatpush.bf16.msra.mxu1 %v6232_v6  ;;  %283 = vmatpush.bf16.msra.mxu2 %v6234_v9  ;;  %v4042_v54 = vld [vmem:[%s10162_s2 + $0xf8] sm:$0xf0]  ;;  %v6339_v61 = vor.u32 %v5632_v48, %v3978_v49  ;;  %v5631_v0 = vld [vmem:[%s10162_s2 + $0x64] sm:$0xf0]  ;;  %v4032_v1 = vld [vmem:[%s10162_s2 + $0xe0] sm:$0xf] }
  0x1a   :  { %296 = vmatpush.bf16.msra.mxu3 %v6246_v14  ;;  %v6351_v2 = vor.u32 %v5648_v53, %v4042_v54  ;;  %v5647_v4 = vld [vmem:[%s10162_s2 + $0xe4] sm:$0xf0]  ;;  %v5630_v10 = vld [vmem:[%s10162_s2 + $0x64] sm:$0xf]  ;;  %v3970_v11 = vld [vmem:[%s10162_s2 + $0x68] sm:$0xf0]  ;;  %v6375_v19 = vor.u32 %v5631_v0, %v3968_v63 }
  0x1b   :  { %10458 = vst [vmem:[#allocation2_spill] sm:$0xff] %v6339_v61  ;;  %v5646_v13 = vld [vmem:[%s10162_s2 + $0xe4] sm:$0xf]  ;;  %v4034_v15 = vld [vmem:[%s10162_s2 + $0xe8] sm:$0xf0]  ;;  %v6379_v24 = vor.u32 %v5647_v4, %v4032_v1  ;;  %v6381_v26 = vor.u32 %v5630_v10, %v3970_v11  ;;  %vm9529_vm4 = vmand %vm1883_vm0, %vm1884_vm1 }
  0x1c   :  { %258 = vmatpush.bf16.msra.mxu0 %v6264_v23  ;;  %10459 = vst [vmem:[#allocation3_spill] sm:$0xff] %v6351_v2  ;;  %v51_v18 = vld [vmem:[%s10163_s1] sm:$0xff]  ;;  %v3960_v30 = vld [vmem:[%s10162_s2 + $0x50] sm:$0xf]  ;;  %v5629_v31 = vld [vmem:[%s10162_s2 + $0x54] sm:$0xf0]  ;;  %v6393_v36 = vor.u32 %v5646_v13, %v4034_v15 }
  0x1d   :  { %271 = vmatpush.bf16.msra.mxu1 %v6274_v27  ;;  %284 = vmatpush.bf16.msra.mxu2 %v6276_v28  ;;  %10460 = vst [vmem:[#allocation4_spill] sm:$0xff] %v6375_v19  ;;  %v86_v20 = vunpack.c.l.b16 %v51_v18  ;;  %v87_v22 = vunpack.c.h.b16 %v51_v18  ;;  %v4024_v32 = vld [vmem:[%s10162_s2 + $0xd0] sm:$0xf]  ;;  %v5645_v37 = vld [vmem:[%s10162_s2 + $0xd4] sm:$0xf0]  ;;  %v6415_v49 = vor.u32 %v5629_v31, %v3960_v30  ;;  %vm9559_vm5 = vmand %vm1886_vm2, %vm1887_vm3 }
  0x1e   :  { %297 = vmatpush.bf16.msra.mxu3 %v6288_v35  ;;  %10461 = vst [vmem:[#allocation5_spill] sm:$0xff] %v6379_v24  ;;  %v5628_v39 = vld [vmem:[%s10162_s2 + $0x54] sm:$0xf]  ;;  %v3962_v40 = vld [vmem:[%s10162_s2 + $0x58] sm:$0xf0]  ;;  %v6420_v53 = vor.u32 %v5645_v37, %v4024_v32  ;;  %vm1889_vm6 = vmor %vm9559_vm5, %vm9529_vm4 }
  0x1f   :  { %10462 = vst [vmem:[#allocation6_spill] sm:$0xff] %v6381_v26  ;;  %v6404_v41 = vpack.c.b16 %v86_v20, %v86_v20  ;;  %v5644_v42 = vld [vmem:[%s10162_s2 + $0xd4] sm:$0xf]  ;;  %v4026_v47 = vld [vmem:[%s10162_s2 + $0xd8] sm:$0xf0]  ;;  %v6412_v48 = vpack.c.b16 %v87_v22, %v87_v22  ;;  %v6422_v54 = vor.u32 %v5628_v39, %v3962_v40 }
  0x20   :  { %259 = vmatpush.bf16.msra.mxu0 %v6309_v43  ;;  %10463 = vst [vmem:[#allocation7_spill] sm:$0xff] %v6393_v36  ;;  %v3952_v63 = vld [vmem:[%s10162_s2 + $0x40] sm:$0xf]  ;;  %v5627_v0 = vld [vmem:[%s10162_s2 + $0x44] sm:$0xf0]  ;;  %v6434_v4 = vor.u32 %v5644_v42, %v4026_v47 }
  0x21   :  { %272 = vmatpush.bf16.msra.mxu1 %v6322_v51  ;;  %285 = vmatpush.bf16.msra.mxu2 %v6324_v52  ;;  %10464 = vst [vmem:[#allocation8_spill] sm:$0xff] %v6415_v49  ;;  %v4016_v1 = vld [vmem:[%s10162_s2 + $0xc0] sm:$0xf]  ;;  %v5643_v10 = vld [vmem:[%s10162_s2 + $0xc4] sm:$0xf0]  ;;  %v6455_v20 = vor.u32 %v5627_v0, %v3952_v63 }
  0x22   :  { %298 = vmatpush.bf16.msra.mxu3 %v6333_v55  ;;  %10465 = vst [vmem:[#allocation9_spill] sm:$0xff] %v6420_v53  ;;  %v5626_v11 = vld [vmem:[%s10162_s2 + $0x44] sm:$0xf]  ;;  %v3954_v13 = vld [vmem:[%s10162_s2 + $0x48] sm:$0xf0]  ;;  %v6459_v22 = vor.u32 %v5643_v10, %v4016_v1 }
  0x23   :  { %10466 = vst [vmem:[#allocation10_spill] sm:$0xff] %v6422_v54  ;;  %260 = vmatmul.bf16.vlgmr.msra.gmra.mxu0 %v6404_v41  ;;  %v5642_v15 = vld [vmem:[%s10162_s2 + $0xc4] sm:$0xf]  ;;  %v4018_v18 = vld [vmem:[%s10162_s2 + $0xc8] sm:$0xf0]  ;;  %v6461_v30 = vor.u32 %v5626_v11, %v3954_v13 }
  0x24   :  { %471 = vmatpush.bf16.msrb.mxu0 %v6335_v59  ;;  %286 = vmatmul.bf16.vlgmr.msra.gmra.mxu2 %v6404_v41  ;;  %10467 = vst [vmem:[#allocation11_spill] sm:$0xff] %v6434_v4  ;;  %v3944_v31 = vld [vmem:[%s10162_s2 + $0x30] sm:$0xf]  ;;  %v5625_v32 = vld [vmem:[%s10162_s2 + $0x34] sm:$0xf0]  ;;  %v6473_v39 = vor.u32 %v5642_v15, %v4018_v18 }
  0x25   :  { %484 = vmatpush.bf16.msrb.mxu1 %v6337_v60  ;;  %497 = vmatpush.bf16.msrb.mxu2 %v6339_v61  ;;  %10468 = vst [vmem:[#allocation12_spill] sm:$0xff] %v6455_v20  ;;  %v4008_v37 = vld [vmem:[%s10162_s2 + $0xb0] sm:$0xf]  ;;  %v5641_v40 = vld [vmem:[%s10162_s2 + $0xb4] sm:$0xf0]  ;;  %v6491_v1 = vor.u32 %v5625_v32, %v3944_v31 }
  0x26   :  { %510 = vmatpush.bf16.msrb.mxu3 %v6351_v2  ;;  %273 = vmatmul.bf16.vlgmr.msra.gmra.mxu1 %v6412_v48  ;;  %10469 = vst [vmem:[#allocation13_spill] sm:$0xff] %v6459_v22  ;;  %v5624_v42 = vld [vmem:[%s10162_s2 + $0x34] sm:$0xf]  ;;  %v3946_v47 = vld [vmem:[%s10162_s2 + $0x38] sm:$0xf0]  ;;  %v6495_v10 = vor.u32 %v5641_v40, %v4008_v37 }
  0x27   :  { %299 = vmatmul.bf16.vlgmr.msra.gmra.mxu3 %v6412_v48  ;;  %10470 = vst [vmem:[#allocation14_spill] sm:$0xff] %v6461_v30  ;;  %v5640_v63 = vld [vmem:[%s10162_s2 + $0xb4] sm:$0xf]  ;;  %v4010_v0 = vld [vmem:[%s10162_s2 + $0xb8] sm:$0xf0]  ;;  %v6497_v11 = vor.u32 %v5624_v42, %v3946_v47 }
  0x28   :  { %472 = vmatpush.bf16.msrb.mxu0 %v6375_v19  ;;  %10471 = vst [vmem:[#allocation15_spill] sm:$0xff] %v6473_v39  ;;  %v3936_v13 = vld [vmem:[%s10162_s2 + $0x20] sm:$0xf]  ;;  %v5623_v15 = vld [vmem:[%s10162_s2 + $0x24] sm:$0xf0]  ;;  %v6509_v31 = vor.u32 %v5640_v63, %v4010_v0 }
  0x29   :  { %485 = vmatpush.bf16.msrb.mxu1 %v6379_v24  ;;  %498 = vmatpush.bf16.msrb.mxu2 %v6381_v26  ;;  %10472 = vst [vmem:[#allocation16_spill] sm:$0xff] %v6491_v1  ;;  %v4000_v18 = vld [vmem:[%s10162_s2 + $0xa0] sm:$0xf]  ;;  %v5639_v32 = vld [vmem:[%s10162_s2 + $0xa4] sm:$0xf0]  ;;  %v6527_v63 = vor.u32 %v5623_v15, %v3936_v13 }
  0x2a   :  { %511 = vmatpush.bf16.msrb.mxu3 %v6393_v36  ;;  %10473 = vst [vmem:[#allocation17_spill] sm:$0xff] %v6495_v10  ;;  %v5622_v37 = vld [vmem:[%s10162_s2 + $0x24] sm:$0xf]  ;;  %v3938_v40 = vld [vmem:[%s10162_s2 + $0x28] sm:$0xf0]  ;;  %v6531_v0 = vor.u32 %v5639_v32, %v4000_v18 }
  0x2b   :  { %10474 = vst [vmem:[#allocation18_spill] sm:$0xff] %v6497_v11  ;;  %v5638_v42 = vld [vmem:[%s10162_s2 + $0xa4] sm:$0xf]  ;;  %v4002_v47 = vld [vmem:[%s10162_s2 + $0xa8] sm:$0xf0] }
  0x2c   :  { %473 = vmatpush.bf16.msrb.mxu0 %v6415_v49  ;;  %10475 = vst [vmem:[#allocation19_spill] sm:$0xff] %v6509_v31  ;;  %v3992_v13 = vld [vmem:[%s10162_s2 + $0x90] sm:$0xf]  ;;  %v6545_v15 = vor.u32 %v5638_v42, %v4002_v47  ;;  %v5637_v18 = vld [vmem:[%s10162_s2 + $0x94] sm:$0xf0] }
  0x2d   :  { %486 = vmatpush.bf16.msrb.mxu1 %v6420_v53  ;;  %499 = vmatpush.bf16.msrb.mxu2 %v6422_v54  ;;  %10476 = vst [vmem:[#allocation20_spill] sm:$0xff] %v6527_v63  ;;  %v5620_v32 = vld [vmem:[%s10162_s2 + $0x14] sm:$0xf]  ;;  %v3994_v42 = vld [vmem:[%s10162_s2 + $0x98] sm:$0xf0] }
  0x2e   :  { %512 = vmatpush.bf16.msrb.mxu3 %v6434_v4  ;;  %10477 = vst [vmem:[#allocation21_spill] sm:$0xff] %v6531_v0  ;;  %v5696_v4 = vld [vmem:[%s10162_s2 + $0x474] sm:$0xf]  ;;  %v4138_v54 = vld [vmem:[%s10162_s2 + $0x478] sm:$0xf0] }
  0x2f   :  { %10479 = vst [vmem:[#allocation23_spill] sm:$0xff] %v6545_v15  ;;  %v4202_v49 = vld [vmem:[%s10162_s2 + $0x4f8] sm:$0xf0] }
  0x30   :  { %474 = vmatpush.bf16.msrb.mxu0 %v6455_v20  ;;  %v18_v20 = vld [vmem:[%s10164_s0] sm:$0xff] }
  0x31   :  { %487 = vmatpush.bf16.msrb.mxu1 %v6459_v22  ;;  %500 = vmatpush.bf16.msrb.mxu2 %v6461_v30  ;;  %v3928_v30 = vld [vmem:[%s10162_s2 + $0x10] sm:$0xf]  ;;  %v5621_v22 = vld [vmem:[%s10162_s2 + $0x14] sm:$0xf0]  ;;  %v305_v53 = vunpack.c.l.b16 %v18_v20  ;;  %v306_v36 = vunpack.c.h.b16 %v18_v20  ;;  %v4192_v20 = vld [vmem:[%s10162_s2 + $0x4e0] sm:$0xf] }
  0x32   :  { %513 = vmatpush.bf16.msrb.mxu3 %v6473_v39  ;;  %v6533_v39 = vor.u32 %v5622_v37, %v3938_v40  ;;  %v3930_v37 = vld [vmem:[%s10162_s2 + $0x18] sm:$0xf0]  ;;  %v5636_v40 = vld [vmem:[%s10162_s2 + $0x94] sm:$0xf]  ;;  %v6563_v47 = vor.u32 %v5621_v22, %v3928_v30  ;;  %v5635_v30 = vld [vmem:[%s10162_s2 + $0x84] sm:$0xf0] }
  0x33   :  { %v6578_v22 = vor.u32 %v5620_v32, %v3930_v37  ;;  %v3986_v32 = vld [vmem:[%s10162_s2 + $0x88] sm:$0xf0]  ;;  %v4136_v37 = vld [vmem:[%s10162_s2 + $0x470] sm:$0xf] }
  0x34   :  { %475 = vmatpush.bf16.msrb.mxu0 %v6491_v1  ;;  %10478 = vst [vmem:[#allocation22_spill] sm:$0xff] %v6533_v39  ;;  %v6576_v1 = vor.u32 %v5637_v18, %v3992_v13  ;;  %v3922_v13 = vld [vmem:[%s10162_s2 + $0x8] sm:$0xf0]  ;;  %v5634_v18 = vld [vmem:[%s10162_s2 + $0x84] sm:$0xf] }
  0x35   :  { %488 = vmatpush.bf16.msrb.mxu1 %v6495_v10  ;;  %501 = vmatpush.bf16.msrb.mxu2 %v6497_v11  ;;  %10480 = vst [vmem:[#allocation24_spill] sm:$0xff] %v6563_v47  ;;  %v5619_v11 = vld [vmem:[%s10162_s2 + $0x4] sm:$0xf0]  ;;  %v3984_v10 = vld [vmem:[%s10162_s2 + $0x80] sm:$0xf]  ;;  %v6635_v26 = vor.u32 %v5634_v18, %v3986_v32 }
  0x36   :  { %514 = vmatpush.bf16.msrb.mxu3 %v6509_v31  ;;  %v3920_v31 = vld [vmem:[%s10162_s2] sm:$0xf]  ;;  %10481 = vst [vmem:[#allocation25_spill] sm:$0xff] %v6576_v1  ;;  %v4130_v18 = vld [vmem:[%s10162_s2 + $0x468] sm:$0xf0] }
  0x37   :  { %10482 = vst [vmem:[#allocation26_spill] sm:$0xff] %v6578_v22  ;;  %v4194_v32 = vld [vmem:[%s10162_s2 + $0x4e8] sm:$0xf0] }
  0x38   :  { %476 = vmatpush.bf16.msrb.mxu0 %v6527_v63  ;;  %v5618_v63 = vld [vmem:[%s10162_s2 + $0x4] sm:$0xf]  ;;  %10487 = vst [vmem:[#allocation31_spill] sm:$0xff] %v6635_v26 }
  0x39   :  { %489 = vmatpush.bf16.msrb.mxu1 %v6531_v0  ;;  %502 = vmatpush.bf16.msrb.mxu2 %v6533_v39  ;;  %v6590_v0 = vor.u32 %v5636_v40, %v3994_v42  ;;  %v5697_v40 = vld [vmem:[%s10162_s2 + $0x474] sm:$0xf0]  ;;  %v4200_v42 = vld [vmem:[%s10162_s2 + $0x4f0] sm:$0xf] }
  0x3a   :  { %515 = vmatpush.bf16.msrb.mxu3 %v6545_v15  ;;  %v6611_v15 = vor.u32 %v5619_v11, %v3920_v31  ;;  %v5713_v39 = vld [vmem:[%s10162_s2 + $0x4f4] sm:$0xf0]  ;;  %v6626_v11 = vor.u32 %v5618_v63, %v3922_v13  ;;  %v5712_v31 = vld [vmem:[%s10162_s2 + $0x4f4] sm:$0xf]  ;;  %v4128_v63 = vld [vmem:[%s10162_s2 + $0x460] sm:$0xf] }
  0x3b   :  { %10483 = vst [vmem:[#allocation27_spill] sm:$0xff] %v6590_v0  ;;  %v6653_v13 = vor.u32 %v5712_v31, %v4202_v49  ;;  %v6668_v49 = vpack.c.b16 %v306_v36, %v306_v36  ;;  %v5693_v31 = vld [vmem:[%s10162_s2 + $0x454] sm:$0xf0] }
  0x3c   :  { %477 = vmatpush.bf16.msrb.mxu0 %v6563_v47  ;;  %10484 = vst [vmem:[#allocation28_spill] sm:$0xff] %v6611_v15  ;;  %v6624_v47 = vor.u32 %v5635_v30, %v3984_v10  ;;  %v6641_v10 = vor.u32 %v5696_v4, %v4138_v54  ;;  %v5695_v30 = vld [vmem:[%s10162_s2 + $0x464] sm:$0xf0]  ;;  %v5694_v4 = vld [vmem:[%s10162_s2 + $0x464] sm:$0xf] }
  0x3d   :  { %490 = vmatpush.bf16.msrb.mxu1 %v6576_v1  ;;  %503 = vmatpush.bf16.msrb.mxu2 %v6578_v22  ;;  %10486 = vst [vmem:[#allocation30_spill] sm:$0xff] %v6626_v11  ;;  %v6637_v1 = vor.u32 %v5697_v40, %v4136_v37  ;;  %v6639_v22 = vor.u32 %v5713_v39, %v4200_v42  ;;  %v5711_v54 = vld [vmem:[%s10162_s2 + $0x4e4] sm:$0xf0]  ;;  %v4120_v42 = vld [vmem:[%s10162_s2 + $0x450] sm:$0xf]  ;;  %v564_v2 = vshrl.u32 %v6668_v49, 16 }
  0x3e   :  { %10485 = vst [vmem:[#allocation29_spill] sm:$0xff] %v6624_v47  ;;  %516 = vmatpush.bf16.msrb.mxu3 %v6590_v0  ;;  %v6655_v39 = vpack.c.b16 %v305_v53, %v305_v53  ;;  %v5710_v53 = vld [vmem:[%s10162_s2 + $0x4e4] sm:$0xf]  ;;  %v6678_v37 = vor.u32 %v5695_v30, %v4128_v63  ;;  %v6682_v36 = vor.u32 %v5711_v54, %v4192_v20  ;;  %v4184_v63 = vld [vmem:[%s10162_s2 + $0x4d0] sm:$0xf] }
  0x3f   :  { %10488 = vst [vmem:[#allocation32_spill] sm:$0xff] %v6637_v1  ;;  %v6684_v40 = vor.u32 %v5694_v4, %v4130_v18  ;;  %v6697_v30 = vor.u32 %v5710_v53, %v4194_v32  ;;  %v5709_v20 = vld [vmem:[%s10162_s2 + $0x4d4] sm:$0xf0]  ;;  %v5692_v54 = vld [vmem:[%s10162_s2 + $0x454] sm:$0xf]  ;;  %v6717_v32 = vor.u32 %v5693_v31, %v4120_v42 }
  0x40   :  { %10489 = vst [vmem:[#allocation33_spill] sm:$0xff] %v6639_v22  ;;  %478 = vmatpush.bf16.msrb.mxu0 %v6611_v15  ;;  %v4122_v4 = vld [vmem:[%s10162_s2 + $0x458] sm:$0xf0]  ;;  %v5708_v18 = vld [vmem:[%s10162_s2 + $0x4d4] sm:$0xf]  ;;  %v557_v0 = vshrl.u32 %v6655_v39, 16 }
  0x41   :  { %10490 = vst [vmem:[#allocation34_spill] sm:$0xff] %v6641_v10  ;;  %491 = vmatpush.bf16.msrb.mxu1 %v6624_v47  ;;  %504 = vmatpush.bf16.msrb.mxu2 %v6626_v11  ;;  %v4186_v53 = vld [vmem:[%s10162_s2 + $0x4d8] sm:$0xf0]  ;;  %v4176_v42 = vld [vmem:[%s10162_s2 + $0x4c0] sm:$0xf] }
  0x42   :  { %10491 = vst [vmem:[#allocation35_spill] sm:$0xff] %v6653_v13  ;;  %517 = vmatpush.bf16.msrb.mxu3 %v6635_v26  ;;  %v6736_v31 = vor.u32 %v5708_v18, %v4186_v53  ;;  %v4178_v18 = vld [vmem:[%s10162_s2 + $0x4c8] sm:$0xf0]  ;;  %v559_v26 = vshll.u32 %v6655_v39, 16 }
  0x43   :  { %10492 = vst [vmem:[#allocation36_spill] sm:$0xff] %v6678_v37  ;;  %479 = vmatmul.bf16.vlgmr.msrb.gmra.mxu0 %v6655_v39 }
  0x44   :  { %732 = vmatpush.bf16.msra.mxu0 %v6637_v1  ;;  %10493 = vst [vmem:[#allocation37_spill] sm:$0xff] %v6682_v36  ;;  %505 = vmatmul.bf16.vlgmr.msrb.gmra.mxu2 %v6655_v39  ;;  %v5689_v1 = vld [vmem:[%s10162_s2 + $0x434] sm:$0xf0]  ;;  %v561_v24 = vrot.slane %v559_v26, 1 }
  0x45   :  { %745 = vmatpush.bf16.msra.mxu1 %v6639_v22  ;;  %758 = vmatpush.bf16.msra.mxu2 %v6641_v10  ;;  %10494 = vst [vmem:[#allocation38_spill] sm:$0xff] %v6684_v40  ;;  %v6724_v10 = vor.u32 %v5692_v54, %v4122_v4  ;;  %v4112_v22 = vld [vmem:[%s10162_s2 + $0x440] sm:$0xf]  ;;  %v4114_v54 = vld [vmem:[%s10162_s2 + $0x448] sm:$0xf0] }
  0x46   :  { %771 = vmatpush.bf16.msra.mxu3 %v6653_v13  ;;  %10495 = vst [vmem:[#allocation39_spill] sm:$0xff] %v6697_v30  ;;  %492 = vmatmul.bf16.vlgmr.msrb.gmra.mxu1 %v6668_v49  ;;  %v6722_v13 = vor.u32 %v5709_v20, %v4184_v63  ;;  %v5707_v63 = vld [vmem:[%s10162_s2 + $0x4c4] sm:$0xf0]  ;;  %v5690_v20 = vld [vmem:[%s10162_s2 + $0x444] sm:$0xf] }
  0x47   :  { %518 = vmatmul.bf16.vlgmr.msrb.gmra.mxu3 %v6668_v49  ;;  %10496 = vst [vmem:[#allocation40_spill] sm:$0xff] %v6717_v32  ;;  %v5706_v4 = vld [vmem:[%s10162_s2 + $0x4c4] sm:$0xf] }
  0x48   :  { %733 = vmatpush.bf16.msra.mxu0 %v6678_v37  ;;  %10497 = vst [vmem:[#allocation41_spill] sm:$0xff] %v6722_v13  ;;  %v5691_v37 = vld [vmem:[%s10162_s2 + $0x444] sm:$0xf0] }
  0x49   :  { %746 = vmatpush.bf16.msra.mxu1 %v6682_v36  ;;  %759 = vmatpush.bf16.msra.mxu2 %v6684_v40  ;;  %10498 = vst [vmem:[#allocation42_spill] sm:$0xff] %v6724_v10  ;;  %v6754_v53 = vor.u32 %v5691_v37, %v4112_v22  ;;  %v6760_v40 = vor.u32 %v5690_v20, %v4114_v54  ;;  %v4104_v36 = vld [vmem:[%s10162_s2 + $0x430] sm:$0xf]  ;;  %v4106_v20 = vld [vmem:[%s10162_s2 + $0x438] sm:$0xf0] }
  0x4a   :  { %772 = vmatpush.bf16.msra.mxu3 %v6697_v30  ;;  %10499 = vst [vmem:[#allocation43_spill] sm:$0xff] %v6736_v31  ;;  %v6758_v30 = vor.u32 %v5707_v63, %v4176_v42  ;;  %v4168_v22 = vld [vmem:[%s10162_s2 + $0x4b0] sm:$0xf]  ;;  %v6772_v37 = vor.u32 %v5706_v4, %v4178_v18  ;;  %v5705_v42 = vld [vmem:[%s10162_s2 + $0x4b4] sm:$0xf0]  ;;  %v6790_v18 = vor.u32 %v5689_v1, %v4104_v36 }
  0x4b   :  { %10500 = vst [vmem:[#allocation44_spill] sm:$0xff] %v6754_v53  ;;  %v5688_v63 = vld [vmem:[%s10162_s2 + $0x434] sm:$0xf]  ;;  %v4170_v4 = vld [vmem:[%s10162_s2 + $0x4b8] sm:$0xf0] }
  0x4c   :  { %734 = vmatpush.bf16.msra.mxu0 %v6717_v32  ;;  %10501 = vst [vmem:[#allocation45_spill] sm:$0xff] %v6758_v30  ;;  %v5704_v54 = vld [vmem:[%s10162_s2 + $0x4b4] sm:$0xf]  ;;  %v5687_v32 = vld [vmem:[%s10162_s2 + $0x424] sm:$0xf0] }
  0x4d   :  { %747 = vmatpush.bf16.msra.mxu1 %v6722_v13  ;;  %760 = vmatpush.bf16.msra.mxu2 %v6724_v10  ;;  %10502 = vst [vmem:[#allocation46_spill] sm:$0xff] %v6760_v40  ;;  %v6796_v10 = vor.u32 %v5688_v63, %v4106_v20  ;;  %v4096_v13 = vld [vmem:[%s10162_s2 + $0x420] sm:$0xf]  ;;  %v6808_v36 = vor.u32 %v5704_v54, %v4170_v4  ;;  %v4098_v63 = vld [vmem:[%s10162_s2 + $0x428] sm:$0xf0] }
  0x4e   :  { %773 = vmatpush.bf16.msra.mxu3 %v6736_v31  ;;  %10503 = vst [vmem:[#allocation47_spill] sm:$0xff] %v6772_v37  ;;  %v6794_v31 = vor.u32 %v5705_v42, %v4168_v22  ;;  %v4160_v1 = vld [vmem:[%s10162_s2 + $0x4a0] sm:$0xf]  ;;  %v5703_v22 = vld [vmem:[%s10162_s2 + $0x4a4] sm:$0xf0]  ;;  %v6826_v4 = vor.u32 %v5687_v32, %v4096_v13 }
  0x4f   :  { %10504 = vst [vmem:[#allocation48_spill] sm:$0xff] %v6790_v18  ;;  %v5686_v42 = vld [vmem:[%s10162_s2 + $0x424] sm:$0xf]  ;;  %v4162_v54 = vld [vmem:[%s10162_s2 + $0x4a8] sm:$0xf0] }
  0x50   :  { %735 = vmatpush.bf16.msra.mxu0 %v6754_v53  ;;  %10505 = vst [vmem:[#allocation49_spill] sm:$0xff] %v6794_v31  ;;  %v5702_v20 = vld [vmem:[%s10162_s2 + $0x4a4] sm:$0xf]  ;;  %v5685_v53 = vld [vmem:[%s10162_s2 + $0x414] sm:$0xf0] }
  0x51   :  { %748 = vmatpush.bf16.msra.mxu1 %v6758_v30  ;;  %761 = vmatpush.bf16.msra.mxu2 %v6760_v40  ;;  %10506 = vst [vmem:[#allocation50_spill] sm:$0xff] %v6796_v10  ;;  %v6833_v40 = vor.u32 %v5703_v22, %v4160_v1  ;;  %v6835_v30 = vor.u32 %v5686_v42, %v4098_v63  ;;  %v4152_v13 = vld [vmem:[%s10162_s2 + $0x490] sm:$0xf]  ;;  %v5701_v32 = vld [vmem:[%s10162_s2 + $0x494] sm:$0xf0] }
  0x52   :  { %774 = vmatpush.bf16.msra.mxu3 %v6772_v37  ;;  %10507 = vst [vmem:[#allocation51_spill] sm:$0xff] %v6808_v36  ;;  %v4088_v37 = vld [vmem:[%s10162_s2 + $0x410] sm:$0xf]  ;;  %v5684_v1 = vld [vmem:[%s10162_s2 + $0x414] sm:$0xf]  ;;  %v6879_v11 = vor.u32 %v5701_v32, %v4152_v13 }
  0x53   :  { %10508 = vst [vmem:[#allocation52_spill] sm:$0xff] %v6826_v4  ;;  %v4090_v22 = vld [vmem:[%s10162_s2 + $0x418] sm:$0xf0]  ;;  %v5700_v42 = vld [vmem:[%s10162_s2 + $0x494] sm:$0xf] }
  0x54   :  { %736 = vmatpush.bf16.msra.mxu0 %v6790_v18  ;;  %10509 = vst [vmem:[#allocation53_spill] sm:$0xff] %v6833_v40  ;;  %v4154_v63 = vld [vmem:[%s10162_s2 + $0x498] sm:$0xf0]  ;;  %v5699_v18 = vld [vmem:[%s10162_s2 + $0x484] sm:$0xf0]  ;;  %v6881_v47 = vor.u32 %v5684_v1, %v4090_v22 }
  0x55   :  { %749 = vmatpush.bf16.msra.mxu1 %v6794_v31  ;;  %762 = vmatpush.bf16.msra.mxu2 %v6796_v10  ;;  %10510 = vst [vmem:[#allocation54_spill] sm:$0xff] %v6835_v30  ;;  %v6847_v31 = vor.u32 %v5702_v20, %v4162_v54  ;;  %v4080_v20 = vld [vmem:[%s10162_s2 + $0x400] sm:$0xf]  ;;  %v5683_v54 = vld [vmem:[%s10162_s2 + $0x404] sm:$0xf0]  ;;  %v6891_v15 = vor.u32 %v5700_v42, %v4154_v63 }
  0x56   :  { %775 = vmatpush.bf16.msra.mxu3 %v6808_v36  ;;  %v6868_v36 = vor.u32 %v5685_v53, %v4088_v37  ;;  %v4144_v10 = vld [vmem:[%s10162_s2 + $0x480] sm:$0xf]  ;;  %10513 = vst [vmem:[#allocation57_spill] sm:$0xff] %v6881_v47  ;;  %v5682_v53 = vld [vmem:[%s10162_s2 + $0x404] sm:$0xf] }
  0x57   :  { %10511 = vst [vmem:[#allocation55_spill] sm:$0xff] %v6847_v31  ;;  %v4082_v37 = vld [vmem:[%s10162_s2 + $0x408] sm:$0xf0]  ;;  %v5698_v13 = vld [vmem:[%s10162_s2 + $0x484] sm:$0xf]  ;;  %v6923_v19 = vor.u32 %v5699_v18, %v4144_v10 }
  0x58   :  { %737 = vmatpush.bf16.msra.mxu0 %v6826_v4  ;;  %10512 = vst [vmem:[#allocation56_spill] sm:$0xff] %v6868_v36  ;;  %v566_v4 = vshll.u32 %v6668_v49, 16  ;;  %v4146_v32 = vld [vmem:[%s10162_s2 + $0x488] sm:$0xf0]  ;;  %v4328_v1 = vld [vmem:[%s10162_s2 + $0x370] sm:$0xf] }
  0x59   :  { %750 = vmatpush.bf16.msra.mxu1 %v6833_v40  ;;  %763 = vmatpush.bf16.msra.mxu2 %v6835_v30  ;;  %v5761_v22 = vld [vmem:[%s10162_s2 + $0x374] sm:$0xf0]  ;;  %v4392_v42 = vld [vmem:[%s10162_s2 + $0x3f0] sm:$0xf]  ;;  %v5760_v30 = vld [vmem:[%s10162_s2 + $0x374] sm:$0xf]  ;;  %v6935_v26 = vor.u32 %v5698_v13, %v4146_v32  ;;  %v6955_v32 = vor.u32 %v561_v24, %v557_v0 }
  0x5a   :  { %776 = vmatpush.bf16.msra.mxu3 %v6847_v31  ;;  %v5777_v63 = vld [vmem:[%s10162_s2 + $0x3f4] sm:$0xf0]  ;;  %v6912_v31 = vor.u32 %v5683_v54, %v4080_v20  ;;  %v4330_v40 = vld [vmem:[%s10162_s2 + $0x378] sm:$0xf0]  ;;  %10515 = vst [vmem:[#allocation59_spill] sm:$0xff] %v6923_v19  ;;  %v568_v61 = vrot.slane %v566_v4, 1 }
  0x5b   :  { %v5776_v20 = vld [vmem:[%s10162_s2 + $0x3f4] sm:$0xf]  ;;  %v4394_v54 = vld [vmem:[%s10162_s2 + $0x3f8] sm:$0xf0]  ;;  %10517 = vst [vmem:[#allocation61_spill] sm:$0xff] %v6935_v26  ;;  %v6939_v10 = vor.u32 %v5777_v63, %v4392_v42  ;;  %v6941_v18 = vor.u32 %v5760_v30, %v4330_v40 }
  0x5c   :  { %738 = vmatpush.bf16.msra.mxu0 %v6868_v36  ;;  %10514 = vst [vmem:[#allocation58_spill] sm:$0xff] %v6912_v31  ;;  %v6925_v36 = vor.u32 %v5682_v53, %v4082_v37  ;;  %v4320_v53 = vld [vmem:[%s10162_s2 + $0x360] sm:$0xf]  ;;  %v5759_v37 = vld [vmem:[%s10162_s2 + $0x364] sm:$0xf0]  ;;  %v6953_v13 = vor.u32 %v5776_v20, %v4394_v54 }
  0x5d   :  { %751 = vmatpush.bf16.msra.mxu1 %v6879_v11  ;;  %764 = vmatpush.bf16.msra.mxu2 %v6881_v47  ;;  %v6937_v47 = vor.u32 %v5761_v22, %v4328_v1  ;;  %10519 = vst [vmem:[#allocation63_spill] sm:$0xff] %v6939_v10  ;;  %v4384_v4 = vld [vmem:[%s10162_s2 + $0x3e0] sm:$0xf]  ;;  %v5775_v40 = vld [vmem:[%s10162_s2 + $0x3e4] sm:$0xf0]  ;;  %v6968_v22 = vor.u32 %v568_v61, %v564_v2 }
  0x5e   :  { %10516 = vst [vmem:[#allocation60_spill] sm:$0xff] %v6925_v36  ;;  %777 = vmatpush.bf16.msra.mxu3 %v6891_v15  ;;  %v5758_v30 = vld [vmem:[%s10162_s2 + $0x364] sm:$0xf]  ;;  %v4322_v1 = vld [vmem:[%s10162_s2 + $0x368] sm:$0xf0]  ;;  %v6978_v42 = vor.u32 %v5759_v37, %v4320_v53  ;;  %v6982_v61 = vor.u32 %v5775_v40, %v4384_v4 }
  0x5f   :  { %10518 = vst [vmem:[#allocation62_spill] sm:$0xff] %v6937_v47  ;;  %v5774_v24 = vld [vmem:[%s10162_s2 + $0x3e4] sm:$0xf]  ;;  %v4386_v0 = vld [vmem:[%s10162_s2 + $0x3e8] sm:$0xf0]  ;;  %v6984_v2 = vor.u32 %v5758_v30, %v4322_v1 }
  0x60   :  { %10520 = vst [vmem:[#allocation64_spill] sm:$0xff] %v6941_v18  ;;  %739 = vmatpush.bf16.msra.mxu0 %v6912_v31  ;;  %v4312_v63 = vld [vmem:[%s10162_s2 + $0x350] sm:$0xf]  ;;  %v5757_v20 = vld [vmem:[%s10162_s2 + $0x354] sm:$0xf0]  ;;  %v6997_v53 = vor.u32 %v5774_v24, %v4386_v0 }
  0x61   :  { %10521 = vst [vmem:[#allocation65_spill] sm:$0xff] %v6953_v13  ;;  %752 = vmatpush.bf16.msra.mxu1 %v6923_v19  ;;  %765 = vmatpush.bf16.msra.mxu2 %v6925_v36  ;;  %v4376_v54 = vld [vmem:[%s10162_s2 + $0x3d0] sm:$0xf]  ;;  %v5773_v37 = vld [vmem:[%s10162_s2 + $0x3d4] sm:$0xf0]  ;;  %v7018_v24 = vor.u32 %v5757_v20, %v4312_v63 }
  0x62   :  { %778 = vmatpush.bf16.msra.mxu3 %v6935_v26  ;;  %10522 = vst [vmem:[#allocation66_spill] sm:$0xff] %v6978_v42  ;;  %v5756_v4 = vld [vmem:[%s10162_s2 + $0x354] sm:$0xf]  ;;  %v4314_v40 = vld [vmem:[%s10162_s2 + $0x358] sm:$0xf0]  ;;  %v7022_v0 = vor.u32 %v5773_v37, %v4376_v54 }
  0x63   :  { %10523 = vst [vmem:[#allocation67_spill] sm:$0xff] %v6982_v61  ;;  %740 = vmatmul.bf16.vlgmr.msra.gmra.mxu0 %v6955_v32  ;;  %v5772_v30 = vld [vmem:[%s10162_s2 + $0x3d4] sm:$0xf]  ;;  %v4378_v1 = vld [vmem:[%s10162_s2 + $0x3d8] sm:$0xf0] }
  0x64   :  { %1021 = vmatpush.bf16.msrb.mxu0 %v6937_v47  ;;  %10524 = vst [vmem:[#allocation68_spill] sm:$0xff] %v6984_v2  ;;  %753 = vmatmul.bf16.vlgmr.msra.gmra.mxu1 %v6968_v22  ;;  %v4368_v63 = vld [vmem:[%s10162_s2 + $0x3c0] sm:$0xf]  ;;  %v7036_v20 = vor.u32 %v5772_v30, %v4378_v1  ;;  %v5771_v54 = vld [vmem:[%s10162_s2 + $0x3c4] sm:$0xf0] }
  0x65   :  { %1034 = vmatpush.bf16.msrb.mxu1 %v6939_v10  ;;  %1047 = vmatpush.bf16.msrb.mxu2 %v6941_v18  ;;  %10525 = vst [vmem:[#allocation69_spill] sm:$0xff] %v6997_v53  ;;  %v4304_v18 = vld [vmem:[%s10162_s2 + $0x340] sm:$0xf]  ;;  %v5755_v10 = vld [vmem:[%s10162_s2 + $0x344] sm:$0xf0] }
  0x66   :  { %1060 = vmatpush.bf16.msrb.mxu3 %v6953_v13  ;;  %766 = vmatmul.bf16.vlgmr.msra.gmra.mxu2 %v6955_v32  ;;  %10526 = vst [vmem:[#allocation70_spill] sm:$0xff] %v7018_v24  ;;  %v7024_v13 = vor.u32 %v5756_v4, %v4314_v40  ;;  %v5754_v37 = vld [vmem:[%s10162_s2 + $0x344] sm:$0xf]  ;;  %v4306_v4 = vld [vmem:[%s10162_s2 + $0x348] sm:$0xf0]  ;;  %v7054_v1 = vor.u32 %v5755_v10, %v4304_v18 }
  0x67   :  { %779 = vmatmul.bf16.vlgmr.msra.gmra.mxu3 %v6968_v22  ;;  %10527 = vst [vmem:[#allocation71_spill] sm:$0xff] %v7022_v0  ;;  %v5770_v40 = vld [vmem:[%s10162_s2 + $0x3c4] sm:$0xf]  ;;  %v4370_v30 = vld [vmem:[%s10162_s2 + $0x3c8] sm:$0xf0] }
  0x68   :  { %1022 = vmatpush.bf16.msrb.mxu0 %v6978_v42  ;;  %10528 = vst [vmem:[#allocation72_spill] sm:$0xff] %v7024_v13  ;;  %v5753_v42 = vld [vmem:[%s10162_s2 + $0x334] sm:$0xf0]  ;;  %v4360_v10 = vld [vmem:[%s10162_s2 + $0x3b0] sm:$0xf]  ;;  %v7072_v18 = vor.u32 %v5770_v40, %v4370_v30 }
  0x69   :  { %1035 = vmatpush.bf16.msrb.mxu1 %v6982_v61  ;;  %1048 = vmatpush.bf16.msrb.mxu2 %v6984_v2  ;;  %10529 = vst [vmem:[#allocation73_spill] sm:$0xff] %v7036_v20  ;;  %v7060_v2 = vor.u32 %v5754_v37, %v4306_v4  ;;  %v4296_v61 = vld [vmem:[%s10162_s2 + $0x330] sm:$0xf]  ;;  %v4298_v37 = vld [vmem:[%s10162_s2 + $0x338] sm:$0xf0] }
  0x6a   :  { %1061 = vmatpush.bf16.msrb.mxu3 %v6997_v53  ;;  %10530 = vst [vmem:[#allocation74_spill] sm:$0xff] %v7054_v1  ;;  %v7058_v53 = vor.u32 %v5771_v54, %v4368_v63  ;;  %v5769_v63 = vld [vmem:[%s10162_s2 + $0x3b4] sm:$0xf0]  ;;  %v5752_v54 = vld [vmem:[%s10162_s2 + $0x334] sm:$0xf]  ;;  %v7090_v30 = vor.u32 %v5753_v42, %v4296_v61 }
  0x6b   :  { %10532 = vst [vmem:[#allocation76_spill] sm:$0xff] %v7060_v2  ;;  %v5768_v4 = vld [vmem:[%s10162_s2 + $0x3b4] sm:$0xf]  ;;  %v4362_v40 = vld [vmem:[%s10162_s2 + $0x3b8] sm:$0xf0] }
  0x6c   :  { %1023 = vmatpush.bf16.msrb.mxu0 %v7018_v24  ;;  %10531 = vst [vmem:[#allocation75_spill] sm:$0xff] %v7058_v53  ;;  %v5751_v24 = vld [vmem:[%s10162_s2 + $0x324] sm:$0xf0]  ;;  %v4352_v42 = vld [vmem:[%s10162_s2 + $0x3a0] sm:$0xf]  ;;  %v7108_v61 = vor.u32 %v5768_v4, %v4362_v40 }
  0x6d   :  { %1036 = vmatpush.bf16.msrb.mxu1 %v7022_v0  ;;  %1049 = vmatpush.bf16.msrb.mxu2 %v7024_v13  ;;  %10533 = vst [vmem:[#allocation77_spill] sm:$0xff] %v7072_v18  ;;  %v7096_v13 = vor.u32 %v5752_v54, %v4298_v37  ;;  %v4288_v0 = vld [vmem:[%s10162_s2 + $0x320] sm:$0xf]  ;;  %v4290_v54 = vld [vmem:[%s10162_s2 + $0x328] sm:$0xf0] }
  0x6e   :  { %1062 = vmatpush.bf16.msrb.mxu3 %v7036_v20  ;;  %10534 = vst [vmem:[#allocation78_spill] sm:$0xff] %v7090_v30  ;;  %v7094_v20 = vor.u32 %v5769_v63, %v4360_v10  ;;  %v5767_v10 = vld [vmem:[%s10162_s2 + $0x3a4] sm:$0xf0]  ;;  %v5750_v63 = vld [vmem:[%s10162_s2 + $0x324] sm:$0xf]  ;;  %v7126_v40 = vor.u32 %v5751_v24, %v4288_v0 }
  0x6f   :  { %10536 = vst [vmem:[#allocation80_spill] sm:$0xff] %v7096_v13  ;;  %v5766_v37 = vld [vmem:[%s10162_s2 + $0x3a4] sm:$0xf]  ;;  %v4354_v4 = vld [vmem:[%s10162_s2 + $0x3a8] sm:$0xf0] }
  0x70   :  { %1024 = vmatpush.bf16.msrb.mxu0 %v7054_v1  ;;  %10535 = vst [vmem:[#allocation79_spill] sm:$0xff] %v7094_v20  ;;  %v5749_v1 = vld [vmem:[%s10162_s2 + $0x314] sm:$0xf0]  ;;  %v4344_v24 = vld [vmem:[%s10162_s2 + $0x390] sm:$0xf]  ;;  %v7144_v0 = vor.u32 %v5766_v37, %v4354_v4 }
  0x71   :  { %1037 = vmatpush.bf16.msrb.mxu1 %v7058_v53  ;;  %1050 = vmatpush.bf16.msrb.mxu2 %v7060_v2  ;;  %10537 = vst [vmem:[#allocation81_spill] sm:$0xff] %v7108_v61  ;;  %v7132_v2 = vor.u32 %v5750_v63, %v4290_v54  ;;  %v4280_v53 = vld [vmem:[%s10162_s2 + $0x310] sm:$0xf]  ;;  %v4282_v63 = vld [vmem:[%s10162_s2 + $0x318] sm:$0xf0] }
  0x72   :  { %1063 = vmatpush.bf16.msrb.mxu3 %v7072_v18  ;;  %10538 = vst [vmem:[#allocation82_spill] sm:$0xff] %v7126_v40  ;;  %v7130_v18 = vor.u32 %v5767_v10, %v4352_v42  ;;  %v5765_v42 = vld [vmem:[%s10162_s2 + $0x394] sm:$0xf0]  ;;  %v5748_v10 = vld [vmem:[%s10162_s2 + $0x314] sm:$0xf]  ;;  %v7162_v4 = vor.u32 %v5749_v1, %v4280_v53 }
  0x73   :  { %10540 = vst [vmem:[#allocation84_spill] sm:$0xff] %v7132_v2  ;;  %v5764_v54 = vld [vmem:[%s10162_s2 + $0x394] sm:$0xf]  ;;  %v4346_v37 = vld [vmem:[%s10162_s2 + $0x398] sm:$0xf0] }
  0x74   :  { %1025 = vmatpush.bf16.msrb.mxu0 %v7090_v30  ;;  %10539 = vst [vmem:[#allocation83_spill] sm:$0xff] %v7130_v18  ;;  %v7174_v30 = vor.u32 %v5748_v10, %v4282_v63  ;;  %v4336_v53 = vld [vmem:[%s10162_s2 + $0x380] sm:$0xf]  ;;  %v5763_v1 = vld [vmem:[%s10162_s2 + $0x384] sm:$0xf0] }
  0x75   :  { %1038 = vmatpush.bf16.msrb.mxu1 %v7094_v20  ;;  %1051 = vmatpush.bf16.msrb.mxu2 %v7096_v13  ;;  %10541 = vst [vmem:[#allocation85_spill] sm:$0xff] %v7144_v0  ;;  %v5747_v13 = vld [vmem:[%s10162_s2 + $0x304] sm:$0xf0]  ;;  %v7172_v20 = vor.u32 %v5765_v42, %v4344_v24  ;;  %v4274_v24 = vld [vmem:[%s10162_s2 + $0x308] sm:$0xf0]  ;;  %v7220_v36 = vor.u32 %v5763_v1, %v4336_v53 }
  0x76   :  { %1064 = vmatpush.bf16.msrb.mxu3 %v7108_v61  ;;  %10542 = vst [vmem:[#allocation86_spill] sm:$0xff] %v7162_v4  ;;  %v4272_v61 = vld [vmem:[%s10162_s2 + $0x300] sm:$0xf]  ;;  %v5762_v42 = vld [vmem:[%s10162_s2 + $0x384] sm:$0xf] }
  0x77   :  { %10543 = vst [vmem:[#allocation87_spill] sm:$0xff] %v7172_v20  ;;  %v4338_v10 = vld [vmem:[%s10162_s2 + $0x388] sm:$0xf0]  ;;  %v4456_v63 = vld [vmem:[%s10162_s2 + $0x170] sm:$0xf] }
  0x78   :  { %1026 = vmatpush.bf16.msrb.mxu0 %v7126_v40  ;;  %10544 = vst [vmem:[#allocation88_spill] sm:$0xff] %v7174_v30  ;;  %v5746_v40 = vld [vmem:[%s10162_s2 + $0x304] sm:$0xf]  ;;  %v5728_v47 = vld [vmem:[%s10162_s2 + $0x174] sm:$0xf]  ;;  %v7231_v19 = vor.u32 %v5762_v42, %v4338_v10 }
  0x79   :  { %1039 = vmatpush.bf16.msrb.mxu1 %v7130_v18  ;;  %1052 = vmatpush.bf16.msrb.mxu2 %v7132_v2  ;;  %v7186_v18 = vor.u32 %v5764_v54, %v4346_v37  ;;  %v5729_v54 = vld [vmem:[%s10162_s2 + $0x174] sm:$0xf0]  ;;  %v4520_v37 = vld [vmem:[%s10162_s2 + $0x1f0] sm:$0xf]  ;;  %v4458_v26 = vld [vmem:[%s10162_s2 + $0x178] sm:$0xf0] }
  0x7a   :  { %1065 = vmatpush.bf16.msrb.mxu3 %v7144_v0  ;;  %v7207_v0 = vor.u32 %v5747_v13, %v4272_v61  ;;  %v5745_v2 = vld [vmem:[%s10162_s2 + $0x1f4] sm:$0xf0]  ;;  %10547 = vst [vmem:[#allocation91_spill] sm:$0xff] %v7220_v36  ;;  %v7222_v13 = vor.u32 %v5746_v40, %v4274_v24  ;;  %v5744_v61 = vld [vmem:[%s10162_s2 + $0x1f4] sm:$0xf]  ;;  %v7233_v31 = vor.u32 %v5729_v54, %v4456_v63 }
  0x7b   :  { %10545 = vst [vmem:[#allocation89_spill] sm:$0xff] %v7186_v18  ;;  %v7237_v53 = vor.u32 %v5728_v47, %v4458_v26  ;;  %v4448_v40 = vld [vmem:[%s10162_s2 + $0x160] sm:$0xf]  ;;  %v5727_v1 = vld [vmem:[%s10162_s2 + $0x164] sm:$0xf0] }
  0x7c   :  { %1027 = vmatpush.bf16.msrb.mxu0 %v7162_v4  ;;  %10546 = vst [vmem:[#allocation90_spill] sm:$0xff] %v7207_v0  ;;  %v4522_v4 = vld [vmem:[%s10162_s2 + $0x1f8] sm:$0xf0]  ;;  %v4512_v24 = vld [vmem:[%s10162_s2 + $0x1e0] sm:$0xf]  ;;  %v7270_v63 = vor.u32 %v5727_v1, %v4448_v40 }
  0x7d   :  { %1040 = vmatpush.bf16.msrb.mxu1 %v7172_v20  ;;  %1053 = vmatpush.bf16.msrb.mxu2 %v7174_v30  ;;  %10548 = vst [vmem:[#allocation92_spill] sm:$0xff] %v7222_v13  ;;  %v7235_v20 = vor.u32 %v5745_v2, %v4520_v37  ;;  %v7249_v42 = vor.u32 %v5744_v61, %v4522_v4  ;;  %v5743_v47 = vld [vmem:[%s10162_s2 + $0x1e4] sm:$0xf0]  ;;  %v5726_v26 = vld [vmem:[%s10162_s2 + $0x164] sm:$0xf] }
  0x7e   :  { %1066 = vmatpush.bf16.msrb.mxu3 %v7186_v18  ;;  %10549 = vst [vmem:[#allocation93_spill] sm:$0xff] %v7231_v19  ;;  %v4450_v2 = vld [vmem:[%s10162_s2 + $0x168] sm:$0xf0]  ;;  %v5742_v4 = vld [vmem:[%s10162_s2 + $0x1e4] sm:$0xf]  ;;  %v7274_v54 = vor.u32 %v5743_v47, %v4512_v24 }
  0x7f   :  { %10550 = vst [vmem:[#allocation94_spill] sm:$0xff] %v7233_v31  ;;  %v4514_v10 = vld [vmem:[%s10162_s2 + $0x1e8] sm:$0xf0]  ;;  %v7276_v37 = vor.u32 %v5726_v26, %v4450_v2  ;;  %v4440_v61 = vld [vmem:[%s10162_s2 + $0x150] sm:$0xf] }
  0x80   :  { %10551 = vst [vmem:[#allocation95_spill] sm:$0xff] %v7235_v20  ;;  %1028 = vmatpush.bf16.msrb.mxu0 %v7207_v0  ;;  %v4504_v40 = vld [vmem:[%s10162_s2 + $0x1d0] sm:$0xf]  ;;  %v7288_v1 = vor.u32 %v5742_v4, %v4514_v10  ;;  %v5741_v24 = vld [vmem:[%s10162_s2 + $0x1d4] sm:$0xf0] }
  0x81   :  { %10552 = vst [vmem:[#allocation96_spill] sm:$0xff] %v7237_v53  ;;  %1041 = vmatpush.bf16.msrb.mxu1 %v7220_v36  ;;  %1054 = vmatpush.bf16.msrb.mxu2 %v7222_v13  ;;  %v5724_v47 = vld [vmem:[%s10162_s2 + $0x154] sm:$0xf]  ;;  %v4442_v26 = vld [vmem:[%s10162_s2 + $0x158] sm:$0xf0] }
  0x82   :  { %10553 = vst [vmem:[#allocation97_spill] sm:$0xff] %v7249_v42  ;;  %1067 = vmatpush.bf16.msrb.mxu3 %v7231_v19  ;;  %v5725_v19 = vld [vmem:[%s10162_s2 + $0x154] sm:$0xf0]  ;;  %v5740_v2 = vld [vmem:[%s10162_s2 + $0x1d4] sm:$0xf] }
  0x83   :  { %10554 = vst [vmem:[#allocation98_spill] sm:$0xff] %v7270_v63  ;;  %v4506_v4 = vld [vmem:[%s10162_s2 + $0x1d8] sm:$0xf0]  ;;  %1029 = vmatmul.bf16.vlgmr.msrb.gmra.mxu0 %v6404_v41  ;;  %v7309_v10 = vor.u32 %v5725_v19, %v4440_v61  ;;  %v4496_v19 = vld [vmem:[%s10162_s2 + $0x1c0] sm:$0xf] }
  0x84   :  { %1233 = vmatpush.bf16.msra.mxu0 %v7233_v31  ;;  %10555 = vst [vmem:[#allocation99_spill] sm:$0xff] %v7274_v54  ;;  %1055 = vmatmul.bf16.vlgmr.msrb.gmra.mxu2 %v6404_v41  ;;  %v7328_v61 = vor.u32 %v5740_v2, %v4506_v4  ;;  %v4498_v2 = vld [vmem:[%s10162_s2 + $0x1c8] sm:$0xf0]  ;;  %v5721_v31 = vld [vmem:[%s10162_s2 + $0x134] sm:$0xf0] }
  0x85   :  { %1246 = vmatpush.bf16.msra.mxu1 %v7235_v20  ;;  %1259 = vmatpush.bf16.msra.mxu2 %v7237_v53  ;;  %10556 = vst [vmem:[#allocation100_spill] sm:$0xff] %v7276_v37  ;;  %v7316_v53 = vor.u32 %v5724_v47, %v4442_v26  ;;  %v4432_v20 = vld [vmem:[%s10162_s2 + $0x140] sm:$0xf]  ;;  %v4434_v47 = vld [vmem:[%s10162_s2 + $0x148] sm:$0xf0] }
  0x86   :  { %1272 = vmatpush.bf16.msra.mxu3 %v7249_v42  ;;  %10557 = vst [vmem:[#allocation101_spill] sm:$0xff] %v7288_v1  ;;  %1042 = vmatmul.bf16.vlgmr.msrb.gmra.mxu1 %v6412_v48  ;;  %v7314_v42 = vor.u32 %v5741_v24, %v4504_v40  ;;  %v5739_v40 = vld [vmem:[%s10162_s2 + $0x1c4] sm:$0xf0]  ;;  %v5722_v24 = vld [vmem:[%s10162_s2 + $0x144] sm:$0xf] }
  0x87   :  { %1068 = vmatmul.bf16.vlgmr.msrb.gmra.mxu3 %v6412_v48  ;;  %10558 = vst [vmem:[#allocation102_spill] sm:$0xff] %v7309_v10  ;;  %v5738_v26 = vld [vmem:[%s10162_s2 + $0x1c4] sm:$0xf]  ;;  %v5792_v13 = vld [vmem:[%s10162_s2 + $0x574] sm:$0xf] }
  0x88   :  { %1234 = vmatpush.bf16.msra.mxu0 %v7270_v63  ;;  %10559 = vst [vmem:[#allocation103_spill] sm:$0xff] %v7314_v42  ;;  %v5723_v63 = vld [vmem:[%s10162_s2 + $0x144] sm:$0xf0]  ;;  %v4618_v36 = vld [vmem:[%s10162_s2 + $0x578] sm:$0xf0] }
  0x89   :  { %1247 = vmatpush.bf16.msra.mxu1 %v7274_v54  ;;  %1260 = vmatpush.bf16.msra.mxu2 %v7276_v37  ;;  %10560 = vst [vmem:[#allocation104_spill] sm:$0xff] %v7316_v53  ;;  %v7346_v4 = vor.u32 %v5723_v63, %v4432_v20  ;;  %v7352_v37 = vor.u32 %v5722_v24, %v4434_v47  ;;  %v4424_v54 = vld [vmem:[%s10162_s2 + $0x130] sm:$0xf]  ;;  %v4426_v24 = vld [vmem:[%s10162_s2 + $0x138] sm:$0xf0] }
  0x8a   :  { %1273 = vmatpush.bf16.msra.mxu3 %v7288_v1  ;;  %10561 = vst [vmem:[#allocation105_spill] sm:$0xff] %v7328_v61  ;;  %v7350_v1 = vor.u32 %v5739_v40, %v4496_v19  ;;  %v4488_v20 = vld [vmem:[%s10162_s2 + $0x1b0] sm:$0xf]  ;;  %v7364_v63 = vor.u32 %v5738_v26, %v4498_v2  ;;  %v5737_v19 = vld [vmem:[%s10162_s2 + $0x1b4] sm:$0xf0]  ;;  %v7382_v2 = vor.u32 %v5721_v31, %v4424_v54 }
  0x8b   :  { %10562 = vst [vmem:[#allocation106_spill] sm:$0xff] %v7346_v4  ;;  %v5720_v40 = vld [vmem:[%s10162_s2 + $0x134] sm:$0xf]  ;;  %v4490_v26 = vld [vmem:[%s10162_s2 + $0x1b8] sm:$0xf0] }
  0x8c   :  { %1235 = vmatpush.bf16.msra.mxu0 %v7309_v10  ;;  %10563 = vst [vmem:[#allocation107_spill] sm:$0xff] %v7350_v1  ;;  %v5736_v47 = vld [vmem:[%s10162_s2 + $0x1b4] sm:$0xf]  ;;  %v5719_v10 = vld [vmem:[%s10162_s2 + $0x124] sm:$0xf0] }
  0x8d   :  { %1248 = vmatpush.bf16.msra.mxu1 %v7314_v42  ;;  %1261 = vmatpush.bf16.msra.mxu2 %v7316_v53  ;;  %10564 = vst [vmem:[#allocation108_spill] sm:$0xff] %v7352_v37  ;;  %v7388_v53 = vor.u32 %v5720_v40, %v4426_v24  ;;  %v4416_v42 = vld [vmem:[%s10162_s2 + $0x120] sm:$0xf]  ;;  %v7400_v54 = vor.u32 %v5736_v47, %v4490_v26  ;;  %v4418_v40 = vld [vmem:[%s10162_s2 + $0x128] sm:$0xf0] }
  0x8e   :  { %1274 = vmatpush.bf16.msra.mxu3 %v7328_v61  ;;  %10565 = vst [vmem:[#allocation109_spill] sm:$0xff] %v7364_v63  ;;  %v7386_v61 = vor.u32 %v5737_v19, %v4488_v20  ;;  %v4480_v31 = vld [vmem:[%s10162_s2 + $0x1a0] sm:$0xf]  ;;  %v5735_v20 = vld [vmem:[%s10162_s2 + $0x1a4] sm:$0xf0]  ;;  %v7418_v26 = vor.u32 %v5719_v10, %v4416_v42 }
  0x8f   :  { %10566 = vst [vmem:[#allocation110_spill] sm:$0xff] %v7382_v2  ;;  %v5718_v19 = vld [vmem:[%s10162_s2 + $0x124] sm:$0xf]  ;;  %v4482_v47 = vld [vmem:[%s10162_s2 + $0x1a8] sm:$0xf0] }
  0x90   :  { %1236 = vmatpush.bf16.msra.mxu0 %v7346_v4  ;;  %10567 = vst [vmem:[#allocation111_spill] sm:$0xff] %v7386_v61  ;;  %v5734_v24 = vld [vmem:[%s10162_s2 + $0x1a4] sm:$0xf]  ;;  %v5717_v4 = vld [vmem:[%s10162_s2 + $0x114] sm:$0xf0] }
  0x91   :  { %1249 = vmatpush.bf16.msra.mxu1 %v7350_v1  ;;  %1262 = vmatpush.bf16.msra.mxu2 %v7352_v37  ;;  %10568 = vst [vmem:[#allocation112_spill] sm:$0xff] %v7388_v53  ;;  %v7424_v37 = vor.u32 %v5718_v19, %v4418_v40  ;;  %v4408_v1 = vld [vmem:[%s10162_s2 + $0x110] sm:$0xf]  ;;  %v7436_v10 = vor.u32 %v5734_v24, %v4482_v47  ;;  %v4410_v19 = vld [vmem:[%s10162_s2 + $0x118] sm:$0xf0] }
  0x92   :  { %1275 = vmatpush.bf16.msra.mxu3 %v7364_v63  ;;  %10569 = vst [vmem:[#allocation113_spill] sm:$0xff] %v7400_v54  ;;  %v7422_v63 = vor.u32 %v5735_v20, %v4480_v31  ;;  %v4472_v42 = vld [vmem:[%s10162_s2 + $0x190] sm:$0xf]  ;;  %v5733_v31 = vld [vmem:[%s10162_s2 + $0x194] sm:$0xf0]  ;;  %v7454_v47 = vor.u32 %v5717_v4, %v4408_v1 }
  0x93   :  { %10570 = vst [vmem:[#allocation114_spill] sm:$0xff] %v7418_v26  ;;  %v5716_v20 = vld [vmem:[%s10162_s2 + $0x114] sm:$0xf]  ;;  %v4474_v24 = vld [vmem:[%s10162_s2 + $0x198] sm:$0xf0] }
  0x94   :  { %1237 = vmatpush.bf16.msra.mxu0 %v7382_v2  ;;  %10571 = vst [vmem:[#allocation115_spill] sm:$0xff] %v7422_v63  ;;  %v5732_v40 = vld [vmem:[%s10162_s2 + $0x194] sm:$0xf]  ;;  %v7466_v2 = vor.u32 %v5716_v20, %v4410_v19  ;;  %v4464_v1 = vld [vmem:[%s10162_s2 + $0x180] sm:$0xf] }
  0x95   :  { %1250 = vmatpush.bf16.msra.mxu1 %v7386_v61  ;;  %1263 = vmatpush.bf16.msra.mxu2 %v7388_v53  ;;  %10572 = vst [vmem:[#allocation116_spill] sm:$0xff] %v7424_v37  ;;  %v5715_v53 = vld [vmem:[%s10162_s2 + $0x104] sm:$0xf0]  ;;  %v7464_v61 = vor.u32 %v5733_v31, %v4472_v42  ;;  %v4402_v42 = vld [vmem:[%s10162_s2 + $0x108] sm:$0xf0] }
  0x96   :  { %1276 = vmatpush.bf16.msra.mxu3 %v7400_v54  ;;  %10573 = vst [vmem:[#allocation117_spill] sm:$0xff] %v7436_v10  ;;  %v4400_v54 = vld [vmem:[%s10162_s2 + $0x100] sm:$0xf]  ;;  %v5731_v4 = vld [vmem:[%s10162_s2 + $0x184] sm:$0xf0] }
  0x97   :  { %10574 = vst [vmem:[#allocation118_spill] sm:$0xff] %v7454_v47  ;;  %v5730_v31 = vld [vmem:[%s10162_s2 + $0x184] sm:$0xf]  ;;  %v4466_v20 = vld [vmem:[%s10162_s2 + $0x188] sm:$0xf0]  ;;  %v7512_v0 = vor.u32 %v5731_v4, %v4464_v1  ;;  %v7529_v1 = vor.u32 %v5792_v13, %v4618_v36 }
  0x98   :  { %1238 = vmatpush.bf16.msra.mxu0 %v7418_v26  ;;  %10575 = vst [vmem:[#allocation119_spill] sm:$0xff] %v7464_v61  ;;  %v5714_v26 = vld [vmem:[%s10162_s2 + $0x104] sm:$0xf]  ;;  %v4616_v19 = vld [vmem:[%s10162_s2 + $0x570] sm:$0xf]  ;;  %v7523_v18 = vor.u32 %v5730_v31, %v4466_v20 }
  0x99   :  { %1251 = vmatpush.bf16.msra.mxu1 %v7422_v63  ;;  %1264 = vmatpush.bf16.msra.mxu2 %v7424_v37  ;;  %v7478_v63 = vor.u32 %v5732_v40, %v4474_v24  ;;  %v5793_v40 = vld [vmem:[%s10162_s2 + $0x574] sm:$0xf0]  ;;  %v4680_v24 = vld [vmem:[%s10162_s2 + $0x5f0] sm:$0xf]  ;;  %10577 = vst [vmem:[#allocation121_spill] sm:$0xff] %v7512_v0 }
  0x9a   :  { %1277 = vmatpush.bf16.msra.mxu3 %v7436_v10  ;;  %v7499_v10 = vor.u32 %v5715_v53, %v4400_v54  ;;  %v5809_v37 = vld [vmem:[%s10162_s2 + $0x5f4] sm:$0xf0]  ;;  %v7514_v53 = vor.u32 %v5714_v26, %v4402_v42  ;;  %v5808_v54 = vld [vmem:[%s10162_s2 + $0x5f4] sm:$0xf]  ;;  %10579 = vst [vmem:[#allocation123_spill] sm:$0xff] %v7523_v18  ;;  %v7525_v30 = vor.u32 %v5793_v40, %v4616_v19 }
  0x9b   :  { %10582 = vst [vmem:[#allocation126_spill] sm:$0xff] %v7529_v1  ;;  %v4608_v26 = vld [vmem:[%s10162_s2 + $0x560] sm:$0xf]  ;;  %v5791_v4 = vld [vmem:[%s10162_s2 + $0x564] sm:$0xf0] }
  0x9c   :  { %1239 = vmatpush.bf16.msra.mxu0 %v7454_v47  ;;  %10576 = vst [vmem:[#allocation120_spill] sm:$0xff] %v7499_v10  ;;  %v4682_v47 = vld [vmem:[%s10162_s2 + $0x5f8] sm:$0xf0]  ;;  %v4672_v42 = vld [vmem:[%s10162_s2 + $0x5e0] sm:$0xf]  ;;  %v7562_v19 = vor.u32 %v5791_v4, %v4608_v26 }
  0x9d   :  { %1252 = vmatpush.bf16.msra.mxu1 %v7464_v61  ;;  %1265 = vmatpush.bf16.msra.mxu2 %v7466_v2  ;;  %10578 = vst [vmem:[#allocation122_spill] sm:$0xff] %v7514_v53  ;;  %v7527_v61 = vor.u32 %v5809_v37, %v4680_v24  ;;  %v7541_v31 = vor.u32 %v5808_v54, %v4682_v47  ;;  %v5807_v36 = vld [vmem:[%s10162_s2 + $0x5e4] sm:$0xf0]  ;;  %v5790_v13 = vld [vmem:[%s10162_s2 + $0x564] sm:$0xf] }
  0x9e   :  { %1278 = vmatpush.bf16.msra.mxu3 %v7478_v63  ;;  %10580 = vst [vmem:[#allocation124_spill] sm:$0xff] %v7525_v30  ;;  %v4610_v37 = vld [vmem:[%s10162_s2 + $0x568] sm:$0xf0]  ;;  %v5806_v47 = vld [vmem:[%s10162_s2 + $0x5e4] sm:$0xf]  ;;  %v7566_v40 = vor.u32 %v5807_v36, %v4672_v42 }
  0x9f   :  { %10581 = vst [vmem:[#allocation125_spill] sm:$0xff] %v7527_v61  ;;  %v4674_v20 = vld [vmem:[%s10162_s2 + $0x5e8] sm:$0xf0]  ;;  %v7568_v24 = vor.u32 %v5790_v13, %v4610_v37  ;;  %v4600_v54 = vld [vmem:[%s10162_s2 + $0x550] sm:$0xf] }
  0xa0   :  { %1240 = vmatpush.bf16.msra.mxu0 %v7499_v10  ;;  %10583 = vst [vmem:[#allocation127_spill] sm:$0xff] %v7541_v31  ;;  %v4664_v26 = vld [vmem:[%s10162_s2 + $0x5d0] sm:$0xf]  ;;  %v7581_v4 = vor.u32 %v5806_v47, %v4674_v20  ;;  %v5805_v42 = vld [vmem:[%s10162_s2 + $0x5d4] sm:$0xf0] }
  0xa1   :  { %1253 = vmatpush.bf16.msra.mxu1 %v7512_v0  ;;  %1266 = vmatpush.bf16.msra.mxu2 %v7514_v53  ;;  %10584 = vst [vmem:[#allocation128_spill] sm:$0xff] %v7562_v19  ;;  %v5788_v36 = vld [vmem:[%s10162_s2 + $0x554] sm:$0xf]  ;;  %v4602_v13 = vld [vmem:[%s10162_s2 + $0x558] sm:$0xf0] }
  0xa2   :  { %1279 = vmatpush.bf16.msra.mxu3 %v7523_v18  ;;  %10585 = vst [vmem:[#allocation129_spill] sm:$0xff] %v7566_v40  ;;  %v5789_v18 = vld [vmem:[%s10162_s2 + $0x554] sm:$0xf0]  ;;  %v5804_v37 = vld [vmem:[%s10162_s2 + $0x5d4] sm:$0xf] }
  0xa3   :  { %10586 = vst [vmem:[#allocation130_spill] sm:$0xff] %v7568_v24  ;;  %1241 = vmatmul.bf16.vlgmr.msra.gmra.mxu0 %v6655_v39  ;;  %v4666_v47 = vld [vmem:[%s10162_s2 + $0x5d8] sm:$0xf0]  ;;  %v7601_v20 = vor.u32 %v5789_v18, %v4600_v54  ;;  %v5803_v54 = vld [vmem:[%s10162_s2 + $0x5c4] sm:$0xf0] }
  0xa4   :  { %1478 = vmatpush.bf16.msrb.mxu0 %v7525_v30  ;;  %1267 = vmatmul.bf16.vlgmr.msra.gmra.mxu2 %v6655_v39  ;;  %10587 = vst [vmem:[#allocation131_spill] sm:$0xff] %v7581_v4  ;;  %v7608_v39 = vor.u32 %v5788_v36, %v4602_v13  ;;  %v7620_v18 = vor.u32 %v5804_v37, %v4666_v47  ;;  %v5802_v36 = vld [vmem:[%s10162_s2 + $0x5c4] sm:$0xf]  ;;  %v4658_v13 = vld [vmem:[%s10162_s2 + $0x5c8] sm:$0xf0] }
  0xa5   :  { %1491 = vmatpush.bf16.msrb.mxu1 %v7527_v61  ;;  %1504 = vmatpush.bf16.msrb.mxu2 %v7529_v1  ;;  %10588 = vst [vmem:[#allocation132_spill] sm:$0xff] %v7601_v20  ;;  %v4592_v1 = vld [vmem:[%s10162_s2 + $0x540] sm:$0xf]  ;;  %v5783_v30 = vld [vmem:[%s10162_s2 + $0x524] sm:$0xf0] }
  0xa6   :  { %1517 = vmatpush.bf16.msrb.mxu3 %v7541_v31  ;;  %1254 = vmatmul.bf16.vlgmr.msra.gmra.mxu1 %v6668_v49  ;;  %v7606_v31 = vor.u32 %v5805_v42, %v4664_v26  ;;  %10590 = vst [vmem:[#allocation134_spill] sm:$0xff] %v7608_v39  ;;  %v5786_v26 = vld [vmem:[%s10162_s2 + $0x544] sm:$0xf]  ;;  %v4594_v42 = vld [vmem:[%s10162_s2 + $0x548] sm:$0xf0] }
  0xa7   :  { %1280 = vmatmul.bf16.vlgmr.msra.gmra.mxu3 %v6668_v49  ;;  %v4656_v49 = vld [vmem:[%s10162_s2 + $0x5c0] sm:$0xf]  ;;  %10591 = vst [vmem:[#allocation135_spill] sm:$0xff] %v7620_v18 }
  0xa8   :  { %1479 = vmatpush.bf16.msrb.mxu0 %v7562_v19  ;;  %10589 = vst [vmem:[#allocation133_spill] sm:$0xff] %v7606_v31  ;;  %v5787_v19 = vld [vmem:[%s10162_s2 + $0x544] sm:$0xf0]  ;;  %v7642_v47 = vor.u32 %v5803_v54, %v4656_v49  ;;  %v5801_v49 = vld [vmem:[%s10162_s2 + $0x5b4] sm:$0xf0] }
  0xa9   :  { %1492 = vmatpush.bf16.msrb.mxu1 %v7566_v40  ;;  %1505 = vmatpush.bf16.msrb.mxu2 %v7568_v24  ;;  %v7638_v37 = vor.u32 %v5787_v19, %v4592_v1  ;;  %v4584_v24 = vld [vmem:[%s10162_s2 + $0x530] sm:$0xf]  ;;  %v5785_v40 = vld [vmem:[%s10162_s2 + $0x534] sm:$0xf0]  ;;  %v7656_v19 = vor.u32 %v5802_v36, %v4658_v13  ;;  %v5784_v54 = vld [vmem:[%s10162_s2 + $0x534] sm:$0xf]  ;;  %v261_v13 = vpop.f32.mrf.mxu0 }
  0xaa   :  { %1518 = vmatpush.bf16.msrb.mxu3 %v7581_v4  ;;  %10593 = vst [vmem:[#allocation137_spill] sm:$0xff] %v7642_v47  ;;  %v7644_v4 = vor.u32 %v5786_v26, %v4594_v42  ;;  %v4648_v1 = vld [vmem:[%s10162_s2 + $0x5b0] sm:$0xf]  ;;  %v4586_v26 = vld [vmem:[%s10162_s2 + $0x538] sm:$0xf0] }
  0xab   :  { %10592 = vst [vmem:[#allocation136_spill] sm:$0xff] %v7638_v37  ;;  %v5800_v42 = vld [vmem:[%s10162_s2 + $0x5b4] sm:$0xf]  ;;  %v4650_v36 = vld [vmem:[%s10162_s2 + $0x5b8] sm:$0xf0] }
  0xac   :  { %1480 = vmatpush.bf16.msrb.mxu0 %v7601_v20  ;;  %10594 = vst [vmem:[#allocation138_spill] sm:$0xff] %v7644_v4  ;;  %v7680_v20 = vor.u32 %v5784_v54, %v4586_v26  ;;  %v4576_v61 = vld [vmem:[%s10162_s2 + $0x520] sm:$0xf]  ;;  %v5782_v54 = vld [vmem:[%s10162_s2 + $0x524] sm:$0xf] }
  0xad   :  { %1493 = vmatpush.bf16.msrb.mxu1 %v7606_v31  ;;  %1506 = vmatpush.bf16.msrb.mxu2 %v7608_v39  ;;  %10595 = vst [vmem:[#allocation139_spill] sm:$0xff] %v7656_v19  ;;  %v274_v39 = vpop.f32.mrf.mxu1  ;;  %v7678_v31 = vor.u32 %v5801_v49, %v4648_v1  ;;  %v7694_v1 = vor.u32 %v5800_v42, %v4650_v36  ;;  %v5799_v49 = vld [vmem:[%s10162_s2 + $0x5a4] sm:$0xf0]  ;;  %v4578_v26 = vld [vmem:[%s10162_s2 + $0x528] sm:$0xf0]  ;;  %v287_v36 = vpop.f32.mrf.mxu2 }
  0xae   :  { %1519 = vmatpush.bf16.msrb.mxu3 %v7620_v18  ;;  %v7674_v18 = vor.u32 %v5785_v40, %v4584_v24  ;;  %10598 = vst [vmem:[#allocation142_spill] sm:$0xff] %v7680_v20  ;;  %v4640_v40 = vld [vmem:[%s10162_s2 + $0x5a0] sm:$0xf]  ;;  %v7691_v24 = vadd.f32 %v274_v39, %v261_v13  ;;  %v5798_v39 = vld [vmem:[%s10162_s2 + $0x5a4] sm:$0xf]  ;;  %v7712_v13 = vor.u32 %v5783_v30, %v4576_v61 }
  0xaf   :  { %10597 = vst [vmem:[#allocation141_spill] sm:$0xff] %v7678_v31  ;;  %v4642_v42 = vld [vmem:[%s10162_s2 + $0x5a8] sm:$0xf0]  ;;  %v4632_v30 = vld [vmem:[%s10162_s2 + $0x590] sm:$0xf] }
  0xb0   :  { %1481 = vmatpush.bf16.msrb.mxu0 %v7638_v37  ;;  %10596 = vst [vmem:[#allocation140_spill] sm:$0xff] %v7674_v18  ;;  %v5781_v37 = vld [vmem:[%s10162_s2 + $0x514] sm:$0xf0]  ;;  %v7730_v61 = vor.u32 %v5798_v39, %v4642_v42  ;;  %v4634_v39 = vld [vmem:[%s10162_s2 + $0x598] sm:$0xf0] }
  0xb1   :  { %1494 = vmatpush.bf16.msrb.mxu1 %v7642_v47  ;;  %1507 = vmatpush.bf16.msrb.mxu2 %v7644_v4  ;;  %10599 = vst [vmem:[#allocation143_spill] sm:$0xff] %v7694_v1  ;;  %v7718_v4 = vor.u32 %v5782_v54, %v4578_v26  ;;  %v4568_v47 = vld [vmem:[%s10162_s2 + $0x510] sm:$0xf]  ;;  %v4570_v54 = vld [vmem:[%s10162_s2 + $0x518] sm:$0xf0]  ;;  %v300_v26 = vpop.f32.mrf.mxu3 }
  0xb2   :  { %1520 = vmatpush.bf16.msrb.mxu3 %v7656_v19  ;;  %v7716_v19 = vor.u32 %v5799_v49, %v4640_v40  ;;  %10601 = vst [vmem:[#allocation145_spill] sm:$0xff] %v7730_v61  ;;  %v5797_v40 = vld [vmem:[%s10162_s2 + $0x594] sm:$0xf0]  ;;  %v5780_v49 = vld [vmem:[%s10162_s2 + $0x514] sm:$0xf]  ;;  %v301_v42 = vadd.f32 %v300_v26, %v287_v36 }
  0xb3   :  { %10600 = vst [vmem:[#allocation144_spill] sm:$0xff] %v7718_v4  ;;  %v7752_v53 = vor.u32 %v5797_v40, %v4632_v30  ;;  %v7754_v0 = vor.u32 %v5780_v49, %v4570_v54  ;;  %v4560_v10 = vld [vmem:[%s10162_s2 + $0x500] sm:$0xf]  ;;  %v5778_v36 = vld [vmem:[%s10162_s2 + $0x504] sm:$0xf] }
  0xb4   :  { %1482 = vmatpush.bf16.msrb.mxu0 %v7674_v18  ;;  %v4562_v30 = vld [vmem:[%s10162_s2 + $0x508] sm:$0xf0]  ;;  %v5794_v40 = vld [vmem:[%s10162_s2 + $0x584] sm:$0xf] }
  0xb5   :  { %1495 = vmatpush.bf16.msrb.mxu1 %v7678_v31  ;;  %1508 = vmatpush.bf16.msrb.mxu2 %v7680_v20  ;;  %v5796_v20 = vld [vmem:[%s10162_s2 + $0x594] sm:$0xf]  ;;  %v7748_v31 = vor.u32 %v5781_v37, %v4568_v47  ;;  %v276_v18 = vpop.f32.mrf.mxu1  ;;  %v5795_v47 = vld [vmem:[%s10162_s2 + $0x584] sm:$0xf0]  ;;  %v289_v49 = vpop.f32.mrf.mxu2 }
  0xb6   :  { %1521 = vmatpush.bf16.msrb.mxu3 %v7694_v1  ;;  %v263_v1 = vpop.f32.mrf.mxu0  ;;  %v4624_v18 = vld [vmem:[%s10162_s2 + $0x580] sm:$0xf]  ;;  %v7766_v37 = vor.u32 %v5796_v20, %v4634_v39  ;;  %v4626_v20 = vld [vmem:[%s10162_s2 + $0x588] sm:$0xf0]  ;;  %v7790_v39 = vor.u32 %v5778_v36, %v4562_v30  ;;  %v10621_v36 = vld [vmem:[#allocation21_spill] sm:$0xff] }
  0xb7   :  { %v5779_v1 = vld [vmem:[%s10162_s2 + $0x504] sm:$0xf0]  ;;  %v7788_v26 = vor.u32 %v5795_v47, %v4624_v18  ;;  %v10620_v47 = vld [vmem:[#allocation20_spill] sm:$0xff]  ;;  %v10622_v30 = vld [vmem:[#allocation22_spill] sm:$0xff] }
  0xb8   :  { %1483 = vmatpush.bf16.msrb.mxu0 %v7712_v13  ;;  %v7784_v54 = vor.u32 %v5779_v1, %v4560_v10  ;;  %v10619_v1 = vld [vmem:[#allocation19_spill] sm:$0xff] }
  0xb9   :  { %1496 = vmatpush.bf16.msrb.mxu1 %v7716_v19  ;;  %1509 = vmatpush.bf16.msrb.mxu2 %v7718_v4  ;;  %v302_v4 = vpop.f32.mrf.mxu3 }
  0xba   :  { %1522 = vmatpush.bf16.msrb.mxu3 %v7730_v61  ;;  %v7793_v61 = vor.u32 %v5794_v40, %v4626_v20  ;;  %v10623_v40 = vld [vmem:[#allocation23_spill] sm:$0xff] }
  0xbc   :  { %1484 = vmatpush.bf16.msrb.mxu0 %v7748_v31 }
  0xbd   :  { %1497 = vmatpush.bf16.msrb.mxu1 %v7752_v53  ;;  %1510 = vmatpush.bf16.msrb.mxu2 %v7754_v0 }
  0xbe   :  { %1523 = vmatpush.bf16.msrb.mxu3 %v7766_v37 }
  0xc0   :  { %1485 = vmatpush.bf16.msrb.mxu0 %v7784_v54 }
  0xc1   :  { %1498 = vmatpush.bf16.msrb.mxu1 %v7788_v26  ;;  %1511 = vmatpush.bf16.msrb.mxu2 %v7790_v39 }
  0xc2   :  { %1524 = vmatpush.bf16.msrb.mxu3 %v7793_v61 }
  0xc3   :  { %1486 = vmatmul.bf16.vlgmr.msrb.gmra.mxu0 %v6955_v32 }
  0xc4   :  { %1538 = vmatpush.bf16.msra.mxu0 %v6036_v3  ;;  %1499 = vmatmul.bf16.vlgmr.msrb.gmra.mxu1 %v6968_v22  ;;  %v480_v3 = vpop.f32.mrf.mxu0 }
  0xc5   :  { %1551 = vmatpush.bf16.msra.mxu1 %v6047_v7  ;;  %1564 = vmatpush.bf16.msra.mxu2 %v6049_v8  ;;  %v481_v7 = vadd.f32 %v480_v3, %v7691_v24  ;;  %v493_v8 = vpop.f32.mrf.mxu1  ;;  %v10617_v24 = vld [vmem:[#allocation17_spill] sm:$0xff]  ;;  %v10624_v3 = vld [vmem:[#allocation24_spill] sm:$0xff] }
  0xc6   :  { %1577 = vmatpush.bf16.msra.mxu3 %v6061_v12  ;;  %1512 = vmatmul.bf16.vlgmr.msrb.gmra.mxu2 %v6955_v32 }
  0xc7   :  { %1525 = vmatmul.bf16.vlgmr.msrb.gmra.mxu3 %v6968_v22  ;;  %v494_v12 = vadd.f32 %v493_v8, %v481_v7  ;;  %v10625_v7 = vld [vmem:[#allocation25_spill] sm:$0xff]  ;;  %v10626_v8 = vld [vmem:[#allocation26_spill] sm:$0xff] }
  0xc8   :  { %1539 = vmatpush.bf16.msra.mxu0 %v6074_v16  ;;  %v506_v16 = vpop.f32.mrf.mxu2 }
  0xc9   :  { %1552 = vmatpush.bf16.msra.mxu1 %v6076_v17  ;;  %1565 = vmatpush.bf16.msra.mxu2 %v6088_v21  ;;  %v507_v17 = vadd.f32 %v506_v16, %v301_v42  ;;  %v10618_v42 = vld [vmem:[#allocation18_spill] sm:$0xff]  ;;  %v10628_v16 = vld [vmem:[#allocation28_spill] sm:$0xff] }
  0xca   :  { %1578 = vmatpush.bf16.msra.mxu3 %v6099_v25  ;;  %v519_v21 = vpop.f32.mrf.mxu3 }
  0xcb   :  { %v520_v25 = vadd.f32 %v519_v21, %v507_v17  ;;  %v10629_v17 = vld [vmem:[#allocation29_spill] sm:$0xff]  ;;  %v10630_v21 = vld [vmem:[#allocation30_spill] sm:$0xff] }
  0xcc   :  { %1540 = vmatpush.bf16.msra.mxu0 %v6111_v29  ;;  %v482_v29 = vpop.f32.mrf.mxu0 }
  0xcd   :  { %1553 = vmatpush.bf16.msra.mxu1 %v6124_v33  ;;  %1566 = vmatpush.bf16.msra.mxu2 %v6126_v34  ;;  %v495_v33 = vpop.f32.mrf.mxu1  ;;  %v10632_v29 = vld [vmem:[#allocation32_spill] sm:$0xff] }
  0xce   :  { %1579 = vmatpush.bf16.msra.mxu3 %v6138_v38  ;;  %v10633_v33 = vld [vmem:[#allocation33_spill] sm:$0xff] }
  0xd0   :  { %1541 = vmatpush.bf16.msra.mxu0 %v6156_v44  ;;  %v508_v34 = vpop.f32.mrf.mxu2  ;;  %v10602_v44 = vld [vmem:[#allocation2_spill] sm:$0xff] }
  0xd1   :  { %1554 = vmatpush.bf16.msra.mxu1 %v6160_v45  ;;  %1567 = vmatpush.bf16.msra.mxu2 %v6162_v46  ;;  %v10603_v45 = vld [vmem:[#allocation3_spill] sm:$0xff]  ;;  %v10604_v46 = vld [vmem:[#allocation4_spill] sm:$0xff]  ;;  %v10634_v34 = vld [vmem:[#allocation34_spill] sm:$0xff] }
  0xd2   :  { %1580 = vmatpush.bf16.msra.mxu3 %v6174_v50  ;;  %v521_v38 = vpop.f32.mrf.mxu3  ;;  %v10605_v50 = vld [vmem:[#allocation5_spill] sm:$0xff] }
  0xd3   :  { %v10635_v38 = vld [vmem:[#allocation35_spill] sm:$0xff] }
  0xd4   :  { %1542 = vmatpush.bf16.msra.mxu0 %v6192_v56  ;;  %v10606_v56 = vld [vmem:[#allocation6_spill] sm:$0xff] }
  0xd5   :  { %1555 = vmatpush.bf16.msra.mxu1 %v6196_v57  ;;  %1568 = vmatpush.bf16.msra.mxu2 %v6198_v58  ;;  %v10607_v57 = vld [vmem:[#allocation7_spill] sm:$0xff] }
  0xd6   :  { %1581 = vmatpush.bf16.msra.mxu3 %v6210_v62  ;;  %v10608_v62 = vld [vmem:[#allocation8_spill] sm:$0xff] }
  0xd8   :  { %1543 = vmatpush.bf16.msra.mxu0 %v6228_v5 }
  0xd9   :  { %1556 = vmatpush.bf16.msra.mxu1 %v6232_v6  ;;  %1569 = vmatpush.bf16.msra.mxu2 %v6234_v9  ;;  %v10609_v6 = vld [vmem:[#allocation9_spill] sm:$0xff]  ;;  %v10610_v9 = vld [vmem:[#allocation10_spill] sm:$0xff] }
  0xda   :  { %1582 = vmatpush.bf16.msra.mxu3 %v6246_v14 }
  0xdc   :  { %1544 = vmatpush.bf16.msra.mxu0 %v6264_v23  ;;  %v10611_v23 = vld [vmem:[#allocation11_spill] sm:$0xff] }
  0xdd   :  { %1557 = vmatpush.bf16.msra.mxu1 %v6274_v27  ;;  %1570 = vmatpush.bf16.msra.mxu2 %v6276_v28  ;;  %v10612_v28 = vld [vmem:[#allocation12_spill] sm:$0xff] }
  0xde   :  { %1583 = vmatpush.bf16.msra.mxu3 %v6288_v35  ;;  %v10613_v35 = vld [vmem:[#allocation13_spill] sm:$0xff] }
  0xe0   :  { %1545 = vmatpush.bf16.msra.mxu0 %v6309_v43  ;;  %v741_v58 = vpop.f32.mrf.mxu0  ;;  %v10614_v43 = vld [vmem:[#allocation14_spill] sm:$0xff] }
  0xe1   :  { %1558 = vmatpush.bf16.msra.mxu1 %v6322_v51  ;;  %1571 = vmatpush.bf16.msra.mxu2 %v6324_v52  ;;  %v754_v5 = vpop.f32.mrf.mxu1  ;;  %v10615_v51 = vld [vmem:[#allocation15_spill] sm:$0xff] }
  0xe2   :  { %1584 = vmatpush.bf16.msra.mxu3 %v6333_v55  ;;  %v755_v14 = vadd.f32 %v754_v5, %v741_v58  ;;  %v10641_v58 = vld [vmem:[#allocation41_spill] sm:$0xff] }
  0xe3   :  { %1546 = vmatmul.bf16.vlgmr.msra.gmra.mxu0 %v6955_v32 }
  0xe4   :  { %1590 = vmatpush.bf16.msrb.mxu0 %v6335_v59  ;;  %1572 = vmatmul.bf16.vlgmr.msra.gmra.mxu2 %v6955_v32  ;;  %v7852_v27 = vadd.f32 %v755_v14, %v494_v12  ;;  %v10627_v12 = vld [vmem:[#allocation27_spill] sm:$0xff]  ;;  %v10644_v14 = vld [vmem:[#allocation44_spill] sm:$0xff] }
  0xe5   :  { %1603 = vmatpush.bf16.msrb.mxu1 %v6337_v60  ;;  %1616 = vmatpush.bf16.msrb.mxu2 %v10602_v44  ;;  %v10616_v60 = vld [vmem:[#allocation16_spill] sm:$0xff] }
  0xe6   :  { %1629 = vmatpush.bf16.msrb.mxu3 %v10603_v45  ;;  %1559 = vmatmul.bf16.vlgmr.msra.gmra.mxu1 %v6968_v22  ;;  %v10636_v44 = vld [vmem:[#allocation36_spill] sm:$0xff]  ;;  %v10637_v45 = vld [vmem:[#allocation37_spill] sm:$0xff] }
  0xe7   :  { %1585 = vmatmul.bf16.vlgmr.msra.gmra.mxu3 %v6968_v22 }
  0xe8   :  { %1591 = vmatpush.bf16.msrb.mxu0 %v10604_v46  ;;  %v743_v59 = vpop.f32.mrf.mxu0  ;;  %v10638_v46 = vld [vmem:[#allocation38_spill] sm:$0xff] }
  0xe9   :  { %1604 = vmatpush.bf16.msrb.mxu1 %v10605_v50  ;;  %1617 = vmatpush.bf16.msrb.mxu2 %v10606_v56  ;;  %v767_v52 = vpop.f32.mrf.mxu2  ;;  %v756_v4 = vpop.f32.mrf.mxu1  ;;  %v10639_v50 = vld [vmem:[#allocation39_spill] sm:$0xff]  ;;  %v10640_v56 = vld [vmem:[#allocation40_spill] sm:$0xff] }
  0xea   :  { %1630 = vmatpush.bf16.msrb.mxu3 %v10607_v57  ;;  %v780_v55 = vpop.f32.mrf.mxu3 }
  0xeb   :  { %v781_v10 = vadd.f32 %v780_v55, %v767_v52  ;;  %v10648_v55 = vld [vmem:[#allocation48_spill] sm:$0xff] }
  0xec   :  { %1592 = vmatpush.bf16.msrb.mxu0 %v10608_v62  ;;  %v10642_v62 = vld [vmem:[#allocation42_spill] sm:$0xff] }
  0xed   :  { %1605 = vmatpush.bf16.msrb.mxu1 %v10609_v6  ;;  %1618 = vmatpush.bf16.msrb.mxu2 %v10610_v9  ;;  %v7862_v18 = vadd.f32 %v781_v10, %v520_v25  ;;  %v10631_v25 = vld [vmem:[#allocation31_spill] sm:$0xff]  ;;  %v10650_v10 = vld [vmem:[#allocation50_spill] sm:$0xff] }
  0xee   :  { %1631 = vmatpush.bf16.msrb.mxu3 %v10611_v23  ;;  %v10643_v6 = vld [vmem:[#allocation43_spill] sm:$0xff]  ;;  %v10645_v23 = vld [vmem:[#allocation45_spill] sm:$0xff] }
  0xf0   :  { %1593 = vmatpush.bf16.msrb.mxu0 %v10612_v28  ;;  %v10646_v28 = vld [vmem:[#allocation46_spill] sm:$0xff] }
  0xf1   :  { %1606 = vmatpush.bf16.msrb.mxu1 %v10613_v35  ;;  %1619 = vmatpush.bf16.msrb.mxu2 %v10614_v43  ;;  %v769_v20 = vpop.f32.mrf.mxu2  ;;  %v10647_v43 = vld [vmem:[#allocation47_spill] sm:$0xff] }
  0xf2   :  { %1632 = vmatpush.bf16.msrb.mxu3 %v10615_v51  ;;  %v782_v49 = vpop.f32.mrf.mxu3  ;;  %v10655_v20 = vld [vmem:[#allocation55_spill] sm:$0xff] }
  0xf4   :  { %1594 = vmatpush.bf16.msrb.mxu0 %v10616_v60  ;;  %v10649_v60 = vld [vmem:[#allocation49_spill] sm:$0xff] }
  0xf5   :  { %1607 = vmatpush.bf16.msrb.mxu1 %v10617_v24  ;;  %1620 = vmatpush.bf16.msrb.mxu2 %v10618_v42  ;;  %v10651_v24 = vld [vmem:[#allocation51_spill] sm:$0xff]  ;;  %v10652_v42 = vld [vmem:[#allocation52_spill] sm:$0xff] }
  0xf6   :  { %1633 = vmatpush.bf16.msrb.mxu3 %v10619_v1  ;;  %v1645_v1 = vshll.u32 %v6404_v41, 16 }
  0xf8   :  { %1595 = vmatpush.bf16.msrb.mxu0 %v10620_v47  ;;  %v10653_v47 = vld [vmem:[#allocation53_spill] sm:$0xff] }
  0xf9   :  { %1608 = vmatpush.bf16.msrb.mxu1 %v10621_v36  ;;  %1621 = vmatpush.bf16.msrb.mxu2 %v10622_v30  ;;  %v10654_v36 = vld [vmem:[#allocation54_spill] sm:$0xff]  ;;  %v1652_v30 = vshll.u32 %v6412_v48, 16 }
  0xfa   :  { %1634 = vmatpush.bf16.msrb.mxu3 %v10623_v40 }
  0xfc   :  { %1596 = vmatpush.bf16.msrb.mxu0 %v10624_v3  ;;  %v10656_v3 = vld [vmem:[#allocation56_spill] sm:$0xff] }
  0xfd   :  { %1609 = vmatpush.bf16.msrb.mxu1 %v10625_v7  ;;  %1622 = vmatpush.bf16.msrb.mxu2 %v10626_v8  ;;  %v1643_v7 = vshrl.u32 %v6404_v41, 16  ;;  %v1647_v8 = vrot.slane %v1645_v1, 1  ;;  %v10679_v1 = vld [vmem:[#allocation79_spill] sm:$0xff] }
  0xfe   :  { %1635 = vmatpush.bf16.msrb.mxu3 %v10627_v12  ;;  %v10657_v12 = vld [vmem:[#allocation57_spill] sm:$0xff] }
 0x100   :  { %1597 = vmatpush.bf16.msrb.mxu0 %v10628_v16  ;;  %v1030_v57 = vpop.f32.mrf.mxu0  ;;  %v1650_v16 = vshrl.u32 %v6412_v48, 16 }
 0x101   :  { %1610 = vmatpush.bf16.msrb.mxu1 %v10629_v17  ;;  %1623 = vmatpush.bf16.msrb.mxu2 %v10630_v21  ;;  %v1654_v17 = vrot.slane %v1652_v30, 1  ;;  %v10658_v21 = vld [vmem:[#allocation58_spill] sm:$0xff]  ;;  %v10681_v30 = vld [vmem:[#allocation81_spill] sm:$0xff] }
 0x102   :  { %1636 = vmatpush.bf16.msrb.mxu3 %v10631_v25  ;;  %v7913_v25 = vor.u32 %v1647_v8, %v1643_v7  ;;  %v10686_v8 = vld [vmem:[#allocation86_spill] sm:$0xff] }
 0x103   :  { %1598 = vmatmul.bf16.vlgmr.msrb.gmra.mxu0 %v6404_v41  ;;  %v1043_v5 = vpop.f32.mrf.mxu1 }
 0x104   :  { %1658 = vmatpush.bf16.msra.mxu0 %v10632_v29  ;;  %1624 = vmatmul.bf16.vlgmr.msrb.gmra.mxu2 %v6404_v41  ;;  %v1044_v9 = vadd.f32 %v1043_v5, %v1030_v57  ;;  %v10659_v29 = vld [vmem:[#allocation59_spill] sm:$0xff]  ;;  %v10669_v57 = vld [vmem:[#allocation69_spill] sm:$0xff] }
 0x105   :  { %1671 = vmatpush.bf16.msra.mxu1 %v10633_v33  ;;  %1684 = vmatpush.bf16.msra.mxu2 %v10634_v34  ;;  %v10660_v33 = vld [vmem:[#allocation60_spill] sm:$0xff]  ;;  %v7917_v34 = vor.u32 %v1654_v17, %v1650_v16  ;;  %v10671_v5 = vld [vmem:[#allocation71_spill] sm:$0xff]  ;;  %v10689_v17 = vld [vmem:[#allocation89_spill] sm:$0xff] }
 0x106   :  { %1697 = vmatpush.bf16.msra.mxu3 %v10635_v38  ;;  %1611 = vmatmul.bf16.vlgmr.msrb.gmra.mxu1 %v6412_v48  ;;  %v10661_v38 = vld [vmem:[#allocation61_spill] sm:$0xff]  ;;  %v10688_v16 = vld [vmem:[#allocation88_spill] sm:$0xff] }
 0x107   :  { %1637 = vmatmul.bf16.vlgmr.msrb.gmra.mxu3 %v6412_v48  ;;  %v1056_v35 = vpop.f32.mrf.mxu2 }
 0x108   :  { %1659 = vmatpush.bf16.msra.mxu0 %v10636_v44  ;;  %v1032_v59 = vpop.f32.mrf.mxu0  ;;  %v10663_v44 = vld [vmem:[#allocation63_spill] sm:$0xff] }
 0x109   :  { %1672 = vmatpush.bf16.msra.mxu1 %v10637_v45  ;;  %1685 = vmatpush.bf16.msra.mxu2 %v10638_v46  ;;  %v10664_v45 = vld [vmem:[#allocation64_spill] sm:$0xff]  ;;  %v10665_v46 = vld [vmem:[#allocation65_spill] sm:$0xff] }
 0x10a   :  { %1698 = vmatpush.bf16.msra.mxu3 %v10639_v50  ;;  %v1069_v51 = vpop.f32.mrf.mxu3  ;;  %v10667_v50 = vld [vmem:[#allocation67_spill] sm:$0xff] }
 0x10b   :  { %v1070_v52 = vadd.f32 %v1069_v51, %v1056_v35  ;;  %v1045_v4 = vpop.f32.mrf.mxu1  ;;  %v10675_v51 = vld [vmem:[#allocation75_spill] sm:$0xff] }
 0x10c   :  { %1660 = vmatpush.bf16.msra.mxu0 %v10640_v56  ;;  %v10668_v56 = vld [vmem:[#allocation68_spill] sm:$0xff] }
 0x10d   :  { %1673 = vmatpush.bf16.msra.mxu1 %v10641_v58  ;;  %1686 = vmatpush.bf16.msra.mxu2 %v10642_v62  ;;  %v10670_v58 = vld [vmem:[#allocation70_spill] sm:$0xff] }
 0x10e   :  { %1699 = vmatpush.bf16.msra.mxu3 %v10643_v6  ;;  %v10672_v6 = vld [vmem:[#allocation72_spill] sm:$0xff] }
 0x10f   :  { %v1058_v40 = vpop.f32.mrf.mxu2 }
 0x110   :  { %1661 = vmatpush.bf16.msra.mxu0 %v10644_v14  ;;  %v10682_v40 = vld [vmem:[#allocation82_spill] sm:$0xff] }
 0x111   :  { %1674 = vmatpush.bf16.msra.mxu1 %v10645_v23  ;;  %1687 = vmatpush.bf16.msra.mxu2 %v10646_v28  ;;  %v10673_v28 = vld [vmem:[#allocation73_spill] sm:$0xff] }
 0x112   :  { %1700 = vmatpush.bf16.msra.mxu3 %v10647_v43  ;;  %v1071_v49 = vpop.f32.mrf.mxu3  ;;  %v10674_v43 = vld [vmem:[#allocation74_spill] sm:$0xff] }
 0x113   :  { %v10684_v49 = vld [vmem:[#allocation84_spill] sm:$0xff] }
 0x114   :  { %1662 = vmatpush.bf16.msra.mxu0 %v10648_v55  ;;  %v10676_v55 = vld [vmem:[#allocation76_spill] sm:$0xff] }
 0x115   :  { %1675 = vmatpush.bf16.msra.mxu1 %v10649_v60  ;;  %1688 = vmatpush.bf16.msra.mxu2 %v10650_v10  ;;  %v10677_v60 = vld [vmem:[#allocation77_spill] sm:$0xff] }
 0x116   :  { %1701 = vmatpush.bf16.msra.mxu3 %v10651_v24  ;;  %v10678_v24 = vld [vmem:[#allocation78_spill] sm:$0xff] }
 0x118   :  { %1663 = vmatpush.bf16.msra.mxu0 %v10652_v42 }
 0x119   :  { %1676 = vmatpush.bf16.msra.mxu1 %v10653_v47  ;;  %1689 = vmatpush.bf16.msra.mxu2 %v10654_v36  ;;  %v10680_v47 = vld [vmem:[#allocation80_spill] sm:$0xff] }
 0x11a   :  { %1702 = vmatpush.bf16.msra.mxu3 %v10655_v20  ;;  %v10683_v20 = vld [vmem:[#allocation83_spill] sm:$0xff] }
 0x11c   :  { %1664 = vmatpush.bf16.msra.mxu0 %v10656_v3  ;;  %v10685_v3 = vld [vmem:[#allocation85_spill] sm:$0xff] }
 0x11d   :  { %1677 = vmatpush.bf16.msra.mxu1 %v6879_v11  ;;  %1690 = vmatpush.bf16.msra.mxu2 %v10657_v12  ;;  %v10662_v11 = vld [vmem:[#allocation62_spill] sm:$0xff]  ;;  %v10687_v12 = vld [vmem:[#allocation87_spill] sm:$0xff] }
 0x11e   :  { %1703 = vmatpush.bf16.msra.mxu3 %v6891_v15  ;;  %v10666_v15 = vld [vmem:[#allocation66_spill] sm:$0xff] }
 0x120   :  { %1665 = vmatpush.bf16.msra.mxu0 %v10658_v21  ;;  %v1242_v62 = vpop.f32.mrf.mxu0  ;;  %v10690_v21 = vld [vmem:[#allocation90_spill] sm:$0xff] }
 0x121   :  { %1678 = vmatpush.bf16.msra.mxu1 %v10659_v29  ;;  %1691 = vmatpush.bf16.msra.mxu2 %v10660_v33  ;;  %v1243_v14 = vadd.f32 %v1242_v62, %v1044_v9  ;;  %v10691_v29 = vld [vmem:[#allocation91_spill] sm:$0xff]  ;;  %v10692_v33 = vld [vmem:[#allocation92_spill] sm:$0xff] }
 0x122   :  { %1704 = vmatpush.bf16.msra.mxu3 %v10661_v38  ;;  %v10693_v38 = vld [vmem:[#allocation93_spill] sm:$0xff] }
 0x123   :  { %1666 = vmatmul.bf16.vlgmr.msra.gmra.mxu0 %v7913_v25  ;;  %v1255_v23 = vpop.f32.mrf.mxu1 }
 0x124   :  { %1718 = vmatpush.bf16.msrb.mxu0 %v10662_v11  ;;  %1679 = vmatmul.bf16.vlgmr.msra.gmra.mxu1 %v7917_v34  ;;  %v1256_v35 = vadd.f32 %v1255_v23, %v1243_v14  ;;  %v10694_v11 = vld [vmem:[#allocation94_spill] sm:$0xff]  ;;  %v10703_v14 = vld [vmem:[#allocation103_spill] sm:$0xff]  ;;  %v10704_v23 = vld [vmem:[#allocation104_spill] sm:$0xff] }
 0x125   :  { %1731 = vmatpush.bf16.msrb.mxu1 %v10663_v44  ;;  %1744 = vmatpush.bf16.msrb.mxu2 %v10664_v45  ;;  %v10695_v44 = vld [vmem:[#allocation95_spill] sm:$0xff]  ;;  %v10696_v45 = vld [vmem:[#allocation96_spill] sm:$0xff] }
 0x126   :  { %1757 = vmatpush.bf16.msrb.mxu3 %v10665_v46  ;;  %1692 = vmatmul.bf16.vlgmr.msra.gmra.mxu2 %v7913_v25  ;;  %v10697_v46 = vld [vmem:[#allocation97_spill] sm:$0xff] }
 0x127   :  { %1705 = vmatmul.bf16.vlgmr.msra.gmra.mxu3 %v7917_v34  ;;  %v1268_v59 = vpop.f32.mrf.mxu2 }
 0x128   :  { %1719 = vmatpush.bf16.msrb.mxu0 %v10666_v15  ;;  %v1269_v10 = vadd.f32 %v1268_v59, %v1070_v52  ;;  %v1244_v9 = vpop.f32.mrf.mxu0  ;;  %v17_v15 = vld [vmem:[%s10165_s3] sm:$0x3] }
 0x129   :  { %1732 = vmatpush.bf16.msrb.mxu1 %v10667_v50  ;;  %1745 = vmatpush.bf16.msrb.mxu2 %v10668_v56  ;;  %v10698_v50 = vld [vmem:[#allocation98_spill] sm:$0xff]  ;;  %v10699_v56 = vld [vmem:[#allocation99_spill] sm:$0xff]  ;;  %v7973_v62 = vperm.slane %v17_v15, 0 }
 0x12a   :  { %1758 = vmatpush.bf16.msrb.mxu3 %v10669_v57  ;;  %v1281_v4 = vpop.f32.mrf.mxu3  ;;  %v10700_v57 = vld [vmem:[#allocation100_spill] sm:$0xff] }
 0x12b   :  { %v7941_v42 = vadd.f32 %v1281_v4, %v1269_v10  ;;  %v1257_v36 = vpop.f32.mrf.mxu1  ;;  %v10708_v10 = vld [vmem:[#allocation108_spill] sm:$0xff]  ;;  %v7985_v4 = vperm.slane %v17_v15, 1  ;;  %v10722_v15 = vld [vmem:[#allocation121_spill] sm:$0xff] }
 0x12c   :  { %1720 = vmatpush.bf16.msrb.mxu0 %v10670_v58  ;;  %v10701_v58 = vld [vmem:[#allocation101_spill] sm:$0xff] }
 0x12d   :  { %1733 = vmatpush.bf16.msrb.mxu1 %v10671_v5  ;;  %1746 = vmatpush.bf16.msrb.mxu2 %v10672_v6  ;;  %v10702_v6 = vld [vmem:[#allocation102_spill] sm:$0xff]  ;;  %10709 = vst [vmem:[#allocation2_spill] sm:$0xff] %v7985_v4 }
 0x12e   :  { %1759 = vmatpush.bf16.msrb.mxu3 %v10673_v28 }
 0x12f   :  { %v1270_v52 = vpop.f32.mrf.mxu2 }
 0x130   :  { %1721 = vmatpush.bf16.msrb.mxu0 %v10674_v43  ;;  %v10705_v43 = vld [vmem:[#allocation105_spill] sm:$0xff]  ;;  %v10713_v52 = vld [vmem:[#allocation112_spill] sm:$0xff] }
 0x131   :  { %1734 = vmatpush.bf16.msrb.mxu1 %v10675_v51  ;;  %1747 = vmatpush.bf16.msrb.mxu2 %v10676_v55  ;;  %v10706_v55 = vld [vmem:[#allocation106_spill] sm:$0xff] }
 0x132   :  { %1760 = vmatpush.bf16.msrb.mxu3 %v10677_v60  ;;  %v1283_v7 = vpop.f32.mrf.mxu3  ;;  %v10707_v60 = vld [vmem:[#allocation107_spill] sm:$0xff] }
 0x133   :  { %v10714_v7 = vld [vmem:[#allocation113_spill] sm:$0xff] }
 0x134   :  { %1722 = vmatpush.bf16.msrb.mxu0 %v10678_v24  ;;  %v10710_v24 = vld [vmem:[#allocation109_spill] sm:$0xff] }
 0x135   :  { %1735 = vmatpush.bf16.msrb.mxu1 %v10679_v1  ;;  %1748 = vmatpush.bf16.msrb.mxu2 %v10680_v47 }
 0x136   :  { %1761 = vmatpush.bf16.msrb.mxu3 %v10681_v30 }
 0x138   :  { %1723 = vmatpush.bf16.msrb.mxu0 %v10682_v40  ;;  %v10711_v40 = vld [vmem:[#allocation110_spill] sm:$0xff] }
 0x139   :  { %1736 = vmatpush.bf16.msrb.mxu1 %v10683_v20  ;;  %1749 = vmatpush.bf16.msrb.mxu2 %v10684_v49  ;;  %v10712_v49 = vld [vmem:[#allocation111_spill] sm:$0xff] }
 0x13a   :  { %1762 = vmatpush.bf16.msrb.mxu3 %v10685_v3  ;;  %v792_v3 = vadd.f32 %v7985_v4, %v7862_v18  ;;  %v10719_v18 = vld [vmem:[#allocation118_spill] sm:$0xff] }
 0x13c   :  { %1724 = vmatpush.bf16.msrb.mxu0 %v10686_v8 }
 0x13d   :  { %1737 = vmatpush.bf16.msrb.mxu1 %v10687_v12  ;;  %1750 = vmatpush.bf16.msrb.mxu2 %v10688_v16  ;;  %v10715_v16 = vld [vmem:[#allocation114_spill] sm:$0xff] }
 0x13e   :  { %1763 = vmatpush.bf16.msrb.mxu3 %v10689_v17  ;;  %v10716_v17 = vld [vmem:[#allocation115_spill] sm:$0xff] }
 0x140   :  { %1725 = vmatpush.bf16.msrb.mxu0 %v10690_v21  ;;  %v1487_v5 = vpop.f32.mrf.mxu0  ;;  %v10717_v21 = vld [vmem:[#allocation116_spill] sm:$0xff] }
 0x141   :  { %1738 = vmatpush.bf16.msrb.mxu1 %v10691_v29  ;;  %1751 = vmatpush.bf16.msrb.mxu2 %v10692_v33  ;;  %v794_v29 = vmax.f32 %v792_v3, 0.0  ;;  %v10746_v3 = vld [vmem:[#allocation145_spill] sm:$0xff] }
 0x142   :  { %1764 = vmatpush.bf16.msrb.mxu3 %v10693_v38  ;;  %v10718_v38 = vld [vmem:[#allocation117_spill] sm:$0xff] }
 0x143   :  { %1726 = vmatmul.bf16.vlgmr.msrb.gmra.mxu0 %v6955_v32 }
 0x144   :  { %1770 = vmatpush.bf16.msra.mxu0 %v10694_v11  ;;  %1752 = vmatmul.bf16.vlgmr.msrb.gmra.mxu2 %v6955_v32  ;;  %v1500_v32 = vpop.f32.mrf.mxu1 }
 0x145   :  { %1783 = vmatpush.bf16.msra.mxu1 %v10695_v44  ;;  %1796 = vmatpush.bf16.msra.mxu2 %v10696_v45  ;;  %v1501_v28 = vadd.f32 %v1500_v32, %v1487_v5  ;;  %v10727_v5 = vld [vmem:[#allocation126_spill] sm:$0xff] }
 0x146   :  { %1809 = vmatpush.bf16.msra.mxu3 %v10697_v46  ;;  %1739 = vmatmul.bf16.vlgmr.msrb.gmra.mxu1 %v6968_v22  ;;  %v10720_v46 = vld [vmem:[#allocation119_spill] sm:$0xff]  ;;  %v10731_v32 = vld [vmem:[#allocation130_spill] sm:$0xff] }
 0x147   :  { %1765 = vmatmul.bf16.vlgmr.msrb.gmra.mxu3 %v6968_v22  ;;  %v791_v22 = vadd.f32 %v7973_v62, %v7852_v27  ;;  %v1530_v51 = vadd.f32 %v1501_v28, %v1256_v35 }
 0x148   :  { %1771 = vmatpush.bf16.msra.mxu0 %v10698_v50  ;;  %v1489_v30 = vpop.f32.mrf.mxu0  ;;  %v10723_v50 = vld [vmem:[#allocation122_spill] sm:$0xff] }
 0x149   :  { %1784 = vmatpush.bf16.msra.mxu1 %v10699_v56  ;;  %1797 = vmatpush.bf16.msra.mxu2 %v10700_v57  ;;  %v1532_v59 = vadd.f32 %v1530_v51, %v7973_v62  ;;  %v1513_v9 = vpop.f32.mrf.mxu2  ;;  %v793_v1 = vmax.f32 %v791_v22, 0.0  ;;  %v10724_v56 = vld [vmem:[#allocation123_spill] sm:$0xff]  ;;  %v10725_v57 = vld [vmem:[#allocation124_spill] sm:$0xff]  ;;  %v10735_v22 = vld [vmem:[#allocation134_spill] sm:$0xff] }
 0x14a   :  { %1810 = vmatpush.bf16.msra.mxu3 %v10701_v58  ;;  %v1526_v36 = vpop.f32.mrf.mxu3  ;;  %v10726_v58 = vld [vmem:[#allocation125_spill] sm:$0xff] }
 0x14b   :  { %v1534_v47 = vmax.f32 %v1532_v59, 0.0  ;;  %v1527_v27 = vadd.f32 %v1526_v36, %v1513_v9  ;;  %v10737_v59 = vld [vmem:[#allocation136_spill] sm:$0xff]  ;;  %v10742_v30 = vld [vmem:[#allocation141_spill] sm:$0xff] }
 0x14c   :  { %1772 = vmatpush.bf16.msra.mxu0 %v10702_v6  ;;  %v1502_v35 = vpop.f32.mrf.mxu1  ;;  %v10728_v6 = vld [vmem:[#allocation127_spill] sm:$0xff] }
 0x14d   :  { %1785 = vmatpush.bf16.msra.mxu1 %v10703_v14  ;;  %1798 = vmatpush.bf16.msra.mxu2 %v10704_v23  ;;  %v7989_v20 = vmax.f32 %v793_v1, %v1534_v47  ;;  %v1531_v8 = vadd.f32 %v1527_v27, %v7941_v42  ;;  %v10721_v42 = vld [vmem:[#allocation120_spill] sm:$0xff]  ;;  %v10732_v14 = vld [vmem:[#allocation131_spill] sm:$0xff] }
 0x14e   :  { %1811 = vmatpush.bf16.msra.mxu3 %v10705_v43  ;;  %v10733_v23 = vld [vmem:[#allocation132_spill] sm:$0xff]  ;;  %v10734_v43 = vld [vmem:[#allocation133_spill] sm:$0xff]  ;;  %v10744_v35 = vld [vmem:[#allocation143_spill] sm:$0xff] }
 0x14f   :  { %v1533_v12 = vadd.f32 %v1531_v8, %v7985_v4  ;;  %v10741_v47 = vld [vmem:[#allocation140_spill] sm:$0xff] }
 0x150   :  { %1773 = vmatpush.bf16.msra.mxu0 %v10706_v55  ;;  %v10736_v55 = vld [vmem:[#allocation135_spill] sm:$0xff]  ;;  %v4778_v8 = vld [vmem:[%s10162_s2 + $0x270] sm:$0xf] }
 0x151   :  { %1786 = vmatpush.bf16.msra.mxu1 %v10707_v60  ;;  %1799 = vmatpush.bf16.msra.mxu2 %v10708_v10  ;;  %v1535_v33 = vmax.f32 %v1533_v12, 0.0  ;;  %v1515_v11 = vpop.f32.mrf.mxu2  ;;  %v10739_v60 = vld [vmem:[#allocation138_spill] sm:$0xff]  ;;  %v5857_v12 = vld [vmem:[%s10162_s2 + $0x274] sm:$0xf0] }
 0x152   :  { %1812 = vmatpush.bf16.msra.mxu3 %v10710_v24  ;;  %v1528_v44 = vpop.f32.mrf.mxu3  ;;  %v10740_v24 = vld [vmem:[#allocation139_spill] sm:$0xff]  ;;  %v4834_v11 = vld [vmem:[%s10162_s2 + $0x2e0] sm:$0xf] }
 0x153   :  { %v8002_v45 = vmax.f32 %v794_v29, %v1535_v33  ;;  %v8072_v29 = vor.u32 %v5857_v12, %v4778_v8  ;;  %v5871_v44 = vld [vmem:[%s10162_s2 + $0x2e4] sm:$0xf0] }
 0x154   :  { %1774 = vmatpush.bf16.msra.mxu0 %v10711_v40  ;;  %v10743_v40 = vld [vmem:[#allocation142_spill] sm:$0xff] }
 0x155   :  { %1787 = vmatpush.bf16.msra.mxu1 %v10712_v49  ;;  %1800 = vmatpush.bf16.msra.mxu2 %v10713_v52  ;;  %v10745_v49 = vld [vmem:[#allocation144_spill] sm:$0xff] }
 0x156   :  { %1813 = vmatpush.bf16.msra.mxu3 %v10714_v7 }
 0x158   :  { %1775 = vmatpush.bf16.msra.mxu0 %v10715_v16  ;;  %v5856_v16 = vld [vmem:[%s10162_s2 + $0x274] sm:$0xf] }
 0x159   :  { %1788 = vmatpush.bf16.msra.mxu1 %v10716_v17  ;;  %1801 = vmatpush.bf16.msra.mxu2 %v10717_v21  ;;  %v4780_v17 = vld [vmem:[%s10162_s2 + $0x278] sm:$0xf0] }
 0x15a   :  { %1814 = vmatpush.bf16.msra.mxu3 %v10718_v38  ;;  %v4844_v21 = vld [vmem:[%s10162_s2 + $0x2f8] sm:$0xf0]  ;;  %v8076_v38 = vor.u32 %v5856_v16, %v4780_v17  ;;  %v4738_v17 = vld [vmem:[%s10162_s2 + $0x220] sm:$0xf] }
 0x15c   :  { %1776 = vmatpush.bf16.msra.mxu0 %v10719_v18  ;;  %v5854_v18 = vld [vmem:[%s10162_s2 + $0x264] sm:$0xf] }
 0x15d   :  { %1789 = vmatpush.bf16.msra.mxu1 %v10720_v46  ;;  %1802 = vmatpush.bf16.msra.mxu2 %v7466_v2  ;;  %v10730_v2 = vld [vmem:[#allocation129_spill] sm:$0xff]  ;;  %v4772_v46 = vld [vmem:[%s10162_s2 + $0x268] sm:$0xf0] }
 0x15e   :  { %1815 = vmatpush.bf16.msra.mxu3 %v7478_v63  ;;  %v10729_v63 = vld [vmem:[#allocation128_spill] sm:$0xff] }
 0x160   :  { %1777 = vmatpush.bf16.msra.mxu0 %v10721_v42  ;;  %v1547_v28 = vpop.f32.mrf.mxu0  ;;  %v4836_v42 = vld [vmem:[%s10162_s2 + $0x2e8] sm:$0xf0] }
 0x161   :  { %1790 = vmatpush.bf16.msra.mxu1 %v10722_v15  ;;  %1803 = vmatpush.bf16.msra.mxu2 %v10723_v50  ;;  %v4762_v50 = vld [vmem:[%s10162_s2 + $0x250] sm:$0xf] }
 0x162   :  { %1816 = vmatpush.bf16.msra.mxu3 %v10724_v56  ;;  %v4826_v56 = vld [vmem:[%s10162_s2 + $0x2d0] sm:$0xf] }
 0x163   :  { %1778 = vmatmul.bf16.vlgmr.msra.gmra.mxu0 %v6404_v41  ;;  %v1560_v51 = vpop.f32.mrf.mxu1 }
 0x164   :  { %1822 = vmatpush.bf16.msrb.mxu0 %v10725_v57  ;;  %1804 = vmatmul.bf16.vlgmr.msra.gmra.mxu2 %v6404_v41  ;;  %v8028_v41 = vadd.f32 %v1560_v51, %v1547_v28  ;;  %v4818_v28 = vld [vmem:[%s10162_s2 + $0x2c0] sm:$0xf]  ;;  %v5850_v51 = vld [vmem:[%s10162_s2 + $0x244] sm:$0xf] }
 0x165   :  { %1835 = vmatpush.bf16.msrb.mxu1 %v10726_v58  ;;  %1848 = vmatpush.bf16.msrb.mxu2 %v10727_v5  ;;  %v5869_v58 = vld [vmem:[%s10162_s2 + $0x2d4] sm:$0xf0]  ;;  %v5852_v5 = vld [vmem:[%s10162_s2 + $0x254] sm:$0xf] }
 0x166   :  { %1861 = vmatpush.bf16.msrb.mxu3 %v10728_v6  ;;  %1791 = vmatmul.bf16.vlgmr.msra.gmra.mxu1 %v6412_v48  ;;  %v4764_v6 = vld [vmem:[%s10162_s2 + $0x258] sm:$0xf0] }
 0x167   :  { %1817 = vmatmul.bf16.vlgmr.msra.gmra.mxu3 %v6412_v48  ;;  %v10738_v48 = vld [vmem:[#allocation137_spill] sm:$0xff]  ;;  %v1573_v10 = vpop.f32.mrf.mxu2 }
 0x168   :  { %1823 = vmatpush.bf16.msrb.mxu0 %v10729_v63  ;;  %v1549_v36 = vpop.f32.mrf.mxu0  ;;  %v5868_v63 = vld [vmem:[%s10162_s2 + $0x2d4] sm:$0xf] }
 0x169   :  { %1836 = vmatpush.bf16.msrb.mxu1 %v10730_v2  ;;  %1849 = vmatpush.bf16.msrb.mxu2 %v10731_v32  ;;  %v4828_v2 = vld [vmem:[%s10162_s2 + $0x2d8] sm:$0xf0]  ;;  %v5849_v36 = vld [vmem:[%s10162_s2 + $0x234] sm:$0xf0] }
 0x16a   :  { %1862 = vmatpush.bf16.msrb.mxu3 %v10732_v14  ;;  %v1586_v9 = vpop.f32.mrf.mxu3  ;;  %v8153_v14 = vor.u32 %v5869_v58, %v4826_v56 }
 0x16b   :  { %v8034_v1 = vadd.f32 %v1586_v9, %v1573_v10  ;;  %v1562_v27 = vpop.f32.mrf.mxu1 }
 0x16c   :  { %1824 = vmatpush.bf16.msrb.mxu0 %v10733_v23  ;;  %v4754_v23 = vld [vmem:[%s10162_s2 + $0x240] sm:$0xf] }
 0x16d   :  { %1837 = vmatpush.bf16.msrb.mxu1 %v10734_v43  ;;  %1850 = vmatpush.bf16.msrb.mxu2 %v10735_v22  ;;  %v8167_v43 = vor.u32 %v5868_v63, %v4828_v2  ;;  %v5867_v22 = vld [vmem:[%s10162_s2 + $0x2c4] sm:$0xf0]  ;;  %v4794_v63 = vld [vmem:[%s10162_s2 + $0x290] sm:$0xf] }
 0x16e   :  { %1863 = vmatpush.bf16.msrb.mxu3 %v10736_v55  ;;  %v4756_v55 = vld [vmem:[%s10162_s2 + $0x248] sm:$0xf0] }
 0x16f   :  { %v1575_v52 = vpop.f32.mrf.mxu2  ;;  %v8191_v9 = vor.u32 %v5850_v51, %v4756_v55  ;;  %v5860_v51 = vld [vmem:[%s10162_s2 + $0x294] sm:$0xf]  ;;  %v4796_v55 = vld [vmem:[%s10162_s2 + $0x298] sm:$0xf0] }
 0x170   :  { %1825 = vmatpush.bf16.msrb.mxu0 %v10737_v59  ;;  %v5866_v59 = vld [vmem:[%s10162_s2 + $0x2c4] sm:$0xf]  ;;  %v5848_v52 = vld [vmem:[%s10162_s2 + $0x234] sm:$0xf] }
 0x171   :  { %1838 = vmatpush.bf16.msrb.mxu1 %v10738_v48  ;;  %1851 = vmatpush.bf16.msrb.mxu2 %v10739_v60  ;;  %v4820_v48 = vld [vmem:[%s10162_s2 + $0x2c8] sm:$0xf0] }
 0x172   :  { %1864 = vmatpush.bf16.msrb.mxu3 %v10740_v24  ;;  %v1588_v7 = vpop.f32.mrf.mxu3  ;;  %v8189_v24 = vor.u32 %v5867_v22, %v4818_v28  ;;  %v5844_v28 = vld [vmem:[%s10162_s2 + $0x214] sm:$0xf]  ;;  %v4732_v22 = vld [vmem:[%s10162_s2 + $0x218] sm:$0xf0] }
 0x173   :  { %v4812_v7 = vld [vmem:[%s10162_s2 + $0x2b8] sm:$0xf0] }
 0x174   :  { %1826 = vmatpush.bf16.msrb.mxu0 %v10741_v47  ;;  %v4746_v47 = vld [vmem:[%s10162_s2 + $0x230] sm:$0xf] }
 0x175   :  { %1839 = vmatpush.bf16.msrb.mxu1 %v10742_v30  ;;  %1852 = vmatpush.bf16.msrb.mxu2 %v10743_v40  ;;  %v4810_v30 = vld [vmem:[%s10162_s2 + $0x2b0] sm:$0xf]  ;;  %v8224_v12 = vor.u32 %v5849_v36, %v4746_v47  ;;  %v4786_v47 = vld [vmem:[%s10162_s2 + $0x280] sm:$0xf] }
 0x176   :  { %1865 = vmatpush.bf16.msrb.mxu3 %v10744_v35  ;;  %v8204_v35 = vor.u32 %v5866_v59, %v4820_v48  ;;  %v4722_v48 = vld [vmem:[%s10162_s2 + $0x200] sm:$0xf] }
 0x178   :  { %1827 = vmatpush.bf16.msrb.mxu0 %v7712_v13  ;;  %v4842_v13 = vld [vmem:[%s10162_s2 + $0x2f0] sm:$0xf] }
 0x179   :  { %1840 = vmatpush.bf16.msrb.mxu1 %v7716_v19  ;;  %1853 = vmatpush.bf16.msrb.mxu2 %v10745_v49  ;;  %v5873_v19 = vld [vmem:[%s10162_s2 + $0x2f4] sm:$0xf0] }
 0x17a   :  { %1866 = vmatpush.bf16.msrb.mxu3 %v10746_v3  ;;  %v8074_v33 = vor.u32 %v5873_v19, %v4842_v13  ;;  %v5865_v49 = vld [vmem:[%s10162_s2 + $0x2b4] sm:$0xf0]  ;;  %v4748_v3 = vld [vmem:[%s10162_s2 + $0x238] sm:$0xf0] }
 0x17b   :  { %v8228_v13 = vor.u32 %v5865_v49, %v4810_v30  ;;  %v8230_v19 = vor.u32 %v5848_v52, %v4748_v3  ;;  %v8314_v30 = vor.u32 %v5844_v28, %v4732_v22  ;;  %v4687_v52 = vld [vmem:[%s10163_s1 + $0x8] sm:$0xff]  ;;  %v8326_v3 = vor.u32 %v5860_v51, %v4796_v55  ;;  %v4898_v51 = vld [vmem:[%s10162_s2 + $0x60] sm:$0xf] }
 0x17c   :  { %1828 = vmatpush.bf16.msrb.mxu0 %v7748_v31  ;;  %v5872_v31 = vld [vmem:[%s10162_s2 + $0x2f4] sm:$0xf]  ;;  %v5823_v55 = vld [vmem:[%s10162_s2 + $0x64] sm:$0xf0] }
 0x17d   :  { %1841 = vmatpush.bf16.msrb.mxu1 %v7752_v53  ;;  %1854 = vmatpush.bf16.msrb.mxu2 %v7754_v0  ;;  %v4770_v0 = vld [vmem:[%s10162_s2 + $0x260] sm:$0xf]  ;;  %v5855_v53 = vld [vmem:[%s10162_s2 + $0x264] sm:$0xf0]  ;;  %10749 = vst [vmem:[#allocation5_spill] sm:$0xff] %v8314_v30 }
 0x17e   :  { %1867 = vmatpush.bf16.msrb.mxu3 %v7766_v37  ;;  %v8088_v37 = vor.u32 %v5872_v31, %v4844_v21  ;;  %v8109_v15 = vor.u32 %v5855_v53, %v4770_v0  ;;  %v5847_v31 = vld [vmem:[%s10162_s2 + $0x224] sm:$0xf0]  ;;  %v4802_v21 = vld [vmem:[%s10162_s2 + $0x2a0] sm:$0xf]  ;;  %10750 = vst [vmem:[#allocation6_spill] sm:$0xff] %v8326_v3 }
 0x180   :  { %1829 = vmatpush.bf16.msrb.mxu0 %v7784_v54  ;;  %v5870_v54 = vld [vmem:[%s10162_s2 + $0x2e4] sm:$0xf]  ;;  %v1599_v10 = vpop.f32.mrf.mxu0 }
 0x181   :  { %1842 = vmatpush.bf16.msrb.mxu1 %v7788_v26  ;;  %1855 = vmatpush.bf16.msrb.mxu2 %v7790_v39  ;;  %v8113_v26 = vor.u32 %v5871_v44, %v4834_v11  ;;  %v8115_v39 = vor.u32 %v5854_v18, %v4772_v46  ;;  %v8128_v57 = vor.u32 %v5870_v54, %v4836_v42  ;;  %v5863_v44 = vld [vmem:[%s10162_s2 + $0x2a4] sm:$0xf0]  ;;  %v5846_v18 = vld [vmem:[%s10162_s2 + $0x224] sm:$0xf]  ;;  %v4740_v46 = vld [vmem:[%s10162_s2 + $0x228] sm:$0xf0] }
 0x182   :  { %1868 = vmatpush.bf16.msrb.mxu3 %v7793_v61  ;;  %v5853_v61 = vld [vmem:[%s10162_s2 + $0x254] sm:$0xf0]  ;;  %v1600_v40 = vadd.f32 %v1599_v10, %v8028_v41  ;;  %v5864_v41 = vld [vmem:[%s10162_s2 + $0x2b4] sm:$0xf]  ;;  %v5862_v54 = vld [vmem:[%s10162_s2 + $0x2a4] sm:$0xf]  ;;  %v8267_v56 = vor.u32 %v5863_v44, %v4802_v21  ;;  %v8269_v58 = vor.u32 %v5846_v18, %v4740_v46 }
 0x183   :  { %1830 = vmatmul.bf16.vlgmr.msrb.gmra.mxu0 %v7913_v25  ;;  %v8149_v32 = vor.u32 %v5853_v61, %v4762_v50  ;;  %v1612_v27 = vpop.f32.mrf.mxu1  ;;  %v8242_v0 = vor.u32 %v5864_v41, %v4812_v7  ;;  %v8263_v50 = vor.u32 %v5847_v31, %v4738_v17  ;;  %v5843_v10 = vld [vmem:[%s10162_s2 + $0x204] sm:$0xf0]  ;;  %v4724_v41 = vld [vmem:[%s10162_s2 + $0x208] sm:$0xf0]  ;;  %v5858_v7 = vld [vmem:[%s10162_s2 + $0x284] sm:$0xf] }
 0x184   :  { %2128 = vmatpush.bf16.msra.mxu0 %v8072_v29  ;;  %1843 = vmatmul.bf16.vlgmr.msrb.gmra.mxu1 %v7917_v34  ;;  %v8221_v8 = vadd.f32 %v1612_v27, %v1600_v40  ;;  %v5859_v40 = vld [vmem:[%s10162_s2 + $0x284] sm:$0xf0]  ;;  %v5842_v27 = vld [vmem:[%s10162_s2 + $0x204] sm:$0xf]  ;;  %v4906_v31 = vld [vmem:[%s10162_s2 + $0x70] sm:$0xf] }
 0x185   :  { %2141 = vmatpush.bf16.msra.mxu1 %v8074_v33  ;;  %2154 = vmatpush.bf16.msra.mxu2 %v8076_v38  ;;  %v5825_v21 = vld [vmem:[%s10162_s2 + $0x74] sm:$0xf0]  ;;  %v5824_v18 = vld [vmem:[%s10162_s2 + $0x74] sm:$0xf]  ;;  %v4908_v46 = vld [vmem:[%s10162_s2 + $0x78] sm:$0xf0] }
 0x186   :  { %2167 = vmatpush.bf16.msra.mxu3 %v8088_v37  ;;  %1856 = vmatmul.bf16.vlgmr.msrb.gmra.mxu2 %v7913_v25  ;;  %v8155_v25 = vor.u32 %v5852_v5, %v4764_v6  ;;  %v4730_v5 = vld [vmem:[%s10162_s2 + $0x210] sm:$0xf]  ;;  %v5845_v6 = vld [vmem:[%s10162_s2 + $0x214] sm:$0xf0]  ;;  %v8377_v22 = vor.u32 %v5824_v18, %v4908_v46 }
 0x187   :  { %1869 = vmatmul.bf16.vlgmr.msrb.gmra.mxu3 %v7917_v34  ;;  %v5851_v34 = vld [vmem:[%s10162_s2 + $0x244] sm:$0xf0]  ;;  %v1625_v16 = vpop.f32.mrf.mxu2  ;;  %v8299_v59 = vor.u32 %v5845_v6, %v4730_v5  ;;  %v5841_v44 = vld [vmem:[%s10162_s2 + $0xf4] sm:$0xf0]  ;;  %v5840_v5 = vld [vmem:[%s10162_s2 + $0xf4] sm:$0xf] }
 0x188   :  { %2129 = vmatpush.bf16.msra.mxu0 %v8109_v15  ;;  %v8185_v60 = vor.u32 %v5851_v34, %v4754_v23  ;;  %v1626_v53 = vadd.f32 %v1625_v16, %v8034_v1  ;;  %v4804_v1 = vld [vmem:[%s10162_s2 + $0x2a8] sm:$0xf0]  ;;  %v1601_v61 = vpop.f32.mrf.mxu0  ;;  %v5861_v34 = vld [vmem:[%s10162_s2 + $0x294] sm:$0xf0]  ;;  %v4972_v6 = vld [vmem:[%s10162_s2 + $0xf8] sm:$0xf0] }
 0x189   :  { %2142 = vmatpush.bf16.msra.mxu1 %v8113_v26  ;;  %2155 = vmatpush.bf16.msra.mxu2 %v8115_v39  ;;  %v8281_v23 = vor.u32 %v5862_v54, %v4804_v1  ;;  %10747 = vst [vmem:[#allocation3_spill] sm:$0xff] %v8299_v59  ;;  %v8312_v36 = vor.u32 %v5861_v34, %v4794_v63  ;;  %v4788_v16 = vld [vmem:[%s10162_s2 + $0x288] sm:$0xf0]  ;;  %v1962_v54 = vunpack.c.l.b16 %v4687_v52  ;;  %v1963_v63 = vunpack.c.h.b16 %v4687_v52  ;;  %v5838_v52 = vld [vmem:[%s10162_s2 + $0xe4] sm:$0xf] }
 0x18a   :  { %2168 = vmatpush.bf16.msra.mxu3 %v8128_v57  ;;  %v1638_v11 = vpop.f32.mrf.mxu3  ;;  %v8360_v1 = vor.u32 %v5859_v40, %v4786_v47  ;;  %v8362_v61 = vor.u32 %v5842_v27, %v4724_v41  ;;  %v8373_v34 = vor.u32 %v5825_v21, %v4906_v31  ;;  %10757 = vst [vmem:[#allocation13_spill] sm:$0xff] %v8377_v22  ;;  %v5839_v47 = vld [vmem:[%s10162_s2 + $0xe4] sm:$0xf0]  ;;  %v5822_v40 = vld [vmem:[%s10162_s2 + $0x64] sm:$0xf] }
 0x18b   :  { %v8261_v42 = vadd.f32 %v1638_v11, %v1626_v53  ;;  %v1614_v2 = vpop.f32.mrf.mxu1  ;;  %10748 = vst [vmem:[#allocation4_spill] sm:$0xff] %v8312_v36  ;;  %v4970_v53 = vld [vmem:[%s10162_s2 + $0xf0] sm:$0xf]  ;;  %v8347_v11 = vor.u32 %v5843_v10, %v4722_v48  ;;  %v4962_v48 = vld [vmem:[%s10162_s2 + $0xe0] sm:$0xf]  ;;  %v8389_v10 = vor.u32 %v5840_v5, %v4972_v6 }
 0x18c   :  { %2130 = vmatpush.bf16.msra.mxu0 %v8149_v32  ;;  %10752 = vst [vmem:[#allocation8_spill] sm:$0xff] %v8360_v1  ;;  %v8371_v2 = vor.u32 %v5858_v7, %v4788_v16  ;;  %v8375_v28 = vor.u32 %v5841_v44, %v4970_v53  ;;  %v4900_v27 = vld [vmem:[%s10162_s2 + $0x68] sm:$0xf0]  ;;  %v8410_v7 = vpack.c.b16 %v1963_v63, %v1963_v63  ;;  %v4890_v21 = vld [vmem:[%s10162_s2 + $0x50] sm:$0xf] }
 0x18d   :  { %2143 = vmatpush.bf16.msra.mxu1 %v8153_v14  ;;  %2156 = vmatpush.bf16.msra.mxu2 %v8155_v25  ;;  %10751 = vst [vmem:[#allocation7_spill] sm:$0xff] %v8347_v11  ;;  %v4964_v41 = vld [vmem:[%s10162_s2 + $0xe8] sm:$0xf0]  ;;  %v8414_v16 = vor.u32 %v5823_v55, %v4898_v51  ;;  %v8420_v31 = vor.u32 %v5822_v40, %v4900_v27  ;;  %v5821_v53 = vld [vmem:[%s10162_s2 + $0x54] sm:$0xf0] }
 0x18e   :  { %2169 = vmatpush.bf16.msra.mxu3 %v8167_v43  ;;  %10753 = vst [vmem:[#allocation9_spill] sm:$0xff] %v8362_v61  ;;  %v4954_v44 = vld [vmem:[%s10162_s2 + $0xd0] sm:$0xf]  ;;  %v8432_v18 = vor.u32 %v5838_v52, %v4964_v41  ;;  %v5837_v46 = vld [vmem:[%s10162_s2 + $0xd4] sm:$0xf0]  ;;  %v8453_v51 = vor.u32 %v5821_v53, %v4890_v21 }
 0x18f   :  { %v1627_v49 = vpop.f32.mrf.mxu2  ;;  %10754 = vst [vmem:[#allocation10_spill] sm:$0xff] %v8371_v2  ;;  %v4892_v5 = vld [vmem:[%s10162_s2 + $0x58] sm:$0xf0]  ;;  %v5836_v6 = vld [vmem:[%s10162_s2 + $0xd4] sm:$0xf]  ;;  %v8458_v55 = vor.u32 %v5837_v46, %v4954_v44 }
 0x190   :  { %2131 = vmatpush.bf16.msra.mxu0 %v8185_v60  ;;  %10755 = vst [vmem:[#allocation11_spill] sm:$0xff] %v8373_v34  ;;  %v8400_v49 = vpack.c.b16 %v1962_v54, %v1962_v54  ;;  %v5820_v54 = vld [vmem:[%s10162_s2 + $0x54] sm:$0xf]  ;;  %v4956_v63 = vld [vmem:[%s10162_s2 + $0xd8] sm:$0xf0] }
 0x191   :  { %2144 = vmatpush.bf16.msra.mxu1 %v8189_v24  ;;  %2157 = vmatpush.bf16.msra.mxu2 %v8191_v9  ;;  %10756 = vst [vmem:[#allocation12_spill] sm:$0xff] %v8375_v28  ;;  %v5819_v40 = vld [vmem:[%s10162_s2 + $0x44] sm:$0xf0]  ;;  %v4946_v27 = vld [vmem:[%s10162_s2 + $0xc0] sm:$0xf]  ;;  %v8472_v52 = vor.u32 %v5836_v6, %v4956_v63 }
 0x192   :  { %2170 = vmatpush.bf16.msra.mxu3 %v8204_v35  ;;  %v1640_v17 = vpop.f32.mrf.mxu3  ;;  %10758 = vst [vmem:[#allocation14_spill] sm:$0xff] %v8389_v10  ;;  %v5835_v41 = vld [vmem:[%s10162_s2 + $0xc4] sm:$0xf0]  ;;  %v5818_v21 = vld [vmem:[%s10162_s2 + $0x44] sm:$0xf] }
 0x193   :  { %10759 = vst [vmem:[#allocation15_spill] sm:$0xff] %v8414_v16  ;;  %v8418_v17 = vor.u32 %v5839_v47, %v4962_v48  ;;  %v8460_v48 = vor.u32 %v5820_v54, %v4892_v5  ;;  %v4882_v47 = vld [vmem:[%s10162_s2 + $0x40] sm:$0xf]  ;;  %v4884_v53 = vld [vmem:[%s10162_s2 + $0x48] sm:$0xf0] }
 0x194   :  { %2132 = vmatpush.bf16.msra.mxu0 %v8224_v12  ;;  %10761 = vst [vmem:[#allocation17_spill] sm:$0xff] %v8420_v31  ;;  %v5834_v46 = vld [vmem:[%s10162_s2 + $0xc4] sm:$0xf]  ;;  %v4948_v54 = vld [vmem:[%s10162_s2 + $0xc8] sm:$0xf0]  ;;  %v8490_v6 = vor.u32 %v5819_v40, %v4882_v47 }
 0x195   :  { %2145 = vmatpush.bf16.msra.mxu1 %v8228_v13  ;;  %2158 = vmatpush.bf16.msra.mxu2 %v8230_v19  ;;  %10760 = vst [vmem:[#allocation16_spill] sm:$0xff] %v8418_v17  ;;  %v4938_v47 = vld [vmem:[%s10162_s2 + $0xb0] sm:$0xf]  ;;  %v8508_v40 = vor.u32 %v5834_v46, %v4948_v54  ;;  %v4940_v46 = vld [vmem:[%s10162_s2 + $0xb8] sm:$0xf0] }
 0x196   :  { %2171 = vmatpush.bf16.msra.mxu3 %v8242_v0  ;;  %10762 = vst [vmem:[#allocation18_spill] sm:$0xff] %v8432_v18 }
 0x197   :  { %10763 = vst [vmem:[#allocation19_spill] sm:$0xff] %v8453_v51 }
 0x198   :  { %2133 = vmatpush.bf16.msra.mxu0 %v8263_v50  ;;  %10764 = vst [vmem:[#allocation20_spill] sm:$0xff] %v8458_v55 }
 0x199   :  { %2146 = vmatpush.bf16.msra.mxu1 %v8267_v56  ;;  %2159 = vmatpush.bf16.msra.mxu2 %v8269_v58  ;;  %10765 = vst [vmem:[#allocation21_spill] sm:$0xff] %v8460_v48 }
 0x19a   :  { %2172 = vmatpush.bf16.msra.mxu3 %v8281_v23  ;;  %10766 = vst [vmem:[#allocation22_spill] sm:$0xff] %v8472_v52 }
 0x19b   :  { %10767 = vst [vmem:[#allocation23_spill] sm:$0xff] %v8490_v6 }
 0x19c   :  { %2134 = vmatpush.bf16.msra.mxu0 %v8299_v59  ;;  %10770 = vst [vmem:[#allocation26_spill] sm:$0xff] %v8508_v40 }
 0x19d   :  { %2147 = vmatpush.bf16.msra.mxu1 %v8312_v36  ;;  %2160 = vmatpush.bf16.msra.mxu2 %v8314_v30 }
 0x19e   :  { %2173 = vmatpush.bf16.msra.mxu3 %v8326_v3 }
 0x1a0   :  { %2135 = vmatpush.bf16.msra.mxu0 %v8347_v11  ;;  %v1667_v44 = vpop.f32.mrf.mxu0 }
 0x1a1   :  { %2148 = vmatpush.bf16.msra.mxu1 %v8360_v1  ;;  %2161 = vmatpush.bf16.msra.mxu2 %v8362_v61  ;;  %v1680_v5 = vpop.f32.mrf.mxu1 }
 0x1a2   :  { %2174 = vmatpush.bf16.msra.mxu3 %v8371_v2  ;;  %v1681_v63 = vadd.f32 %v1680_v5, %v1667_v44  ;;  %v5832_v44 = vld [vmem:[%s10162_s2 + $0xb4] sm:$0xf] }
 0x1a3   :  { %2136 = vmatmul.bf16.vlgmr.msra.gmra.mxu0 %v8400_v49 }
 0x1a4   :  { %2347 = vmatpush.bf16.msrb.mxu0 %v8373_v34  ;;  %2162 = vmatmul.bf16.vlgmr.msra.gmra.mxu2 %v8400_v49 }
 0x1a5   :  { %2360 = vmatpush.bf16.msrb.mxu1 %v8375_v28  ;;  %2373 = vmatpush.bf16.msrb.mxu2 %v8377_v22 }
 0x1a6   :  { %2386 = vmatpush.bf16.msrb.mxu3 %v8389_v10  ;;  %2149 = vmatmul.bf16.vlgmr.msra.gmra.mxu1 %v8410_v7 }
 0x1a7   :  { %2175 = vmatmul.bf16.vlgmr.msra.gmra.mxu3 %v8410_v7 }
 0x1a8   :  { %2348 = vmatpush.bf16.msrb.mxu0 %v8414_v16 }
 0x1a9   :  { %2361 = vmatpush.bf16.msrb.mxu1 %v8418_v17  ;;  %2374 = vmatpush.bf16.msrb.mxu2 %v8420_v31  ;;  %v8496_v31 = vor.u32 %v5818_v21, %v4884_v53  ;;  %v4874_v17 = vld [vmem:[%s10162_s2 + $0x30] sm:$0xf]  ;;  %v4876_v21 = vld [vmem:[%s10162_s2 + $0x38] sm:$0xf0]  ;;  %v1710_v53 = vadd.f32 %v1681_v63, %v8221_v8  ;;  %v4866_v63 = vld [vmem:[%s10162_s2 + $0x20] sm:$0xf] }
 0x1aa   :  { %2387 = vmatpush.bf16.msrb.mxu3 %v8432_v18  ;;  %v8494_v18 = vor.u32 %v5835_v41, %v4946_v27  ;;  %v5833_v27 = vld [vmem:[%s10162_s2 + $0xb4] sm:$0xf0]  ;;  %v5816_v41 = vld [vmem:[%s10162_s2 + $0x34] sm:$0xf] }
 0x1ab   :  { %10769 = vst [vmem:[#allocation25_spill] sm:$0xff] %v8496_v31  ;;  %v1712_v5 = vadd.f32 %v1710_v53, %v7973_v62  ;;  %v8534_v8 = vor.u32 %v5816_v41, %v4876_v21  ;;  %v5814_v41 = vld [vmem:[%s10162_s2 + $0x24] sm:$0xf]  ;;  %v4868_v21 = vld [vmem:[%s10162_s2 + $0x28] sm:$0xf0] }
 0x1ac   :  { %2349 = vmatpush.bf16.msrb.mxu0 %v8453_v51  ;;  %10768 = vst [vmem:[#allocation24_spill] sm:$0xff] %v8494_v18  ;;  %v5817_v51 = vld [vmem:[%s10162_s2 + $0x34] sm:$0xf0]  ;;  %v8573_v10 = vor.u32 %v5814_v41, %v4868_v21 }
 0x1ad   :  { %2362 = vmatpush.bf16.msrb.mxu1 %v8458_v55  ;;  %2375 = vmatpush.bf16.msrb.mxu2 %v8460_v48  ;;  %v8527_v54 = vor.u32 %v5817_v51, %v4874_v17  ;;  %10773 = vst [vmem:[#allocation29_spill] sm:$0xff] %v8534_v8  ;;  %v4930_v17 = vld [vmem:[%s10162_s2 + $0xa0] sm:$0xf]  ;;  %v8546_v51 = vor.u32 %v5832_v44, %v4940_v46  ;;  %v1714_v53 = vmax.f32 %v1712_v5, 0.0  ;;  %v5830_v44 = vld [vmem:[%s10162_s2 + $0xa4] sm:$0xf]  ;;  %v1682_v55 = vpop.f32.mrf.mxu1 }
 0x1ae   :  { %2388 = vmatpush.bf16.msrb.mxu3 %v8472_v52  ;;  %v8532_v52 = vor.u32 %v5833_v27, %v4938_v47  ;;  %v1693_v47 = vpop.f32.mrf.mxu2  ;;  %v5831_v27 = vld [vmem:[%s10162_s2 + $0xa4] sm:$0xf0]  ;;  %v4932_v46 = vld [vmem:[%s10162_s2 + $0xa8] sm:$0xf0]  ;;  %10777 = vst [vmem:[#allocation33_spill] sm:$0xff] %v8573_v10 }
 0x1af   :  { %10771 = vst [vmem:[#allocation27_spill] sm:$0xff] %v8527_v54  ;;  %v8567_v16 = vmax.f32 %v7989_v20, %v1714_v53  ;;  %v8571_v5 = vor.u32 %v5831_v27, %v4930_v17  ;;  %v4922_v20 = vld [vmem:[%s10162_s2 + $0x90] sm:$0xf]  ;;  %v5812_v17 = vld [vmem:[%s10162_s2 + $0x14] sm:$0xf] }
 0x1b0   :  { %2350 = vmatpush.bf16.msrb.mxu0 %v8490_v6  ;;  %10772 = vst [vmem:[#allocation28_spill] sm:$0xff] %v8532_v52  ;;  %v5815_v6 = vld [vmem:[%s10162_s2 + $0x24] sm:$0xf0]  ;;  %v5828_v27 = vld [vmem:[%s10162_s2 + $0x94] sm:$0xf] }
 0x1b1   :  { %2363 = vmatpush.bf16.msrb.mxu1 %v8494_v18  ;;  %2376 = vmatpush.bf16.msrb.mxu2 %v8496_v31  ;;  %10774 = vst [vmem:[#allocation30_spill] sm:$0xff] %v8546_v51  ;;  %v1706_v31 = vpop.f32.mrf.mxu3  ;;  %v8564_v48 = vor.u32 %v5815_v6, %v4866_v63  ;;  %v8586_v6 = vor.u32 %v5830_v44, %v4932_v46  ;;  %v5829_v63 = vld [vmem:[%s10162_s2 + $0x94] sm:$0xf0]  ;;  %v5811_v53 = vld [vmem:[%s10162_s2 + $0x4] sm:$0xf0] }
 0x1b2   :  { %2389 = vmatpush.bf16.msrb.mxu3 %v8508_v40  ;;  %v1669_v40 = vpop.f32.mrf.mxu0  ;;  %v1707_v18 = vadd.f32 %v1706_v31, %v1693_v47  ;;  %10776 = vst [vmem:[#allocation32_spill] sm:$0xff] %v8571_v5  ;;  %v5813_v31 = vld [vmem:[%s10162_s2 + $0x14] sm:$0xf0]  ;;  %v4860_v47 = vld [vmem:[%s10162_s2 + $0x18] sm:$0xf0] }
 0x1b3   :  { %10775 = vst [vmem:[#allocation31_spill] sm:$0xff] %v8564_v48  ;;  %v4858_v40 = vld [vmem:[%s10162_s2 + $0x10] sm:$0xf]  ;;  %v4914_v44 = vld [vmem:[%s10162_s2 + $0x80] sm:$0xf] }
 0x1b4   :  { %2351 = vmatpush.bf16.msrb.mxu0 %v8527_v54  ;;  %v1711_v55 = vadd.f32 %v1707_v18, %v8261_v42  ;;  %10778 = vst [vmem:[#allocation34_spill] sm:$0xff] %v8586_v6  ;;  %v4924_v42 = vld [vmem:[%s10162_s2 + $0x98] sm:$0xf0]  ;;  %v4850_v18 = vld [vmem:[%s10162_s2] sm:$0xf]  ;;  %v8608_v21 = vor.u32 %v5813_v31, %v4858_v40  ;;  %v8623_v40 = vor.u32 %v5812_v17, %v4860_v47 }
 0x1b5   :  { %2364 = vmatpush.bf16.msrb.mxu1 %v8532_v52  ;;  %2377 = vmatpush.bf16.msrb.mxu2 %v8534_v8  ;;  %v5827_v46 = vld [vmem:[%s10162_s2 + $0x84] sm:$0xf0]  ;;  %v5810_v31 = vld [vmem:[%s10162_s2 + $0x4] sm:$0xf]  ;;  %v5066_v47 = vld [vmem:[%s10162_s2 + $0x470] sm:$0xf] }
 0x1b6   :  { %2390 = vmatpush.bf16.msrb.mxu3 %v8546_v51  ;;  %v1713_v41 = vadd.f32 %v1711_v55, %v7985_v4  ;;  %10779 = vst [vmem:[#allocation35_spill] sm:$0xff] %v8608_v21  ;;  %v8621_v55 = vor.u32 %v5829_v63, %v4922_v20  ;;  %v4686_v51 = vld [vmem:[%s10164_s0 + $0x8] sm:$0xff]  ;;  %v5826_v20 = vld [vmem:[%s10162_s2 + $0x84] sm:$0xf]  ;;  %v1695_v17 = vpop.f32.mrf.mxu2  ;;  %v5888_v52 = vld [vmem:[%s10162_s2 + $0x474] sm:$0xf] }
 0x1b7   :  { %10781 = vst [vmem:[#allocation37_spill] sm:$0xff] %v8623_v40  ;;  %v4916_v63 = vld [vmem:[%s10162_s2 + $0x88] sm:$0xf0]  ;;  %v5905_v17 = vld [vmem:[%s10162_s2 + $0x4f4] sm:$0xf0] }
 0x1b8   :  { %2352 = vmatpush.bf16.msrb.mxu0 %v8564_v48  ;;  %10780 = vst [vmem:[#allocation36_spill] sm:$0xff] %v8621_v55  ;;  %v4852_v48 = vld [vmem:[%s10162_s2 + $0x8] sm:$0xf0]  ;;  %v1715_v8 = vmax.f32 %v1713_v41, 0.0  ;;  %v5889_v41 = vld [vmem:[%s10162_s2 + $0x474] sm:$0xf0]  ;;  %v8680_v22 = vor.u32 %v5826_v20, %v4916_v63 }
 0x1b9   :  { %2365 = vmatpush.bf16.msrb.mxu1 %v8571_v5  ;;  %2378 = vmatpush.bf16.msrb.mxu2 %v8573_v10  ;;  %v8635_v10 = vor.u32 %v5828_v27, %v4924_v42  ;;  %v5130_v27 = vld [vmem:[%s10162_s2 + $0x4f0] sm:$0xf]  ;;  %v1708_v42 = vpop.f32.mrf.mxu3  ;;  %v8656_v5 = vor.u32 %v5811_v53, %v4850_v18  ;;  %v5068_v54 = vld [vmem:[%s10162_s2 + $0x478] sm:$0xf0]  ;;  %v5904_v18 = vld [vmem:[%s10162_s2 + $0x4f4] sm:$0xf] }
 0x1ba   :  { %2391 = vmatpush.bf16.msrb.mxu3 %v8586_v6  ;;  %v8653_v6 = vmax.f32 %v8002_v45, %v1715_v8  ;;  %v2181_v42 = vunpack.c.l.b16 %v4686_v51  ;;  %v8669_v45 = vor.u32 %v5827_v46, %v4914_v44  ;;  %v8671_v8 = vor.u32 %v5810_v31, %v4852_v48  ;;  %v5132_v53 = vld [vmem:[%s10162_s2 + $0x4f8] sm:$0xf0]  ;;  %10786 = vst [vmem:[#allocation42_spill] sm:$0xff] %v8680_v22  ;;  %v5058_v48 = vld [vmem:[%s10162_s2 + $0x460] sm:$0xf] }
 0x1bb   :  { %10782 = vst [vmem:[#allocation38_spill] sm:$0xff] %v8635_v10  ;;  %v8686_v44 = vor.u32 %v5888_v52, %v5068_v54  ;;  %v5887_v46 = vld [vmem:[%s10162_s2 + $0x464] sm:$0xf0]  ;;  %v8698_v31 = vor.u32 %v5904_v18, %v5132_v53  ;;  %v5886_v54 = vld [vmem:[%s10162_s2 + $0x464] sm:$0xf] }
 0x1bc   :  { %2353 = vmatpush.bf16.msrb.mxu0 %v8608_v21  ;;  %10783 = vst [vmem:[#allocation39_spill] sm:$0xff] %v8656_v5  ;;  %v2182_v21 = vunpack.c.h.b16 %v4686_v51  ;;  %v5122_v51 = vld [vmem:[%s10162_s2 + $0x4e0] sm:$0xf]  ;;  %v8700_v20 = vpack.c.b16 %v2181_v42, %v2181_v42  ;;  %v5903_v52 = vld [vmem:[%s10162_s2 + $0x4e4] sm:$0xf0] }
 0x1bd   :  { %2366 = vmatpush.bf16.msrb.mxu1 %v8621_v55  ;;  %2379 = vmatpush.bf16.msrb.mxu2 %v8623_v40  ;;  %10784 = vst [vmem:[#allocation40_spill] sm:$0xff] %v8669_v45  ;;  %v8682_v55 = vor.u32 %v5889_v41, %v5066_v47  ;;  %v8684_v40 = vor.u32 %v5905_v17, %v5130_v27  ;;  %v5060_v63 = vld [vmem:[%s10162_s2 + $0x468] sm:$0xf0]  ;;  %v5902_v41 = vld [vmem:[%s10162_s2 + $0x4e4] sm:$0xf] }
 0x1be   :  { %10785 = vst [vmem:[#allocation41_spill] sm:$0xff] %v8671_v8  ;;  %2392 = vmatpush.bf16.msrb.mxu3 %v8635_v10  ;;  %v8713_v47 = vpack.c.b16 %v2182_v21, %v2182_v21  ;;  %v5124_v27 = vld [vmem:[%s10162_s2 + $0x4e8] sm:$0xf0]  ;;  %v8723_v17 = vor.u32 %v5887_v46, %v5058_v48  ;;  %v8727_v21 = vor.u32 %v5903_v52, %v5122_v51  ;;  %v5050_v18 = vld [vmem:[%s10162_s2 + $0x450] sm:$0xf]  ;;  %v2432_v61 = vshrl.u32 %v8700_v20, 16 }
 0x1bf   :  { %10787 = vst [vmem:[#allocation43_spill] sm:$0xff] %v8682_v55  ;;  %v8729_v42 = vor.u32 %v5886_v54, %v5060_v63  ;;  %v5885_v53 = vld [vmem:[%s10162_s2 + $0x454] sm:$0xf0]  ;;  %v5114_v48 = vld [vmem:[%s10162_s2 + $0x4d0] sm:$0xf]  ;;  %v8742_v46 = vor.u32 %v5902_v41, %v5124_v27 }
 0x1c0   :  { %10788 = vst [vmem:[#allocation44_spill] sm:$0xff] %v8684_v40  ;;  %2354 = vmatpush.bf16.msrb.mxu0 %v8656_v5  ;;  %v5901_v51 = vld [vmem:[%s10162_s2 + $0x4d4] sm:$0xf0]  ;;  %v5884_v52 = vld [vmem:[%s10162_s2 + $0x454] sm:$0xf]  ;;  %v8762_v27 = vor.u32 %v5885_v53, %v5050_v18  ;;  %v2439_v3 = vshrl.u32 %v8713_v47, 16 }
 0x1c1   :  { %10789 = vst [vmem:[#allocation45_spill] sm:$0xff] %v8686_v44  ;;  %2367 = vmatpush.bf16.msrb.mxu1 %v8669_v45  ;;  %2380 = vmatpush.bf16.msrb.mxu2 %v8671_v8  ;;  %v5052_v54 = vld [vmem:[%s10162_s2 + $0x458] sm:$0xf0]  ;;  %v5900_v63 = vld [vmem:[%s10162_s2 + $0x4d4] sm:$0xf] }
 0x1c2   :  { %10790 = vst [vmem:[#allocation46_spill] sm:$0xff] %v8698_v31  ;;  %2393 = vmatpush.bf16.msrb.mxu3 %v8680_v22  ;;  %v5116_v41 = vld [vmem:[%s10162_s2 + $0x4d8] sm:$0xf0]  ;;  %v5106_v18 = vld [vmem:[%s10162_s2 + $0x4c0] sm:$0xf] }
 0x1c3   :  { %10791 = vst [vmem:[#allocation47_spill] sm:$0xff] %v8723_v17  ;;  %2355 = vmatmul.bf16.vlgmr.msrb.gmra.mxu0 %v8700_v20  ;;  %v8781_v53 = vor.u32 %v5900_v63, %v5116_v41  ;;  %v5108_v63 = vld [vmem:[%s10162_s2 + $0x4c8] sm:$0xf0]  ;;  %v5026_v22 = vld [vmem:[%s10162_s2 + $0x420] sm:$0xf] }
 0x1c4   :  { %2607 = vmatpush.bf16.msra.mxu0 %v8682_v55  ;;  %10792 = vst [vmem:[#allocation48_spill] sm:$0xff] %v8727_v21  ;;  %2381 = vmatmul.bf16.vlgmr.msrb.gmra.mxu2 %v8700_v20  ;;  %v5034_v55 = vld [vmem:[%s10162_s2 + $0x430] sm:$0xf]  ;;  %v5879_v8 = vld [vmem:[%s10162_s2 + $0x424] sm:$0xf0] }
 0x1c5   :  { %2620 = vmatpush.bf16.msra.mxu1 %v8684_v40  ;;  %2633 = vmatpush.bf16.msra.mxu2 %v8686_v44  ;;  %10793 = vst [vmem:[#allocation49_spill] sm:$0xff] %v8729_v42  ;;  %v8769_v44 = vor.u32 %v5884_v52, %v5052_v54  ;;  %v5042_v40 = vld [vmem:[%s10162_s2 + $0x440] sm:$0xf]  ;;  %v5044_v52 = vld [vmem:[%s10162_s2 + $0x448] sm:$0xf0] }
 0x1c6   :  { %2646 = vmatpush.bf16.msra.mxu3 %v8698_v31  ;;  %10794 = vst [vmem:[#allocation50_spill] sm:$0xff] %v8742_v46  ;;  %2368 = vmatmul.bf16.vlgmr.msrb.gmra.mxu1 %v8713_v47  ;;  %v8767_v31 = vor.u32 %v5901_v51, %v5114_v48  ;;  %v5899_v48 = vld [vmem:[%s10162_s2 + $0x4c4] sm:$0xf0]  ;;  %v5882_v51 = vld [vmem:[%s10162_s2 + $0x444] sm:$0xf] }
 0x1c7   :  { %2394 = vmatmul.bf16.vlgmr.msrb.gmra.mxu3 %v8713_v47  ;;  %10795 = vst [vmem:[#allocation51_spill] sm:$0xff] %v8762_v27  ;;  %v5898_v54 = vld [vmem:[%s10162_s2 + $0x4c4] sm:$0xf]  ;;  %v5877_v10 = vld [vmem:[%s10162_s2 + $0x414] sm:$0xf0] }
 0x1c8   :  { %2608 = vmatpush.bf16.msra.mxu0 %v8723_v17  ;;  %10796 = vst [vmem:[#allocation52_spill] sm:$0xff] %v8767_v31  ;;  %v5883_v17 = vld [vmem:[%s10162_s2 + $0x444] sm:$0xf0] }
 0x1c9   :  { %2621 = vmatpush.bf16.msra.mxu1 %v8727_v21  ;;  %2634 = vmatpush.bf16.msra.mxu2 %v8729_v42  ;;  %10797 = vst [vmem:[#allocation53_spill] sm:$0xff] %v8769_v44  ;;  %v8799_v41 = vor.u32 %v5883_v17, %v5042_v40  ;;  %v8805_v42 = vor.u32 %v5899_v48, %v5106_v18  ;;  %v5098_v40 = vld [vmem:[%s10162_s2 + $0x4b0] sm:$0xf]  ;;  %v8818_v17 = vpop.f32.mrf.mxu1  ;;  %v5897_v48 = vld [vmem:[%s10162_s2 + $0x4b4] sm:$0xf0] }
 0x1ca   :  { %2647 = vmatpush.bf16.msra.mxu3 %v8742_v46  ;;  %10798 = vst [vmem:[#allocation54_spill] sm:$0xff] %v8781_v53  ;;  %v8801_v46 = vpop.f32.mrf.mxu0  ;;  %v8807_v21 = vor.u32 %v5882_v51, %v5044_v52  ;;  %v8821_v18 = vor.u32 %v5898_v54, %v5108_v63  ;;  %v5880_v51 = vld [vmem:[%s10162_s2 + $0x434] sm:$0xf]  ;;  %v5036_v52 = vld [vmem:[%s10162_s2 + $0x438] sm:$0xf0] }
 0x1cb   :  { %10799 = vst [vmem:[#allocation55_spill] sm:$0xff] %v8799_v41  ;;  %v5100_v54 = vld [vmem:[%s10162_s2 + $0x4b8] sm:$0xf0] }
 0x1cc   :  { %2609 = vmatpush.bf16.msra.mxu0 %v8762_v27  ;;  %10800 = vst [vmem:[#allocation56_spill] sm:$0xff] %v8805_v42  ;;  %v5881_v27 = vld [vmem:[%s10162_s2 + $0x434] sm:$0xf0] }
 0x1cd   :  { %2622 = vmatpush.bf16.msra.mxu1 %v8767_v31  ;;  %2635 = vmatpush.bf16.msra.mxu2 %v8769_v44  ;;  %10801 = vst [vmem:[#allocation57_spill] sm:$0xff] %v8807_v21  ;;  %v5896_v44 = vld [vmem:[%s10162_s2 + $0x4b4] sm:$0xf]  ;;  %v8839_v63 = vor.u32 %v5881_v27, %v5034_v55  ;;  %v8845_v31 = vor.u32 %v5880_v51, %v5036_v52  ;;  %v5090_v55 = vld [vmem:[%s10162_s2 + $0x4a0] sm:$0xf]  ;;  %v8856_v27 = vpop.f32.mrf.mxu2 }
 0x1ce   :  { %2648 = vmatpush.bf16.msra.mxu3 %v8781_v53  ;;  %10802 = vst [vmem:[#allocation58_spill] sm:$0xff] %v8821_v18  ;;  %v8843_v53 = vor.u32 %v5897_v48, %v5098_v40  ;;  %v8859_v40 = vor.u32 %v5896_v44, %v5100_v54  ;;  %v5895_v48 = vld [vmem:[%s10162_s2 + $0x4a4] sm:$0xf0]  ;;  %v5878_v51 = vld [vmem:[%s10162_s2 + $0x424] sm:$0xf]  ;;  %v8879_v54 = vor.u32 %v5879_v8, %v5026_v22 }
 0x1cf   :  { %10803 = vst [vmem:[#allocation59_spill] sm:$0xff] %v8839_v63  ;;  %v5028_v52 = vld [vmem:[%s10162_s2 + $0x428] sm:$0xf0]  ;;  %v8886_v45 = vor.u32 %v5895_v48, %v5090_v55  ;;  %v5082_v22 = vld [vmem:[%s10162_s2 + $0x490] sm:$0xf] }
 0x1d0   :  { %2610 = vmatpush.bf16.msra.mxu0 %v8799_v41  ;;  %10804 = vst [vmem:[#allocation60_spill] sm:$0xff] %v8843_v53  ;;  %v5092_v44 = vld [vmem:[%s10162_s2 + $0x4a8] sm:$0xf0]  ;;  %v8888_v5 = vor.u32 %v5878_v51, %v5028_v52  ;;  %v5893_v8 = vld [vmem:[%s10162_s2 + $0x494] sm:$0xf0] }
 0x1d1   :  { %2623 = vmatpush.bf16.msra.mxu1 %v8805_v42  ;;  %2636 = vmatpush.bf16.msra.mxu2 %v8807_v21  ;;  %10805 = vst [vmem:[#allocation61_spill] sm:$0xff] %v8845_v31  ;;  %v8870_v21 = vpop.f32.mrf.mxu3  ;;  %v5018_v42 = vld [vmem:[%s10162_s2 + $0x410] sm:$0xf]  ;;  %v5876_v55 = vld [vmem:[%s10162_s2 + $0x414] sm:$0xf]  ;;  %v8932_v28 = vor.u32 %v5893_v8, %v5082_v22 }
 0x1d2   :  { %2649 = vmatpush.bf16.msra.mxu3 %v8821_v18  ;;  %10806 = vst [vmem:[#allocation62_spill] sm:$0xff] %v8859_v40  ;;  %v5894_v18 = vld [vmem:[%s10162_s2 + $0x4a4] sm:$0xf]  ;;  %v1729_v41 = vpop.f32.mrf.mxu0  ;;  %v5020_v48 = vld [vmem:[%s10162_s2 + $0x418] sm:$0xf0] }
 0x1d3   :  { %10807 = vst [vmem:[#allocation63_spill] sm:$0xff] %v8879_v54  ;;  %v1742_v41 = vpop.f32.mrf.mxu1  ;;  %v5892_v51 = vld [vmem:[%s10162_s2 + $0x494] sm:$0xf]  ;;  %v5084_v52 = vld [vmem:[%s10162_s2 + $0x498] sm:$0xf0]  ;;  %v8934_v34 = vor.u32 %v5876_v55, %v5020_v48 }
 0x1d4   :  { %2611 = vmatpush.bf16.msra.mxu0 %v8839_v63  ;;  %10808 = vst [vmem:[#allocation64_spill] sm:$0xff] %v8886_v45  ;;  %v8921_v41 = vor.u32 %v5877_v10, %v5018_v42  ;;  %v2434_v63 = vshll.u32 %v8700_v20, 16  ;;  %v5874_v10 = vld [vmem:[%s10162_s2 + $0x404] sm:$0xf]  ;;  %v5012_v42 = vld [vmem:[%s10162_s2 + $0x408] sm:$0xf0] }
 0x1d5   :  { %2624 = vmatpush.bf16.msra.mxu1 %v8843_v53  ;;  %2637 = vmatpush.bf16.msra.mxu2 %v8845_v31  ;;  %10809 = vst [vmem:[#allocation65_spill] sm:$0xff] %v8888_v5  ;;  %v8900_v31 = vor.u32 %v5894_v18, %v5092_v44  ;;  %v5010_v18 = vld [vmem:[%s10162_s2 + $0x400] sm:$0xf]  ;;  %v5875_v44 = vld [vmem:[%s10162_s2 + $0x404] sm:$0xf0]  ;;  %v1755_v2 = vpop.f32.mrf.mxu2 }
 0x1d6   :  { %2650 = vmatpush.bf16.msra.mxu3 %v8859_v40  ;;  %10811 = vst [vmem:[#allocation67_spill] sm:$0xff] %v8921_v41  ;;  %v5074_v40 = vld [vmem:[%s10162_s2 + $0x480] sm:$0xf]  ;;  %v5891_v53 = vld [vmem:[%s10162_s2 + $0x484] sm:$0xf0]  ;;  %v2436_v1 = vrot.slane %v2434_v63, 1 }
 0x1d7   :  { %10810 = vst [vmem:[#allocation66_spill] sm:$0xff] %v8900_v31  ;;  %v5890_v22 = vld [vmem:[%s10162_s2 + $0x484] sm:$0xf]  ;;  %v5076_v8 = vld [vmem:[%s10162_s2 + $0x488] sm:$0xf0]  ;;  %v8976_v11 = vor.u32 %v5891_v53, %v5074_v40 }
 0x1d8   :  { %2612 = vmatpush.bf16.msra.mxu0 %v8879_v54  ;;  %10812 = vst [vmem:[#allocation68_spill] sm:$0xff] %v8932_v28  ;;  %v2441_v54 = vshll.u32 %v8713_v47, 16  ;;  %v5258_v55 = vld [vmem:[%s10162_s2 + $0x370] sm:$0xf]  ;;  %v5953_v2 = vld [vmem:[%s10162_s2 + $0x374] sm:$0xf0]  ;;  %v8988_v63 = vor.u32 %v5890_v22, %v5076_v8  ;;  %v9008_v8 = vor.u32 %v2436_v1, %v2432_v61 }
 0x1d9   :  { %2625 = vmatpush.bf16.msra.mxu1 %v8886_v45  ;;  %2638 = vmatpush.bf16.msra.mxu2 %v8888_v5  ;;  %10813 = vst [vmem:[#allocation69_spill] sm:$0xff] %v8934_v34  ;;  %v8944_v45 = vor.u32 %v5892_v51, %v5084_v52  ;;  %v1768_v48 = vpop.f32.mrf.mxu3  ;;  %v5322_v51 = vld [vmem:[%s10162_s2 + $0x3f0] sm:$0xf]  ;;  %v5969_v52 = vld [vmem:[%s10162_s2 + $0x3f4] sm:$0xf0] }
 0x1da   :  { %2651 = vmatpush.bf16.msra.mxu3 %v8900_v31  ;;  %v8965_v31 = vor.u32 %v5875_v44, %v5010_v18  ;;  %v5952_v48 = vld [vmem:[%s10162_s2 + $0x374] sm:$0xf]  ;;  %v5260_v5 = vld [vmem:[%s10162_s2 + $0x378] sm:$0xf0]  ;;  %10816 = vst [vmem:[#allocation72_spill] sm:$0xff] %v8976_v11  ;;  %v2443_v30 = vrot.slane %v2441_v54, 1  ;;  %v8992_v53 = vor.u32 %v5969_v52, %v5322_v51 }
 0x1db   :  { %10814 = vst [vmem:[#allocation70_spill] sm:$0xff] %v8944_v45  ;;  %v5968_v18 = vld [vmem:[%s10162_s2 + $0x3f4] sm:$0xf]  ;;  %v5324_v44 = vld [vmem:[%s10162_s2 + $0x3f8] sm:$0xf0]  ;;  %v8994_v40 = vor.u32 %v5952_v48, %v5260_v5 }
 0x1dc   :  { %2613 = vmatpush.bf16.msra.mxu0 %v8921_v41  ;;  %10815 = vst [vmem:[#allocation71_spill] sm:$0xff] %v8965_v31  ;;  %v8978_v41 = vor.u32 %v5874_v10, %v5012_v42  ;;  %v5250_v10 = vld [vmem:[%s10162_s2 + $0x360] sm:$0xf]  ;;  %v5951_v42 = vld [vmem:[%s10162_s2 + $0x364] sm:$0xf0]  ;;  %v9006_v22 = vor.u32 %v5968_v18, %v5324_v44  ;;  %v9021_v51 = vor.u32 %v2443_v30, %v2439_v3 }
 0x1dd   :  { %2626 = vmatpush.bf16.msra.mxu1 %v8932_v28  ;;  %2639 = vmatpush.bf16.msra.mxu2 %v8934_v34  ;;  %10818 = vst [vmem:[#allocation74_spill] sm:$0xff] %v8988_v63  ;;  %v8990_v34 = vor.u32 %v5953_v2, %v5258_v55  ;;  %v5314_v54 = vld [vmem:[%s10162_s2 + $0x3e0] sm:$0xf]  ;;  %v5967_v5 = vld [vmem:[%s10162_s2 + $0x3e4] sm:$0xf0]  ;;  %v9031_v52 = vor.u32 %v5951_v42, %v5250_v10 }
 0x1de   :  { %10817 = vst [vmem:[#allocation73_spill] sm:$0xff] %v8978_v41  ;;  %2652 = vmatpush.bf16.msra.mxu3 %v8944_v45  ;;  %v5950_v55 = vld [vmem:[%s10162_s2 + $0x364] sm:$0xf]  ;;  %v5252_v2 = vld [vmem:[%s10162_s2 + $0x368] sm:$0xf0]  ;;  %v9035_v30 = vor.u32 %v5967_v5, %v5314_v54 }
 0x1df   :  { %10819 = vst [vmem:[#allocation75_spill] sm:$0xff] %v8990_v34  ;;  %v5966_v1 = vld [vmem:[%s10162_s2 + $0x3e4] sm:$0xf]  ;;  %v5316_v61 = vld [vmem:[%s10162_s2 + $0x3e8] sm:$0xf0]  ;;  %v9037_v3 = vor.u32 %v5950_v55, %v5252_v2 }
 0x1e0   :  { %10820 = vst [vmem:[#allocation76_spill] sm:$0xff] %v8992_v53  ;;  %2614 = vmatpush.bf16.msra.mxu0 %v8965_v31  ;;  %v5242_v48 = vld [vmem:[%s10162_s2 + $0x350] sm:$0xf]  ;;  %v5949_v18 = vld [vmem:[%s10162_s2 + $0x354] sm:$0xf0]  ;;  %v9050_v10 = vor.u32 %v5966_v1, %v5316_v61 }
 0x1e1   :  { %10821 = vst [vmem:[#allocation77_spill] sm:$0xff] %v8994_v40  ;;  %2627 = vmatpush.bf16.msra.mxu1 %v8976_v11  ;;  %2640 = vmatpush.bf16.msra.mxu2 %v8978_v41  ;;  %v5306_v44 = vld [vmem:[%s10162_s2 + $0x3d0] sm:$0xf]  ;;  %v5965_v42 = vld [vmem:[%s10162_s2 + $0x3d4] sm:$0xf0]  ;;  %v9071_v1 = vor.u32 %v5949_v18, %v5242_v48 }
 0x1e2   :  { %10822 = vst [vmem:[#allocation78_spill] sm:$0xff] %v9006_v22  ;;  %2653 = vmatpush.bf16.msra.mxu3 %v8988_v63  ;;  %v5948_v54 = vld [vmem:[%s10162_s2 + $0x354] sm:$0xf]  ;;  %v5244_v5 = vld [vmem:[%s10162_s2 + $0x358] sm:$0xf0]  ;;  %v9075_v61 = vor.u32 %v5965_v42, %v5306_v44 }
 0x1e3   :  { %10823 = vst [vmem:[#allocation79_spill] sm:$0xff] %v9031_v52  ;;  %2615 = vmatmul.bf16.vlgmr.msra.gmra.mxu0 %v9008_v8  ;;  %v5964_v55 = vld [vmem:[%s10162_s2 + $0x3d4] sm:$0xf]  ;;  %v5308_v2 = vld [vmem:[%s10162_s2 + $0x3d8] sm:$0xf0] }
 0x1e4   :  { %2889 = vmatpush.bf16.msrb.mxu0 %v8990_v34  ;;  %10824 = vst [vmem:[#allocation80_spill] sm:$0xff] %v9035_v30  ;;  %2628 = vmatmul.bf16.vlgmr.msra.gmra.mxu1 %v9021_v51  ;;  %v5298_v48 = vld [vmem:[%s10162_s2 + $0x3c0] sm:$0xf]  ;;  %v9089_v18 = vor.u32 %v5964_v55, %v5308_v2  ;;  %v5963_v44 = vld [vmem:[%s10162_s2 + $0x3c4] sm:$0xf0] }
 0x1e5   :  { %2902 = vmatpush.bf16.msrb.mxu1 %v8992_v53  ;;  %2915 = vmatpush.bf16.msrb.mxu2 %v8994_v40  ;;  %10825 = vst [vmem:[#allocation81_spill] sm:$0xff] %v9037_v3  ;;  %v5234_v40 = vld [vmem:[%s10162_s2 + $0x340] sm:$0xf]  ;;  %v5947_v53 = vld [vmem:[%s10162_s2 + $0x344] sm:$0xf0] }
 0x1e6   :  { %2928 = vmatpush.bf16.msrb.mxu3 %v9006_v22  ;;  %10826 = vst [vmem:[#allocation82_spill] sm:$0xff] %v9050_v10  ;;  %2641 = vmatmul.bf16.vlgmr.msra.gmra.mxu2 %v9008_v8  ;;  %v9077_v22 = vor.u32 %v5948_v54, %v5244_v5  ;;  %v5946_v42 = vld [vmem:[%s10162_s2 + $0x344] sm:$0xf]  ;;  %v5236_v54 = vld [vmem:[%s10162_s2 + $0x348] sm:$0xf0]  ;;  %v9107_v2 = vor.u32 %v5947_v53, %v5234_v40  ;;  %v9126_v40 = vpop.f32.mrf.mxu1 }
 0x1e7   :  { %2654 = vmatmul.bf16.vlgmr.msra.gmra.mxu3 %v9021_v51  ;;  %10827 = vst [vmem:[#allocation83_spill] sm:$0xff] %v9071_v1  ;;  %v5962_v5 = vld [vmem:[%s10162_s2 + $0x3c4] sm:$0xf]  ;;  %v5300_v55 = vld [vmem:[%s10162_s2 + $0x3c8] sm:$0xf0]  ;;  %v9155_v34 = vpop.f32.mrf.mxu2 }
 0x1e8   :  { %2890 = vmatpush.bf16.msrb.mxu0 %v9031_v52  ;;  %10828 = vst [vmem:[#allocation84_spill] sm:$0xff] %v9075_v61  ;;  %v5226_v52 = vld [vmem:[%s10162_s2 + $0x330] sm:$0xf]  ;;  %v5218_v63 = vld [vmem:[%s10162_s2 + $0x320] sm:$0xf] }
 0x1e9   :  { %2903 = vmatpush.bf16.msrb.mxu1 %v9035_v30  ;;  %2916 = vmatpush.bf16.msrb.mxu2 %v9037_v3  ;;  %10829 = vst [vmem:[#allocation85_spill] sm:$0xff] %v9077_v22  ;;  %v9113_v3 = vor.u32 %v5963_v44, %v5298_v48  ;;  %v9115_v30 = vor.u32 %v5946_v42, %v5236_v54  ;;  %v5290_v53 = vld [vmem:[%s10162_s2 + $0x3b0] sm:$0xf]  ;;  %v5961_v44 = vld [vmem:[%s10162_s2 + $0x3b4] sm:$0xf0] }
 0x1ea   :  { %2929 = vmatpush.bf16.msrb.mxu3 %v9050_v10  ;;  %10830 = vst [vmem:[#allocation86_spill] sm:$0xff] %v9089_v18  ;;  %v9109_v10 = vpop.f32.mrf.mxu0  ;;  %v9129_v48 = vor.u32 %v5962_v5, %v5300_v55  ;;  %v5944_v42 = vld [vmem:[%s10162_s2 + $0x334] sm:$0xf]  ;;  %v5228_v54 = vld [vmem:[%s10162_s2 + $0x338] sm:$0xf0] }
 0x1eb   :  { %10831 = vst [vmem:[#allocation87_spill] sm:$0xff] %v9107_v2  ;;  %v5292_v5 = vld [vmem:[%s10162_s2 + $0x3b8] sm:$0xf0]  ;;  %v5210_v11 = vld [vmem:[%s10162_s2 + $0x310] sm:$0xf] }
 0x1ec   :  { %2891 = vmatpush.bf16.msrb.mxu0 %v9071_v1  ;;  %10832 = vst [vmem:[#allocation88_spill] sm:$0xff] %v9113_v3  ;;  %v5945_v1 = vld [vmem:[%s10162_s2 + $0x334] sm:$0xf0]  ;;  %v5388_v45 = vld [vmem:[%s10162_s2 + $0x178] sm:$0xf0] }
 0x1ed   :  { %2904 = vmatpush.bf16.msrb.mxu1 %v9075_v61  ;;  %2917 = vmatpush.bf16.msrb.mxu2 %v9077_v22  ;;  %10833 = vst [vmem:[#allocation89_spill] sm:$0xff] %v9115_v30  ;;  %v5960_v22 = vld [vmem:[%s10162_s2 + $0x3b4] sm:$0xf]  ;;  %v9147_v55 = vor.u32 %v5945_v1, %v5226_v52  ;;  %v9153_v61 = vor.u32 %v5944_v42, %v5228_v54  ;;  %v5282_v52 = vld [vmem:[%s10162_s2 + $0x3a0] sm:$0xf] }
 0x1ee   :  { %2930 = vmatpush.bf16.msrb.mxu3 %v9089_v18  ;;  %10834 = vst [vmem:[#allocation90_spill] sm:$0xff] %v9129_v48  ;;  %v9151_v18 = vor.u32 %v5961_v44, %v5290_v53  ;;  %v9167_v1 = vor.u32 %v5960_v22, %v5292_v5  ;;  %v9169_v53 = vpop.f32.mrf.mxu3  ;;  %v5959_v44 = vld [vmem:[%s10162_s2 + $0x3a4] sm:$0xf0]  ;;  %v5942_v42 = vld [vmem:[%s10162_s2 + $0x324] sm:$0xf] }
 0x1ef   :  { %10835 = vst [vmem:[#allocation91_spill] sm:$0xff] %v9147_v55  ;;  %v5220_v54 = vld [vmem:[%s10162_s2 + $0x328] sm:$0xf0]  ;;  %v5941_v31 = vld [vmem:[%s10162_s2 + $0x314] sm:$0xf0] }
 0x1f0   :  { %2892 = vmatpush.bf16.msrb.mxu0 %v9107_v2  ;;  %10836 = vst [vmem:[#allocation92_spill] sm:$0xff] %v9151_v18  ;;  %v5943_v2 = vld [vmem:[%s10162_s2 + $0x324] sm:$0xf0]  ;;  %v5284_v22 = vld [vmem:[%s10162_s2 + $0x3a8] sm:$0xf0]  ;;  %v9193_v41 = vor.u32 %v5942_v42, %v5220_v54 }
 0x1f1   :  { %2905 = vmatpush.bf16.msrb.mxu1 %v9113_v3  ;;  %2918 = vmatpush.bf16.msrb.mxu2 %v9115_v30  ;;  %10837 = vst [vmem:[#allocation93_spill] sm:$0xff] %v9153_v61  ;;  %v9187_v5 = vor.u32 %v5943_v2, %v5218_v63  ;;  %v9191_v3 = vor.u32 %v5959_v44, %v5282_v52  ;;  %v5274_v63 = vld [vmem:[%s10162_s2 + $0x390] sm:$0xf]  ;;  %v5957_v52 = vld [vmem:[%s10162_s2 + $0x394] sm:$0xf0] }
 0x1f2   :  { %2931 = vmatpush.bf16.msrb.mxu3 %v9129_v48  ;;  %10838 = vst [vmem:[#allocation94_spill] sm:$0xff] %v9167_v1  ;;  %v5958_v48 = vld [vmem:[%s10162_s2 + $0x3a4] sm:$0xf]  ;;  %v1781_v30 = vpop.f32.mrf.mxu0  ;;  %v5940_v44 = vld [vmem:[%s10162_s2 + $0x314] sm:$0xf] }
 0x1f3   :  { %10839 = vst [vmem:[#allocation95_spill] sm:$0xff] %v9187_v5  ;;  %v1794_v30 = vpop.f32.mrf.mxu1  ;;  %v9205_v2 = vor.u32 %v5958_v48, %v5284_v22  ;;  %v5212_v42 = vld [vmem:[%s10162_s2 + $0x318] sm:$0xf0]  ;;  %v5956_v54 = vld [vmem:[%s10162_s2 + $0x394] sm:$0xf]  ;;  %v9223_v22 = vor.u32 %v5941_v31, %v5210_v11 }
 0x1f4   :  { %2893 = vmatpush.bf16.msrb.mxu0 %v9147_v55  ;;  %10840 = vst [vmem:[#allocation96_spill] sm:$0xff] %v9191_v3  ;;  %v5276_v48 = vld [vmem:[%s10162_s2 + $0x398] sm:$0xf0]  ;;  %v5202_v30 = vld [vmem:[%s10162_s2 + $0x300] sm:$0xf]  ;;  %v1807_v55 = vpop.f32.mrf.mxu2 }
 0x1f5   :  { %2906 = vmatpush.bf16.msrb.mxu1 %v9151_v18  ;;  %2919 = vmatpush.bf16.msrb.mxu2 %v9153_v61  ;;  %10841 = vst [vmem:[#allocation97_spill] sm:$0xff] %v9193_v41  ;;  %v9233_v61 = vor.u32 %v5957_v52, %v5274_v63  ;;  %v9235_v18 = vor.u32 %v5940_v44, %v5212_v42  ;;  %v5266_v11 = vld [vmem:[%s10162_s2 + $0x380] sm:$0xf]  ;;  %v5955_v31 = vld [vmem:[%s10162_s2 + $0x384] sm:$0xf0] }
 0x1f6   :  { %2932 = vmatpush.bf16.msrb.mxu3 %v9167_v1  ;;  %10842 = vst [vmem:[#allocation98_spill] sm:$0xff] %v9205_v2  ;;  %v5939_v1 = vld [vmem:[%s10162_s2 + $0x304] sm:$0xf0]  ;;  %v5204_v63 = vld [vmem:[%s10162_s2 + $0x308] sm:$0xf0]  ;;  %v1820_v42 = vpop.f32.mrf.mxu3  ;;  %v9281_v28 = vor.u32 %v5955_v31, %v5266_v11 }
 0x1f7   :  { %10843 = vst [vmem:[#allocation99_spill] sm:$0xff] %v9223_v22  ;;  %v5954_v52 = vld [vmem:[%s10162_s2 + $0x384] sm:$0xf]  ;;  %v5268_v44 = vld [vmem:[%s10162_s2 + $0x388] sm:$0xf0] }
 0x1f8   :  { %2894 = vmatpush.bf16.msrb.mxu0 %v9187_v5  ;;  %10844 = vst [vmem:[#allocation100_spill] sm:$0xff] %v9233_v61  ;;  %v5938_v5 = vld [vmem:[%s10162_s2 + $0x304] sm:$0xf]  ;;  %v5386_v55 = vld [vmem:[%s10162_s2 + $0x170] sm:$0xf]  ;;  %v9292_v36 = vor.u32 %v5954_v52, %v5268_v44 }
 0x1f9   :  { %2907 = vmatpush.bf16.msrb.mxu1 %v9191_v3  ;;  %2920 = vmatpush.bf16.msrb.mxu2 %v9193_v41  ;;  %v9247_v41 = vor.u32 %v5956_v54, %v5276_v48  ;;  %v5921_v54 = vld [vmem:[%s10162_s2 + $0x174] sm:$0xf0]  ;;  %v5450_v48 = vld [vmem:[%s10162_s2 + $0x1f0] sm:$0xf]  ;;  %v5920_v3 = vld [vmem:[%s10162_s2 + $0x174] sm:$0xf] }
 0x1fa   :  { %2933 = vmatpush.bf16.msrb.mxu3 %v9205_v2  ;;  %v9268_v2 = vor.u32 %v5939_v1, %v5202_v30  ;;  %v5937_v42 = vld [vmem:[%s10162_s2 + $0x1f4] sm:$0xf0]  ;;  %v9283_v1 = vor.u32 %v5938_v5, %v5204_v63  ;;  %v5936_v30 = vld [vmem:[%s10162_s2 + $0x1f4] sm:$0xf]  ;;  %10846 = vst [vmem:[#allocation102_spill] sm:$0xff] %v9292_v36  ;;  %v9294_v59 = vor.u32 %v5921_v54, %v5386_v55 }
 0x1fb   :  { %v9298_v11 = vor.u32 %v5920_v3, %v5388_v45  ;;  %v5378_v5 = vld [vmem:[%s10162_s2 + $0x160] sm:$0xf]  ;;  %v5919_v31 = vld [vmem:[%s10162_s2 + $0x164] sm:$0xf0]  ;;  %v5918_v3 = vld [vmem:[%s10162_s2 + $0x164] sm:$0xf] }
 0x1fc   :  { %2895 = vmatpush.bf16.msrb.mxu0 %v9223_v22  ;;  %10845 = vst [vmem:[#allocation101_spill] sm:$0xff] %v9283_v1  ;;  %v5452_v22 = vld [vmem:[%s10162_s2 + $0x1f8] sm:$0xf0]  ;;  %v5442_v63 = vld [vmem:[%s10162_s2 + $0x1e0] sm:$0xf]  ;;  %v9331_v54 = vor.u32 %v5919_v31, %v5378_v5  ;;  %v1741_v31 = vadd.f32 %v8818_v17, %v8801_v46 }
 0x1fd   :  { %2908 = vmatpush.bf16.msrb.mxu1 %v9233_v61  ;;  %2921 = vmatpush.bf16.msrb.mxu2 %v9235_v18  ;;  %10847 = vst [vmem:[#allocation103_spill] sm:$0xff] %v9294_v59  ;;  %v9296_v61 = vor.u32 %v5937_v42, %v5450_v48  ;;  %v9310_v52 = vor.u32 %v5936_v30, %v5452_v22  ;;  %v5935_v45 = vld [vmem:[%s10162_s2 + $0x1e4] sm:$0xf0]  ;;  %v5380_v44 = vld [vmem:[%s10162_s2 + $0x168] sm:$0xf0] }
 0x1fe   :  { %2934 = vmatpush.bf16.msrb.mxu3 %v9247_v41  ;;  %10849 = vst [vmem:[#allocation105_spill] sm:$0xff] %v9298_v11  ;;  %v5934_v22 = vld [vmem:[%s10162_s2 + $0x1e4] sm:$0xf]  ;;  %v5444_v55 = vld [vmem:[%s10162_s2 + $0x1e8] sm:$0xf0]  ;;  %v9335_v48 = vor.u32 %v5935_v45, %v5442_v63  ;;  %v9337_v42 = vor.u32 %v5918_v3, %v5380_v44 }
 0x1ff   :  { %10848 = vst [vmem:[#allocation104_spill] sm:$0xff] %v9296_v61  ;;  %v5370_v30 = vld [vmem:[%s10162_s2 + $0x150] sm:$0xf]  ;;  %v9351_v63 = vor.u32 %v5934_v22, %v5444_v55  ;;  %v5933_v45 = vld [vmem:[%s10162_s2 + $0x1d4] sm:$0xf0] }
 0x200   :  { %2896 = vmatpush.bf16.msrb.mxu0 %v9268_v2  ;;  %10850 = vst [vmem:[#allocation106_spill] sm:$0xff] %v9310_v52  ;;  %v5434_v5 = vld [vmem:[%s10162_s2 + $0x1d0] sm:$0xf]  ;;  %v5916_v3 = vld [vmem:[%s10162_s2 + $0x154] sm:$0xf] }
 0x201   :  { %2909 = vmatpush.bf16.msrb.mxu1 %v9281_v28  ;;  %2922 = vmatpush.bf16.msrb.mxu2 %v9283_v1  ;;  %10851 = vst [vmem:[#allocation107_spill] sm:$0xff] %v9331_v54  ;;  %v5372_v44 = vld [vmem:[%s10162_s2 + $0x158] sm:$0xf0]  ;;  %v5932_v46 = vld [vmem:[%s10162_s2 + $0x1d4] sm:$0xf]  ;;  %v9377_v55 = vor.u32 %v5933_v45, %v5434_v5 }
 0x202   :  { %2935 = vmatpush.bf16.msrb.mxu3 %v9292_v36  ;;  %10852 = vst [vmem:[#allocation108_spill] sm:$0xff] %v9335_v48  ;;  %v5917_v36 = vld [vmem:[%s10162_s2 + $0x154] sm:$0xf0]  ;;  %v5436_v17 = vld [vmem:[%s10162_s2 + $0x1d8] sm:$0xf0] }
 0x203   :  { %10853 = vst [vmem:[#allocation109_spill] sm:$0xff] %v9337_v42  ;;  %2897 = vmatmul.bf16.vlgmr.msrb.gmra.mxu0 %v8400_v49  ;;  %v9372_v22 = vor.u32 %v5917_v36, %v5370_v30  ;;  %v5426_v36 = vld [vmem:[%s10162_s2 + $0x1c0] sm:$0xf]  ;;  %v1780_v30 = vadd.f32 %v9109_v10, %v1741_v31  ;;  %v9392_v5 = vor.u32 %v5932_v46, %v5436_v17  ;;  %v5931_v45 = vld [vmem:[%s10162_s2 + $0x1c4] sm:$0xf0]  ;;  %v1844_v17 = vpop.f32.mrf.mxu1 }
 0x204   :  { %3101 = vmatpush.bf16.msra.mxu0 %v9294_v59  ;;  %10854 = vst [vmem:[#allocation110_spill] sm:$0xff] %v9351_v63  ;;  %2923 = vmatmul.bf16.vlgmr.msrb.gmra.mxu2 %v8400_v49  ;;  %v5930_v10 = vld [vmem:[%s10162_s2 + $0x1c4] sm:$0xf]  ;;  %v5428_v31 = vld [vmem:[%s10162_s2 + $0x1c8] sm:$0xf0]  ;;  %v1767_v46 = vadd.f32 %v8870_v21, %v8856_v27 }
 0x205   :  { %3114 = vmatpush.bf16.msra.mxu1 %v9296_v61  ;;  %3127 = vmatpush.bf16.msra.mxu2 %v9298_v11  ;;  %10855 = vst [vmem:[#allocation111_spill] sm:$0xff] %v9377_v55  ;;  %v5362_v11 = vld [vmem:[%s10162_s2 + $0x140] sm:$0xf]  ;;  %v9416_v61 = vor.u32 %v5931_v45, %v5426_v36  ;;  %v5354_v1 = vld [vmem:[%s10162_s2 + $0x130] sm:$0xf] }
 0x206   :  { %3140 = vmatpush.bf16.msra.mxu3 %v9310_v52  ;;  %2910 = vmatmul.bf16.vlgmr.msrb.gmra.mxu1 %v8410_v7  ;;  %v9379_v52 = vor.u32 %v5916_v3, %v5372_v44  ;;  %10857 = vst [vmem:[#allocation113_spill] sm:$0xff] %v9392_v5  ;;  %v5914_v3 = vld [vmem:[%s10162_s2 + $0x144] sm:$0xf]  ;;  %v5364_v44 = vld [vmem:[%s10162_s2 + $0x148] sm:$0xf0] }
 0x207   :  { %2936 = vmatmul.bf16.vlgmr.msrb.gmra.mxu3 %v8410_v7  ;;  %10859 = vst [vmem:[#allocation115_spill] sm:$0xff] %v9416_v61  ;;  %v9418_v59 = vor.u32 %v5914_v3, %v5364_v44  ;;  %v5913_v21 = vld [vmem:[%s10162_s2 + $0x134] sm:$0xf0]  ;;  %v5418_v27 = vld [vmem:[%s10162_s2 + $0x1b0] sm:$0xf]  ;;  %v1806_v3 = vadd.f32 %v9155_v34, %v1767_v46 }
 0x208   :  { %3102 = vmatpush.bf16.msra.mxu0 %v9331_v54  ;;  %10856 = vst [vmem:[#allocation112_spill] sm:$0xff] %v9379_v52  ;;  %v5915_v54 = vld [vmem:[%s10162_s2 + $0x144] sm:$0xf0]  ;;  %v5912_v36 = vld [vmem:[%s10162_s2 + $0x134] sm:$0xf] }
 0x209   :  { %3115 = vmatpush.bf16.msra.mxu1 %v9335_v48  ;;  %3128 = vmatpush.bf16.msra.mxu2 %v9337_v42  ;;  %v1831_v42 = vpop.f32.mrf.mxu0  ;;  %10860 = vst [vmem:[#allocation116_spill] sm:$0xff] %v9418_v59  ;;  %v5356_v45 = vld [vmem:[%s10162_s2 + $0x138] sm:$0xf0]  ;;  %v5911_v34 = vld [vmem:[%s10162_s2 + $0x124] sm:$0xf0]  ;;  %v1857_v46 = vpop.f32.mrf.mxu2 }
 0x20a   :  { %3141 = vmatpush.bf16.msra.mxu3 %v9351_v63  ;;  %v9412_v63 = vor.u32 %v5915_v54, %v5362_v11  ;;  %v1845_v48 = vadd.f32 %v1844_v17, %v1831_v42  ;;  %v1793_v11 = vadd.f32 %v9126_v40, %v1780_v30  ;;  %v9431_v54 = vor.u32 %v5930_v10, %v5428_v31  ;;  %v5929_v42 = vld [vmem:[%s10162_s2 + $0x1b4] sm:$0xf0]  ;;  %v5928_v40 = vld [vmem:[%s10162_s2 + $0x1b4] sm:$0xf]  ;;  %v5420_v30 = vld [vmem:[%s10162_s2 + $0x1b8] sm:$0xf0] }
 0x20b   :  { %v9450_v10 = vor.u32 %v5913_v21, %v5354_v1  ;;  %v9454_v31 = vor.u32 %v5929_v42, %v5418_v27  ;;  %v9456_v17 = vor.u32 %v5912_v36, %v5356_v45  ;;  %v5410_v1 = vld [vmem:[%s10162_s2 + $0x1a0] sm:$0xf]  ;;  %v5927_v21 = vld [vmem:[%s10162_s2 + $0x1a4] sm:$0xf0]  ;;  %v5910_v27 = vld [vmem:[%s10162_s2 + $0x124] sm:$0xf]  ;;  %v1870_v42 = vpop.f32.mrf.mxu3 }
 0x20c   :  { %3103 = vmatpush.bf16.msra.mxu0 %v9372_v22  ;;  %10858 = vst [vmem:[#allocation114_spill] sm:$0xff] %v9412_v63  ;;  %v1874_v44 = vadd.f32 %v1845_v48, %v1793_v11  ;;  %v9468_v48 = vor.u32 %v5928_v40, %v5420_v30  ;;  %v5348_v11 = vld [vmem:[%s10162_s2 + $0x128] sm:$0xf0]  ;;  %v5926_v36 = vld [vmem:[%s10162_s2 + $0x1a4] sm:$0xf] }
 0x20d   :  { %3116 = vmatpush.bf16.msra.mxu1 %v9377_v55  ;;  %3129 = vmatpush.bf16.msra.mxu2 %v9379_v52  ;;  %10861 = vst [vmem:[#allocation117_spill] sm:$0xff] %v9431_v54  ;;  %v5412_v45 = vld [vmem:[%s10162_s2 + $0x1a8] sm:$0xf0]  ;;  %v5338_v40 = vld [vmem:[%s10162_s2 + $0x110] sm:$0xf] }
 0x20e   :  { %3142 = vmatpush.bf16.msra.mxu3 %v9392_v5  ;;  %10862 = vst [vmem:[#allocation118_spill] sm:$0xff] %v9450_v10  ;;  %v5346_v5 = vld [vmem:[%s10162_s2 + $0x120] sm:$0xf]  ;;  %v5909_v52 = vld [vmem:[%s10162_s2 + $0x114] sm:$0xf0] }
 0x20f   :  { %10863 = vst [vmem:[#allocation119_spill] sm:$0xff] %v9454_v31  ;;  %v5402_v55 = vld [vmem:[%s10162_s2 + $0x190] sm:$0xf] }
 0x210   :  { %3104 = vmatpush.bf16.msra.mxu0 %v9412_v63  ;;  %10864 = vst [vmem:[#allocation120_spill] sm:$0xff] %v9456_v17  ;;  %v9491_v63 = vor.u32 %v5911_v34, %v5346_v5  ;;  %v9504_v5 = vor.u32 %v5927_v21, %v5410_v1  ;;  %v5924_v1 = vld [vmem:[%s10162_s2 + $0x194] sm:$0xf]  ;;  %v5404_v21 = vld [vmem:[%s10162_s2 + $0x198] sm:$0xf0] }
 0x211   :  { %3117 = vmatpush.bf16.msra.mxu1 %v9416_v61  ;;  %3130 = vmatpush.bf16.msra.mxu2 %v9418_v59  ;;  %10865 = vst [vmem:[#allocation121_spill] sm:$0xff] %v9468_v48  ;;  %v1833_v30 = vpop.f32.mrf.mxu0  ;;  %v1876_v59 = vadd.f32 %v1874_v44, %v7973_v62  ;;  %v1871_v61 = vadd.f32 %v1870_v42, %v1857_v46  ;;  %v5908_v44 = vld [vmem:[%s10162_s2 + $0x114] sm:$0xf]  ;;  %v5340_v42 = vld [vmem:[%s10162_s2 + $0x118] sm:$0xf0] }
 0x212   :  { %3143 = vmatpush.bf16.msra.mxu3 %v9431_v54  ;;  %v1819_v54 = vadd.f32 %v9169_v53, %v1806_v3  ;;  %10866 = vst [vmem:[#allocation122_spill] sm:$0xff] %v9491_v63  ;;  %v5925_v30 = vld [vmem:[%s10162_s2 + $0x194] sm:$0xf0]  ;;  %v1846_v53 = vpop.f32.mrf.mxu1  ;;  %v9506_v3 = vor.u32 %v5910_v27, %v5348_v11  ;;  %v9512_v46 = vor.u32 %v5926_v36, %v5412_v45  ;;  %v10870_v11 = vmov 0  ;;  %v5907_v45 = vld [vmem:[%s10162_s2 + $0x104] sm:$0xf0] }
 0x213   :  { %10867 = vst [vmem:[#allocation123_spill] sm:$0xff] %v9504_v5  ;;  %v10871_v11 = vsel %vm9529_vm4, 4294967295, %v10870_v11  ;;  %v9534_v36 = vor.u32 %v5909_v52, %v5338_v40  ;;  %v9544_v53 = vor.u32 %v5925_v30, %v5402_v55  ;;  %v5923_v52 = vld [vmem:[%s10162_s2 + $0x184] sm:$0xf0]  ;;  %v5906_v40 = vld [vmem:[%s10162_s2 + $0x104] sm:$0xf]  ;;  %v9564_v30 = vor.u32 %v5924_v1, %v5404_v21 }
 0x214   :  { %3105 = vmatpush.bf16.msra.mxu0 %v9450_v10  ;;  %10868 = vst [vmem:[#allocation124_spill] sm:$0xff] %v9506_v3  ;;  %v1875_v34 = vadd.f32 %v1871_v61, %v1819_v54  ;;  %v5330_v61 = vld [vmem:[%s10162_s2 + $0x100] sm:$0xf]  ;;  %v1878_v54 = vmax.f32 %v1876_v59, 0.0  ;;  %v10875_v55 = vmov 0 }
 0x215   :  { %3118 = vmatpush.bf16.msra.mxu1 %v9454_v31  ;;  %3131 = vmatpush.bf16.msra.mxu2 %v9456_v17  ;;  %10869 = vst [vmem:[#allocation125_spill] sm:$0xff] %v9512_v46  ;;  %v5394_v59 = vld [vmem:[%s10162_s2 + $0x180] sm:$0xf]  ;;  %v10876_v55 = vsel %vm9559_vm5, 4294967295, %v10875_v55  ;;  %v5985_v1 = vld [vmem:[%s10162_s2 + $0x574] sm:$0xf0]  ;;  %v9587_v17 = vor.u32 %v5907_v45, %v5330_v61 }
 0x216   :  { %3144 = vmatpush.bf16.msra.mxu3 %v9468_v48  ;;  %v1877_v27 = vadd.f32 %v1875_v34, %v7985_v4  ;;  %10872 = vst [vmem:[#allocation126_spill] sm:$0xff] %v10871_v11  ;;  %v9546_v34 = vor.u32 %v5908_v44, %v5340_v42  ;;  %v5922_v44 = vld [vmem:[%s10162_s2 + $0x184] sm:$0xf]  ;;  %v5396_v42 = vld [vmem:[%s10162_s2 + $0x188] sm:$0xf0]  ;;  %v1880_v4 = vmax.f32 %v8567_v16, %v1878_v54 }
 0x217   :  { %10873 = vst [vmem:[#allocation127_spill] sm:$0xff] %v9544_v53  ;;  %v5610_v21 = vld [vmem:[%s10162_s2 + $0x5f0] sm:$0xf]  ;;  %v6001_v31 = vld [vmem:[%s10162_s2 + $0x5f4] sm:$0xf0]  ;;  %v9604_v16 = vor.u32 %v5923_v52, %v5394_v59  ;;  %v9615_v45 = vor.u32 %v5922_v44, %v5396_v42 }
 0x218   :  { %3106 = vmatpush.bf16.msra.mxu0 %v9491_v63  ;;  %10874 = vst [vmem:[#allocation128_spill] sm:$0xff] %v9546_v34  ;;  %v5332_v63 = vld [vmem:[%s10162_s2 + $0x108] sm:$0xf0]  ;;  %v1879_v48 = vmax.f32 %v1877_v27, 0.0  ;;  %v1890_v27 = vld [vmem:[%s10166_s4] sm:$0xff] }
 0x219   :  { %3119 = vmatpush.bf16.msra.mxu1 %v9504_v5  ;;  %3132 = vmatpush.bf16.msra.mxu2 %v9506_v3  ;;  %10877 = vst [vmem:[#allocation129_spill] sm:$0xff] %v10876_v55  ;;  %v1859_v3 = vpop.f32.mrf.mxu2  ;;  %v5546_v5 = vld [vmem:[%s10162_s2 + $0x570] sm:$0xf]  ;;  %v5984_v10 = vld [vmem:[%s10162_s2 + $0x574] sm:$0xf] }
 0x21a   :  { %3145 = vmatpush.bf16.msra.mxu3 %v9512_v46  ;;  %v1872_v46 = vpop.f32.mrf.mxu3  ;;  %v1881_v3 = vmax.f32 %v8653_v6, %v1879_v48  ;;  %v9606_v6 = vor.u32 %v5906_v40, %v5332_v63  ;;  %v6000_v48 = vld [vmem:[%s10162_s2 + $0x5f4] sm:$0xf]  ;;  %v5612_v61 = vld [vmem:[%s10162_s2 + $0x5f8] sm:$0xf0]  ;;  %v5538_v63 = vld [vmem:[%s10162_s2 + $0x560] sm:$0xf] }
 0x21b   :  { %v5548_v46 = vld [vmem:[%s10162_s2 + $0x578] sm:$0xf0]  ;;  %v5983_v52 = vld [vmem:[%s10162_s2 + $0x564] sm:$0xf0]  ;;  %v5982_v40 = vld [vmem:[%s10162_s2 + $0x564] sm:$0xf] }
 0x21c   :  { %3107 = vmatpush.bf16.msra.mxu0 %v9534_v36  ;;  %v1882_v54 = vpack.c.bf16 %v1881_v3, %v1880_v4  ;;  %v9621_v59 = vor.u32 %v5984_v10, %v5548_v46  ;;  %v5602_v4 = vld [vmem:[%s10162_s2 + $0x5e0] sm:$0xf]  ;;  %v9638_v10 = vor.u32 %v6000_v48, %v5612_v61  ;;  %v5540_v44 = vld [vmem:[%s10162_s2 + $0x568] sm:$0xf0]  ;;  %v5998_v42 = vld [vmem:[%s10162_s2 + $0x5e4] sm:$0xf] }
 0x21d   :  { %3120 = vmatpush.bf16.msra.mxu1 %v9544_v53  ;;  %3133 = vmatpush.bf16.msra.mxu2 %v9546_v34  ;;  %v9617_v53 = vor.u32 %v5985_v1, %v5546_v5  ;;  %v9619_v34 = vor.u32 %v6001_v31, %v5610_v21  ;;  %v5999_v5 = vld [vmem:[%s10162_s2 + $0x5e4] sm:$0xf0]  ;;  %v9662_v1 = vor.u32 %v5983_v52, %v5538_v63  ;;  %v5530_v46 = vld [vmem:[%s10162_s2 + $0x550] sm:$0xf]  ;;  %v5981_v48 = vld [vmem:[%s10162_s2 + $0x554] sm:$0xf0] }
 0x21e   :  { %3146 = vmatpush.bf16.msra.mxu3 %v9564_v30  ;;  %v1891_v31 = vsel %vm1889_vm6, %v1882_v54, %v1890_v27  ;;  %10878 = vst [vmem:[#allocation130_spill] sm:$0xff] %v9638_v10  ;;  %v5604_v27 = vld [vmem:[%s10162_s2 + $0x5e8] sm:$0xf0]  ;;  %v9666_v21 = vor.u32 %v5999_v5, %v5602_v4  ;;  %v9668_v3 = vor.u32 %v5982_v40, %v5540_v44  ;;  %v5594_v61 = vld [vmem:[%s10162_s2 + $0x5d0] sm:$0xf] }
 0x21f   :  { %1892 = vst [vmem:[%s10166_s4] sm:$0xff] %v1891_v31  ;;  %v9681_v54 = vor.u32 %v5998_v42, %v5604_v27  ;;  %v5997_v63 = vld [vmem:[%s10162_s2 + $0x5d4] sm:$0xf0]  ;;  %v5980_v52 = vld [vmem:[%s10162_s2 + $0x554] sm:$0xf]  ;;  %v5532_v4 = vld [vmem:[%s10162_s2 + $0x558] sm:$0xf0]  ;;  %v9701_v40 = vor.u32 %v5981_v48, %v5530_v46 }
 0x220   :  { %3108 = vmatpush.bf16.msra.mxu0 %v9587_v17  ;;  %10879 = vst [vmem:[#allocation131_spill] sm:$0xff] %v9662_v1  ;;  %v5996_v31 = vld [vmem:[%s10162_s2 + $0x5d4] sm:$0xf]  ;;  %v5596_v5 = vld [vmem:[%s10162_s2 + $0x5d8] sm:$0xf0]  ;;  %v9706_v44 = vor.u32 %v5997_v63, %v5594_v61 }
 0x221   :  { %3121 = vmatpush.bf16.msra.mxu1 %v9604_v16  ;;  %3134 = vmatpush.bf16.msra.mxu2 %v9606_v6  ;;  %10880 = vst [vmem:[#allocation132_spill] sm:$0xff] %v9666_v21  ;;  %v5522_v42 = vld [vmem:[%s10162_s2 + $0x540] sm:$0xf]  ;;  %v5979_v27 = vld [vmem:[%s10162_s2 + $0x544] sm:$0xf0]  ;;  %v9720_v46 = vor.u32 %v5996_v31, %v5596_v5  ;;  %v2137_v5 = vpop.f32.mrf.mxu0 }
 0x222   :  { %3147 = vmatpush.bf16.msra.mxu3 %v9615_v45  ;;  %10881 = vst [vmem:[#allocation133_spill] sm:$0xff] %v9668_v3  ;;  %v5995_v48 = vld [vmem:[%s10162_s2 + $0x5c4] sm:$0xf0]  ;;  %v5978_v61 = vld [vmem:[%s10162_s2 + $0x544] sm:$0xf]  ;;  %v9738_v31 = vor.u32 %v5979_v27, %v5522_v42 }
 0x223   :  { %10882 = vst [vmem:[#allocation134_spill] sm:$0xff] %v9681_v54  ;;  %3109 = vmatmul.bf16.vlgmr.msra.gmra.mxu0 %v8700_v20  ;;  %v5524_v63 = vld [vmem:[%s10162_s2 + $0x548] sm:$0xf0]  ;;  %v5578_v42 = vld [vmem:[%s10162_s2 + $0x5b0] sm:$0xf]  ;;  %v2150_v27 = vpop.f32.mrf.mxu1 }
 0x224   :  { %3345 = vmatpush.bf16.msrb.mxu0 %v9617_v53  ;;  %3135 = vmatmul.bf16.vlgmr.msra.gmra.mxu2 %v8700_v20  ;;  %10883 = vst [vmem:[#allocation135_spill] sm:$0xff] %v9701_v40  ;;  %v9708_v20 = vor.u32 %v5980_v52, %v5532_v4  ;;  %v5994_v52 = vld [vmem:[%s10162_s2 + $0x5c4] sm:$0xf]  ;;  %v5588_v4 = vld [vmem:[%s10162_s2 + $0x5c8] sm:$0xf0]  ;;  %v9744_v55 = vor.u32 %v5978_v61, %v5524_v63 }
 0x225   :  { %3358 = vmatpush.bf16.msrb.mxu1 %v9619_v34  ;;  %3371 = vmatpush.bf16.msrb.mxu2 %v9621_v59  ;;  %10884 = vst [vmem:[#allocation136_spill] sm:$0xff] %v9706_v44  ;;  %v5516_v61 = vld [vmem:[%s10162_s2 + $0x538] sm:$0xf0]  ;;  %v9767_v63 = vadd.f32 %v2150_v27, %v2137_v5  ;;  %v5506_v27 = vld [vmem:[%s10162_s2 + $0x520] sm:$0xf] }
 0x226   :  { %3384 = vmatpush.bf16.msrb.mxu3 %v9638_v10  ;;  %3122 = vmatmul.bf16.vlgmr.msra.gmra.mxu1 %v8713_v47  ;;  %10885 = vst [vmem:[#allocation137_spill] sm:$0xff] %v9708_v20  ;;  %v5498_v10 = vld [vmem:[%s10162_s2 + $0x510] sm:$0xf] }
 0x227   :  { %3148 = vmatmul.bf16.vlgmr.msra.gmra.mxu3 %v8713_v47  ;;  %v5586_v47 = vld [vmem:[%s10162_s2 + $0x5c0] sm:$0xf]  ;;  %10886 = vst [vmem:[#allocation138_spill] sm:$0xff] %v9720_v46 }
 0x228   :  { %3346 = vmatpush.bf16.msrb.mxu0 %v9662_v1  ;;  %10887 = vst [vmem:[#allocation139_spill] sm:$0xff] %v9738_v31  ;;  %v9742_v11 = vor.u32 %v5995_v48, %v5586_v47  ;;  %v5993_v47 = vld [vmem:[%s10162_s2 + $0x5b4] sm:$0xf0]  ;;  %v5976_v48 = vld [vmem:[%s10162_s2 + $0x534] sm:$0xf] }
 0x229   :  { %3359 = vmatpush.bf16.msrb.mxu1 %v9666_v21  ;;  %3372 = vmatpush.bf16.msrb.mxu2 %v9668_v3  ;;  %10889 = vst [vmem:[#allocation141_spill] sm:$0xff] %v9744_v55  ;;  %v5977_v3 = vld [vmem:[%s10162_s2 + $0x534] sm:$0xf0]  ;;  %v9782_v5 = vor.u32 %v5976_v48, %v5516_v61  ;;  %v5508_v48 = vld [vmem:[%s10162_s2 + $0x528] sm:$0xf0] }
 0x22a   :  { %3385 = vmatpush.bf16.msrb.mxu3 %v9681_v54  ;;  %10888 = vst [vmem:[#allocation140_spill] sm:$0xff] %v9742_v11  ;;  %v5514_v54 = vld [vmem:[%s10162_s2 + $0x530] sm:$0xf]  ;;  %v2176_v61 = vpop.f32.mrf.mxu3 }
 0x22b   :  { %10891 = vst [vmem:[#allocation143_spill] sm:$0xff] %v9782_v5 }
 0x22c   :  { %3347 = vmatpush.bf16.msrb.mxu0 %v9701_v40  ;;  %v5975_v40 = vld [vmem:[%s10162_s2 + $0x524] sm:$0xf0] }
 0x22d   :  { %3360 = vmatpush.bf16.msrb.mxu1 %v9706_v44  ;;  %3373 = vmatpush.bf16.msrb.mxu2 %v9708_v20  ;;  %v9756_v20 = vor.u32 %v5994_v52, %v5588_v4  ;;  %v5580_v52 = vld [vmem:[%s10162_s2 + $0x5b8] sm:$0xf0]  ;;  %v9776_v4 = vor.u32 %v5977_v3, %v5514_v54  ;;  %v9780_v44 = vor.u32 %v5993_v47, %v5578_v42  ;;  %v5570_v3 = vld [vmem:[%s10162_s2 + $0x5a0] sm:$0xf]  ;;  %v2163_v54 = vpop.f32.mrf.mxu2  ;;  %v5991_v42 = vld [vmem:[%s10162_s2 + $0x5a4] sm:$0xf0] }
 0x22e   :  { %3386 = vmatpush.bf16.msrb.mxu3 %v9720_v46  ;;  %v5992_v46 = vld [vmem:[%s10162_s2 + $0x5b4] sm:$0xf]  ;;  %v5974_v47 = vld [vmem:[%s10162_s2 + $0x524] sm:$0xf]  ;;  %v9818_v21 = vor.u32 %v5991_v42, %v5570_v3  ;;  %v5989_v3 = vld [vmem:[%s10162_s2 + $0x594] sm:$0xf0] }
 0x22f   :  { %10890 = vst [vmem:[#allocation142_spill] sm:$0xff] %v9756_v20  ;;  %v9820_v1 = vor.u32 %v5974_v47, %v5508_v48  ;;  %v5972_v42 = vld [vmem:[%s10162_s2 + $0x514] sm:$0xf]  ;;  %v5500_v47 = vld [vmem:[%s10162_s2 + $0x518] sm:$0xf0] }
 0x230   :  { %3348 = vmatpush.bf16.msrb.mxu0 %v9738_v31  ;;  %v2139_v31 = vpop.f32.mrf.mxu0  ;;  %10893 = vst [vmem:[#allocation145_spill] sm:$0xff] %v9818_v21  ;;  %v5988_v48 = vld [vmem:[%s10162_s2 + $0x594] sm:$0xf] }
 0x231   :  { %3361 = vmatpush.bf16.msrb.mxu1 %v9742_v11  ;;  %3374 = vmatpush.bf16.msrb.mxu2 %v9744_v55  ;;  %v9794_v55 = vor.u32 %v5992_v46, %v5580_v52  ;;  %v5990_v11 = vld [vmem:[%s10162_s2 + $0x5a4] sm:$0xf]  ;;  %v5572_v46 = vld [vmem:[%s10162_s2 + $0x5a8] sm:$0xf0]  ;;  %v9811_v52 = vadd.f32 %v2176_v61, %v2163_v54  ;;  %10894 = vst [vmem:[#allocation146_spill] sm:$0xff] %v9820_v1  ;;  %v2152_v31 = vpop.f32.mrf.mxu1 }
 0x232   :  { %3387 = vmatpush.bf16.msrb.mxu3 %v9756_v20  ;;  %v9814_v20 = vor.u32 %v5975_v40, %v5506_v27  ;;  %v5973_v54 = vld [vmem:[%s10162_s2 + $0x514] sm:$0xf0]  ;;  %v5562_v40 = vld [vmem:[%s10162_s2 + $0x590] sm:$0xf]  ;;  %v9832_v27 = vor.u32 %v5990_v11, %v5572_v46  ;;  %v5564_v11 = vld [vmem:[%s10162_s2 + $0x598] sm:$0xf0]  ;;  %v9856_v31 = vor.u32 %v5972_v42, %v5500_v47  ;;  %v2178_v47 = vpop.f32.mrf.mxu3 }
 0x233   :  { %10892 = vst [vmem:[#allocation144_spill] sm:$0xff] %v9794_v55  ;;  %v9850_v61 = vor.u32 %v5973_v54, %v5498_v10  ;;  %v9854_v46 = vor.u32 %v5989_v3, %v5562_v40  ;;  %v5554_v10 = vld [vmem:[%s10162_s2 + $0x580] sm:$0xf]  ;;  %v5987_v40 = vld [vmem:[%s10162_s2 + $0x584] sm:$0xf0] }
 0x234   :  { %3349 = vmatpush.bf16.msrb.mxu0 %v9776_v4  ;;  %10895 = vst [vmem:[#allocation147_spill] sm:$0xff] %v9832_v27  ;;  %v5970_v3 = vld [vmem:[%s10162_s2 + $0x504] sm:$0xf]  ;;  %v5492_v42 = vld [vmem:[%s10162_s2 + $0x508] sm:$0xf0] }
 0x235   :  { %3362 = vmatpush.bf16.msrb.mxu1 %v9780_v44  ;;  %3375 = vmatpush.bf16.msrb.mxu2 %v9782_v5  ;;  %v5971_v5 = vld [vmem:[%s10162_s2 + $0x504] sm:$0xf0]  ;;  %v2165_v54 = vpop.f32.mrf.mxu2 }
 0x236   :  { %3388 = vmatpush.bf16.msrb.mxu3 %v9794_v55  ;;  %v5490_v55 = vld [vmem:[%s10162_s2 + $0x500] sm:$0xf]  ;;  %v5986_v54 = vld [vmem:[%s10162_s2 + $0x584] sm:$0xf] }
 0x238   :  { %3350 = vmatpush.bf16.msrb.mxu0 %v9814_v20 }
 0x239   :  { %3363 = vmatpush.bf16.msrb.mxu1 %v9818_v21  ;;  %3376 = vmatpush.bf16.msrb.mxu2 %v9820_v1  ;;  %v9868_v1 = vor.u32 %v5988_v48, %v5564_v11  ;;  %v5556_v48 = vld [vmem:[%s10162_s2 + $0x588] sm:$0xf0]  ;;  %v9886_v11 = vor.u32 %v5971_v5, %v5490_v55  ;;  %v9892_v21 = vor.u32 %v5970_v3, %v5492_v42  ;;  %v10910_v5 = vld [vmem:[#allocation17_spill] sm:$0xff]  ;;  %v10913_v42 = vld [vmem:[#allocation20_spill] sm:$0xff] }
 0x23a   :  { %3389 = vmatpush.bf16.msrb.mxu3 %v9832_v27  ;;  %v9890_v27 = vor.u32 %v5987_v40, %v5554_v10  ;;  %v9895_v47 = vor.u32 %v5986_v54, %v5556_v48  ;;  %v10908_v55 = vld [vmem:[#allocation15_spill] sm:$0xff]  ;;  %v10914_v54 = vld [vmem:[#allocation21_spill] sm:$0xff] }
 0x23b   :  { %v10912_v40 = vld [vmem:[#allocation19_spill] sm:$0xff] }
 0x23c   :  { %3351 = vmatpush.bf16.msrb.mxu0 %v9850_v61 }
 0x23d   :  { %3364 = vmatpush.bf16.msrb.mxu1 %v9854_v46  ;;  %3377 = vmatpush.bf16.msrb.mxu2 %v9856_v31 }
 0x23e   :  { %3390 = vmatpush.bf16.msrb.mxu3 %v9868_v1 }
 0x240   :  { %3352 = vmatpush.bf16.msrb.mxu0 %v9886_v11 }
 0x241   :  { %3365 = vmatpush.bf16.msrb.mxu1 %v9890_v27  ;;  %3378 = vmatpush.bf16.msrb.mxu2 %v9892_v21 }
 0x242   :  { %3391 = vmatpush.bf16.msrb.mxu3 %v9895_v47 }
 0x243   :  { %3353 = vmatmul.bf16.vlgmr.msrb.gmra.mxu0 %v9008_v8 }
 0x244   :  { %3405 = vmatpush.bf16.msra.mxu0 %v8072_v29  ;;  %3366 = vmatmul.bf16.vlgmr.msrb.gmra.mxu1 %v9021_v51  ;;  %v2356_v29 = vpop.f32.mrf.mxu0 }
 0x245   :  { %3418 = vmatpush.bf16.msra.mxu1 %v8074_v33  ;;  %3431 = vmatpush.bf16.msra.mxu2 %v8076_v38  ;;  %v2357_v33 = vadd.f32 %v2356_v29, %v9767_v63  ;;  %v2369_v38 = vpop.f32.mrf.mxu1  ;;  %v10909_v63 = vld [vmem:[#allocation16_spill] sm:$0xff]  ;;  %v10915_v29 = vld [vmem:[#allocation22_spill] sm:$0xff] }
 0x246   :  { %3444 = vmatpush.bf16.msra.mxu3 %v8088_v37  ;;  %3379 = vmatmul.bf16.vlgmr.msrb.gmra.mxu2 %v9008_v8 }
 0x247   :  { %3392 = vmatmul.bf16.vlgmr.msrb.gmra.mxu3 %v9021_v51  ;;  %v2370_v37 = vadd.f32 %v2369_v38, %v2357_v33  ;;  %v10916_v38 = vld [vmem:[#allocation23_spill] sm:$0xff] }
 0x248   :  { %3406 = vmatpush.bf16.msra.mxu0 %v8109_v15  ;;  %v2382_v15 = vpop.f32.mrf.mxu2 }
 0x249   :  { %3419 = vmatpush.bf16.msra.mxu1 %v8113_v26  ;;  %3432 = vmatpush.bf16.msra.mxu2 %v8115_v39  ;;  %v2383_v26 = vadd.f32 %v2382_v15, %v9811_v52  ;;  %v10911_v52 = vld [vmem:[#allocation18_spill] sm:$0xff]  ;;  %v10917_v15 = vld [vmem:[#allocation24_spill] sm:$0xff] }
 0x24a   :  { %3445 = vmatpush.bf16.msra.mxu3 %v8128_v57  ;;  %v2395_v39 = vpop.f32.mrf.mxu3 }
 0x24b   :  { %v2396_v57 = vadd.f32 %v2395_v39, %v2383_v26  ;;  %v10918_v26 = vld [vmem:[#allocation25_spill] sm:$0xff]  ;;  %v10919_v39 = vld [vmem:[#allocation26_spill] sm:$0xff] }
 0x24c   :  { %3407 = vmatpush.bf16.msra.mxu0 %v8149_v32  ;;  %v2358_v32 = vpop.f32.mrf.mxu0 }
 0x24d   :  { %3420 = vmatpush.bf16.msra.mxu1 %v8153_v14  ;;  %3433 = vmatpush.bf16.msra.mxu2 %v8155_v25  ;;  %v2371_v14 = vpop.f32.mrf.mxu1 }
 0x24e   :  { %3446 = vmatpush.bf16.msra.mxu3 %v8167_v43 }
 0x250   :  { %3408 = vmatpush.bf16.msra.mxu0 %v8185_v60  ;;  %v2384_v25 = vpop.f32.mrf.mxu2  ;;  %v10896_v60 = vld [vmem:[#allocation3_spill] sm:$0xff] }
 0x251   :  { %3421 = vmatpush.bf16.msra.mxu1 %v8189_v24  ;;  %3434 = vmatpush.bf16.msra.mxu2 %v8191_v9  ;;  %v10897_v24 = vld [vmem:[#allocation4_spill] sm:$0xff]  ;;  %v10898_v9 = vld [vmem:[#allocation5_spill] sm:$0xff] }
 0x252   :  { %3447 = vmatpush.bf16.msra.mxu3 %v8204_v35  ;;  %v2397_v43 = vpop.f32.mrf.mxu3  ;;  %v10899_v35 = vld [vmem:[#allocation6_spill] sm:$0xff] }
 0x253   :  { %v10920_v43 = vld [vmem:[#allocation27_spill] sm:$0xff] }
 0x254   :  { %3409 = vmatpush.bf16.msra.mxu0 %v8224_v12  ;;  %v10900_v12 = vld [vmem:[#allocation7_spill] sm:$0xff] }
 0x255   :  { %3422 = vmatpush.bf16.msra.mxu1 %v8228_v13  ;;  %3435 = vmatpush.bf16.msra.mxu2 %v8230_v19  ;;  %v10901_v13 = vld [vmem:[#allocation8_spill] sm:$0xff]  ;;  %v10902_v19 = vld [vmem:[#allocation9_spill] sm:$0xff] }
 0x256   :  { %3448 = vmatpush.bf16.msra.mxu3 %v8242_v0  ;;  %v10903_v0 = vld [vmem:[#allocation10_spill] sm:$0xff] }
 0x258   :  { %3410 = vmatpush.bf16.msra.mxu0 %v8263_v50  ;;  %v10904_v50 = vld [vmem:[#allocation11_spill] sm:$0xff] }
 0x259   :  { %3423 = vmatpush.bf16.msra.mxu1 %v8267_v56  ;;  %3436 = vmatpush.bf16.msra.mxu2 %v8269_v58  ;;  %v10905_v56 = vld [vmem:[#allocation12_spill] sm:$0xff]  ;;  %v10906_v58 = vld [vmem:[#allocation13_spill] sm:$0xff] }
 0x25a   :  { %3449 = vmatpush.bf16.msra.mxu3 %v8281_v23  ;;  %v10907_v23 = vld [vmem:[#allocation14_spill] sm:$0xff] }
 0x25c   :  { %3411 = vmatpush.bf16.msra.mxu0 %v10896_v60 }
 0x25d   :  { %3424 = vmatpush.bf16.msra.mxu1 %v10897_v24  ;;  %3437 = vmatpush.bf16.msra.mxu2 %v10898_v9  ;;  %v10921_v9 = vld [vmem:[#allocation28_spill] sm:$0xff] }
 0x25e   :  { %3450 = vmatpush.bf16.msra.mxu3 %v10899_v35  ;;  %v10922_v35 = vld [vmem:[#allocation29_spill] sm:$0xff] }
 0x260   :  { %3412 = vmatpush.bf16.msra.mxu0 %v10900_v12  ;;  %v2616_v10 = vpop.f32.mrf.mxu0 }
 0x261   :  { %3425 = vmatpush.bf16.msra.mxu1 %v10901_v13  ;;  %3438 = vmatpush.bf16.msra.mxu2 %v10902_v19  ;;  %v2629_v3 = vpop.f32.mrf.mxu1  ;;  %v10924_v13 = vld [vmem:[#allocation31_spill] sm:$0xff]  ;;  %v10925_v19 = vld [vmem:[#allocation32_spill] sm:$0xff] }
 0x262   :  { %3451 = vmatpush.bf16.msra.mxu3 %v10903_v0  ;;  %v2630_v48 = vadd.f32 %v2629_v3, %v2616_v10  ;;  %v10926_v0 = vld [vmem:[#allocation33_spill] sm:$0xff]  ;;  %v10936_v3 = vld [vmem:[#allocation43_spill] sm:$0xff] }
 0x263   :  { %3413 = vmatmul.bf16.vlgmr.msra.gmra.mxu0 %v9008_v8  ;;  %v10934_v10 = vld [vmem:[#allocation41_spill] sm:$0xff] }
 0x264   :  { %3457 = vmatpush.bf16.msrb.mxu0 %v10904_v50  ;;  %3439 = vmatmul.bf16.vlgmr.msra.gmra.mxu2 %v9008_v8  ;;  %v9955_v33 = vadd.f32 %v2630_v48, %v2370_v37  ;;  %v10923_v37 = vld [vmem:[#allocation30_spill] sm:$0xff] }
 0x265   :  { %3470 = vmatpush.bf16.msrb.mxu1 %v10905_v56  ;;  %3483 = vmatpush.bf16.msrb.mxu2 %v10906_v58  ;;  %v10927_v50 = vld [vmem:[#allocation34_spill] sm:$0xff] }
 0x266   :  { %3496 = vmatpush.bf16.msrb.mxu3 %v10907_v23  ;;  %3426 = vmatmul.bf16.vlgmr.msra.gmra.mxu1 %v9021_v51  ;;  %v10928_v23 = vld [vmem:[#allocation35_spill] sm:$0xff]  ;;  %v10939_v48 = vld [vmem:[#allocation46_spill] sm:$0xff] }
 0x267   :  { %3452 = vmatmul.bf16.vlgmr.msra.gmra.mxu3 %v9021_v51 }
 0x268   :  { %3458 = vmatpush.bf16.msrb.mxu0 %v10908_v55  ;;  %v2618_v25 = vpop.f32.mrf.mxu0  ;;  %v10929_v55 = vld [vmem:[#allocation36_spill] sm:$0xff] }
 0x269   :  { %3471 = vmatpush.bf16.msrb.mxu1 %v10909_v63  ;;  %3484 = vmatpush.bf16.msrb.mxu2 %v10910_v5  ;;  %v2642_v32 = vpop.f32.mrf.mxu2  ;;  %v2631_v24 = vpop.f32.mrf.mxu1  ;;  %v10930_v63 = vld [vmem:[#allocation37_spill] sm:$0xff]  ;;  %v10931_v5 = vld [vmem:[#allocation38_spill] sm:$0xff] }
 0x26a   :  { %3497 = vmatpush.bf16.msrb.mxu3 %v10911_v52  ;;  %v2655_v14 = vpop.f32.mrf.mxu3  ;;  %v10933_v52 = vld [vmem:[#allocation40_spill] sm:$0xff]  ;;  %v10946_v25 = vld [vmem:[#allocation53_spill] sm:$0xff] }
 0x26b   :  { %v2656_v60 = vadd.f32 %v2655_v14, %v2642_v32  ;;  %v10945_v14 = vld [vmem:[#allocation52_spill] sm:$0xff] }
 0x26c   :  { %3459 = vmatpush.bf16.msrb.mxu0 %v10912_v40  ;;  %v10935_v40 = vld [vmem:[#allocation42_spill] sm:$0xff] }
 0x26d   :  { %3472 = vmatpush.bf16.msrb.mxu1 %v10913_v42  ;;  %3485 = vmatpush.bf16.msrb.mxu2 %v10914_v54  ;;  %v9965_v12 = vadd.f32 %v2656_v60, %v2396_v57  ;;  %v10932_v57 = vld [vmem:[#allocation39_spill] sm:$0xff]  ;;  %v10937_v42 = vld [vmem:[#allocation44_spill] sm:$0xff]  ;;  %v10938_v54 = vld [vmem:[#allocation45_spill] sm:$0xff] }
 0x26e   :  { %3498 = vmatpush.bf16.msrb.mxu3 %v10915_v29  ;;  %v10940_v29 = vld [vmem:[#allocation47_spill] sm:$0xff]  ;;  %v10947_v60 = vld [vmem:[#allocation54_spill] sm:$0xff] }
 0x270   :  { %3460 = vmatpush.bf16.msrb.mxu0 %v10916_v38  ;;  %v10941_v38 = vld [vmem:[#allocation48_spill] sm:$0xff] }
 0x271   :  { %3473 = vmatpush.bf16.msrb.mxu1 %v10917_v15  ;;  %3486 = vmatpush.bf16.msrb.mxu2 %v10918_v26  ;;  %v2644_v56 = vpop.f32.mrf.mxu2  ;;  %v10942_v15 = vld [vmem:[#allocation49_spill] sm:$0xff]  ;;  %v10943_v26 = vld [vmem:[#allocation50_spill] sm:$0xff] }
 0x272   :  { %3499 = vmatpush.bf16.msrb.mxu3 %v10919_v39  ;;  %v2657_v58 = vpop.f32.mrf.mxu3  ;;  %v10944_v39 = vld [vmem:[#allocation51_spill] sm:$0xff] }
 0x273   :  { %v10952_v56 = vld [vmem:[#allocation59_spill] sm:$0xff] }
 0x274   :  { %3461 = vmatpush.bf16.msrb.mxu0 %v10920_v43 }
 0x275   :  { %3474 = vmatpush.bf16.msrb.mxu1 %v10921_v9  ;;  %3487 = vmatpush.bf16.msrb.mxu2 %v10922_v35  ;;  %v10948_v9 = vld [vmem:[#allocation55_spill] sm:$0xff]  ;;  %v10949_v35 = vld [vmem:[#allocation56_spill] sm:$0xff] }
 0x276   :  { %3500 = vmatpush.bf16.msrb.mxu3 %v10923_v37  ;;  %v10950_v37 = vld [vmem:[#allocation57_spill] sm:$0xff] }
 0x278   :  { %3462 = vmatpush.bf16.msrb.mxu0 %v10924_v13 }
 0x279   :  { %3475 = vmatpush.bf16.msrb.mxu1 %v10925_v19  ;;  %3488 = vmatpush.bf16.msrb.mxu2 %v10926_v0  ;;  %v10951_v19 = vld [vmem:[#allocation58_spill] sm:$0xff] }
 0x27a   :  { %3501 = vmatpush.bf16.msrb.mxu3 %v10927_v50 }
 0x27c   :  { %3463 = vmatpush.bf16.msrb.mxu0 %v10928_v23  ;;  %v10953_v23 = vld [vmem:[#allocation60_spill] sm:$0xff] }
 0x27d   :  { %3476 = vmatpush.bf16.msrb.mxu1 %v10929_v55  ;;  %3489 = vmatpush.bf16.msrb.mxu2 %v10930_v63  ;;  %v10954_v55 = vld [vmem:[#allocation61_spill] sm:$0xff] }
 0x27e   :  { %3502 = vmatpush.bf16.msrb.mxu3 %v10931_v5  ;;  %v10955_v5 = vld [vmem:[#allocation62_spill] sm:$0xff] }
 0x280   :  { %3464 = vmatpush.bf16.msrb.mxu0 %v10932_v57  ;;  %v2898_v32 = vpop.f32.mrf.mxu0  ;;  %v10956_v57 = vld [vmem:[#allocation63_spill] sm:$0xff] }
 0x281   :  { %3477 = vmatpush.bf16.msrb.mxu1 %v10933_v52  ;;  %3490 = vmatpush.bf16.msrb.mxu2 %v10934_v10  ;;  %v3512_v52 = vshll.u32 %v8400_v49, 16  ;;  %v10957_v10 = vld [vmem:[#allocation64_spill] sm:$0xff] }
 0x282   :  { %3503 = vmatpush.bf16.msrb.mxu3 %v10935_v40  ;;  %v10958_v40 = vld [vmem:[#allocation65_spill] sm:$0xff] }
 0x283   :  { %3465 = vmatmul.bf16.vlgmr.msrb.gmra.mxu0 %v8400_v49  ;;  %v2911_v43 = vpop.f32.mrf.mxu1 }
 0x284   :  { %3525 = vmatpush.bf16.msra.mxu0 %v10936_v3  ;;  %3491 = vmatmul.bf16.vlgmr.msrb.gmra.mxu2 %v8400_v49  ;;  %v2912_v24 = vadd.f32 %v2911_v43, %v2898_v32  ;;  %v3519_v3 = vshll.u32 %v8410_v7, 16  ;;  %v3517_v32 = vshrl.u32 %v8410_v7, 16  ;;  %v10964_v43 = vld [vmem:[#allocation71_spill] sm:$0xff] }
 0x285   :  { %3538 = vmatpush.bf16.msra.mxu1 %v10937_v42  ;;  %3551 = vmatpush.bf16.msra.mxu2 %v10938_v54  ;;  %v10959_v54 = vld [vmem:[#allocation66_spill] sm:$0xff] }
 0x286   :  { %3564 = vmatpush.bf16.msra.mxu3 %v10939_v48  ;;  %3478 = vmatmul.bf16.vlgmr.msrb.gmra.mxu1 %v8410_v7 }
 0x287   :  { %3504 = vmatmul.bf16.vlgmr.msrb.gmra.mxu3 %v8410_v7  ;;  %v2924_v13 = vpop.f32.mrf.mxu2 }
 0x288   :  { %3526 = vmatpush.bf16.msra.mxu0 %v10940_v29  ;;  %v2900_v58 = vpop.f32.mrf.mxu0  ;;  %v10960_v29 = vld [vmem:[#allocation67_spill] sm:$0xff] }
 0x289   :  { %3539 = vmatpush.bf16.msra.mxu1 %v10941_v38  ;;  %3552 = vmatpush.bf16.msra.mxu2 %v10942_v15  ;;  %v3510_v38 = vshrl.u32 %v8400_v49, 16  ;;  %v3514_v15 = vrot.slane %v3512_v52, 1  ;;  %v10971_v58 = vld [vmem:[#allocation78_spill] sm:$0xff] }
 0x28a   :  { %3565 = vmatpush.bf16.msra.mxu3 %v10943_v26  ;;  %v2937_v0 = vpop.f32.mrf.mxu3  ;;  %v10961_v26 = vld [vmem:[#allocation68_spill] sm:$0xff] }
 0x28b   :  { %v2938_v50 = vadd.f32 %v2937_v0, %v2924_v13  ;;  %v2913_v63 = vpop.f32.mrf.mxu1  ;;  %v10967_v13 = vld [vmem:[#allocation74_spill] sm:$0xff]  ;;  %v10969_v0 = vld [vmem:[#allocation76_spill] sm:$0xff] }
 0x28c   :  { %3527 = vmatpush.bf16.msra.mxu0 %v10944_v39  ;;  %v10962_v39 = vld [vmem:[#allocation69_spill] sm:$0xff] }
 0x28d   :  { %3540 = vmatpush.bf16.msra.mxu1 %v10945_v14  ;;  %3553 = vmatpush.bf16.msra.mxu2 %v10946_v25  ;;  %v3521_v14 = vrot.slane %v3519_v3, 1  ;;  %v10963_v25 = vld [vmem:[#allocation70_spill] sm:$0xff]  ;;  %v10974_v63 = vld [vmem:[#allocation81_spill] sm:$0xff] }
 0x28e   :  { %3566 = vmatpush.bf16.msra.mxu3 %v10947_v60  ;;  %v10016_v60 = vor.u32 %v3514_v15, %v3510_v38  ;;  %v10981_v38 = vld [vmem:[#allocation88_spill] sm:$0xff]  ;;  %v10982_v15 = vld [vmem:[#allocation89_spill] sm:$0xff] }
 0x28f   :  { %v2926_v42 = vpop.f32.mrf.mxu2 }
 0x290   :  { %3528 = vmatpush.bf16.msra.mxu0 %v10948_v9  ;;  %v10965_v9 = vld [vmem:[#allocation72_spill] sm:$0xff] }
 0x291   :  { %3541 = vmatpush.bf16.msra.mxu1 %v10949_v35  ;;  %3554 = vmatpush.bf16.msra.mxu2 %v10950_v37  ;;  %v10966_v35 = vld [vmem:[#allocation73_spill] sm:$0xff]  ;;  %v10020_v37 = vor.u32 %v3521_v14, %v3517_v32 }
 0x292   :  { %3567 = vmatpush.bf16.msra.mxu3 %v10951_v19  ;;  %v2939_v48 = vpop.f32.mrf.mxu3  ;;  %v10968_v19 = vld [vmem:[#allocation75_spill] sm:$0xff] }
 0x294   :  { %3529 = vmatpush.bf16.msra.mxu0 %v10952_v56  ;;  %v10970_v56 = vld [vmem:[#allocation77_spill] sm:$0xff] }
 0x295   :  { %3542 = vmatpush.bf16.msra.mxu1 %v10953_v23  ;;  %3555 = vmatpush.bf16.msra.mxu2 %v10954_v55  ;;  %v10972_v23 = vld [vmem:[#allocation79_spill] sm:$0xff]  ;;  %v10973_v55 = vld [vmem:[#allocation80_spill] sm:$0xff] }
 0x296   :  { %3568 = vmatpush.bf16.msra.mxu3 %v10955_v5  ;;  %v10975_v5 = vld [vmem:[#allocation82_spill] sm:$0xff] }
 0x298   :  { %3530 = vmatpush.bf16.msra.mxu0 %v10956_v57  ;;  %v10976_v57 = vld [vmem:[#allocation83_spill] sm:$0xff] }
 0x299   :  { %3543 = vmatpush.bf16.msra.mxu1 %v10957_v10  ;;  %3556 = vmatpush.bf16.msra.mxu2 %v10958_v40  ;;  %v10977_v10 = vld [vmem:[#allocation84_spill] sm:$0xff]  ;;  %v10978_v40 = vld [vmem:[#allocation85_spill] sm:$0xff] }
 0x29a   :  { %3569 = vmatpush.bf16.msra.mxu3 %v10959_v54  ;;  %v10979_v54 = vld [vmem:[#allocation86_spill] sm:$0xff] }
 0x29c   :  { %3531 = vmatpush.bf16.msra.mxu0 %v10960_v29  ;;  %v10980_v29 = vld [vmem:[#allocation87_spill] sm:$0xff] }
 0x29d   :  { %3544 = vmatpush.bf16.msra.mxu1 %v10961_v26  ;;  %3557 = vmatpush.bf16.msra.mxu2 %v10962_v39  ;;  %v10983_v39 = vld [vmem:[#allocation90_spill] sm:$0xff] }
 0x29e   :  { %3570 = vmatpush.bf16.msra.mxu3 %v10963_v25  ;;  %v10984_v25 = vld [vmem:[#allocation91_spill] sm:$0xff] }
 0x2a0   :  { %3532 = vmatpush.bf16.msra.mxu0 %v10964_v43  ;;  %v3110_v52 = vpop.f32.mrf.mxu0 }
 0x2a1   :  { %3545 = vmatpush.bf16.msra.mxu1 %v10965_v9  ;;  %3558 = vmatpush.bf16.msra.mxu2 %v10966_v35  ;;  %v3111_v3 = vadd.f32 %v3110_v52, %v2912_v24  ;;  %v10985_v24 = vld [vmem:[#allocation92_spill] sm:$0xff]  ;;  %v10986_v35 = vld [vmem:[#allocation93_spill] sm:$0xff]  ;;  %v10995_v52 = vld [vmem:[#allocation102_spill] sm:$0xff] }
 0x2a2   :  { %3571 = vmatpush.bf16.msra.mxu3 %v10967_v13 }
 0x2a3   :  { %3533 = vmatmul.bf16.vlgmr.msra.gmra.mxu0 %v10016_v60  ;;  %v3123_v42 = vpop.f32.mrf.mxu1 }
 0x2a4   :  { %3585 = vmatpush.bf16.msrb.mxu0 %v10968_v19  ;;  %3546 = vmatmul.bf16.vlgmr.msra.gmra.mxu1 %v10020_v37  ;;  %v3124_v48 = vadd.f32 %v3123_v42, %v3111_v3  ;;  %v10987_v19 = vld [vmem:[#allocation94_spill] sm:$0xff]  ;;  %v10998_v3 = vld [vmem:[#allocation105_spill] sm:$0xff] }
 0x2a5   :  { %3598 = vmatpush.bf16.msrb.mxu1 %v10969_v0  ;;  %3611 = vmatpush.bf16.msrb.mxu2 %v10970_v56  ;;  %v10988_v0 = vld [vmem:[#allocation95_spill] sm:$0xff]  ;;  %v10989_v56 = vld [vmem:[#allocation96_spill] sm:$0xff]  ;;  %v10999_v42 = vld [vmem:[#allocation106_spill] sm:$0xff] }
 0x2a6   :  { %3624 = vmatpush.bf16.msrb.mxu3 %v10971_v58  ;;  %3559 = vmatmul.bf16.vlgmr.msra.gmra.mxu2 %v10016_v60  ;;  %v10990_v58 = vld [vmem:[#allocation97_spill] sm:$0xff] }
 0x2a7   :  { %3572 = vmatmul.bf16.vlgmr.msra.gmra.mxu3 %v10020_v37  ;;  %v3136_v26 = vpop.f32.mrf.mxu2 }
 0x2a8   :  { %3586 = vmatpush.bf16.msrb.mxu0 %v10972_v23  ;;  %v3137_v32 = vadd.f32 %v3136_v26, %v2938_v50  ;;  %v3112_v9 = vpop.f32.mrf.mxu0  ;;  %v10991_v50 = vld [vmem:[#allocation98_spill] sm:$0xff] }
 0x2a9   :  { %3599 = vmatpush.bf16.msrb.mxu1 %v10973_v55  ;;  %3612 = vmatpush.bf16.msrb.mxu2 %v10974_v63  ;;  %v10992_v63 = vld [vmem:[#allocation99_spill] sm:$0xff]  ;;  %v11009_v9 = vld [vmem:[#allocation116_spill] sm:$0xff] }
 0x2aa   :  { %3625 = vmatpush.bf16.msrb.mxu3 %v10975_v5  ;;  %v3149_v14 = vpop.f32.mrf.mxu3  ;;  %v10993_v5 = vld [vmem:[#allocation100_spill] sm:$0xff] }
 0x2ab   :  { %v3150_v43 = vadd.f32 %v3149_v14, %v3137_v32  ;;  %v3125_v13 = vpop.f32.mrf.mxu1  ;;  %v11007_v32 = vld [vmem:[#allocation114_spill] sm:$0xff] }
 0x2ac   :  { %3587 = vmatpush.bf16.msrb.mxu0 %v10976_v57  ;;  %v10994_v57 = vld [vmem:[#allocation101_spill] sm:$0xff] }
 0x2ad   :  { %3600 = vmatpush.bf16.msrb.mxu1 %v10977_v10  ;;  %3613 = vmatpush.bf16.msrb.mxu2 %v10978_v40  ;;  %v10996_v10 = vld [vmem:[#allocation103_spill] sm:$0xff]  ;;  %v10997_v40 = vld [vmem:[#allocation104_spill] sm:$0xff] }
 0x2ae   :  { %3626 = vmatpush.bf16.msrb.mxu3 %v10979_v54 }
 0x2af   :  { %v3138_v23 = vpop.f32.mrf.mxu2 }
 0x2b0   :  { %3588 = vmatpush.bf16.msrb.mxu0 %v10980_v29  ;;  %v11012_v23 = vld [vmem:[#allocation119_spill] sm:$0xff] }
 0x2b1   :  { %3601 = vmatpush.bf16.msrb.mxu1 %v10981_v38  ;;  %3614 = vmatpush.bf16.msrb.mxu2 %v10982_v15  ;;  %v11004_v38 = vld [vmem:[#allocation111_spill] sm:$0xff]  ;;  %v11005_v15 = vld [vmem:[#allocation112_spill] sm:$0xff] }
 0x2b2   :  { %3627 = vmatpush.bf16.msrb.mxu3 %v10983_v39  ;;  %v3151_v55 = vpop.f32.mrf.mxu3 }
 0x2b3   :  { %v11014_v55 = vld [vmem:[#allocation2_spill] sm:$0xff] }
 0x2b4   :  { %3589 = vmatpush.bf16.msrb.mxu0 %v10984_v25  ;;  %v11008_v25 = vld [vmem:[#allocation115_spill] sm:$0xff] }
 0x2b5   :  { %3602 = vmatpush.bf16.msrb.mxu1 %v10985_v24  ;;  %3615 = vmatpush.bf16.msrb.mxu2 %v10986_v35 }
 0x2b6   :  { %3628 = vmatpush.bf16.msrb.mxu3 %v10987_v19 }
 0x2b8   :  { %3590 = vmatpush.bf16.msrb.mxu0 %v10988_v0 }
 0x2b9   :  { %3603 = vmatpush.bf16.msrb.mxu1 %v10989_v56  ;;  %3616 = vmatpush.bf16.msrb.mxu2 %v10990_v58  ;;  %v11011_v56 = vld [vmem:[#allocation118_spill] sm:$0xff] }
 0x2ba   :  { %3629 = vmatpush.bf16.msrb.mxu3 %v10991_v50  ;;  %v11013_v50 = vld [vmem:[#allocation120_spill] sm:$0xff] }
 0x2bc   :  { %3591 = vmatpush.bf16.msrb.mxu0 %v10992_v63  ;;  %v2662_v63 = vadd.f32 %v9965_v12, %v11014_v55  ;;  %v11020_v12 = vld [vmem:[#allocation127_spill] sm:$0xff] }
 0x2bd   :  { %3604 = vmatpush.bf16.msrb.mxu1 %v10993_v5  ;;  %3617 = vmatpush.bf16.msrb.mxu2 %v9235_v18  ;;  %v11002_v18 = vld [vmem:[#allocation109_spill] sm:$0xff] }
 0x2be   :  { %3630 = vmatpush.bf16.msrb.mxu3 %v9247_v41  ;;  %v11000_v41 = vld [vmem:[#allocation107_spill] sm:$0xff]  ;;  %v11015_v5 = vld [vmem:[#allocation121_spill] sm:$0xff] }
 0x2c0   :  { %3592 = vmatpush.bf16.msrb.mxu0 %v9268_v2  ;;  %v11003_v2 = vld [vmem:[#allocation110_spill] sm:$0xff]  ;;  %v3354_v54 = vpop.f32.mrf.mxu0 }
 0x2c1   :  { %3605 = vmatpush.bf16.msrb.mxu1 %v9281_v28  ;;  %3618 = vmatpush.bf16.msrb.mxu2 %v10994_v57  ;;  %v11001_v28 = vld [vmem:[#allocation108_spill] sm:$0xff]  ;;  %v3367_v29 = vpop.f32.mrf.mxu1 }
 0x2c2   :  { %3631 = vmatpush.bf16.msrb.mxu3 %v10995_v52  ;;  %v3368_v26 = vadd.f32 %v3367_v29, %v3354_v54 }
 0x2c3   :  { %3593 = vmatmul.bf16.vlgmr.msrb.gmra.mxu0 %v9008_v8 }
 0x2c4   :  { %3637 = vmatpush.bf16.msra.mxu0 %v10996_v10  ;;  %3619 = vmatmul.bf16.vlgmr.msrb.gmra.mxu2 %v9008_v8  ;;  %v11006_v8 = vld [vmem:[#allocation113_spill] sm:$0xff]  ;;  %v3397_v39 = vadd.f32 %v3368_v26, %v3124_v48  ;;  %v11016_v10 = vld [vmem:[#allocation122_spill] sm:$0xff] }
 0x2c5   :  { %3650 = vmatpush.bf16.msra.mxu1 %v10997_v40  ;;  %3663 = vmatpush.bf16.msra.mxu2 %v10998_v3  ;;  %v11017_v40 = vld [vmem:[#allocation123_spill] sm:$0xff]  ;;  %v11018_v3 = vld [vmem:[#allocation124_spill] sm:$0xff]  ;;  %v11033_v26 = vld [vmem:[#allocation141_spill] sm:$0xff] }
 0x2c6   :  { %3676 = vmatpush.bf16.msra.mxu3 %v10999_v42  ;;  %3606 = vmatmul.bf16.vlgmr.msrb.gmra.mxu1 %v9021_v51  ;;  %v3399_v14 = vadd.f32 %v3397_v39, %v7973_v62  ;;  %v2664_v42 = vmax.f32 %v2662_v63, 0.0 }
 0x2c7   :  { %3632 = vmatmul.bf16.vlgmr.msrb.gmra.mxu3 %v9021_v51  ;;  %v2661_v51 = vadd.f32 %v9955_v33, %v7973_v62 }
 0x2c8   :  { %3638 = vmatpush.bf16.msra.mxu0 %v11000_v41  ;;  %v3401_v13 = vmax.f32 %v3399_v14, 0.0  ;;  %v3356_v0 = vpop.f32.mrf.mxu0 }
 0x2c9   :  { %3651 = vmatpush.bf16.msra.mxu1 %v11001_v28  ;;  %3664 = vmatpush.bf16.msra.mxu2 %v11002_v18  ;;  %v3380_v24 = vpop.f32.mrf.mxu2  ;;  %v2663_v35 = vmax.f32 %v2661_v51, 0.0  ;;  %v3369_v33 = vpop.f32.mrf.mxu1  ;;  %v11019_v28 = vld [vmem:[#allocation125_spill] sm:$0xff]  ;;  %v11034_v51 = vld [vmem:[#allocation142_spill] sm:$0xff] }
 0x2ca   :  { %3677 = vmatpush.bf16.msra.mxu3 %v11003_v2  ;;  %v3393_v19 = vpop.f32.mrf.mxu3 }
 0x2cb   :  { %v3394_v58 = vadd.f32 %v3393_v19, %v3380_v24  ;;  %v10083_v48 = vmax.f32 %v2663_v35, %v3401_v13  ;;  %v11037_v24 = vld [vmem:[#allocation145_spill] sm:$0xff]  ;;  %v11038_v35 = vld [vmem:[#allocation146_spill] sm:$0xff]  ;;  %v11039_v19 = vld [vmem:[#allocation147_spill] sm:$0xff] }
 0x2cc   :  { %3639 = vmatpush.bf16.msra.mxu0 %v9372_v22  ;;  %v11010_v22 = vld [vmem:[#allocation117_spill] sm:$0xff] }
 0x2cd   :  { %3652 = vmatpush.bf16.msra.mxu1 %v11004_v38  ;;  %3665 = vmatpush.bf16.msra.mxu2 %v11005_v15  ;;  %v3398_v57 = vadd.f32 %v3394_v58, %v3150_v43  ;;  %v11021_v43 = vld [vmem:[#allocation128_spill] sm:$0xff]  ;;  %v11030_v38 = vld [vmem:[#allocation138_spill] sm:$0xff]  ;;  %v11031_v15 = vld [vmem:[#allocation139_spill] sm:$0xff] }
 0x2ce   :  { %3678 = vmatpush.bf16.msra.mxu3 %v11006_v8 }
 0x2cf   :  { %v3400_v52 = vadd.f32 %v3398_v57, %v11014_v55 }
 0x2d0   :  { %3640 = vmatpush.bf16.msra.mxu0 %v11007_v32 }
 0x2d1   :  { %3653 = vmatpush.bf16.msra.mxu1 %v11008_v25  ;;  %3666 = vmatpush.bf16.msra.mxu2 %v11009_v9  ;;  %v3402_v41 = vmax.f32 %v3400_v52, 0.0  ;;  %v3382_v18 = vpop.f32.mrf.mxu2  ;;  %v11035_v25 = vld [vmem:[#allocation143_spill] sm:$0xff] }
 0x2d2   :  { %3679 = vmatpush.bf16.msra.mxu3 %v11010_v22  ;;  %v3395_v2 = vpop.f32.mrf.mxu3  ;;  %v11036_v22 = vld [vmem:[#allocation144_spill] sm:$0xff] }
 0x2d3   :  { %v10095_v54 = vmax.f32 %v2664_v42, %v3402_v41 }
 0x2d4   :  { %3641 = vmatpush.bf16.msra.mxu0 %v11011_v56 }
 0x2d5   :  { %3654 = vmatpush.bf16.msra.mxu1 %v11012_v23  ;;  %3667 = vmatpush.bf16.msra.mxu2 %v11013_v50 }
 0x2d6   :  { %3680 = vmatpush.bf16.msra.mxu3 %v11015_v5 }
 0x2d8   :  { %3642 = vmatpush.bf16.msra.mxu0 %v11016_v10 }
 0x2d9   :  { %3655 = vmatpush.bf16.msra.mxu1 %v11017_v40  ;;  %3668 = vmatpush.bf16.msra.mxu2 %v11018_v3 }
 0x2da   :  { %3681 = vmatpush.bf16.msra.mxu3 %v11019_v28 }
 0x2dc   :  { %3643 = vmatpush.bf16.msra.mxu0 %v9534_v36  ;;  %v11022_v36 = vld [vmem:[#allocation130_spill] sm:$0xff] }
 0x2dd   :  { %3656 = vmatpush.bf16.msra.mxu1 %v11020_v12  ;;  %3669 = vmatpush.bf16.msra.mxu2 %v11021_v43 }
 0x2de   :  { %3682 = vmatpush.bf16.msra.mxu3 %v9564_v30  ;;  %v11024_v30 = vld [vmem:[#allocation132_spill] sm:$0xff] }
 0x2e0   :  { %3644 = vmatpush.bf16.msra.mxu0 %v9587_v17  ;;  %v11023_v17 = vld [vmem:[#allocation131_spill] sm:$0xff] }
 0x2e1   :  { %3657 = vmatpush.bf16.msra.mxu1 %v9604_v16  ;;  %3670 = vmatpush.bf16.msra.mxu2 %v9606_v6  ;;  %v11025_v16 = vld [vmem:[#allocation133_spill] sm:$0xff]  ;;  %v3414_v6 = vpop.f32.mrf.mxu0 }
 0x2e2   :  { %3683 = vmatpush.bf16.msra.mxu3 %v9615_v45  ;;  %v11028_v45 = vld [vmem:[#allocation136_spill] sm:$0xff] }
 0x2e3   :  { %3645 = vmatmul.bf16.vlgmr.msra.gmra.mxu0 %v8400_v49  ;;  %v3427_v29 = vpop.f32.mrf.mxu1 }
 0x2e4   :  { %3689 = vmatpush.bf16.msrb.mxu0 %v9617_v53  ;;  %3671 = vmatmul.bf16.vlgmr.msra.gmra.mxu2 %v8400_v49  ;;  %v11026_v53 = vld [vmem:[#allocation134_spill] sm:$0xff]  ;;  %v3428_v49 = vadd.f32 %v3427_v29, %v3414_v6 }
 0x2e5   :  { %3702 = vmatpush.bf16.msrb.mxu1 %v9619_v34  ;;  %3715 = vmatpush.bf16.msrb.mxu2 %v9621_v59  ;;  %v11027_v34 = vld [vmem:[#allocation135_spill] sm:$0xff]  ;;  %v11029_v59 = vld [vmem:[#allocation137_spill] sm:$0xff] }
 0x2e6   :  { %3728 = vmatpush.bf16.msrb.mxu3 %v11022_v36  ;;  %3658 = vmatmul.bf16.vlgmr.msra.gmra.mxu1 %v8410_v7 }
 0x2e7   :  { %3684 = vmatmul.bf16.vlgmr.msra.gmra.mxu3 %v8410_v7  ;;  %v11032_v7 = vld [vmem:[#allocation140_spill] sm:$0xff]  ;;  %v3440_v8 = vpop.f32.mrf.mxu2 }
 0x2e8   :  { %3690 = vmatpush.bf16.msrb.mxu0 %v11023_v17 }
 0x2e9   :  { %3703 = vmatpush.bf16.msrb.mxu1 %v11024_v30  ;;  %3716 = vmatpush.bf16.msrb.mxu2 %v11025_v16  ;;  %v3416_v14 = vpop.f32.mrf.mxu0 }
 0x2ea   :  { %3729 = vmatpush.bf16.msrb.mxu3 %v11026_v53  ;;  %v3453_v39 = vpop.f32.mrf.mxu3 }
 0x2eb   :  { %v3454_v32 = vadd.f32 %v3453_v39, %v3440_v8  ;;  %v3429_v9 = vpop.f32.mrf.mxu1 }
 0x2ec   :  { %3691 = vmatpush.bf16.msrb.mxu0 %v11027_v34 }
 0x2ed   :  { %3704 = vmatpush.bf16.msrb.mxu1 %v11028_v45  ;;  %3717 = vmatpush.bf16.msrb.mxu2 %v11029_v59 }
 0x2ee   :  { %3730 = vmatpush.bf16.msrb.mxu3 %v11030_v38 }
 0x2ef   :  { %v3442_v13 = vpop.f32.mrf.mxu2 }
 0x2f0   :  { %3692 = vmatpush.bf16.msrb.mxu0 %v11031_v15 }
 0x2f1   :  { %3705 = vmatpush.bf16.msrb.mxu1 %v11032_v7  ;;  %3718 = vmatpush.bf16.msrb.mxu2 %v11033_v26 }
 0x2f2   :  { %3731 = vmatpush.bf16.msrb.mxu3 %v11034_v51  ;;  %v3455_v0 = vpop.f32.mrf.mxu3 }
 0x2f4   :  { %3693 = vmatpush.bf16.msrb.mxu0 %v9776_v4 }
 0x2f5   :  { %3706 = vmatpush.bf16.msrb.mxu1 %v9780_v44  ;;  %3719 = vmatpush.bf16.msrb.mxu2 %v11035_v25 }
 0x2f6   :  { %3732 = vmatpush.bf16.msrb.mxu3 %v11036_v22 }
 0x2f8   :  { %3694 = vmatpush.bf16.msrb.mxu0 %v9814_v20 }
 0x2f9   :  { %3707 = vmatpush.bf16.msrb.mxu1 %v11037_v24  ;;  %3720 = vmatpush.bf16.msrb.mxu2 %v11038_v35 }
 0x2fa   :  { %3733 = vmatpush.bf16.msrb.mxu3 %v11039_v19 }
 0x2fc   :  { %3695 = vmatpush.bf16.msrb.mxu0 %v9850_v61 }
 0x2fd   :  { %3708 = vmatpush.bf16.msrb.mxu1 %v9854_v46  ;;  %3721 = vmatpush.bf16.msrb.mxu2 %v9856_v31 }
 0x2fe   :  { %3734 = vmatpush.bf16.msrb.mxu3 %v9868_v1 }
 0x300   :  { %3696 = vmatpush.bf16.msrb.mxu0 %v9886_v11  ;;  %v3466_v44 = vpop.f32.mrf.mxu0 }
 0x301   :  { %3709 = vmatpush.bf16.msrb.mxu1 %v9890_v27  ;;  %3722 = vmatpush.bf16.msrb.mxu2 %v9892_v21  ;;  %v3467_v20 = vadd.f32 %v3466_v44, %v3428_v49 }
 0x302   :  { %3735 = vmatpush.bf16.msrb.mxu3 %v9895_v47 }
 0x303   :  { %3697 = vmatmul.bf16.vlgmr.msrb.gmra.mxu0 %v10016_v60  ;;  %v3479_v4 = vpop.f32.mrf.mxu1 }
 0x304   :  { %3710 = vmatmul.bf16.vlgmr.msrb.gmra.mxu1 %v10020_v37  ;;  %3723 = vmatmul.bf16.vlgmr.msrb.gmra.mxu2 %v10016_v60  ;;  %v3480_v1 = vadd.f32 %v3479_v4, %v3467_v20 }
 0x305   :  { %3736 = vmatmul.bf16.vlgmr.msrb.gmra.mxu3 %v10020_v37 }
 0x307   :  { %v3492_v61 = vpop.f32.mrf.mxu2 }
 0x308   :  { %v3493_v46 = vadd.f32 %v3492_v61, %v3454_v32  ;;  %v3468_v11 = vpop.f32.mrf.mxu0 }
 0x309   :  { %v5616_v11 = vld [vmem:[%s10166_s4 + $0x8] sm:$0xff] }
 0x30a   :  { %v3505_v31 = vpop.f32.mrf.mxu3 }
 0x30b   :  { %v3506_v27 = vadd.f32 %v3505_v31, %v3493_v46  ;;  %v3481_v21 = vpop.f32.mrf.mxu1 }
 0x30f   :  { %v3494_v56 = vpop.f32.mrf.mxu2 }
 0x312   :  { %v3507_v47 = vpop.f32.mrf.mxu3 }
 0x320   :  { %v3534_v58 = vpop.f32.mrf.mxu0 }
 0x321   :  { %v3547_v33 = vpop.f32.mrf.mxu1 }
 0x322   :  { %v3548_v23 = vadd.f32 %v3547_v33, %v3534_v58 }
 0x324   :  { %v3577_v50 = vadd.f32 %v3548_v23, %v3480_v1 }
 0x326   :  { %v3579_v60 = vadd.f32 %v3577_v50, %v7973_v62 }
 0x328   :  { %v3581_v37 = vmax.f32 %v3579_v60, 0.0  ;;  %v3536_v57 = vpop.f32.mrf.mxu0 }
 0x329   :  { %v3560_v63 = vpop.f32.mrf.mxu2  ;;  %v3549_v10 = vpop.f32.mrf.mxu1 }
 0x32a   :  { %v3573_v5 = vpop.f32.mrf.mxu3  ;;  %v3583_v40 = vmax.f32 %v10083_v48, %v3581_v37 }
 0x32b   :  { %v3574_v52 = vadd.f32 %v3573_v5, %v3560_v63 }
 0x32d   :  { %v3578_v3 = vadd.f32 %v3574_v52, %v3506_v27 }
 0x32f   :  { %v3580_v42 = vadd.f32 %v3578_v3, %v11014_v55 }
 0x331   :  { %v3582_v41 = vmax.f32 %v3580_v42, 0.0  ;;  %v3562_v28 = vpop.f32.mrf.mxu2 }
 0x332   :  { %v3575_v18 = vpop.f32.mrf.mxu3 }
 0x333   :  { %v3584_v2 = vmax.f32 %v10095_v54, %v3582_v41 }
 0x340   :  { %v3594_v12 = vpop.f32.mrf.mxu0 }
 0x343   :  { %v3607_v43 = vpop.f32.mrf.mxu1 }
 0x344   :  { %v3608_v7 = vadd.f32 %v3607_v43, %v3594_v12 }
 0x347   :  { %v3620_v36 = vpop.f32.mrf.mxu2 }
 0x348   :  { %v3596_v30 = vpop.f32.mrf.mxu0 }
 0x34a   :  { %v3633_v17 = vpop.f32.mrf.mxu3 }
 0x34b   :  { %v3609_v16 = vpop.f32.mrf.mxu1  ;;  %v3634_v54 = vadd.f32 %v3633_v17, %v3620_v36 }
 0x34f   :  { %v3622_v53 = vpop.f32.mrf.mxu2 }
 0x352   :  { %v3635_v34 = vpop.f32.mrf.mxu3 }
 0x360   :  { %v3646_v6 = vpop.f32.mrf.mxu0 }
 0x361   :  { %v3647_v26 = vadd.f32 %v3646_v6, %v3608_v7 }
 0x363   :  { %v3659_v45 = vpop.f32.mrf.mxu1 }
 0x364   :  { %v3660_v32 = vadd.f32 %v3659_v45, %v3647_v26 }
 0x367   :  { %v3672_v59 = vpop.f32.mrf.mxu2 }
 0x368   :  { %v3648_v29 = vpop.f32.mrf.mxu0  ;;  %v3673_v14 = vadd.f32 %v3672_v59, %v3634_v54 }
 0x36a   :  { %v3685_v48 = vpop.f32.mrf.mxu3 }
 0x36b   :  { %v3661_v38 = vpop.f32.mrf.mxu1  ;;  %v3686_v35 = vadd.f32 %v3685_v48, %v3673_v14 }
 0x36f   :  { %v3674_v49 = vpop.f32.mrf.mxu2 }
 0x372   :  { %v3687_v15 = vpop.f32.mrf.mxu3 }
 0x380   :  { %v3698_v8 = vpop.f32.mrf.mxu0 }
 0x381   :  { %v3711_v51 = vpop.f32.mrf.mxu1 }
 0x382   :  { %v3712_v39 = vadd.f32 %v3711_v51, %v3698_v8 }
 0x384   :  { %v3741_v25 = vadd.f32 %v3712_v39, %v3660_v32 }
 0x386   :  { %v3743_v13 = vadd.f32 %v3741_v25, %v7973_v62 }
 0x387   :  { %v3724_v9 = vpop.f32.mrf.mxu2 }
 0x388   :  { %v3737_v22 = vpop.f32.mrf.mxu3  ;;  %v3700_v24 = vpop.f32.mrf.mxu0  ;;  %v3745_v20 = vmax.f32 %v3743_v13, 0.0 }
 0x389   :  { %v3738_v19 = vadd.f32 %v3737_v22, %v3724_v9  ;;  %v3713_v0 = vpop.f32.mrf.mxu1 }
 0x38a   :  { %v3747_v31 = vmax.f32 %v3583_v40, %v3745_v20 }
 0x38b   :  { %v3742_v44 = vadd.f32 %v3738_v19, %v3686_v35 }
 0x38d   :  { %v3744_v4 = vadd.f32 %v3742_v44, %v11014_v55 }
 0x38f   :  { %v3746_v1 = vmax.f32 %v3744_v4, 0.0  ;;  %v3726_v61 = vpop.f32.mrf.mxu2 }
 0x390   :  { %v3739_v46 = vpop.f32.mrf.mxu3 }
 0x391   :  { %v3748_v27 = vmax.f32 %v3584_v2, %v3746_v1 }
 0x393   :  { %v3749_v21 = vpack.c.bf16 %v3748_v27, %v3747_v31 }
 0x395   :  { %v3752_v62 = vsel %vm1889_vm6, %v3749_v21, %v5616_v11 }
 0x396   :  { %5617 = vst [vmem:[%s10166_s4 + $0x8] sm:$0xff] %v3752_v62 }

</bundles_post_ra>
